<compile_context>
chip_gen: v7x
topology: tpu7x:2x2x1
jax: 0.10.0
libtpu: 0.0.40
codegen_flags: <defaults>
</compile_context>

<pallas_src>
import functools

import jax
import jax.numpy as jnp
from jax.experimental import pallas as pl
from jax.experimental.pallas import tpu as pltpu

N_HIDDENS = 200            # logical hidden size (matches the PyTorch module)
N_LAYERS = 3
H_PAD = 256                # lane-aligned padded hidden size
H2_PAD = 2 * H_PAD         # 512   [fwd-h | bwd-h] concat width
G_PAD = 3 * H_PAD          # 768   stacked (r, z, n) gates, one direction
G2_PAD = 2 * G_PAD         # 1536  both directions' gates


# ----------------------------------------------------------------------------
# One grid step == one GRU layer (both directions).  Gate order follows
# PyTorch (r, z, n):
#   r = sigmoid(W_ir x + b_ir + W_hr h + b_hr)
#   z = sigmoid(W_iz x + b_iz + W_hz h + b_hz)
#   n = tanh  (W_in x + b_in + r * (W_hn h + b_hn))
#   h' = (1 - z) * n + z * h
# b_hr / b_hz are folded into the packed b_ih; only b_hn is applied per step.
# ----------------------------------------------------------------------------
def _stacked_gru_kernel(x_ref, wih0_ref, wih12_ref, whh_ref, bih_ref, bhn_ref,
                        fcw_ref, fcb_ref, out_ref, buf_ref, xproj_ref, *, T, B):
    # x_ref:     (T*B, n_tags)       time-major, row = t*B + b (f32)
    # wih0_ref:  (n_tags, 6*HP)      layer-0 W_ih, both directions along N (bf16)
    # wih12_ref: (2*HP, 6*HP)        this layer's W_ih for layers 1/2 (bf16)
    # whh_ref:   (2*HP, 3*HP)        [W_hh_fwd; W_hh_bwd] stacked along K (bf16)
    # bih_ref:   (1, 6*HP)           b_ih (+ folded b_hr, b_hz), both dirs (f32)
    # bhn_ref:   (2, HP)             b_hn per direction (f32)
    # fcw_ref:   (2*HP, n_tags)      head weight (bf16);  fcb_ref: (1, n_tags) f32
    # out_ref:   (B, n_tags)         final output (written at the last layer only)
    # buf_ref:   (T*B, 2*HP) bf16    persistent layer-output slab (single buffer:
    #                                it is fully consumed by the projection matmul
    #                                before this layer's recurrence overwrites it)
    # xproj_ref: (T*B, 6*HP) f32     hoisted input projections (fwd | bwd gates)
    HP = H_PAD
    layer = pl.program_id(0)

    # ---- input projections (both directions fused along N), hoisted ----------
    bih = bih_ref[...]                                           # (1, 6*HP)

    @pl.when(layer == 0)
    def _():
        xin = x_ref[...].astype(jnp.bfloat16)                    # (T*B, n_tags)
        xproj_ref[...] = jnp.dot(xin, wih0_ref[...],
                                 preferred_element_type=jnp.float32) + bih

    @pl.when(layer > 0)
    def _():
        xin = buf_ref[...]                                       # (T*B, 2*HP) bf16
        xproj_ref[...] = jnp.dot(xin, wih12_ref[...],
                                 preferred_element_type=jnp.float32) + bih

    # ---- fused bidirectional recurrence ---------------------------------------
    W = whh_ref[...]                                             # (2*HP, 3*HP) bf16
    bhn = bhn_ref[...]                                           # (2, HP) f32
    bhn2 = jnp.concatenate(                                      # (2B, HP)
        [jnp.broadcast_to(bhn[0:1, :], (B, HP)),
         jnp.broadcast_to(bhn[1:2, :], (B, HP))], axis=0)

    # block-diagonal mask: rows 0:B (fwd) keep cols 0:HP, rows B:2B keep HP:2HP
    row = jax.lax.broadcasted_iota(jnp.int32, (2 * B, 2 * HP), 0)
    col = jax.lax.broadcasted_iota(jnp.int32, (2 * B, 2 * HP), 1)
    bd_mask = (row < B) == (col < HP)

    h = jnp.zeros((2 * B, HP), jnp.float32)      # rows 0:B fwd chain, B:2B bwd chain
    for s in range(T):                           # statically unrolled (T = 8)
        t, tb = s, T - 1 - s                     # fwd time, bwd time
        gx = jnp.concatenate(                    # (2B, 3*HP) f32
            [xproj_ref[t * B:(t + 1) * B, 0:3 * HP],
             xproj_ref[tb * B:(tb + 1) * B, 3 * HP:6 * HP]], axis=0)
        lhs = jnp.where(bd_mask, jnp.concatenate([h, h], axis=1),
                        0.0).astype(jnp.bfloat16)                # (2B, 2*HP)
        gh = jnp.dot(lhs, W, preferred_element_type=jnp.float32)  # (2B, 3*HP)
        r = jax.nn.sigmoid(gx[:, 0:HP] + gh[:, 0:HP])
        z = jax.nn.sigmoid(gx[:, HP:2 * HP] + gh[:, HP:2 * HP])
        n = jnp.tanh(gx[:, 2 * HP:] + r * (gh[:, 2 * HP:] + bhn2))
        h = n + z * (h - n)                      # == (1 - z) * n + z * h
        hb = h.astype(jnp.bfloat16)
        buf_ref[t * B:(t + 1) * B, 0:HP] = hb[0:B]                # fwd half, time t
        buf_ref[tb * B:(tb + 1) * B, HP:2 * HP] = hb[B:2 * B]     # bwd half, time tb

    # ---- head, only after the top layer ---------------------------------------
    @pl.when(layer == N_LAYERS - 1)
    def _():
        last = buf_ref[(T - 1) * B:T * B, :]                      # outs[-1]: (B, 2*HP)
        y = jnp.dot(jnp.maximum(last, 0), fcw_ref[...],
                    preferred_element_type=jnp.float32) + fcb_ref[...]
        out_ref[...] = x_ref[0:B, :] + y                          # + x[0] (timestep 0)


# ----------------------------------------------------------------------------
# Wrapper
# ----------------------------------------------------------------------------
@jax.jit
def stacked_gru_forward(x, params):
    """x: (B, T, n_tags), batch-first, same user-facing layout as the module."""
    B, T, n_tags = x.shape
    # time-major flattening: row = t*B + b, so rows [0, B) are timestep 0 (= x[0]).
    x_seq = jnp.transpose(x, (1, 0, 2)).reshape(T * B, n_tags).astype(jnp.float32)

    kernel = functools.partial(_stacked_gru_kernel, T=T, B=B)
    grid_spec = pltpu.PrefetchScalarGridSpec(
        num_scalar_prefetch=0,
        grid=(N_LAYERS,),                                          # sequential layers
        in_specs=[
            pl.BlockSpec((T * B, n_tags), lambda l: (0, 0)),              # x (resident)
            pl.BlockSpec((n_tags, G2_PAD), lambda l: (0, 0)),             # W_ih layer 0
            pl.BlockSpec((None, H2_PAD, G2_PAD),
                         lambda l: (jnp.maximum(l - 1, 0), 0, 0)),        # W_ih layers 1/2
            pl.BlockSpec((None, H2_PAD, G_PAD), lambda l: (l, 0, 0)),     # W_hh (per layer)
            pl.BlockSpec((None, 1, G2_PAD), lambda l: (l, 0, 0)),         # b_ih (+b_hr,b_hz)
            pl.BlockSpec((None, 2, H_PAD), lambda l: (l, 0, 0)),          # b_hn
            pl.BlockSpec((H2_PAD, n_tags), lambda l: (0, 0)),             # fc weight
            pl.BlockSpec((1, n_tags), lambda l: (0, 0)),                  # fc bias
        ],
        out_specs=pl.BlockSpec((B, n_tags), lambda l: (0, 0)),
        scratch_shapes=[
            pltpu.VMEM((T * B, H2_PAD), jnp.bfloat16),    # persistent layer-output slab
            pltpu.VMEM((T * B, G2_PAD), jnp.float32),     # hoisted input projections
        ],
    )
    return pl.pallas_call(
        kernel,
        out_shape=jax.ShapeDtypeStruct((B, n_tags), jnp.float32),
        grid_spec=grid_spec,
        compiler_params=pltpu.CompilerParams(
            dimension_semantics=("arbitrary",)),   # layers carry state via scratch
    )(x_seq, params["wih0"], params["wih12"], params["whh"],
      params["bih"], params["bhn"], params["fc_w"], params["fc_b"])


# ----------------------------------------------------------------------------
# Parameter init (deterministic, synthetic -- same logical shapes as
# torch.nn.GRU / torch.nn.Linear), packed for the kernel:
#   * gates stacked as (r, z, n), directions fused (along N for W_ih, along K
#     for W_hh), hidden padded 200 -> 256 with zeros,
#   * b_hr / b_hz folded into b_ih; b_hn kept separate,
#   * weights stored in bfloat16, biases in float32.
# ----------------------------------------------------------------------------
def init_params(key, n_tags):
    H, HP = N_HIDDENS, H_PAD
    bound = 1.0 / (H ** 0.5)

    def u(k, shape, b):
        return jax.random.uniform(k, shape, jnp.float32, -b, b)

    wih0 = None
    wih12, whh, bih, bhn = [], [], [], []
    for layer in range(N_LAYERS):
        if layer == 0:
            wih_l = jnp.zeros((n_tags, 2, 3, HP), jnp.float32)
        else:
            # input = [fwd-h | pad | bwd-h | pad]; leading axis = input half
            wih_l = jnp.zeros((2, HP, 2, 3, HP), jnp.float32)
        whh_l = jnp.zeros((2, HP, 3, HP), jnp.float32)
        bih_l = jnp.zeros((2, 3, HP), jnp.float32)
        bhn_l = jnp.zeros((2, HP), jnp.float32)
        for d in range(2):                     # 0 = forward, 1 = backward
            key, k1, k2, k3, k4 = jax.random.split(key, 5)
            if layer == 0:
                w_raw = u(k1, (n_tags, 3, H), bound)
                wih_l = wih_l.at[:, d, :, :H].set(w_raw)
            else:
                w_raw = u(k1, (2, H, 3, H), bound)
                wih_l = wih_l.at[:, :H, d, :, :H].set(w_raw)
            wh_raw = u(k2, (H, 3, H), bound)
            whh_l = whh_l.at[d, :H, :, :H].set(wh_raw)
            bi_raw = u(k3, (3, H), bound)
            bh_raw = u(k4, (3, H), bound)
            bih_l = bih_l.at[d, 0, :H].set(bi_raw[0] + bh_raw[0])   # r: fold b_hr
            bih_l = bih_l.at[d, 1, :H].set(bi_raw[1] + bh_raw[1])   # z: fold b_hz
            bih_l = bih_l.at[d, 2, :H].set(bi_raw[2])               # n: b_in only
            bhn_l = bhn_l.at[d, :H].set(bh_raw[2])                  # b_hn stays separate
        if layer == 0:
            wih0 = wih_l.reshape(n_tags, G2_PAD).astype(jnp.bfloat16)
        else:
            wih12.append(wih_l.reshape(H2_PAD, G2_PAD).astype(jnp.bfloat16))
        whh.append(whh_l.reshape(H2_PAD, G_PAD).astype(jnp.bfloat16))
        bih.append(bih_l.reshape(1, G2_PAD))
        bhn.append(bhn_l)

    # fc: torch Linear(2H, n_tags); kaiming_uniform-style synthetic init.
    key, kw, kb = jax.random.split(key, 3)
    fan_in = 2 * H
    w_bound = (6.0 / fan_in) ** 0.5
    b_bound = 1.0 / (fan_in ** 0.5)
    fcw_raw = u(kw, (2, H, n_tags), w_bound)
    fcw = (jnp.zeros((2, HP, n_tags), jnp.float32)
           .at[:, :H, :].set(fcw_raw).reshape(H2_PAD, n_tags))

    return dict(
        wih0=wih0,                                # (n_tags, 1536) bf16
        wih12=jnp.stack(wih12),                   # (2, 512, 1536) bf16  (layers 1, 2)
        whh=jnp.stack(whh),                       # (3, 512, 768)  bf16
        bih=jnp.stack(bih),                       # (3, 1, 1536)   f32
        bhn=jnp.stack(bhn),                       # (3, 2, 256)    f32
        fc_w=fcw.astype(jnp.bfloat16),            # (512, n_tags)  bf16
        fc_b=u(kb, (1, n_tags), b_bound),         # (1, n_tags)    f32
    )


if __name__ == "__main__":
    key = jax.random.PRNGKey(0)
    n_tags = 16
    batch, seq = 2, 8

    key, kx, kp = jax.random.split(key, 3)
    x = jax.random.normal(kx, (batch, seq, n_tags), jnp.float32)
    params = init_params(kp, n_tags)

    out = stacked_gru_forward(x, params)
    out = jax.block_until_ready(out)
    assert out.shape == (batch, n_tags), out.shape
    print("KERNEL_OK")
</pallas_src>

<mosaic_0001>
module attributes {stable_mosaic.version = 11 : i64} {
  func.func @_stacked_gru_kernel(%arg0: i32, %arg1: memref<16x16xf32, #tpu.memory_space<vmem>>, %arg2: memref<16x1536xbf16, #tpu.memory_space<vmem>>, %arg3: memref<1x512x1536xbf16, #tpu.memory_space<vmem>>, %arg4: memref<1x512x768xbf16, #tpu.memory_space<vmem>>, %arg5: memref<1x1x1536xf32, #tpu.memory_space<vmem>>, %arg6: memref<1x2x256xf32, #tpu.memory_space<vmem>>, %arg7: memref<512x16xbf16, #tpu.memory_space<vmem>>, %arg8: memref<1x16xf32, #tpu.memory_space<vmem>>, %arg9: memref<2x16xf32, #tpu.memory_space<vmem>>, %arg10: memref<16x512xbf16, #tpu.memory_space<vmem>>, %arg11: memref<16x1536xf32, #tpu.memory_space<vmem>>) attributes {dimension_semantics = [#tpu.dimension_semantics<arbitrary>], iteration_bounds = array<i64: 3>, scalar_prefetch = 0 : i64, scratch_operands = 2 : i64, tpu.core_type = #tpu.core_type<tc>, window_params = [{pipeline_mode = #tpu.pipeline_mode<synchronous>, transform_indices = @transform_0, window_bounds = array<i64: 16, 16>}, {pipeline_mode = #tpu.pipeline_mode<synchronous>, transform_indices = @transform_1, window_bounds = array<i64: 16, 1536>}, {transform_indices = @transform_2, window_bounds = array<i64: 1, 512, 1536>}, {transform_indices = @transform_3, window_bounds = array<i64: 1, 512, 768>}, {transform_indices = @transform_4, window_bounds = array<i64: 1, 1, 1536>}, {transform_indices = @transform_5, window_bounds = array<i64: 1, 2, 256>}, {pipeline_mode = #tpu.pipeline_mode<synchronous>, transform_indices = @transform_6, window_bounds = array<i64: 512, 16>}, {pipeline_mode = #tpu.pipeline_mode<synchronous>, transform_indices = @transform_7, window_bounds = array<i64: 1, 16>}, {pipeline_mode = #tpu.pipeline_mode<synchronous>, transform_indices = @transform_8, window_bounds = array<i64: 2, 16>}]} {
    %c0 = arith.constant 0 : index
    %c0_0 = arith.constant 0 : index
    %c0_1 = arith.constant 0 : index
    %0 = vector.load %arg5[%c0, %c0_0, %c0_1] : memref<1x1x1536xf32, #tpu.memory_space<vmem>>, vector<1x1x1536xf32>
    %1 = vector.shape_cast %0 : vector<1x1x1536xf32> to vector<1x1536xf32>
    %c0_i32 = arith.constant 0 : i32
    %2 = arith.cmpi eq, %arg0, %c0_i32 : i32
    %3 = arith.extui %2 : i1 to i32
    %c0_i32_2 = arith.constant 0 : i32
    %4 = arith.cmpi ne, %3, %c0_i32_2 : i32
    scf.if %4 {
      %c0_101 = arith.constant 0 : index
      %c0_102 = arith.constant 0 : index
      %335 = vector.load %arg1[%c0_101, %c0_102] : memref<16x16xf32, #tpu.memory_space<vmem>>, vector<16x16xf32>
      %336 = arith.truncf %335 : vector<16x16xf32> to vector<16x16xbf16>
      %c0_103 = arith.constant 0 : index
      %c0_104 = arith.constant 0 : index
      %337 = vector.load %arg2[%c0_103, %c0_104] : memref<16x1536xbf16, #tpu.memory_space<vmem>>, vector<16x1536xbf16>
      %cst_105 = arith.constant dense<0.000000e+00> : vector<16x1536xf32>
      %338 = tpu.matmul %336, %337, %cst_105 {dimension_numbers = #tpu.dot_dimension_numbers<[1], [0], [0], [1], [0, 0, 1, 1], [], []>} : vector<16x16xbf16>, vector<16x1536xbf16>, vector<16x1536xf32> -> vector<16x1536xf32>
      %339 = vector.broadcast %1 : vector<1x1536xf32> to vector<16x1536xf32>
      %340 = arith.addf %338, %339 : vector<16x1536xf32>
      %c0_106 = arith.constant 0 : index
      %c0_107 = arith.constant 0 : index
      %341 = vector.load %arg11[%c0_106, %c0_107] : memref<16x1536xf32, #tpu.memory_space<vmem>>, vector<16x1536xf32>
      tpu.vector_store %arg11[%c0_106, %c0_107], %340 {strides = array<i32>} : memref<16x1536xf32, #tpu.memory_space<vmem>>, vector<16x1536xf32>,
    } else {
    }
    %c0_i32_3 = arith.constant 0 : i32
    %5 = arith.cmpi sgt, %arg0, %c0_i32_3 : i32
    %6 = arith.extui %5 : i1 to i32
    %c0_i32_4 = arith.constant 0 : i32
    %7 = arith.cmpi ne, %6, %c0_i32_4 : i32
    scf.if %7 {
      %c0_101 = arith.constant 0 : index
      %c0_102 = arith.constant 0 : index
      %335 = vector.load %arg10[%c0_101, %c0_102] : memref<16x512xbf16, #tpu.memory_space<vmem>>, vector<16x512xbf16>
      %c0_103 = arith.constant 0 : index
      %c0_104 = arith.constant 0 : index
      %c0_105 = arith.constant 0 : index
      %336 = vector.load %arg3[%c0_103, %c0_104, %c0_105] : memref<1x512x1536xbf16, #tpu.memory_space<vmem>>, vector<1x512x1536xbf16>
      %337 = vector.shape_cast %336 : vector<1x512x1536xbf16> to vector<512x1536xbf16>
      %cst_106 = arith.constant dense<0.000000e+00> : vector<16x1536xf32>
      %338 = tpu.matmul %335, %337, %cst_106 {dimension_numbers = #tpu.dot_dimension_numbers<[1], [0], [0], [1], [0, 0, 1, 1], [], []>} : vector<16x512xbf16>, vector<512x1536xbf16>, vector<16x1536xf32> -> vector<16x1536xf32>
      %339 = vector.broadcast %1 : vector<1x1536xf32> to vector<16x1536xf32>
      %340 = arith.addf %338, %339 : vector<16x1536xf32>
      %c0_107 = arith.constant 0 : index
      %c0_108 = arith.constant 0 : index
      %341 = vector.load %arg11[%c0_107, %c0_108] : memref<16x1536xf32, #tpu.memory_space<vmem>>, vector<16x1536xf32>
      tpu.vector_store %arg11[%c0_107, %c0_108], %340 {strides = array<i32>} : memref<16x1536xf32, #tpu.memory_space<vmem>>, vector<16x1536xf32>,
    } else {
    }
    %c0_5 = arith.constant 0 : index
    %c0_6 = arith.constant 0 : index
    %c0_7 = arith.constant 0 : index
    %8 = vector.load %arg4[%c0_5, %c0_6, %c0_7] : memref<1x512x768xbf16, #tpu.memory_space<vmem>>, vector<1x512x768xbf16>
    %9 = vector.shape_cast %8 : vector<1x512x768xbf16> to vector<512x768xbf16>
    %c0_8 = arith.constant 0 : index
    %c0_9 = arith.constant 0 : index
    %c0_10 = arith.constant 0 : index
    %10 = vector.load %arg6[%c0_8, %c0_9, %c0_10] : memref<1x2x256xf32, #tpu.memory_space<vmem>>, vector<1x2x256xf32>
    %11 = vector.shape_cast %10 : vector<1x2x256xf32> to vector<2x256xf32>
    %12 = vector.extract_strided_slice %11 {offsets = [0, 0], sizes = [1, 256], strides = [1, 1]} : vector<2x256xf32> to vector<1x256xf32>
    %13 = vector.shape_cast %12 : vector<1x256xf32> to vector<1x256xf32>
    %14 = vector.broadcast %13 : vector<1x256xf32> to vector<2x256xf32>
    %15 = vector.extract_strided_slice %11 {offsets = [1, 0], sizes = [1, 256], strides = [1, 1]} : vector<2x256xf32> to vector<1x256xf32>
    %16 = vector.shape_cast %15 : vector<1x256xf32> to vector<1x256xf32>
    %17 = vector.broadcast %16 : vector<1x256xf32> to vector<2x256xf32>
    %18 = tpu.concatenate %14, %17 in 0 : vector<2x256xf32>, vector<2x256xf32> -> vector<4x256xf32>
    %19 = tpu.iota {dimensions = array<i32: 0>} : vector<4x512xi32>
    %20 = tpu.iota {dimensions = array<i32: 1>} : vector<4x512xi32>
    %c2_i32 = arith.constant 2 : i32
    %21 = vector.broadcast %c2_i32 : i32 to vector<4x512xi32>
    %22 = arith.cmpi slt, %19, %21 : vector<4x512xi32>
    %c256_i32 = arith.constant 256 : i32
    %23 = vector.broadcast %c256_i32 : i32 to vector<4x512xi32>
    %24 = arith.cmpi slt, %20, %23 : vector<4x512xi32>
    %25 = arith.xori %22, %24 : vector<4x512xi1>
    %cst = arith.constant dense<true> : vector<4x512xi1>
    %26 = arith.xori %25, %cst : vector<4x512xi1>
    %cst_11 = arith.constant 0.000000e+00 : f32
    %27 = vector.broadcast %cst_11 : f32 to vector<4x256xf32>
    %c0_12 = arith.constant 0 : index
    %c0_13 = arith.constant 0 : index
    %28 = vector.load %arg11[%c0_12, %c0_13] : memref<16x1536xf32, #tpu.memory_space<vmem>>, vector<2x768xf32>
    %c14 = arith.constant 14 : index
    %c768 = arith.constant 768 : index
    %29 = vector.load %arg11[%c14, %c768] : memref<16x1536xf32, #tpu.memory_space<vmem>>, vector<2x768xf32>
    %30 = tpu.concatenate %28, %29 in 0 : vector<2x768xf32>, vector<2x768xf32> -> vector<4x768xf32>
    %31 = tpu.concatenate %27, %27 in 1 : vector<4x256xf32>, vector<4x256xf32> -> vector<4x512xf32>
    %cst_14 = arith.constant 0.000000e+00 : f32
    %32 = vector.broadcast %cst_14 : f32 to vector<4x512xf32>
    %33 = arith.select %26, %31, %32 : vector<4x512xi1>, vector<4x512xf32>
    %34 = arith.truncf %33 : vector<4x512xf32> to vector<4x512xbf16>
    %cst_15 = arith.constant dense<0.000000e+00> : vector<4x768xf32>
    %35 = tpu.matmul %34, %9, %cst_15 {dimension_numbers = #tpu.dot_dimension_numbers<[1], [0], [0], [1], [0, 0, 1, 1], [], []>} : vector<4x512xbf16>, vector<512x768xbf16>, vector<4x768xf32> -> vector<4x768xf32>
    %36 = vector.extract_strided_slice %30 {offsets = [0, 0], sizes = [4, 256], strides = [1, 1]} : vector<4x768xf32> to vector<4x256xf32>
    %37 = vector.extract_strided_slice %35 {offsets = [0, 0], sizes = [4, 256], strides = [1, 1]} : vector<4x768xf32> to vector<4x256xf32>
    %38 = arith.addf %36, %37 : vector<4x256xf32>
    %39 = arith.negf %38 : vector<4x256xf32>
    %40 = math.exp %39 : vector<4x256xf32>
    %cst_16 = arith.constant 1.000000e+00 : f32
    %41 = vector.broadcast %cst_16 : f32 to vector<4x256xf32>
    %42 = arith.addf %41, %40 : vector<4x256xf32>
    %43 = arith.divf %41, %42 : vector<4x256xf32>
    %44 = vector.extract_strided_slice %30 {offsets = [0, 256], sizes = [4, 256], strides = [1, 1]} : vector<4x768xf32> to vector<4x256xf32>
    %45 = vector.extract_strided_slice %35 {offsets = [0, 256], sizes = [4, 256], strides = [1, 1]} : vector<4x768xf32> to vector<4x256xf32>
    %46 = arith.addf %44, %45 : vector<4x256xf32>
    %47 = arith.negf %46 : vector<4x256xf32>
    %48 = math.exp %47 : vector<4x256xf32>
    %cst_17 = arith.constant 1.000000e+00 : f32
    %49 = vector.broadcast %cst_17 : f32 to vector<4x256xf32>
    %50 = arith.addf %49, %48 : vector<4x256xf32>
    %51 = arith.divf %49, %50 : vector<4x256xf32>
    %52 = vector.extract_strided_slice %30 {offsets = [0, 512], sizes = [4, 256], strides = [1, 1]} : vector<4x768xf32> to vector<4x256xf32>
    %53 = vector.extract_strided_slice %35 {offsets = [0, 512], sizes = [4, 256], strides = [1, 1]} : vector<4x768xf32> to vector<4x256xf32>
    %54 = arith.addf %53, %18 : vector<4x256xf32>
    %55 = arith.mulf %43, %54 : vector<4x256xf32>
    %56 = arith.addf %52, %55 : vector<4x256xf32>
    %57 = math.tanh %56 : vector<4x256xf32>
    %58 = arith.subf %27, %57 : vector<4x256xf32>
    %59 = arith.mulf %51, %58 : vector<4x256xf32>
    %60 = arith.addf %57, %59 : vector<4x256xf32>
    %61 = arith.truncf %60 : vector<4x256xf32> to vector<4x256xbf16>
    %62 = vector.extract_strided_slice %61 {offsets = [0, 0], sizes = [2, 256], strides = [1, 1]} : vector<4x256xbf16> to vector<2x256xbf16>
    %c0_18 = arith.constant 0 : index
    %c0_19 = arith.constant 0 : index
    %63 = vector.load %arg10[%c0_18, %c0_19] : memref<16x512xbf16, #tpu.memory_space<vmem>>, vector<2x256xbf16>
    tpu.vector_store %arg10[%c0_18, %c0_19], %62 {strides = array<i32>} : memref<16x512xbf16, #tpu.memory_space<vmem>>, vector<2x256xbf16>,
    %64 = vector.extract_strided_slice %61 {offsets = [2, 0], sizes = [2, 256], strides = [1, 1]} : vector<4x256xbf16> to vector<2x256xbf16>
    %c14_20 = arith.constant 14 : index
    %c256 = arith.constant 256 : index
    %65 = vector.load %arg10[%c14_20, %c256] : memref<16x512xbf16, #tpu.memory_space<vmem>>, vector<2x256xbf16>
    tpu.vector_store %arg10[%c14_20, %c256], %64 {strides = array<i32>} : memref<16x512xbf16, #tpu.memory_space<vmem>>, vector<2x256xbf16>,
    %c2 = arith.constant 2 : index
    %c0_21 = arith.constant 0 : index
    %66 = vector.load %arg11[%c2, %c0_21] : memref<16x1536xf32, #tpu.memory_space<vmem>>, vector<2x768xf32>
    %c12 = arith.constant 12 : index
    %c768_22 = arith.constant 768 : index
    %67 = vector.load %arg11[%c12, %c768_22] : memref<16x1536xf32, #tpu.memory_space<vmem>>, vector<2x768xf32>
    %68 = tpu.concatenate %66, %67 in 0 : vector<2x768xf32>, vector<2x768xf32> -> vector<4x768xf32>
    %69 = tpu.concatenate %60, %60 in 1 : vector<4x256xf32>, vector<4x256xf32> -> vector<4x512xf32>
    %cst_23 = arith.constant 0.000000e+00 : f32
    %70 = vector.broadcast %cst_23 : f32 to vector<4x512xf32>
    %71 = arith.select %26, %69, %70 : vector<4x512xi1>, vector<4x512xf32>
    %72 = arith.truncf %71 : vector<4x512xf32> to vector<4x512xbf16>
    %cst_24 = arith.constant dense<0.000000e+00> : vector<4x768xf32>
    %73 = tpu.matmul %72, %9, %cst_24 {dimension_numbers = #tpu.dot_dimension_numbers<[1], [0], [0], [1], [0, 0, 1, 1], [], []>} : vector<4x512xbf16>, vector<512x768xbf16>, vector<4x768xf32> -> vector<4x768xf32>
    %74 = vector.extract_strided_slice %68 {offsets = [0, 0], sizes = [4, 256], strides = [1, 1]} : vector<4x768xf32> to vector<4x256xf32>
    %75 = vector.extract_strided_slice %73 {offsets = [0, 0], sizes = [4, 256], strides = [1, 1]} : vector<4x768xf32> to vector<4x256xf32>
    %76 = arith.addf %74, %75 : vector<4x256xf32>
    %77 = arith.negf %76 : vector<4x256xf32>
    %78 = math.exp %77 : vector<4x256xf32>
    %cst_25 = arith.constant 1.000000e+00 : f32
    %79 = vector.broadcast %cst_25 : f32 to vector<4x256xf32>
    %80 = arith.addf %79, %78 : vector<4x256xf32>
    %81 = arith.divf %79, %80 : vector<4x256xf32>
    %82 = vector.extract_strided_slice %68 {offsets = [0, 256], sizes = [4, 256], strides = [1, 1]} : vector<4x768xf32> to vector<4x256xf32>
    %83 = vector.extract_strided_slice %73 {offsets = [0, 256], sizes = [4, 256], strides = [1, 1]} : vector<4x768xf32> to vector<4x256xf32>
    %84 = arith.addf %82, %83 : vector<4x256xf32>
    %85 = arith.negf %84 : vector<4x256xf32>
    %86 = math.exp %85 : vector<4x256xf32>
    %cst_26 = arith.constant 1.000000e+00 : f32
    %87 = vector.broadcast %cst_26 : f32 to vector<4x256xf32>
    %88 = arith.addf %87, %86 : vector<4x256xf32>
    %89 = arith.divf %87, %88 : vector<4x256xf32>
    %90 = vector.extract_strided_slice %68 {offsets = [0, 512], sizes = [4, 256], strides = [1, 1]} : vector<4x768xf32> to vector<4x256xf32>
    %91 = vector.extract_strided_slice %73 {offsets = [0, 512], sizes = [4, 256], strides = [1, 1]} : vector<4x768xf32> to vector<4x256xf32>
    %92 = arith.addf %91, %18 : vector<4x256xf32>
    %93 = arith.mulf %81, %92 : vector<4x256xf32>
    %94 = arith.addf %90, %93 : vector<4x256xf32>
    %95 = math.tanh %94 : vector<4x256xf32>
    %96 = arith.subf %60, %95 : vector<4x256xf32>
    %97 = arith.mulf %89, %96 : vector<4x256xf32>
    %98 = arith.addf %95, %97 : vector<4x256xf32>
    %99 = arith.truncf %98 : vector<4x256xf32> to vector<4x256xbf16>
    %100 = vector.extract_strided_slice %99 {offsets = [0, 0], sizes = [2, 256], strides = [1, 1]} : vector<4x256xbf16> to vector<2x256xbf16>
    %c2_27 = arith.constant 2 : index
    %c0_28 = arith.constant 0 : index
    %101 = vector.load %arg10[%c2_27, %c0_28] : memref<16x512xbf16, #tpu.memory_space<vmem>>, vector<2x256xbf16>
    tpu.vector_store %arg10[%c2_27, %c0_28], %100 {strides = array<i32>} : memref<16x512xbf16, #tpu.memory_space<vmem>>, vector<2x256xbf16>,
    %102 = vector.extract_strided_slice %99 {offsets = [2, 0], sizes = [2, 256], strides = [1, 1]} : vector<4x256xbf16> to vector<2x256xbf16>
    %c12_29 = arith.constant 12 : index
    %c256_30 = arith.constant 256 : index
    %103 = vector.load %arg10[%c12_29, %c256_30] : memref<16x512xbf16, #tpu.memory_space<vmem>>, vector<2x256xbf16>
    tpu.vector_store %arg10[%c12_29, %c256_30], %102 {strides = array<i32>} : memref<16x512xbf16, #tpu.memory_space<vmem>>, vector<2x256xbf16>,
    %c4 = arith.constant 4 : index
    %c0_31 = arith.constant 0 : index
    %104 = vector.load %arg11[%c4, %c0_31] : memref<16x1536xf32, #tpu.memory_space<vmem>>, vector<2x768xf32>
    %c10 = arith.constant 10 : index
    %c768_32 = arith.constant 768 : index
    %105 = vector.load %arg11[%c10, %c768_32] : memref<16x1536xf32, #tpu.memory_space<vmem>>, vector<2x768xf32>
    %106 = tpu.concatenate %104, %105 in 0 : vector<2x768xf32>, vector<2x768xf32> -> vector<4x768xf32>
    %107 = tpu.concatenate %98, %98 in 1 : vector<4x256xf32>, vector<4x256xf32> -> vector<4x512xf32>
    %cst_33 = arith.constant 0.000000e+00 : f32
    %108 = vector.broadcast %cst_33 : f32 to vector<4x512xf32>
    %109 = arith.select %26, %107, %108 : vector<4x512xi1>, vector<4x512xf32>
    %110 = arith.truncf %109 : vector<4x512xf32> to vector<4x512xbf16>
    %cst_34 = arith.constant dense<0.000000e+00> : vector<4x768xf32>
    %111 = tpu.matmul %110, %9, %cst_34 {dimension_numbers = #tpu.dot_dimension_numbers<[1], [0], [0], [1], [0, 0, 1, 1], [], []>} : vector<4x512xbf16>, vector<512x768xbf16>, vector<4x768xf32> -> vector<4x768xf32>
    %112 = vector.extract_strided_slice %106 {offsets = [0, 0], sizes = [4, 256], strides = [1, 1]} : vector<4x768xf32> to vector<4x256xf32>
    %113 = vector.extract_strided_slice %111 {offsets = [0, 0], sizes = [4, 256], strides = [1, 1]} : vector<4x768xf32> to vector<4x256xf32>
    %114 = arith.addf %112, %113 : vector<4x256xf32>
    %115 = arith.negf %114 : vector<4x256xf32>
    %116 = math.exp %115 : vector<4x256xf32>
    %cst_35 = arith.constant 1.000000e+00 : f32
    %117 = vector.broadcast %cst_35 : f32 to vector<4x256xf32>
    %118 = arith.addf %117, %116 : vector<4x256xf32>
    %119 = arith.divf %117, %118 : vector<4x256xf32>
    %120 = vector.extract_strided_slice %106 {offsets = [0, 256], sizes = [4, 256], strides = [1, 1]} : vector<4x768xf32> to vector<4x256xf32>
    %121 = vector.extract_strided_slice %111 {offsets = [0, 256], sizes = [4, 256], strides = [1, 1]} : vector<4x768xf32> to vector<4x256xf32>
    %122 = arith.addf %120, %121 : vector<4x256xf32>
    %123 = arith.negf %122 : vector<4x256xf32>
    %124 = math.exp %123 : vector<4x256xf32>
    %cst_36 = arith.constant 1.000000e+00 : f32
    %125 = vector.broadcast %cst_36 : f32 to vector<4x256xf32>
    %126 = arith.addf %125, %124 : vector<4x256xf32>
    %127 = arith.divf %125, %126 : vector<4x256xf32>
    %128 = vector.extract_strided_slice %106 {offsets = [0, 512], sizes = [4, 256], strides = [1, 1]} : vector<4x768xf32> to vector<4x256xf32>
    %129 = vector.extract_strided_slice %111 {offsets = [0, 512], sizes = [4, 256], strides = [1, 1]} : vector<4x768xf32> to vector<4x256xf32>
    %130 = arith.addf %129, %18 : vector<4x256xf32>
    %131 = arith.mulf %119, %130 : vector<4x256xf32>
    %132 = arith.addf %128, %131 : vector<4x256xf32>
    %133 = math.tanh %132 : vector<4x256xf32>
    %134 = arith.subf %98, %133 : vector<4x256xf32>
    %135 = arith.mulf %127, %134 : vector<4x256xf32>
    %136 = arith.addf %133, %135 : vector<4x256xf32>
    %137 = arith.truncf %136 : vector<4x256xf32> to vector<4x256xbf16>
    %138 = vector.extract_strided_slice %137 {offsets = [0, 0], sizes = [2, 256], strides = [1, 1]} : vector<4x256xbf16> to vector<2x256xbf16>
    %c4_37 = arith.constant 4 : index
    %c0_38 = arith.constant 0 : index
    %139 = vector.load %arg10[%c4_37, %c0_38] : memref<16x512xbf16, #tpu.memory_space<vmem>>, vector<2x256xbf16>
    tpu.vector_store %arg10[%c4_37, %c0_38], %138 {strides = array<i32>} : memref<16x512xbf16, #tpu.memory_space<vmem>>, vector<2x256xbf16>,
    %140 = vector.extract_strided_slice %137 {offsets = [2, 0], sizes = [2, 256], strides = [1, 1]} : vector<4x256xbf16> to vector<2x256xbf16>
    %c10_39 = arith.constant 10 : index
    %c256_40 = arith.constant 256 : index
    %141 = vector.load %arg10[%c10_39, %c256_40] : memref<16x512xbf16, #tpu.memory_space<vmem>>, vector<2x256xbf16>
    tpu.vector_store %arg10[%c10_39, %c256_40], %140 {strides = array<i32>} : memref<16x512xbf16, #tpu.memory_space<vmem>>, vector<2x256xbf16>,
    %c6 = arith.constant 6 : index
    %c0_41 = arith.constant 0 : index
    %142 = vector.load %arg11[%c6, %c0_41] : memref<16x1536xf32, #tpu.memory_space<vmem>>, vector<2x768xf32>
    %c8 = arith.constant 8 : index
    %c768_42 = arith.constant 768 : index
    %143 = vector.load %arg11[%c8, %c768_42] : memref<16x1536xf32, #tpu.memory_space<vmem>>, vector<2x768xf32>
    %144 = tpu.concatenate %142, %143 in 0 : vector<2x768xf32>, vector<2x768xf32> -> vector<4x768xf32>
    %145 = tpu.concatenate %136, %136 in 1 : vector<4x256xf32>, vector<4x256xf32> -> vector<4x512xf32>
    %cst_43 = arith.constant 0.000000e+00 : f32
    %146 = vector.broadcast %cst_43 : f32 to vector<4x512xf32>
    %147 = arith.select %26, %145, %146 : vector<4x512xi1>, vector<4x512xf32>
    %148 = arith.truncf %147 : vector<4x512xf32> to vector<4x512xbf16>
    %cst_44 = arith.constant dense<0.000000e+00> : vector<4x768xf32>
    %149 = tpu.matmul %148, %9, %cst_44 {dimension_numbers = #tpu.dot_dimension_numbers<[1], [0], [0], [1], [0, 0, 1, 1], [], []>} : vector<4x512xbf16>, vector<512x768xbf16>, vector<4x768xf32> -> vector<4x768xf32>
    %150 = vector.extract_strided_slice %144 {offsets = [0, 0], sizes = [4, 256], strides = [1, 1]} : vector<4x768xf32> to vector<4x256xf32>
    %151 = vector.extract_strided_slice %149 {offsets = [0, 0], sizes = [4, 256], strides = [1, 1]} : vector<4x768xf32> to vector<4x256xf32>
    %152 = arith.addf %150, %151 : vector<4x256xf32>
    %153 = arith.negf %152 : vector<4x256xf32>
    %154 = math.exp %153 : vector<4x256xf32>
    %cst_45 = arith.constant 1.000000e+00 : f32
    %155 = vector.broadcast %cst_45 : f32 to vector<4x256xf32>
    %156 = arith.addf %155, %154 : vector<4x256xf32>
    %157 = arith.divf %155, %156 : vector<4x256xf32>
    %158 = vector.extract_strided_slice %144 {offsets = [0, 256], sizes = [4, 256], strides = [1, 1]} : vector<4x768xf32> to vector<4x256xf32>
    %159 = vector.extract_strided_slice %149 {offsets = [0, 256], sizes = [4, 256], strides = [1, 1]} : vector<4x768xf32> to vector<4x256xf32>
    %160 = arith.addf %158, %159 : vector<4x256xf32>
    %161 = arith.negf %160 : vector<4x256xf32>
    %162 = math.exp %161 : vector<4x256xf32>
    %cst_46 = arith.constant 1.000000e+00 : f32
    %163 = vector.broadcast %cst_46 : f32 to vector<4x256xf32>
    %164 = arith.addf %163, %162 : vector<4x256xf32>
    %165 = arith.divf %163, %164 : vector<4x256xf32>
    %166 = vector.extract_strided_slice %144 {offsets = [0, 512], sizes = [4, 256], strides = [1, 1]} : vector<4x768xf32> to vector<4x256xf32>
    %167 = vector.extract_strided_slice %149 {offsets = [0, 512], sizes = [4, 256], strides = [1, 1]} : vector<4x768xf32> to vector<4x256xf32>
    %168 = arith.addf %167, %18 : vector<4x256xf32>
    %169 = arith.mulf %157, %168 : vector<4x256xf32>
    %170 = arith.addf %166, %169 : vector<4x256xf32>
    %171 = math.tanh %170 : vector<4x256xf32>
    %172 = arith.subf %136, %171 : vector<4x256xf32>
    %173 = arith.mulf %165, %172 : vector<4x256xf32>
    %174 = arith.addf %171, %173 : vector<4x256xf32>
    %175 = arith.truncf %174 : vector<4x256xf32> to vector<4x256xbf16>
    %176 = vector.extract_strided_slice %175 {offsets = [0, 0], sizes = [2, 256], strides = [1, 1]} : vector<4x256xbf16> to vector<2x256xbf16>
    %c6_47 = arith.constant 6 : index
    %c0_48 = arith.constant 0 : index
    %177 = vector.load %arg10[%c6_47, %c0_48] : memref<16x512xbf16, #tpu.memory_space<vmem>>, vector<2x256xbf16>
    tpu.vector_store %arg10[%c6_47, %c0_48], %176 {strides = array<i32>} : memref<16x512xbf16, #tpu.memory_space<vmem>>, vector<2x256xbf16>,
    %178 = vector.extract_strided_slice %175 {offsets = [2, 0], sizes = [2, 256], strides = [1, 1]} : vector<4x256xbf16> to vector<2x256xbf16>
    %c8_49 = arith.constant 8 : index
    %c256_50 = arith.constant 256 : index
    %179 = vector.load %arg10[%c8_49, %c256_50] : memref<16x512xbf16, #tpu.memory_space<vmem>>, vector<2x256xbf16>
    tpu.vector_store %arg10[%c8_49, %c256_50], %178 {strides = array<i32>} : memref<16x512xbf16, #tpu.memory_space<vmem>>, vector<2x256xbf16>,
    %c8_51 = arith.constant 8 : index
    %c0_52 = arith.constant 0 : index
    %180 = vector.load %arg11[%c8_51, %c0_52] : memref<16x1536xf32, #tpu.memory_space<vmem>>, vector<2x768xf32>
    %c6_53 = arith.constant 6 : index
    %c768_54 = arith.constant 768 : index
    %181 = vector.load %arg11[%c6_53, %c768_54] : memref<16x1536xf32, #tpu.memory_space<vmem>>, vector<2x768xf32>
    %182 = tpu.concatenate %180, %181 in 0 : vector<2x768xf32>, vector<2x768xf32> -> vector<4x768xf32>
    %183 = tpu.concatenate %174, %174 in 1 : vector<4x256xf32>, vector<4x256xf32> -> vector<4x512xf32>
    %cst_55 = arith.constant 0.000000e+00 : f32
    %184 = vector.broadcast %cst_55 : f32 to vector<4x512xf32>
    %185 = arith.select %26, %183, %184 : vector<4x512xi1>, vector<4x512xf32>
    %186 = arith.truncf %185 : vector<4x512xf32> to vector<4x512xbf16>
    %cst_56 = arith.constant dense<0.000000e+00> : vector<4x768xf32>
    %187 = tpu.matmul %186, %9, %cst_56 {dimension_numbers = #tpu.dot_dimension_numbers<[1], [0], [0], [1], [0, 0, 1, 1], [], []>} : vector<4x512xbf16>, vector<512x768xbf16>, vector<4x768xf32> -> vector<4x768xf32>
    %188 = vector.extract_strided_slice %182 {offsets = [0, 0], sizes = [4, 256], strides = [1, 1]} : vector<4x768xf32> to vector<4x256xf32>
    %189 = vector.extract_strided_slice %187 {offsets = [0, 0], sizes = [4, 256], strides = [1, 1]} : vector<4x768xf32> to vector<4x256xf32>
    %190 = arith.addf %188, %189 : vector<4x256xf32>
    %191 = arith.negf %190 : vector<4x256xf32>
    %192 = math.exp %191 : vector<4x256xf32>
    %cst_57 = arith.constant 1.000000e+00 : f32
    %193 = vector.broadcast %cst_57 : f32 to vector<4x256xf32>
    %194 = arith.addf %193, %192 : vector<4x256xf32>
    %195 = arith.divf %193, %194 : vector<4x256xf32>
    %196 = vector.extract_strided_slice %182 {offsets = [0, 256], sizes = [4, 256], strides = [1, 1]} : vector<4x768xf32> to vector<4x256xf32>
    %197 = vector.extract_strided_slice %187 {offsets = [0, 256], sizes = [4, 256], strides = [1, 1]} : vector<4x768xf32> to vector<4x256xf32>
    %198 = arith.addf %196, %197 : vector<4x256xf32>
    %199 = arith.negf %198 : vector<4x256xf32>
    %200 = math.exp %199 : vector<4x256xf32>
    %cst_58 = arith.constant 1.000000e+00 : f32
    %201 = vector.broadcast %cst_58 : f32 to vector<4x256xf32>
    %202 = arith.addf %201, %200 : vector<4x256xf32>
    %203 = arith.divf %201, %202 : vector<4x256xf32>
    %204 = vector.extract_strided_slice %182 {offsets = [0, 512], sizes = [4, 256], strides = [1, 1]} : vector<4x768xf32> to vector<4x256xf32>
    %205 = vector.extract_strided_slice %187 {offsets = [0, 512], sizes = [4, 256], strides = [1, 1]} : vector<4x768xf32> to vector<4x256xf32>
    %206 = arith.addf %205, %18 : vector<4x256xf32>
    %207 = arith.mulf %195, %206 : vector<4x256xf32>
    %208 = arith.addf %204, %207 : vector<4x256xf32>
    %209 = math.tanh %208 : vector<4x256xf32>
    %210 = arith.subf %174, %209 : vector<4x256xf32>
    %211 = arith.mulf %203, %210 : vector<4x256xf32>
    %212 = arith.addf %209, %211 : vector<4x256xf32>
    %213 = arith.truncf %212 : vector<4x256xf32> to vector<4x256xbf16>
    %214 = vector.extract_strided_slice %213 {offsets = [0, 0], sizes = [2, 256], strides = [1, 1]} : vector<4x256xbf16> to vector<2x256xbf16>
    %c8_59 = arith.constant 8 : index
    %c0_60 = arith.constant 0 : index
    %215 = vector.load %arg10[%c8_59, %c0_60] : memref<16x512xbf16, #tpu.memory_space<vmem>>, vector<2x256xbf16>
    tpu.vector_store %arg10[%c8_59, %c0_60], %214 {strides = array<i32>} : memref<16x512xbf16, #tpu.memory_space<vmem>>, vector<2x256xbf16>,
    %216 = vector.extract_strided_slice %213 {offsets = [2, 0], sizes = [2, 256], strides = [1, 1]} : vector<4x256xbf16> to vector<2x256xbf16>
    %c6_61 = arith.constant 6 : index
    %c256_62 = arith.constant 256 : index
    %217 = vector.load %arg10[%c6_61, %c256_62] : memref<16x512xbf16, #tpu.memory_space<vmem>>, vector<2x256xbf16>
    tpu.vector_store %arg10[%c6_61, %c256_62], %216 {strides = array<i32>} : memref<16x512xbf16, #tpu.memory_space<vmem>>, vector<2x256xbf16>,
    %c10_63 = arith.constant 10 : index
    %c0_64 = arith.constant 0 : index
    %218 = vector.load %arg11[%c10_63, %c0_64] : memref<16x1536xf32, #tpu.memory_space<vmem>>, vector<2x768xf32>
    %c4_65 = arith.constant 4 : index
    %c768_66 = arith.constant 768 : index
    %219 = vector.load %arg11[%c4_65, %c768_66] : memref<16x1536xf32, #tpu.memory_space<vmem>>, vector<2x768xf32>
    %220 = tpu.concatenate %218, %219 in 0 : vector<2x768xf32>, vector<2x768xf32> -> vector<4x768xf32>
    %221 = tpu.concatenate %212, %212 in 1 : vector<4x256xf32>, vector<4x256xf32> -> vector<4x512xf32>
    %cst_67 = arith.constant 0.000000e+00 : f32
    %222 = vector.broadcast %cst_67 : f32 to vector<4x512xf32>
    %223 = arith.select %26, %221, %222 : vector<4x512xi1>, vector<4x512xf32>
    %224 = arith.truncf %223 : vector<4x512xf32> to vector<4x512xbf16>
    %cst_68 = arith.constant dense<0.000000e+00> : vector<4x768xf32>
    %225 = tpu.matmul %224, %9, %cst_68 {dimension_numbers = #tpu.dot_dimension_numbers<[1], [0], [0], [1], [0, 0, 1, 1], [], []>} : vector<4x512xbf16>, vector<512x768xbf16>, vector<4x768xf32> -> vector<4x768xf32>
    %226 = vector.extract_strided_slice %220 {offsets = [0, 0], sizes = [4, 256], strides = [1, 1]} : vector<4x768xf32> to vector<4x256xf32>
    %227 = vector.extract_strided_slice %225 {offsets = [0, 0], sizes = [4, 256], strides = [1, 1]} : vector<4x768xf32> to vector<4x256xf32>
    %228 = arith.addf %226, %227 : vector<4x256xf32>
    %229 = arith.negf %228 : vector<4x256xf32>
    %230 = math.exp %229 : vector<4x256xf32>
    %cst_69 = arith.constant 1.000000e+00 : f32
    %231 = vector.broadcast %cst_69 : f32 to vector<4x256xf32>
    %232 = arith.addf %231, %230 : vector<4x256xf32>
    %233 = arith.divf %231, %232 : vector<4x256xf32>
    %234 = vector.extract_strided_slice %220 {offsets = [0, 256], sizes = [4, 256], strides = [1, 1]} : vector<4x768xf32> to vector<4x256xf32>
    %235 = vector.extract_strided_slice %225 {offsets = [0, 256], sizes = [4, 256], strides = [1, 1]} : vector<4x768xf32> to vector<4x256xf32>
    %236 = arith.addf %234, %235 : vector<4x256xf32>
    %237 = arith.negf %236 : vector<4x256xf32>
    %238 = math.exp %237 : vector<4x256xf32>
    %cst_70 = arith.constant 1.000000e+00 : f32
    %239 = vector.broadcast %cst_70 : f32 to vector<4x256xf32>
    %240 = arith.addf %239, %238 : vector<4x256xf32>
    %241 = arith.divf %239, %240 : vector<4x256xf32>
    %242 = vector.extract_strided_slice %220 {offsets = [0, 512], sizes = [4, 256], strides = [1, 1]} : vector<4x768xf32> to vector<4x256xf32>
    %243 = vector.extract_strided_slice %225 {offsets = [0, 512], sizes = [4, 256], strides = [1, 1]} : vector<4x768xf32> to vector<4x256xf32>
    %244 = arith.addf %243, %18 : vector<4x256xf32>
    %245 = arith.mulf %233, %244 : vector<4x256xf32>
    %246 = arith.addf %242, %245 : vector<4x256xf32>
    %247 = math.tanh %246 : vector<4x256xf32>
    %248 = arith.subf %212, %247 : vector<4x256xf32>
    %249 = arith.mulf %241, %248 : vector<4x256xf32>
    %250 = arith.addf %247, %249 : vector<4x256xf32>
    %251 = arith.truncf %250 : vector<4x256xf32> to vector<4x256xbf16>
    %252 = vector.extract_strided_slice %251 {offsets = [0, 0], sizes = [2, 256], strides = [1, 1]} : vector<4x256xbf16> to vector<2x256xbf16>
    %c10_71 = arith.constant 10 : index
    %c0_72 = arith.constant 0 : index
    %253 = vector.load %arg10[%c10_71, %c0_72] : memref<16x512xbf16, #tpu.memory_space<vmem>>, vector<2x256xbf16>
    tpu.vector_store %arg10[%c10_71, %c0_72], %252 {strides = array<i32>} : memref<16x512xbf16, #tpu.memory_space<vmem>>, vector<2x256xbf16>,
    %254 = vector.extract_strided_slice %251 {offsets = [2, 0], sizes = [2, 256], strides = [1, 1]} : vector<4x256xbf16> to vector<2x256xbf16>
    %c4_73 = arith.constant 4 : index
    %c256_74 = arith.constant 256 : index
    %255 = vector.load %arg10[%c4_73, %c256_74] : memref<16x512xbf16, #tpu.memory_space<vmem>>, vector<2x256xbf16>
    tpu.vector_store %arg10[%c4_73, %c256_74], %254 {strides = array<i32>} : memref<16x512xbf16, #tpu.memory_space<vmem>>, vector<2x256xbf16>,
    %c12_75 = arith.constant 12 : index
    %c0_76 = arith.constant 0 : index
    %256 = vector.load %arg11[%c12_75, %c0_76] : memref<16x1536xf32, #tpu.memory_space<vmem>>, vector<2x768xf32>
    %c2_77 = arith.constant 2 : index
    %c768_78 = arith.constant 768 : index
    %257 = vector.load %arg11[%c2_77, %c768_78] : memref<16x1536xf32, #tpu.memory_space<vmem>>, vector<2x768xf32>
    %258 = tpu.concatenate %256, %257 in 0 : vector<2x768xf32>, vector<2x768xf32> -> vector<4x768xf32>
    %259 = tpu.concatenate %250, %250 in 1 : vector<4x256xf32>, vector<4x256xf32> -> vector<4x512xf32>
    %cst_79 = arith.constant 0.000000e+00 : f32
    %260 = vector.broadcast %cst_79 : f32 to vector<4x512xf32>
    %261 = arith.select %26, %259, %260 : vector<4x512xi1>, vector<4x512xf32>
    %262 = arith.truncf %261 : vector<4x512xf32> to vector<4x512xbf16>
    %cst_80 = arith.constant dense<0.000000e+00> : vector<4x768xf32>
    %263 = tpu.matmul %262, %9, %cst_80 {dimension_numbers = #tpu.dot_dimension_numbers<[1], [0], [0], [1], [0, 0, 1, 1], [], []>} : vector<4x512xbf16>, vector<512x768xbf16>, vector<4x768xf32> -> vector<4x768xf32>
    %264 = vector.extract_strided_slice %258 {offsets = [0, 0], sizes = [4, 256], strides = [1, 1]} : vector<4x768xf32> to vector<4x256xf32>
    %265 = vector.extract_strided_slice %263 {offsets = [0, 0], sizes = [4, 256], strides = [1, 1]} : vector<4x768xf32> to vector<4x256xf32>
    %266 = arith.addf %264, %265 : vector<4x256xf32>
    %267 = arith.negf %266 : vector<4x256xf32>
    %268 = math.exp %267 : vector<4x256xf32>
    %cst_81 = arith.constant 1.000000e+00 : f32
    %269 = vector.broadcast %cst_81 : f32 to vector<4x256xf32>
    %270 = arith.addf %269, %268 : vector<4x256xf32>
    %271 = arith.divf %269, %270 : vector<4x256xf32>
    %272 = vector.extract_strided_slice %258 {offsets = [0, 256], sizes = [4, 256], strides = [1, 1]} : vector<4x768xf32> to vector<4x256xf32>
    %273 = vector.extract_strided_slice %263 {offsets = [0, 256], sizes = [4, 256], strides = [1, 1]} : vector<4x768xf32> to vector<4x256xf32>
    %274 = arith.addf %272, %273 : vector<4x256xf32>
    %275 = arith.negf %274 : vector<4x256xf32>
    %276 = math.exp %275 : vector<4x256xf32>
    %cst_82 = arith.constant 1.000000e+00 : f32
    %277 = vector.broadcast %cst_82 : f32 to vector<4x256xf32>
    %278 = arith.addf %277, %276 : vector<4x256xf32>
    %279 = arith.divf %277, %278 : vector<4x256xf32>
    %280 = vector.extract_strided_slice %258 {offsets = [0, 512], sizes = [4, 256], strides = [1, 1]} : vector<4x768xf32> to vector<4x256xf32>
    %281 = vector.extract_strided_slice %263 {offsets = [0, 512], sizes = [4, 256], strides = [1, 1]} : vector<4x768xf32> to vector<4x256xf32>
    %282 = arith.addf %281, %18 : vector<4x256xf32>
    %283 = arith.mulf %271, %282 : vector<4x256xf32>
    %284 = arith.addf %280, %283 : vector<4x256xf32>
    %285 = math.tanh %284 : vector<4x256xf32>
    %286 = arith.subf %250, %285 : vector<4x256xf32>
    %287 = arith.mulf %279, %286 : vector<4x256xf32>
    %288 = arith.addf %285, %287 : vector<4x256xf32>
    %289 = arith.truncf %288 : vector<4x256xf32> to vector<4x256xbf16>
    %290 = vector.extract_strided_slice %289 {offsets = [0, 0], sizes = [2, 256], strides = [1, 1]} : vector<4x256xbf16> to vector<2x256xbf16>
    %c12_83 = arith.constant 12 : index
    %c0_84 = arith.constant 0 : index
    %291 = vector.load %arg10[%c12_83, %c0_84] : memref<16x512xbf16, #tpu.memory_space<vmem>>, vector<2x256xbf16>
    tpu.vector_store %arg10[%c12_83, %c0_84], %290 {strides = array<i32>} : memref<16x512xbf16, #tpu.memory_space<vmem>>, vector<2x256xbf16>,
    %292 = vector.extract_strided_slice %289 {offsets = [2, 0], sizes = [2, 256], strides = [1, 1]} : vector<4x256xbf16> to vector<2x256xbf16>
    %c2_85 = arith.constant 2 : index
    %c256_86 = arith.constant 256 : index
    %293 = vector.load %arg10[%c2_85, %c256_86] : memref<16x512xbf16, #tpu.memory_space<vmem>>, vector<2x256xbf16>
    tpu.vector_store %arg10[%c2_85, %c256_86], %292 {strides = array<i32>} : memref<16x512xbf16, #tpu.memory_space<vmem>>, vector<2x256xbf16>,
    %c14_87 = arith.constant 14 : index
    %c0_88 = arith.constant 0 : index
    %294 = vector.load %arg11[%c14_87, %c0_88] : memref<16x1536xf32, #tpu.memory_space<vmem>>, vector<2x768xf32>
    %c0_89 = arith.constant 0 : index
    %c768_90 = arith.constant 768 : index
    %295 = vector.load %arg11[%c0_89, %c768_90] : memref<16x1536xf32, #tpu.memory_space<vmem>>, vector<2x768xf32>
    %296 = tpu.concatenate %294, %295 in 0 : vector<2x768xf32>, vector<2x768xf32> -> vector<4x768xf32>
    %297 = tpu.concatenate %288, %288 in 1 : vector<4x256xf32>, vector<4x256xf32> -> vector<4x512xf32>
    %cst_91 = arith.constant 0.000000e+00 : f32
    %298 = vector.broadcast %cst_91 : f32 to vector<4x512xf32>
    %299 = arith.select %26, %297, %298 : vector<4x512xi1>, vector<4x512xf32>
    %300 = arith.truncf %299 : vector<4x512xf32> to vector<4x512xbf16>
    %cst_92 = arith.constant dense<0.000000e+00> : vector<4x768xf32>
    %301 = tpu.matmul %300, %9, %cst_92 {dimension_numbers = #tpu.dot_dimension_numbers<[1], [0], [0], [1], [0, 0, 1, 1], [], []>} : vector<4x512xbf16>, vector<512x768xbf16>, vector<4x768xf32> -> vector<4x768xf32>
    %302 = vector.extract_strided_slice %296 {offsets = [0, 0], sizes = [4, 256], strides = [1, 1]} : vector<4x768xf32> to vector<4x256xf32>
    %303 = vector.extract_strided_slice %301 {offsets = [0, 0], sizes = [4, 256], strides = [1, 1]} : vector<4x768xf32> to vector<4x256xf32>
    %304 = arith.addf %302, %303 : vector<4x256xf32>
    %305 = arith.negf %304 : vector<4x256xf32>
    %306 = math.exp %305 : vector<4x256xf32>
    %cst_93 = arith.constant 1.000000e+00 : f32
    %307 = vector.broadcast %cst_93 : f32 to vector<4x256xf32>
    %308 = arith.addf %307, %306 : vector<4x256xf32>
    %309 = arith.divf %307, %308 : vector<4x256xf32>
    %310 = vector.extract_strided_slice %296 {offsets = [0, 256], sizes = [4, 256], strides = [1, 1]} : vector<4x768xf32> to vector<4x256xf32>
    %311 = vector.extract_strided_slice %301 {offsets = [0, 256], sizes = [4, 256], strides = [1, 1]} : vector<4x768xf32> to vector<4x256xf32>
    %312 = arith.addf %310, %311 : vector<4x256xf32>
    %313 = arith.negf %312 : vector<4x256xf32>
    %314 = math.exp %313 : vector<4x256xf32>
    %cst_94 = arith.constant 1.000000e+00 : f32
    %315 = vector.broadcast %cst_94 : f32 to vector<4x256xf32>
    %316 = arith.addf %315, %314 : vector<4x256xf32>
    %317 = arith.divf %315, %316 : vector<4x256xf32>
    %318 = vector.extract_strided_slice %296 {offsets = [0, 512], sizes = [4, 256], strides = [1, 1]} : vector<4x768xf32> to vector<4x256xf32>
    %319 = vector.extract_strided_slice %301 {offsets = [0, 512], sizes = [4, 256], strides = [1, 1]} : vector<4x768xf32> to vector<4x256xf32>
    %320 = arith.addf %319, %18 : vector<4x256xf32>
    %321 = arith.mulf %309, %320 : vector<4x256xf32>
    %322 = arith.addf %318, %321 : vector<4x256xf32>
    %323 = math.tanh %322 : vector<4x256xf32>
    %324 = arith.subf %288, %323 : vector<4x256xf32>
    %325 = arith.mulf %317, %324 : vector<4x256xf32>
    %326 = arith.addf %323, %325 : vector<4x256xf32>
    %327 = arith.truncf %326 : vector<4x256xf32> to vector<4x256xbf16>
    %328 = vector.extract_strided_slice %327 {offsets = [0, 0], sizes = [2, 256], strides = [1, 1]} : vector<4x256xbf16> to vector<2x256xbf16>
    %c14_95 = arith.constant 14 : index
    %c0_96 = arith.constant 0 : index
    %329 = vector.load %arg10[%c14_95, %c0_96] : memref<16x512xbf16, #tpu.memory_space<vmem>>, vector<2x256xbf16>
    tpu.vector_store %arg10[%c14_95, %c0_96], %328 {strides = array<i32>} : memref<16x512xbf16, #tpu.memory_space<vmem>>, vector<2x256xbf16>,
    %330 = vector.extract_strided_slice %327 {offsets = [2, 0], sizes = [2, 256], strides = [1, 1]} : vector<4x256xbf16> to vector<2x256xbf16>
    %c0_97 = arith.constant 0 : index
    %c256_98 = arith.constant 256 : index
    %331 = vector.load %arg10[%c0_97, %c256_98] : memref<16x512xbf16, #tpu.memory_space<vmem>>, vector<2x256xbf16>
    tpu.vector_store %arg10[%c0_97, %c256_98], %330 {strides = array<i32>} : memref<16x512xbf16, #tpu.memory_space<vmem>>, vector<2x256xbf16>,
    %c2_i32_99 = arith.constant 2 : i32
    %332 = arith.cmpi eq, %arg0, %c2_i32_99 : i32
    %333 = arith.extui %332 : i1 to i32
    %c0_i32_100 = arith.constant 0 : i32
    %334 = arith.cmpi ne, %333, %c0_i32_100 : i32
    scf.if %334 {
      %c14_101 = arith.constant 14 : index
      %c0_102 = arith.constant 0 : index
      %335 = vector.load %arg10[%c14_101, %c0_102] : memref<16x512xbf16, #tpu.memory_space<vmem>>, vector<2x512xbf16>
      %cst_103 = arith.constant 0.000000e+00 : bf16
      %336 = vector.broadcast %cst_103 : bf16 to vector<2x512xbf16>
      %337 = arith.maximumf %335, %336 : vector<2x512xbf16>
      %c0_104 = arith.constant 0 : index
      %c0_105 = arith.constant 0 : index
      %338 = vector.load %arg7[%c0_104, %c0_105] : memref<512x16xbf16, #tpu.memory_space<vmem>>, vector<512x16xbf16>
      %cst_106 = arith.constant dense<0.000000e+00> : vector<2x16xf32>
      %339 = tpu.matmul %337, %338, %cst_106 {dimension_numbers = #tpu.dot_dimension_numbers<[1], [0], [0], [1], [0, 0, 1, 1], [], []>} : vector<2x512xbf16>, vector<512x16xbf16>, vector<2x16xf32> -> vector<2x16xf32>
      %c0_107 = arith.constant 0 : index
      %c0_108 = arith.constant 0 : index
      %340 = vector.load %arg8[%c0_107, %c0_108] : memref<1x16xf32, #tpu.memory_space<vmem>>, vector<1x16xf32>
      %341 = vector.broadcast %340 : vector<1x16xf32> to vector<2x16xf32>
      %342 = arith.addf %339, %341 : vector<2x16xf32>
      %c0_109 = arith.constant 0 : index
      %c0_110 = arith.constant 0 : index
      %343 = vector.load %arg1[%c0_109, %c0_110] : memref<16x16xf32, #tpu.memory_space<vmem>>, vector<2x16xf32>
      %344 = arith.addf %343, %342 : vector<2x16xf32>
      %c0_111 = arith.constant 0 : index
      %c0_112 = arith.constant 0 : index
      %345 = vector.load %arg9[%c0_111, %c0_112] : memref<2x16xf32, #tpu.memory_space<vmem>>, vector<2x16xf32>
      tpu.vector_store %arg9[%c0_111, %c0_112], %344 {strides = array<i32>} : memref<2x16xf32, #tpu.memory_space<vmem>>, vector<2x16xf32>,
    } else {
    }
    return
  }
  func.func @transform_0(%arg0: i32) -> (i32, i32) {
    %c0_i32 = arith.constant 0 : i32
    %c0_i32_0 = arith.constant 0 : i32
    %c0_i32_1 = arith.constant 0 : i32
    return %c0_i32, %c0_i32_0 : i32, i32
  }
  func.func @transform_1(%arg0: i32) -> (i32, i32) {
    %c0_i32 = arith.constant 0 : i32
    %c0_i32_0 = arith.constant 0 : i32
    %c0_i32_1 = arith.constant 0 : i32
    return %c0_i32, %c0_i32_0 : i32, i32
  }
  func.func @transform_2(%arg0: i32) -> (i32, i32, i32) {
    %c1_i32 = arith.constant 1 : i32
    %0 = arith.subi %arg0, %c1_i32 : i32
    %c0_i32 = arith.constant 0 : i32
    %1 = arith.maxsi %0, %c0_i32 : i32
    %c0_i32_0 = arith.constant 0 : i32
    %c0_i32_1 = arith.constant 0 : i32
    %c0_i32_2 = arith.constant 0 : i32
    return %1, %c0_i32_0, %c0_i32_1 : i32, i32, i32
  }
  func.func @transform_3(%arg0: i32) -> (i32, i32, i32) {
    %c0_i32 = arith.constant 0 : i32
    %c0_i32_0 = arith.constant 0 : i32
    %c0_i32_1 = arith.constant 0 : i32
    return %arg0, %c0_i32, %c0_i32_0 : i32, i32, i32
  }
  func.func @transform_4(%arg0: i32) -> (i32, i32, i32) {
    %c0_i32 = arith.constant 0 : i32
    %c0_i32_0 = arith.constant 0 : i32
    %c0_i32_1 = arith.constant 0 : i32
    return %arg0, %c0_i32, %c0_i32_0 : i32, i32, i32
  }
  func.func @transform_5(%arg0: i32) -> (i32, i32, i32) {
    %c0_i32 = arith.constant 0 : i32
    %c0_i32_0 = arith.constant 0 : i32
    %c0_i32_1 = arith.constant 0 : i32
    return %arg0, %c0_i32, %c0_i32_0 : i32, i32, i32
  }
  func.func @transform_6(%arg0: i32) -> (i32, i32) {
    %c0_i32 = arith.constant 0 : i32
    %c0_i32_0 = arith.constant 0 : i32
    %c0_i32_1 = arith.constant 0 : i32
    return %c0_i32, %c0_i32_0 : i32, i32
  }
  func.func @transform_7(%arg0: i32) -> (i32, i32) {
    %c0_i32 = arith.constant 0 : i32
    %c0_i32_0 = arith.constant 0 : i32
    %c0_i32_1 = arith.constant 0 : i32
    return %c0_i32, %c0_i32_0 : i32, i32
  }
  func.func @transform_8(%arg0: i32) -> (i32, i32) {
    %c0_i32 = arith.constant 0 : i32
    %c0_i32_0 = arith.constant 0 : i32
    %c0_i32_1 = arith.constant 0 : i32
    return %c0_i32, %c0_i32_0 : i32, i32
  }
}

</mosaic_0001>

<bundles_post_ra>
// kernel: stacked_gru_forward.1
= control target key start
LH: loop header
LB: loop body
LE: loop exit
PB: predicated region body
PF: predicated region fallthrough
CT: control target
= control target key end

     0   :  { %s16714_s0 = inlined_call_operand.vmem [shape: f32[16,16], index: 0, kind: input, shape index: {}]   ;;  %s16715_s1 = inlined_call_operand.hbm [shape: bf16[16,1536], index: 1, kind: input, shape index: {}]   ;;  %s16716_s2 = inlined_call_operand.hbm [shape: bf16[2,512,1536], index: 2, kind: input, shape index: {}]   ;;  %s16717_s3 = inlined_call_operand.hbm [shape: bf16[3,512,768], index: 3, kind: input, shape index: {}]   ;;  %s16718_s4 = inlined_call_operand.hbm [shape: f32[3,1,1536], index: 4, kind: input, shape index: {}]   ;;  %s16719_s5 = inlined_call_operand.hbm [shape: f32[3,2,256], index: 5, kind: input, shape index: {}]   ;;  %s16720_s6 = inlined_call_operand.vmem [shape: bf16[512,16], index: 6, kind: input, shape index: {}]   ;;  %s16721_s7 = inlined_call_operand.hbm [shape: f32[1,16], index: 7, kind: input, shape index: {}]   ;;  %s16722_s8 = inlined_call_operand.hbm [shape: f32[2,16], index: 8, kind: output, shape index: {}]  }
   0x1   :  { %17190 = sst [smem:[#allocation152_spill]] %s16714_s0 }
   0x2   :  { %17191 = sst [smem:[#allocation153_spill]] %s16716_s2 }
   0x3   :  { %17192 = sst [smem:[#allocation154_spill]] %s16718_s4 }
   0x4   :  { %17193 = sst [smem:[#allocation155_spill]] %s16720_s6 }
   0x5   :  { %17194 = sst [smem:[#allocation156_spill]] %s16722_s8 }
   0x6   :  { %13 = vsyncpa [#allocation5], 0 }
   0x7   :  { %14 = vsyncpa [#allocation8], 0 }
   0x8   :  { %16 = vsyncpa [#allocation8 + $0x1], 0 }
   0x9   :  { %17 = vsyncpa [#allocation11], 0 }
   0xa   :  { %19 = vsyncpa [#allocation11 + $0x1], 0 }
   0xb   :  { %20 = vsyncpa [#allocation14], 0 }
   0xc   :  { %21 = vsyncpa [#allocation6], 0  ;;  %s11567_s27 = smov 0   ;;  %s11569_s28 = smov 0  }
   0xd   :  { %s11571_s29 = smov 0   ;;  %s11573_s30 = smov 0  }
   0xe   :  { %s11575_s9 = smov 0   ;;  %s11577_s10 = smov 0  }
   0xf   :  { %s11579_s11 = smov 0  }
  0x10 LB: > { %17195 = sst [smem:[#allocation22_spill]] %s11489_s29  ;;  %s11603_s12 = sadd.s32 4294967295, %s11505_s11   ;;  %s11505_s11 = sphi %s11579_s11, %s18131_s11   ;;  %s11501_s10 = sphi %s11577_s10, %s18135_s10   ;;  %s11497_s9 = sphi %s11575_s9, %s18139_s9   ;;  %s11493_s30 = sphi %s11573_s30, %s18138_s30   ;;  %s11489_s29 = sphi %s11571_s29, %s18133_s29   ;;  %s11485_s28 = sphi %s11569_s28, %s18137_s28   ;;  %s11481_s27 = sphi %s11567_s27, %s18136_s27  }
  0x11   : > { %17196 = sst [smem:[#allocation23_spill]] %s11501_s10  ;;  %s11606_s13 = sadd.s32 1, %s11505_s11  }
  0x12   : > { %17197 = sst [smem:[#allocation24_spill]] %s11606_s13  ;;  %p74_p0 = scmp.gt.s32.totalorder %s11603_s12, 0 }
  0x13   : > { %s8367_s14 = sadd.s32 4294967295, %s11606_s13  ;;  %s82_s15 = sadd.s32 1, %s11501_s10 }
  0x14   : > { %p77_p1 = scmp.gt.s32.totalorder %s8367_s14, 0  ;;  %p89_p2 = scmp.ne.s32.totalorder %s11501_s10, %s11497_s9 }
  0x15   : > { %s75_s16 = scalar_select %p74_p0, %s11603_s12, 0 }
  0x16   : > { %s18141_s14 = smov (!%p77_p1, %s8367_s14), 0  ;;  %p16724_p3 = scmp.eq.s32.totalorder %s11505_s11, 0 }
  0x17   : > { %s79_s17 = ssub.s32 %s75_s16, %s18141_s14  ;;  %s105_s18 = ssub.s32 %s11505_s11, %s11606_s13 }
  0x18   : > { %p80_p4 = scmp.eq.s32.totalorder %s79_s17, 0  ;;  %p91_p5 = por %p16724_p3, %p89_p2 }
  0x19   : > { %p11619_p6 = scmp.eq.s32.totalorder %s105_s18, 0  ;;  %p16723_p8 = scmp.lt.s32.totalorder %s11505_s11, 3 }
  0x1a   : > { %s11625_s20 = scalar_select %p80_p4, %s11501_s10, %s82_s15  }
  0x1b   : > { %s16727_s21 = sand.u32 1, %s11505_s11   ;;  %s292_s22 = sand.u32 1, %s11501_s10  }
  0x1c   : > { %17199 = sst [smem:[#allocation25_spill]] %s11625_s20  ;;  %s9394_s23 = smul.u32 3072, %s292_s22 }
  0x1d   : > { %s9395_s24 = smul.u32 49152, %s75_s16  ;;  %p11632_p9 = pnand %p16723_p8, %p91_p5 }
  0x1e   : > { %s17201_s2 = sld [smem:[#allocation153_spill]]  ;;  %s294_s15 = scalar_lea.vmem [#allocation7], %s9394_s23 }
  0x1f   : > { %s304_s18 = sshll.u32 %s294_s15, 4  ;;  %s11645_s16 = scalar_lea.sflag [#allocation8], %s16727_s21  ;;  %s11641_s18 = int_to_ptr.vmem [resolvable:$true] %s304_s18 }
  0x20   : > { %p11227_p11 = pneg %p11632_p9 }
  0x24   : > { %s11639_s17 = scalar_lea.hbm %s17201_s2, %s9395_s24  ;;  %s11230_s14 = scalar_lea.hbm %s17201_s2, 98304 }
  0x25   : > { %s11225_s22 = scalar_lea.hbm %s11639_s17, 49152  ;;  %p11231_p0 = scmp.lt.u32.totalorder %s11639_s17, %s17201_s2 }
  0x26   : > { %p11226_p10 = scmp.ne.s32.totalorder %s11639_s17, %s11225_s22  ;;  %p11232_p1 = scmp.lt.u32.totalorder %s11230_s14, %s11225_s22 }
  0x27   : > { %p11234_p4 = scmp.lt.u32.totalorder %s11225_s22, %s11639_s17 }
  0x28   : > { %p11228_p12 = pnand %p11227_p11, %p11226_p10  ;;  %p11233_p2 = por %p11232_p1, %p11231_p0 }
  0x2a   : > { %p11229_p13 = pneg %p11228_p12  ;;  %p11235_p5 = por %p11234_p4, %p11233_p2 }
  0x2c   : > { %p11236_p7 = pnand %p11235_p5, %p11229_p13 }
  0x2e   : > { %11239 = shalt.err (!%p11236_p7)
}
  0x2f   : > { %s11240_s15 = scalar_lea.vmem %s11641_s18, 49152  ;;  %s11507_s24 = smov [#allocation7]  }
  0x30   : > { %p11241_p10 = scmp.ne.s32.totalorder %s11641_s18, %s11240_s15  ;;  %s11245_s26 = sshll.u32 %s11507_s24, 4  ;;  %s11246_s26 = int_to_ptr.vmem [resolvable:$false] %s11245_s26 }
  0x31   : > { %s11247_s20 = scalar_lea.vmem %s11246_s26, 98304  ;;  %p11248_p3 = scmp.lt.s32.totalorder %s11641_s18, %s11246_s26 }
  0x32   : > { %p11243_p12 = pnand %p11241_p10, %p11227_p11  ;;  %p11249_p0 = scmp.lt.s32.totalorder %s11247_s20, %s11240_s15 }
  0x34   : > { %p11244_p8 = pneg %p11243_p12  ;;  %p11250_p1 = por %p11249_p0, %p11248_p3 }
  0x36   : > { %p11251_p2 = pnand %p11250_p1, %p11244_p8 }
  0x38   : > { %11254 = shalt.err (!%p11251_p2)
}
  0x39   : > { %s16725_s22 = smov 768   ;;  %s16726_s14 = smov 48  }
  0x3a   : > { %9433 = dma.hbm_to_vmem [thread:$0]  (!%p11632_p9), %s11639_s17, 49152, %s11641_s18, %s11645_s16, %s16725_s22, %s16725_s22, %s16726_s14  }
  0x3b   : > { %s108_s23 = sadd.s32 1, %s11489_s29  ;;  %p115_p3 = scmp.ne.s32.totalorder %s11489_s29, %s11485_s28 }
  0x3c   : > { %s11680_s15 = scalar_select %p11619_p6, %s11489_s29, %s108_s23  }
  0x3d   : > { %s11687_s24 = sand.u32 1, %s11489_s29   ;;  %p17203_p8 = scmp.eq.s32.totalorder %s11505_s11, 0 }
  0x3e   : > { %17202 = sst [smem:[#allocation26_spill]] %s11680_s15  ;;  %s9396_s25 = smul.u32 1536, %s11687_s24 }
  0x3f   : > { %p117_p11 = por %p115_p3, %p17203_p8  ;;  %s9398_s26 = smul.u32 12, %s11687_s24 }
  0x40   : > { %p17204_p13 = scmp.lt.s32.totalorder %s11505_s11, 3  ;;  %s318_s19 = scalar_lea.vmem [#allocation9], %s9396_s25 }
  0x41   : > { %s325_s18 = sshll.u32 %s318_s19, 4  ;;  %s9399_s20 = smul.u32 192, %s11505_s11  ;;  %s11699_s18 = int_to_ptr.vmem [resolvable:$true] %s325_s18 }
  0x42   : > { %p11695_p4 = pnand %p17204_p13, %p117_p11  ;;  %s339_s23 = scalar_lea.vmem [#allocation10], %s9398_s26 }
  0x43   : > { %s347_s22 = sshll.u32 %s339_s23, 4  ;;  %s17206_s4 = sld [smem:[#allocation154_spill]]  ;;  %s11702_s22 = int_to_ptr.vmem [resolvable:$true] %s347_s22 }
  0x44   : > { %s17205_s17 = scalar_select %p11695_p4, 1, 0 }
  0x45   : > { %s17207_s10 = sand.u32 1, %s11505_s11   ;;  %p11719_p5 = pneg %p11695_p4 }
  0x46   : > { %s11713_s25 = scalar_lea.sflag [#allocation11], %s17207_s10 }
  0x49   : > { %s11707_s2 = scalar_lea.hbm %s17206_s4, %s9399_s20  ;;  %s11260_s20 = scalar_lea.hbm %s17206_s4, 576 }
  0x4a   : > { %s11255_s19 = scalar_lea.hbm %s11707_s2, 192  ;;  %p11261_p0 = scmp.lt.u32.totalorder %s11707_s2, %s17206_s4 }
  0x4b   : > { %p11256_p9 = scmp.ne.s32.totalorder %s11707_s2, %s11255_s19  ;;  %p11262_p1 = scmp.lt.u32.totalorder %s11260_s20, %s11255_s19 }
  0x4c   : > { %p11264_p3 = scmp.lt.u32.totalorder %s11255_s19, %s11707_s2 }
  0x4d   : > { %p11258_p10 = pnand %p11719_p5, %p11256_p9  ;;  %p11263_p2 = por %p11262_p1, %p11261_p0 }
  0x4f   : > { %p11259_p12 = pneg %p11258_p10  ;;  %p11265_p8 = por %p11264_p3, %p11263_p2 }
  0x51   : > { %p11266_p11 = pnand %p11265_p8, %p11259_p12 }
  0x53   : > { %11269 = shalt.err (!%p11266_p11)
}
  0x54   : > { %s11270_s10 = scalar_lea.vmem %s11702_s22, 192  ;;  %s11510_s21 = smov [#allocation10]  }
  0x55   : > { %p11271_p13 = scmp.ne.s32.totalorder %s11702_s22, %s11270_s10  ;;  %s11275_s14 = sshll.u32 %s11510_s21, 4  ;;  %s11276_s14 = int_to_ptr.vmem [resolvable:$false] %s11275_s14 }
  0x56   : > { %s11277_s15 = scalar_lea.vmem %s11276_s14, 384  ;;  %p11278_p7 = scmp.lt.s32.totalorder %s11702_s22, %s11276_s14 }
  0x57   : > { %p11273_p9 = pnand %p11271_p13, %p11719_p5  ;;  %p11279_p6 = scmp.lt.s32.totalorder %s11277_s15, %s11270_s10 }
  0x59   : > { %p11274_p10 = pneg %p11273_p9  ;;  %p11280_p0 = por %p11279_p6, %p11278_p7 }
  0x5b   : > { %p11281_p1 = pnand %p11280_p0, %p11274_p10 }
  0x5d   : > { %11284 = shalt.err (!%p11281_p1)
}
  0x5e   : > { %9439 = dma.hbm_to_vmem [thread:$0]  (!%p11695_p4), %s11707_s2, 192, %s11702_s22, %s11713_s25  }
  0x5f   : > { %p16734_p7 = scmp.eq.s32.totalorder %s11603_s12, 0  ;;  %p8368_p6 = scmp.ge.s32.totalorder %s11505_s11, 1 }
  0x60   : > { %p247_p12 = scmp.lt.s32.totalorder %s11505_s11, 4  ;;  %p17209_p2 = scmp.ne.s32.totalorder %s11497_s9, %s11493_s30 }
  0x61   : > { %p17211_p8 = scmp.ne.s32.totalorder %s11485_s28, %s11481_s27  ;;  %s11511_s2 = smov [#allocation4]  }
  0x62   : > { %p11751_p3 = por %p16734_p7, %p17209_p2  ;;  %p11764_p13 = pnand %p8368_p6, %p247_p12 }
  0x63   : > { %p11760_p11 = por %p17211_p8, %p16734_p7  ;;  %s262_s22 = sshll.u32 %s11511_s2, 4  ;;  %s11768_s22 = int_to_ptr.vmem [resolvable:$true] %s262_s22 }
  0x64   : > { %s17210_s19 = scalar_select %p11751_p3, 1, 0 }
  0x65   : > { %s17212_s20 = scalar_select %p11760_p11, 1, 0 }
  0x66   : > { %s17214_s23 = scalar_select %p11764_p13, 1, 0 }
  0x67   : > { %17213 = sst [smem:[#allocation27_spill]] %s17212_s20  ;;  %p9423_p9 = pneg %p11764_p13 }
  0x68   : > { %s11512_s30 = smov [#allocation13]   ;;  %s9397_s27 = smul.u32 24576, %s11505_s11 }
  0x69   : > { %s279_s10 = sshll.u32 %s11512_s30, 4  ;;  %p11777_p10 = pnand %p9423_p9, %p16734_p7  ;;  %s11772_s10 = int_to_ptr.vmem [resolvable:$true] %s279_s10 }
  0x6a   : > { %s11784_s2 = scalar_lea.hbm %s16717_s3, %s9397_s27  ;;  %s11285_s30 = scalar_lea.hbm %s16715_s1, 1536 }
  0x6b   : > { %p11286_p0 = scmp.ne.s32.totalorder %s16715_s1, %s11285_s30  ;;  %p11287_p1 = pneg %p11777_p10 }
  0x6c   : > { %p11292_p2 = scmp.lt.u32.totalorder %s11285_s30, %s16715_s1 }
  0x6d   : > { %p11288_p6 = pnand %p11287_p1, %p11286_p0 }
  0x6f   : > { %p11289_p12 = pneg %p11288_p6 }
  0x71   : > { %p11294_p8 = pnand %p11292_p2, %p11289_p12 }
  0x73   : > { %11297 = shalt.err (!%p11294_p8)
}
  0x74   : > { %s11298_s29 = scalar_lea.vmem %s11768_s22, 1536  ;;  %p11306_p3 = scmp.lt.s32.totalorder %s11768_s22, %s11768_s22 }
  0x75   : > { %p11299_p9 = scmp.ne.s32.totalorder %s11768_s22, %s11298_s29  ;;  %p11307_p0 = scmp.lt.s32.totalorder %s11298_s29, %s11298_s29 }
  0x77   : > { %p11301_p7 = pnand %p11299_p9, %p11287_p1  ;;  %p11308_p6 = por %p11307_p0, %p11306_p3 }
  0x79   : > { %p11302_p11 = pneg %p11301_p7 }
  0x7b   : > { %p11309_p13 = pnand %p11308_p6, %p11302_p11 }
  0x7d   : > { %11312 = shalt.err (!%p11309_p13)
}
  0x7e   : > { %s17216_s6 = smov 48   ;;  %s17217_s8 = smov 768  }
  0x7f   : > { %9426 = dma.hbm_to_vmem [thread:$0]  (!%p11777_p10), %s16715_s1, 1536, %s11768_s22, [#allocation5], %s17217_s8, %s17217_s8, %s17216_s6  }
  0x80   : > { %s11313_s15 = scalar_lea.hbm %s16721_s7, 16 }
  0x81   : > { %p11314_p7 = scmp.ne.s32.totalorder %s16721_s7, %s11313_s15  ;;  %p11320_p13 = scmp.lt.u32.totalorder %s11313_s15, %s16721_s7 }
  0x83   : > { %p11316_p3 = pnand %p11314_p7, %p11287_p1 }
  0x85   : > { %p11317_p11 = pneg %p11316_p3 }
  0x87   : > { %p11322_p12 = pnand %p11320_p13, %p11317_p11 }
  0x89   : > { %11325 = shalt.err (!%p11322_p12)
}
  0x8a   : > { %s11326_s22 = scalar_lea.vmem %s11772_s10, 16  ;;  %s11333_s4 = scalar_lea.vmem %s11772_s10, 32 }
  0x8b   : > { %p11327_p2 = scmp.ne.s32.totalorder %s11772_s10, %s11326_s22  ;;  %p11334_p0 = scmp.lt.s32.totalorder %s11772_s10, %s11772_s10 }
  0x8c   : > { %p11335_p6 = scmp.lt.s32.totalorder %s11333_s4, %s11326_s22 }
  0x8d   : > { %p11329_p8 = pnand %p11327_p2, %p11287_p1 }
  0x8e   : > { %p11336_p7 = por %p11335_p6, %p11334_p0 }
  0x8f   : > { %p11330_p9 = pneg %p11329_p8 }
  0x91   : > { %p11337_p3 = pnand %p11336_p7, %p11330_p9 }
  0x93   : > { %11340 = shalt.err (!%p11337_p3)
}
  0x94   : > { %9429 = dma.hbm_to_vmem [thread:$0]  (!%p11777_p10), %s16721_s7, 16, %s11772_s10, [#allocation14]  }
  0x95   : > { %s11341_s6 = scalar_lea.hbm %s11784_s2, 24576  ;;  %s11346_s27 = scalar_lea.hbm %s16717_s3, 73728 }
  0x96   : > { %p11342_p1 = scmp.ne.s32.totalorder %s11784_s2, %s11341_s6  ;;  %p11347_p12 = scmp.lt.u32.totalorder %s11784_s2, %s16717_s3 }
  0x97   : > { %p11348_p2 = scmp.lt.u32.totalorder %s11346_s27, %s11341_s6  ;;  %p11350_p9 = scmp.lt.u32.totalorder %s11341_s6, %s11784_s2 }
  0x98   : > { %p11344_p11 = pnand %p11342_p1, %p11719_p5 }
  0x99   : > { %p11349_p8 = por %p11348_p2, %p11347_p12 }
  0x9a   : > { %p11345_p13 = pneg %p11344_p11 }
  0x9b   : > { %p11351_p0 = por %p11350_p9, %p11349_p8 }
  0x9d   : > { %p11352_p6 = pnand %p11351_p0, %p11345_p13 }
  0x9f   : > { %11355 = shalt.err (!%p11352_p6)
}
  0xa0   : > { %s11356_s10 = scalar_lea.vmem %s11699_s18, 24576  ;;  %s11513_s14 = smov [#allocation9]  }
  0xa1   : > { %p11357_p10 = scmp.ne.s32.totalorder %s11699_s18, %s11356_s10  ;;  %s11361_s15 = sshll.u32 %s11513_s14, 4  ;;  %s11362_s15 = int_to_ptr.vmem [resolvable:$false] %s11361_s15 }
  0xa2   : > { %s11363_s29 = scalar_lea.vmem %s11362_s15, 49152  ;;  %p11364_p1 = scmp.lt.s32.totalorder %s11699_s18, %s11362_s15 }
  0xa3   : > { %p11359_p7 = pnand %p11357_p10, %p11719_p5  ;;  %p11365_p11 = scmp.lt.s32.totalorder %s11363_s29, %s11356_s10 }
  0xa5   : > { %p11360_p3 = pneg %p11359_p7  ;;  %p11366_p12 = por %p11365_p11, %p11364_p1 }
  0xa7   : > { %p11367_p2 = pnand %p11366_p12, %p11360_p3 }
  0xa9   : > { %11370 = shalt.err (!%p11367_p2)
}
  0xaa   : > { %s11514_s22 = smov 384   ;;  %s11515_s4 = smov 24  }
  0xab   : > { %9436 = dma.hbm_to_vmem [thread:$0]  (!%p11695_p4), %s11784_s2, 24576, %s11699_s18, %s11645_s16, %s11514_s22, %s11514_s22, %s11515_s4  }
  0xac   : > { %s9301_s0 = sshll.u32 %s11505_s11, 6  ;;  %s17218_s13 = sshll.u32 %s11687_s24, 2 }
  0xad   : > { %s11869_s8 = scalar_lea.hbm %s16719_s5, %s9301_s0  ;;  %s358_s27 = scalar_lea.vmem [#allocation12], %s17218_s13 }
  0xae   : > { %s366_s21 = sshll.u32 %s358_s27, 4  ;;  %s11371_s30 = scalar_lea.hbm %s11869_s8, 64  ;;  %s367_s21 = int_to_ptr.vmem [resolvable:$true] %s366_s21 }
  0xaf   : > { %p11372_p13 = scmp.ne.s32.totalorder %s11869_s8, %s11371_s30  ;;  %s11376_s18 = scalar_lea.hbm %s16719_s5, 192 }
  0xb0   : > { %p11377_p0 = scmp.lt.u32.totalorder %s11869_s8, %s16719_s5  ;;  %p11378_p6 = scmp.lt.u32.totalorder %s11376_s18, %s11371_s30 }
  0xb1   : > { %p11374_p8 = pnand %p11372_p13, %p11719_p5  ;;  %p11380_p7 = scmp.lt.u32.totalorder %s11371_s30, %s11869_s8 }
  0xb2   : > { %p11379_p10 = por %p11378_p6, %p11377_p0 }
  0xb3   : > { %p11375_p9 = pneg %p11374_p8 }
  0xb4   : > { %p11381_p3 = por %p11380_p7, %p11379_p10 }
  0xb6   : > { %p11382_p1 = pnand %p11381_p3, %p11375_p9 }
  0xb8   : > { %11385 = shalt.err (!%p11382_p1)
}
  0xb9   : > { %s11386_s24 = scalar_lea.vmem %s367_s21, 64  ;;  %s11516_s14 = smov [#allocation12]  }
  0xba   : > { %p11387_p11 = scmp.ne.s32.totalorder %s367_s21, %s11386_s24  ;;  %s11391_s15 = sshll.u32 %s11516_s14, 4  ;;  %s11392_s15 = int_to_ptr.vmem [resolvable:$false] %s11391_s15 }
  0xbb   : > { %s11393_s29 = scalar_lea.vmem %s11392_s15, 128  ;;  %p11394_p13 = scmp.lt.s32.totalorder %s367_s21, %s11392_s15 }
  0xbc   : > { %p11389_p12 = pnand %p11387_p11, %p11719_p5  ;;  %p11395_p8 = scmp.lt.s32.totalorder %s11393_s29, %s11386_s24 }
  0xbe   : > { %p11390_p2 = pneg %p11389_p12  ;;  %p11396_p4 = por %p11395_p8, %p11394_p13 }
  0xc0   : > { %p11397_p0 = pnand %p11396_p4, %p11390_p2 }
  0xc2   : > { %11400 = shalt.err (!%p11397_p0)
}
  0xc3   : > { %p17219_p6 = scmp.ne.s32.totalorder %s17205_s17, 0  ;;  %p17220_p9 = scmp.ne.s32.totalorder %s17214_s23, 0 }
  0xc5   : > { %9442 = dma.hbm_to_vmem [thread:$0]  (!%p17219_p6), %s11869_s8, 64, %s367_s21, %s11713_s25  }
  0xc6   : > { %375 = sbr.rel (%p17220_p9) target bundleno = 4380 (0x111c), region = 52 }
  0xcd   : > { %p17221_p5 = scmp.eq.s32.totalorder %s11603_s12, 0 }
  0xcf   : > { %11456 = dma.done.wait (%p17221_p5), [#allocation5], 1536   ;;  %p17222_p10 = pmov %p17221_p5 }
  0xd0   : > { %s381_s26 = sand.u32 1, %s11603_s12   ;;  %s383_s22 = sand.u32 1, %s11497_s9  }
  0xd1   : > { %11458 = vsyncadd (%p17222_p10), [#allocation5], 4294965760  ;;  %s9400_s4 = smul.u32 3072, %s383_s22  ;;  %s382_s0 = scalar_lea.sflag [#allocation8], %s381_s26 }
  0xd2   : > { %p17223_p4 = scmp.ne.s32.totalorder %s17210_s19, 0 }
  0xd3   : > { %s11899_s17 = scalar_lea.vmem [#allocation7], %s9400_s4 }
  0xd4   : > { %11460 = dma.done.wait (%p17223_p4), %s382_s0, 49152  }
  0xd5   : > { %11462 = vsyncadd (%p17223_p4), %s382_s0, 4294918144  ;;  %s17224_s25 = sld [smem:[#allocation27_spill]]  ;;  %s392_s23 = sand.u32 1, %s11485_s28  }
  0xd6   : > { %s9401_s20 = smul.u32 1536, %s392_s23 }
  0xd8   : > { %s11906_s6 = scalar_lea.vmem [#allocation9], %s9401_s20 }
  0xdb   : > { %p17225_p7 = scmp.ne.s32.totalorder %s17224_s25, 0 }
  0xdd   : > { %11464 = dma.done.wait (%p17225_p7), %s382_s0, 24576  }
  0xde   : > { %11466 = vsyncadd (%p17225_p7), %s382_s0, 4294942720  ;;  %s9402_s8 = smul.u32 12, %s392_s23  ;;  %s400_s13 = scalar_lea.sflag [#allocation11], %s381_s26 }
  0xe0   : > { %s403_s27 = scalar_lea.vmem [#allocation10], %s9402_s8 }
  0xe1   : > { %11468 = dma.done.wait (%p17225_p7), %s400_s13, 256  }
  0xe2   : > { %11470 = vsyncadd (%p17225_p7), %s400_s13, 4294967040  ;;  %s8381_s19 = sshll.u32 %s392_s23, 2  ;;  %p17226_p3 = pmov %p17221_p5 }
  0xe3   : > { %s11916_s21 = scalar_lea.vmem [#allocation12], %s8381_s19 }
  0xe4   : > { %11472 = dma.done.wait (%p17226_p3), [#allocation14], 16   ;;  %p17227_p1 = pmov %p17226_p3 }
  0xe5   : > { %v11922_v0 = vld [vmem:[%s403_s27] sm:$0xff]  ;;  %v11924_v1 = vld [vmem:[%s403_s27 + $0x8] sm:$0xf]  ;;  %p17228_p11 = scmp.ne.s32.totalorder %s11603_s12, 0 }
  0xe6   : > { %11474 = vsyncadd (%p17227_p1), [#allocation14], 4294967280  ;;  %v9517_v2 = vld [vmem:[#allocation4 + $0x4] ss:$48 sps:$4 sm:$0xff] (!%p17228_p11)   ;;  %v9519_v3 = vld [vmem:[#allocation4 + $0xc] ss:$48 sps:$4 sm:$0xff] (!%p17228_p11)   ;;  %v486_v18 = vlaneseq (!%p17228_p11) }
  0xe7   : > { %468 = sbr.rel (%p17228_p11) target bundleno = 475 (0x1db), region = 80  ;;  %v11517_v4 = vmov (!%p17228_p11), 0   ;;  %610 = vmatprep.subr.bf16.mxu0 (!%p17228_p11), %v9517_v2  ;;  %v9521_v5 = vld [vmem:[#allocation4] ss:$48 sps:$4 sm:$0xff] (!%p17228_p11)   ;;  %v9522_v6 = vld [vmem:[#allocation4 + $0x8] ss:$48 sps:$4 sm:$0xff] (!%p17228_p11)   ;;  %653 = vmatprep.subr.bf16.mxu1 (!%p17228_p11), %v9519_v3 }
  0xe8   : > { %642 = vmatprep.mubr.bf16.mxu0 (!%p17228_p11), %v11517_v4  ;;  %685 = vmatprep.mubr.bf16.mxu1 (!%p17228_p11), %v11517_v4  ;;  %s17229_s11 = sld [smem:[#allocation152_spill]] (!%p17228_p11)  ;;  %vm606_vm0 = vcmask (!%p17228_p11), 130048   ;;  %v9523_v10 = vld [vmem:[#allocation4 + $0x10] ss:$48 sps:$4 sm:$0xff] (!%p17228_p11)   ;;  %v9525_v11 = vld [vmem:[#allocation4 + $0x14] ss:$48 sps:$4 sm:$0xff] (!%p17228_p11)  }
  0xe9   : > { %611 = vmatpush1.bf16.msra.mxu0 (!%p17228_p11), %v9521_v5  ;;  %654 = vmatpush1.bf16.msra.mxu1 (!%p17228_p11), %v9522_v6  ;;  %v9526_v12 = vld [vmem:[#allocation4 + $0x18] ss:$48 sps:$4 sm:$0xff] (!%p17228_p11)   ;;  %v9528_v13 = vld [vmem:[#allocation4 + $0x1c] ss:$48 sps:$4 sm:$0xff] (!%p17228_p11)   ;;  %v9531_v14 = vld [vmem:[#allocation4 + $0x24] ss:$48 sps:$4 sm:$0xff] (!%p17228_p11)  }
  0xea   : > { %696 = vmatprep.subr.bf16.mxu0 (!%p17228_p11), %v9525_v11  ;;  %739 = vmatprep.subr.bf16.mxu1 (!%p17228_p11), %v9528_v13  ;;  %v9534_v15 = vld [vmem:[#allocation4 + $0x2c] ss:$48 sps:$4 sm:$0xff] (!%p17228_p11)   ;;  %v9529_v16 = vld [vmem:[#allocation4 + $0x20] ss:$48 sps:$4 sm:$0xff] (!%p17228_p11)   ;;  %v9532_v17 = vld [vmem:[#allocation4 + $0x28] ss:$48 sps:$4 sm:$0xff] (!%p17228_p11)  }
  0xeb   : > { %v11940_v19 = vshrl.u32 (!%p17228_p11), %v486_v18, 7 }
  0xed   : > { %v488_v20 = vsub.s32 (!%p17228_p11), 0, %v11940_v19  ;;  %v496_v21 = vsub.s32 (!%p17228_p11), 2, %v11940_v19  ;;  %v492_v22 = vsub.s32 (!%p17228_p11), 1, %v11940_v19  ;;  %v500_v23 = vsub.s32 (!%p17228_p11), 3, %v11940_v19 }
  0xee   : > { %v469_v7 = vld [vmem:[%s17229_s11] sm:$0xff]  ;;  %v470_v8 = vld [vmem:[%s17229_s11 + $0x8] sm:$0xff]  ;;  %v504_v34 = vsub.s32 4, %v11940_v19  ;;  %v512_v35 = vsub.s32 6, %v11940_v19  ;;  %v508_v40 = vsub.s32 5, %v11940_v19  ;;  %v516_v41 = vsub.s32 7, %v11940_v19 }
  0xef   : > { %v471_v9 = vpack.c.bf16 %v470_v8, %v469_v7  ;;  %v489_v24 = vrot.slane %v11922_v0, %v488_v20  ;;  %v497_v25 = vrot.slane %v11922_v0, %v496_v21  ;;  %v493_v26 = vrot.slane %v11922_v0, %v492_v22 }
  0xf0   : > { %v501_v27 = vrot.slane %v11922_v0, %v500_v23  ;;  %v505_v48 = vrot.slane %v11922_v0, %v504_v34  ;;  %v513_v49 = vrot.slane %v11922_v0, %v512_v35  ;;  %v509_v50 = vrot.slane %v11922_v0, %v508_v40 }
  0xf1   : > { %8396 = vmatmul.mubr.msk.bf16.vlgmr.msra.gmra.mrb[0].mxu0 %vm606_vm0, %v471_v9  ;;  %8397 = vmatmul.mubr.msk.bf16.vlgmr.msra.gmra.mrb[0].mxu1 %vm606_vm0, %v471_v9  ;;  %v517_v51 = vrot.slane %v11922_v0, %v516_v41  ;;  %v521_v6 = vrot.slane %v11924_v1, %v488_v20  ;;  %v529_v7 = vrot.slane %v11924_v1, %v496_v21 }
  0xf2   : > { %697 = vmatpush1.bf16.msra.mxu0 %v9523_v10  ;;  %740 = vmatpush1.bf16.msra.mxu1 %v9526_v12  ;;  %v525_v8 = vrot.slane %v11924_v1, %v492_v22 }
  0xf3   : > { %728 = vmatprep.mubr.bf16.mxu0 %v11517_v4  ;;  %771 = vmatprep.mubr.bf16.mxu1 %v11517_v4 }
  0xf4   : > { %782 = vmatprep.subr.bf16.mxu0 %v9531_v14  ;;  %825 = vmatprep.subr.bf16.mxu1 %v9534_v15 }
  0xf9   : > { %8398 = vmatmul.mubr.msk.bf16.vlgmr.msra.gmra.mrb[4].mxu0 %vm606_vm0, %v471_v9  ;;  %8399 = vmatmul.mubr.msk.bf16.vlgmr.msra.gmra.mrb[4].mxu1 %vm606_vm0, %v471_v9 }
  0xfa   : > { %783 = vmatpush1.bf16.msra.mxu0 %v9529_v16  ;;  %826 = vmatpush1.bf16.msra.mxu1 %v9532_v17 }
  0xfb   : > { %814 = vmatprep.mubr.bf16.mxu0 %v11517_v4  ;;  %857 = vmatprep.mubr.bf16.mxu1 %v11517_v4 }
 0x101   : > { %8400 = vmatmul.mubr.msk.bf16.vlgmr.msra.gmra.mrb[8].mxu0 %vm606_vm0, %v471_v9  ;;  %8401 = vmatmul.mubr.msk.bf16.vlgmr.msra.gmra.mrb[8].mxu1 %vm606_vm0, %v471_v9  ;;  %v533_v9 = vrot.slane %v11924_v1, %v500_v23 }
 0x1c4   : > { %v644_v28 = vpop.f32.mrb[0].mxu0  ;;  %v687_v29 = vpop.f32.mrb[0].mxu1 }
 0x1c5   : > { %v645_v30 = vadd.f32 %v644_v28, %v489_v24  ;;  %v688_v31 = vadd.f32 %v687_v29, %v497_v25  ;;  %v646_v32 = vpop.f32.mrb[1].mxu0  ;;  %v689_v33 = vpop.f32.mrb[1].mxu1 }
 0x1c6   : > { %v647_v36 = vadd.f32 %v646_v32, %v493_v26  ;;  %v690_v37 = vadd.f32 %v689_v33, %v501_v27  ;;  %v648_v38 = vpop.f32.mrb[2].mxu0  ;;  %v691_v39 = vpop.f32.mrb[2].mxu1 }
 0x1c7   : > { %868 = vst [vmem:[#allocation3] sm:$0xff] %v645_v30  ;;  %870 = vst [vmem:[#allocation3 + $0x10] sm:$0xff] %v688_v31  ;;  %v649_v42 = vadd.f32 %v648_v38, %v489_v24  ;;  %v692_v43 = vadd.f32 %v691_v39, %v497_v25  ;;  %v650_v44 = vpop.f32.mrb[3].mxu0  ;;  %v693_v45 = vpop.f32.mrb[3].mxu1 }
 0x1c8   : > { %869 = vst [vmem:[#allocation3 + $0x8] sm:$0xff] %v647_v36  ;;  %871 = vst [vmem:[#allocation3 + $0x18] sm:$0xff] %v690_v37  ;;  %v651_v46 = vadd.f32 %v650_v44, %v493_v26  ;;  %v694_v47 = vadd.f32 %v693_v45, %v501_v27 }
 0x1c9   : > { %880 = vst [vmem:[#allocation3 + $0x60] sm:$0xff] %v649_v42  ;;  %882 = vst [vmem:[#allocation3 + $0x70] sm:$0xff] %v692_v43 }
 0x1ca   : > { %881 = vst [vmem:[#allocation3 + $0x68] sm:$0xff] %v651_v46  ;;  %883 = vst [vmem:[#allocation3 + $0x78] sm:$0xff] %v694_v47 }
 0x1cc   : > { %v730_v52 = vpop.f32.mrb[4].mxu0  ;;  %v773_v53 = vpop.f32.mrb[4].mxu1 }
 0x1cd   : > { %v731_v54 = vadd.f32 %v730_v52, %v505_v48  ;;  %v774_v55 = vadd.f32 %v773_v53, %v513_v49  ;;  %v732_v56 = vpop.f32.mrb[5].mxu0  ;;  %v775_v57 = vpop.f32.mrb[5].mxu1 }
 0x1ce   : > { %v733_v58 = vadd.f32 %v732_v56, %v509_v50  ;;  %v776_v59 = vadd.f32 %v775_v57, %v517_v51  ;;  %v734_v60 = vpop.f32.mrb[6].mxu0  ;;  %v777_v61 = vpop.f32.mrb[6].mxu1 }
 0x1cf   : > { %872 = vst [vmem:[#allocation3 + $0x20] sm:$0xff] %v731_v54  ;;  %874 = vst [vmem:[#allocation3 + $0x30] sm:$0xff] %v774_v55  ;;  %v735_v62 = vadd.f32 %v734_v60, %v505_v48  ;;  %v778_v63 = vadd.f32 %v777_v61, %v513_v49  ;;  %v736_v2 = vpop.f32.mrb[7].mxu0  ;;  %v779_v3 = vpop.f32.mrb[7].mxu1 }
 0x1d0   : > { %873 = vst [vmem:[#allocation3 + $0x28] sm:$0xff] %v733_v58  ;;  %875 = vst [vmem:[#allocation3 + $0x38] sm:$0xff] %v776_v59  ;;  %v737_v4 = vadd.f32 %v736_v2, %v509_v50  ;;  %v780_v5 = vadd.f32 %v779_v3, %v517_v51 }
 0x1d1   : > { %884 = vst [vmem:[#allocation3 + $0x80] sm:$0xff] %v735_v62  ;;  %886 = vst [vmem:[#allocation3 + $0x90] sm:$0xff] %v778_v63 }
 0x1d2   : > { %885 = vst [vmem:[#allocation3 + $0x88] sm:$0xff] %v737_v4  ;;  %887 = vst [vmem:[#allocation3 + $0x98] sm:$0xff] %v780_v5 }
 0x1d4   : > { %v816_v10 = vpop.f32.mrb[8].mxu0  ;;  %v859_v11 = vpop.f32.mrb[8].mxu1 }
 0x1d5   : > { %v817_v12 = vadd.f32 %v816_v10, %v521_v6  ;;  %v860_v13 = vadd.f32 %v859_v11, %v529_v7  ;;  %v818_v14 = vpop.f32.mrb[9].mxu0  ;;  %v861_v15 = vpop.f32.mrb[9].mxu1 }
 0x1d6   : > { %v819_v16 = vadd.f32 %v818_v14, %v525_v8  ;;  %v862_v17 = vadd.f32 %v861_v15, %v533_v9  ;;  %v820_v18 = vpop.f32.mrb[10].mxu0  ;;  %v863_v20 = vpop.f32.mrb[10].mxu1 }
 0x1d7   : > { %876 = vst [vmem:[#allocation3 + $0x40] sm:$0xff] %v817_v12  ;;  %878 = vst [vmem:[#allocation3 + $0x50] sm:$0xff] %v860_v13  ;;  %v821_v21 = vadd.f32 %v820_v18, %v521_v6  ;;  %v864_v24 = vadd.f32 %v863_v20, %v529_v7  ;;  %v822_v25 = vpop.f32.mrb[11].mxu0  ;;  %v865_v22 = vpop.f32.mrb[11].mxu1 }
 0x1d8   : > { %877 = vst [vmem:[#allocation3 + $0x48] sm:$0xff] %v819_v16  ;;  %879 = vst [vmem:[#allocation3 + $0x58] sm:$0xff] %v862_v17  ;;  %v823_v19 = vadd.f32 %v822_v25, %v525_v8  ;;  %v866_v23 = vadd.f32 %v865_v22, %v533_v9 }
 0x1d9   : > { %888 = vst [vmem:[#allocation3 + $0xa0] sm:$0xff] %v821_v21  ;;  %890 = vst [vmem:[#allocation3 + $0xb0] sm:$0xff] %v864_v24 }
 0x1da   : > { %889 = vst [vmem:[#allocation3 + $0xa8] sm:$0xff] %v823_v19  ;;  %891 = vst [vmem:[#allocation3 + $0xb8] sm:$0xff] %v866_v23 }
 0x1db PF: > { %p8402_p12 = scmp.le.s32.totalorder %s11603_s12, 0 }
 0x1dc   : > { %v9535_v26 = vld [vmem:[%s11899_s17 + $0x4] ss:$48 sps:$4 sm:$0xff] (!%p8402_p12)   ;;  %v9537_v27 = vld [vmem:[%s11899_s17 + $0xc] ss:$48 sps:$4 sm:$0xff] (!%p8402_p12)   ;;  %v9539_v28 = vld [vmem:[%s11899_s17] ss:$48 sps:$4 sm:$0xff] (!%p8402_p12)  }
 0x1dd   : > { %895 = sbr.rel (%p8402_p12) target bundleno = 1079 (0x437), region = 84  ;;  %3266 = vmatprep.subr.bf16.mxu0 (!%p8402_p12), %v9535_v26  ;;  %v9540_v29 = vld [vmem:[%s11899_s17 + $0x8] ss:$48 sps:$4 sm:$0xff] (!%p8402_p12)   ;;  %3352 = vmatprep.subr.bf16.mxu1 (!%p8402_p12), %v9537_v27  ;;  %v9541_v30 = vld [vmem:[%s11899_s17 + $0x64] ss:$48 sps:$4 sm:$0xff] (!%p8402_p12)  }
 0x1de   : > { %3267 = vmatpush1.bf16.msra.mxu0 (!%p8402_p12), %v9539_v28  ;;  %3353 = vmatpush1.bf16.msra.mxu1 (!%p8402_p12), %v9540_v29  ;;  %v9543_v31 = vld [vmem:[%s11899_s17 + $0x6c] ss:$48 sps:$4 sm:$0xff] (!%p8402_p12)   ;;  %v9545_v32 = vld [vmem:[%s11899_s17 + $0x60] ss:$48 sps:$4 sm:$0xff] (!%p8402_p12)   ;;  %v9546_v33 = vld [vmem:[%s11899_s17 + $0x68] ss:$48 sps:$4 sm:$0xff] (!%p8402_p12)  }
 0x1df   : > { %3268 = vmatprep.subr.bf16.mxu0 (!%p8402_p12), %v9541_v30  ;;  %3354 = vmatprep.subr.bf16.mxu1 (!%p8402_p12), %v9543_v31  ;;  %v9547_v34 = vld [vmem:[%s11899_s17 + $0xc4] ss:$48 sps:$4 sm:$0xff] (!%p8402_p12)   ;;  %v9549_v35 = vld [vmem:[%s11899_s17 + $0xcc] ss:$48 sps:$4 sm:$0xff] (!%p8402_p12)   ;;  %v9551_v36 = vld [vmem:[%s11899_s17 + $0xc0] ss:$48 sps:$4 sm:$0xff] (!%p8402_p12)  }
 0x1e0   : > { %v9552_v37 = vld [vmem:[%s11899_s17 + $0xc8] ss:$48 sps:$4 sm:$0xff] (!%p8402_p12)   ;;  %v9553_v38 = vld [vmem:[%s11899_s17 + $0x124] ss:$48 sps:$4 sm:$0xff] (!%p8402_p12)   ;;  %v9555_v39 = vld [vmem:[%s11899_s17 + $0x12c] ss:$48 sps:$4 sm:$0xff] (!%p8402_p12)  }
 0x1e1   : > { %v9557_v40 = vld [vmem:[%s11899_s17 + $0x120] ss:$48 sps:$4 sm:$0xff] (!%p8402_p12)   ;;  %v9558_v41 = vld [vmem:[%s11899_s17 + $0x128] ss:$48 sps:$4 sm:$0xff] (!%p8402_p12)   ;;  %v9559_v42 = vld [vmem:[%s11899_s17 + $0x184] ss:$48 sps:$4 sm:$0xff] (!%p8402_p12)  }
 0x1e2   : > { %3269 = vmatpush1.bf16.msra.mxu0 (!%p8402_p12), %v9545_v32  ;;  %3355 = vmatpush1.bf16.msra.mxu1 (!%p8402_p12), %v9546_v33  ;;  %v9561_v43 = vld [vmem:[%s11899_s17 + $0x18c] ss:$48 sps:$4 sm:$0xff] (!%p8402_p12)   ;;  %v9563_v44 = vld [vmem:[%s11899_s17 + $0x180] ss:$48 sps:$4 sm:$0xff] (!%p8402_p12)   ;;  %v9564_v45 = vld [vmem:[%s11899_s17 + $0x188] ss:$48 sps:$4 sm:$0xff] (!%p8402_p12)  }
 0x1e3   : > { %3270 = vmatprep.subr.bf16.mxu0 (!%p8402_p12), %v9547_v34  ;;  %3356 = vmatprep.subr.bf16.mxu1 (!%p8402_p12), %v9549_v35  ;;  %v9565_v46 = vld [vmem:[%s11899_s17 + $0x1e4] ss:$48 sps:$4 sm:$0xff] (!%p8402_p12)   ;;  %v9567_v47 = vld [vmem:[%s11899_s17 + $0x1ec] ss:$48 sps:$4 sm:$0xff] (!%p8402_p12)   ;;  %v9569_v48 = vld [vmem:[%s11899_s17 + $0x1e0] ss:$48 sps:$4 sm:$0xff] (!%p8402_p12)  }
 0x1e4   : > { %v9570_v49 = vld [vmem:[%s11899_s17 + $0x1e8] ss:$48 sps:$4 sm:$0xff]   ;;  %v9571_v50 = vld [vmem:[%s11899_s17 + $0x244] ss:$48 sps:$4 sm:$0xff]   ;;  %v9573_v51 = vld [vmem:[%s11899_s17 + $0x24c] ss:$48 sps:$4 sm:$0xff]  }
 0x1e5   : > { %v9575_v52 = vld [vmem:[%s11899_s17 + $0x240] ss:$48 sps:$4 sm:$0xff]   ;;  %v9576_v53 = vld [vmem:[%s11899_s17 + $0x248] ss:$48 sps:$4 sm:$0xff]   ;;  %v9577_v54 = vld [vmem:[%s11899_s17 + $0x2a4] ss:$48 sps:$4 sm:$0xff]  }
 0x1e6   : > { %3271 = vmatpush1.bf16.msra.mxu0 %v9551_v36  ;;  %3357 = vmatpush1.bf16.msra.mxu1 %v9552_v37  ;;  %v9579_v55 = vld [vmem:[%s11899_s17 + $0x2ac] ss:$48 sps:$4 sm:$0xff]   ;;  %v9581_v56 = vld [vmem:[%s11899_s17 + $0x2a0] ss:$48 sps:$4 sm:$0xff]   ;;  %v9582_v57 = vld [vmem:[%s11899_s17 + $0x2a8] ss:$48 sps:$4 sm:$0xff]  }
 0x1e7   : > { %3272 = vmatprep.subr.bf16.mxu0 %v9553_v38  ;;  %3358 = vmatprep.subr.bf16.mxu1 %v9555_v39  ;;  %v9583_v58 = vld [vmem:[%s11899_s17 + $0x304] ss:$48 sps:$4 sm:$0xff]   ;;  %v9585_v59 = vld [vmem:[%s11899_s17 + $0x30c] ss:$48 sps:$4 sm:$0xff]   ;;  %v9587_v60 = vld [vmem:[%s11899_s17 + $0x300] ss:$48 sps:$4 sm:$0xff]  }
 0x1e8   : > { %v9588_v61 = vld [vmem:[%s11899_s17 + $0x308] ss:$48 sps:$4 sm:$0xff]   ;;  %v9589_v62 = vld [vmem:[%s11899_s17 + $0x364] ss:$48 sps:$4 sm:$0xff]   ;;  %v9591_v63 = vld [vmem:[%s11899_s17 + $0x36c] ss:$48 sps:$4 sm:$0xff]  }
 0x1e9   : > { %v9593_v2 = vld [vmem:[%s11899_s17 + $0x360] ss:$48 sps:$4 sm:$0xff]   ;;  %v9594_v3 = vld [vmem:[%s11899_s17 + $0x368] ss:$48 sps:$4 sm:$0xff]   ;;  %v9595_v4 = vld [vmem:[%s11899_s17 + $0x3c4] ss:$48 sps:$4 sm:$0xff]  }
 0x1ea   : > { %3273 = vmatpush1.bf16.msra.mxu0 %v9557_v40  ;;  %3359 = vmatpush1.bf16.msra.mxu1 %v9558_v41  ;;  %v9597_v5 = vld [vmem:[%s11899_s17 + $0x3cc] ss:$48 sps:$4 sm:$0xff]   ;;  %v9599_v6 = vld [vmem:[%s11899_s17 + $0x3c0] ss:$48 sps:$4 sm:$0xff]   ;;  %v9600_v7 = vld [vmem:[%s11899_s17 + $0x3c8] ss:$48 sps:$4 sm:$0xff]  }
 0x1eb   : > { %3274 = vmatprep.subr.bf16.mxu0 %v9559_v42  ;;  %3360 = vmatprep.subr.bf16.mxu1 %v9561_v43  ;;  %v9601_v8 = vld [vmem:[%s11899_s17 + $0x424] ss:$48 sps:$4 sm:$0xff]   ;;  %v9603_v9 = vld [vmem:[%s11899_s17 + $0x42c] ss:$48 sps:$4 sm:$0xff]   ;;  %v9605_v11 = vld [vmem:[%s11899_s17 + $0x420] ss:$48 sps:$4 sm:$0xff]  }
 0x1ec   : > { %v12017_v10 = vld [vmem:[#allocation2 + $0x8] sm:$0xff]  ;;  %v9607_v13 = vld [vmem:[%s11899_s17 + $0x484] ss:$48 sps:$4 sm:$0xff]   ;;  %v9611_v15 = vld [vmem:[%s11899_s17 + $0x480] ss:$48 sps:$4 sm:$0xff]  }
 0x1ed   : > { %3298 = vmatprep.mubr.bf16.mxu0 %v12017_v10  ;;  %3384 = vmatprep.mubr.bf16.mxu1 %v12017_v10  ;;  %v9606_v12 = vld [vmem:[%s11899_s17 + $0x428] ss:$48 sps:$4 sm:$0xff]   ;;  %v9609_v14 = vld [vmem:[%s11899_s17 + $0x48c] ss:$48 sps:$4 sm:$0xff]   ;;  %v9613_v17 = vld [vmem:[%s11899_s17 + $0x4e4] ss:$48 sps:$4 sm:$0xff]  }
 0x1ee   : > { %3275 = vmatpush1.bf16.msra.mxu0 %v9563_v44  ;;  %3361 = vmatpush1.bf16.msra.mxu1 %v9564_v45  ;;  %v9612_v16 = vld [vmem:[%s11899_s17 + $0x488] ss:$48 sps:$4 sm:$0xff]   ;;  %v9615_v18 = vld [vmem:[%s11899_s17 + $0x4ec] ss:$48 sps:$4 sm:$0xff]   ;;  %v9617_v20 = vld [vmem:[%s11899_s17 + $0x4e0] ss:$48 sps:$4 sm:$0xff]  }
 0x1ef   : > { %3276 = vmatprep.subr.bf16.mxu0 %v9565_v46  ;;  %3362 = vmatprep.subr.bf16.mxu1 %v9567_v47  ;;  %v9618_v21 = vld [vmem:[%s11899_s17 + $0x4e8] ss:$48 sps:$4 sm:$0xff]   ;;  %v9619_v24 = vld [vmem:[%s11899_s17 + $0x544] ss:$48 sps:$4 sm:$0xff]   ;;  %v9621_v25 = vld [vmem:[%s11899_s17 + $0x54c] ss:$48 sps:$4 sm:$0xff]  }
 0x1f0   : > { %v9623_v22 = vld [vmem:[%s11899_s17 + $0x540] ss:$48 sps:$4 sm:$0xff]   ;;  %v9624_v19 = vld [vmem:[%s11899_s17 + $0x548] ss:$48 sps:$4 sm:$0xff]   ;;  %v9625_v23 = vld [vmem:[%s11899_s17 + $0x5a4] ss:$48 sps:$4 sm:$0xff]  }
 0x1f1   : > { %v9627_v26 = vld [vmem:[%s11899_s17 + $0x5ac] ss:$48 sps:$4 sm:$0xff]   ;;  %v9629_v27 = vld [vmem:[%s11899_s17 + $0x5a0] ss:$48 sps:$4 sm:$0xff]   ;;  %v9630_v28 = vld [vmem:[%s11899_s17 + $0x5a8] ss:$48 sps:$4 sm:$0xff]  }
 0x1f2   : > { %3277 = vmatpush1.bf16.msra.mxu0 %v9569_v48  ;;  %3363 = vmatpush1.bf16.msra.mxu1 %v9570_v49  ;;  %v9633_v29 = vld [vmem:[%s11899_s17 + $0x604] ss:$48 sps:$4 sm:$0xff]   ;;  %v9636_v30 = vld [vmem:[%s11899_s17 + $0x60c] ss:$48 sps:$4 sm:$0xff]   ;;  %v9631_v31 = vld [vmem:[%s11899_s17 + $0x600] ss:$48 sps:$4 sm:$0xff]  }
 0x1f3   : > { %3278 = vmatprep.subr.bf16.mxu0 %v9571_v50  ;;  %3364 = vmatprep.subr.bf16.mxu1 %v9573_v51  ;;  %v9634_v32 = vld [vmem:[%s11899_s17 + $0x608] ss:$48 sps:$4 sm:$0xff]   ;;  %v12043_v33 = vld [vmem:[#allocation2] sm:$0xff]  ;;  %v9642_v35 = vld [vmem:[%s11899_s17 + $0x66c] ss:$48 sps:$4 sm:$0xff]  }
 0x1f4   : > { %v9639_v34 = vld [vmem:[%s11899_s17 + $0x664] ss:$48 sps:$4 sm:$0xff]   ;;  %v9637_v36 = vld [vmem:[%s11899_s17 + $0x660] ss:$48 sps:$4 sm:$0xff]   ;;  %v9640_v37 = vld [vmem:[%s11899_s17 + $0x668] ss:$48 sps:$4 sm:$0xff]  }
 0x1f5   : > { %v9645_v38 = vld [vmem:[%s11899_s17 + $0x6c4] ss:$48 sps:$4 sm:$0xff]   ;;  %v9648_v39 = vld [vmem:[%s11899_s17 + $0x6cc] ss:$48 sps:$4 sm:$0xff]   ;;  %v9643_v40 = vld [vmem:[%s11899_s17 + $0x6c0] ss:$48 sps:$4 sm:$0xff]  }
 0x1f6   : > { %3279 = vmatpush1.bf16.msra.mxu0 %v9575_v52  ;;  %3365 = vmatpush1.bf16.msra.mxu1 %v9576_v53  ;;  %v9646_v41 = vld [vmem:[%s11899_s17 + $0x6c8] ss:$48 sps:$4 sm:$0xff]   ;;  %v9651_v42 = vld [vmem:[%s11899_s17 + $0x724] ss:$48 sps:$4 sm:$0xff]   ;;  %v9654_v43 = vld [vmem:[%s11899_s17 + $0x72c] ss:$48 sps:$4 sm:$0xff]  }
 0x1f7   : > { %3280 = vmatprep.subr.bf16.mxu0 %v9577_v54  ;;  %3366 = vmatprep.subr.bf16.mxu1 %v9579_v55  ;;  %v9649_v44 = vld [vmem:[%s11899_s17 + $0x720] ss:$48 sps:$4 sm:$0xff]   ;;  %v9652_v45 = vld [vmem:[%s11899_s17 + $0x728] ss:$48 sps:$4 sm:$0xff]   ;;  %v9657_v46 = vld [vmem:[%s11899_s17 + $0x784] ss:$48 sps:$4 sm:$0xff]  }
 0x1f8   : > { %v9660_v47 = vld [vmem:[%s11899_s17 + $0x78c] ss:$48 sps:$4 sm:$0xff]   ;;  %v9655_v48 = vld [vmem:[%s11899_s17 + $0x780] ss:$48 sps:$4 sm:$0xff]   ;;  %v9658_v49 = vld [vmem:[%s11899_s17 + $0x788] ss:$48 sps:$4 sm:$0xff]  }
 0x1f9   : > { %v9663_v50 = vld [vmem:[%s11899_s17 + $0x7e4] ss:$48 sps:$4 sm:$0xff]   ;;  %v9666_v51 = vld [vmem:[%s11899_s17 + $0x7ec] ss:$48 sps:$4 sm:$0xff]   ;;  %v9661_v52 = vld [vmem:[%s11899_s17 + $0x7e0] ss:$48 sps:$4 sm:$0xff]  }
 0x1fa   : > { %3281 = vmatpush1.bf16.msra.mxu0 %v9581_v56  ;;  %3367 = vmatpush1.bf16.msra.mxu1 %v9582_v57  ;;  %v9664_v53 = vld [vmem:[%s11899_s17 + $0x7e8] ss:$48 sps:$4 sm:$0xff]   ;;  %v9669_v54 = vld [vmem:[%s11899_s17 + $0x844] ss:$48 sps:$4 sm:$0xff]   ;;  %v9672_v55 = vld [vmem:[%s11899_s17 + $0x84c] ss:$48 sps:$4 sm:$0xff]  }
 0x1fb   : > { %3282 = vmatprep.subr.bf16.mxu0 %v9583_v58  ;;  %3368 = vmatprep.subr.bf16.mxu1 %v9585_v59  ;;  %v12069_v56 = vld [vmem:[#allocation2 + $0x18] sm:$0xff]  ;;  %v9667_v57 = vld [vmem:[%s11899_s17 + $0x840] ss:$48 sps:$4 sm:$0xff]   ;;  %v9675_v59 = vld [vmem:[%s11899_s17 + $0x8a4] ss:$48 sps:$4 sm:$0xff]  }
 0x1fc   : > { %v9670_v58 = vld [vmem:[%s11899_s17 + $0x848] ss:$48 sps:$4 sm:$0xff]  }
 0x1fe   : > { %3283 = vmatpush1.bf16.msra.mxu0 %v9587_v60  ;;  %3369 = vmatpush1.bf16.msra.mxu1 %v9588_v61  ;;  %v9678_v60 = vld [vmem:[%s11899_s17 + $0x8ac] ss:$48 sps:$4 sm:$0xff]   ;;  %v9673_v61 = vld [vmem:[%s11899_s17 + $0x8a0] ss:$48 sps:$4 sm:$0xff]  }
 0x1ff   : > { %3284 = vmatprep.subr.bf16.mxu0 %v9589_v62  ;;  %3370 = vmatprep.subr.bf16.mxu1 %v9591_v63  ;;  %v9676_v62 = vld [vmem:[%s11899_s17 + $0x8a8] ss:$48 sps:$4 sm:$0xff]   ;;  %v9681_v63 = vld [vmem:[%s11899_s17 + $0x904] ss:$48 sps:$4 sm:$0xff]  }
 0x202   : > { %3285 = vmatpush1.bf16.msra.mxu0 %v9593_v2  ;;  %3371 = vmatpush1.bf16.msra.mxu1 %v9594_v3  ;;  %v9684_v2 = vld [vmem:[%s11899_s17 + $0x90c] ss:$48 sps:$4 sm:$0xff]   ;;  %v9679_v3 = vld [vmem:[%s11899_s17 + $0x900] ss:$48 sps:$4 sm:$0xff]  }
 0x203   : > { %3286 = vmatprep.subr.bf16.mxu0 %v9595_v4  ;;  %3372 = vmatprep.subr.bf16.mxu1 %v9597_v5  ;;  %v9682_v4 = vld [vmem:[%s11899_s17 + $0x908] ss:$48 sps:$4 sm:$0xff]   ;;  %v9687_v5 = vld [vmem:[%s11899_s17 + $0x964] ss:$48 sps:$4 sm:$0xff]  }
 0x206   : > { %3287 = vmatpush1.bf16.msra.mxu0 %v9599_v6  ;;  %3373 = vmatpush1.bf16.msra.mxu1 %v9600_v7  ;;  %v9690_v6 = vld [vmem:[%s11899_s17 + $0x96c] ss:$48 sps:$4 sm:$0xff]   ;;  %v9685_v7 = vld [vmem:[%s11899_s17 + $0x960] ss:$48 sps:$4 sm:$0xff]  }
 0x207   : > { %3288 = vmatprep.subr.bf16.mxu0 %v9601_v8  ;;  %3374 = vmatprep.subr.bf16.mxu1 %v9603_v9  ;;  %v9688_v8 = vld [vmem:[%s11899_s17 + $0x968] ss:$48 sps:$4 sm:$0xff]   ;;  %v9693_v9 = vld [vmem:[%s11899_s17 + $0x9c4] ss:$48 sps:$4 sm:$0xff]  }
 0x20a   : > { %3289 = vmatpush1.bf16.msra.mxu0 %v9605_v11  ;;  %3375 = vmatpush1.bf16.msra.mxu1 %v9606_v12  ;;  %v9696_v11 = vld [vmem:[%s11899_s17 + $0x9cc] ss:$48 sps:$4 sm:$0xff]   ;;  %v9691_v12 = vld [vmem:[%s11899_s17 + $0x9c0] ss:$48 sps:$4 sm:$0xff]  }
 0x20b   : > { %3290 = vmatprep.subr.bf16.mxu0 %v9607_v13  ;;  %3376 = vmatprep.subr.bf16.mxu1 %v9609_v14  ;;  %v9694_v13 = vld [vmem:[%s11899_s17 + $0x9c8] ss:$48 sps:$4 sm:$0xff]   ;;  %v9699_v14 = vld [vmem:[%s11899_s17 + $0xa24] ss:$48 sps:$4 sm:$0xff]  }
 0x20e   : > { %3291 = vmatpush1.bf16.msra.mxu0 %v9611_v15  ;;  %3377 = vmatpush1.bf16.msra.mxu1 %v9612_v16  ;;  %v9702_v15 = vld [vmem:[%s11899_s17 + $0xa2c] ss:$48 sps:$4 sm:$0xff]   ;;  %v9697_v16 = vld [vmem:[%s11899_s17 + $0xa20] ss:$48 sps:$4 sm:$0xff]  }
 0x20f   : > { %3292 = vmatprep.subr.bf16.mxu0 %v9613_v17  ;;  %3378 = vmatprep.subr.bf16.mxu1 %v9615_v18  ;;  %v9700_v17 = vld [vmem:[%s11899_s17 + $0xa28] ss:$48 sps:$4 sm:$0xff]   ;;  %v9705_v18 = vld [vmem:[%s11899_s17 + $0xa84] ss:$48 sps:$4 sm:$0xff]  }
 0x212   : > { %3293 = vmatpush1.bf16.msra.mxu0 %v9617_v20  ;;  %3379 = vmatpush1.bf16.msra.mxu1 %v9618_v21  ;;  %v9708_v20 = vld [vmem:[%s11899_s17 + $0xa8c] ss:$48 sps:$4 sm:$0xff]   ;;  %v9703_v21 = vld [vmem:[%s11899_s17 + $0xa80] ss:$48 sps:$4 sm:$0xff]  }
 0x213   : > { %3294 = vmatprep.subr.bf16.mxu0 %v9619_v24  ;;  %3380 = vmatprep.subr.bf16.mxu1 %v9621_v25  ;;  %v9706_v24 = vld [vmem:[%s11899_s17 + $0xa88] ss:$48 sps:$4 sm:$0xff]   ;;  %v9711_v25 = vld [vmem:[%s11899_s17 + $0xae4] ss:$48 sps:$4 sm:$0xff]  }
 0x216   : > { %3295 = vmatpush1.bf16.msra.mxu0 %v9623_v22  ;;  %3381 = vmatpush1.bf16.msra.mxu1 %v9624_v19  ;;  %v9714_v22 = vld [vmem:[%s11899_s17 + $0xaec] ss:$48 sps:$4 sm:$0xff]   ;;  %v9709_v19 = vld [vmem:[%s11899_s17 + $0xae0] ss:$48 sps:$4 sm:$0xff]  }
 0x217   : > { %3296 = vmatprep.subr.bf16.mxu0 %v9625_v23  ;;  %3382 = vmatprep.subr.bf16.mxu1 %v9627_v26  ;;  %v9712_v23 = vld [vmem:[%s11899_s17 + $0xae8] ss:$48 sps:$4 sm:$0xff]   ;;  %v9717_v26 = vld [vmem:[%s11899_s17 + $0xb44] ss:$48 sps:$4 sm:$0xff]  }
 0x21a   : > { %3297 = vmatpush1.bf16.msra.mxu0 %v9629_v27  ;;  %3383 = vmatpush1.bf16.msra.mxu1 %v9630_v28  ;;  %v9720_v27 = vld [vmem:[%s11899_s17 + $0xb4c] ss:$48 sps:$4 sm:$0xff]   ;;  %v9715_v28 = vld [vmem:[%s11899_s17 + $0xb40] ss:$48 sps:$4 sm:$0xff]  }
 0x21b   : > { %3309 = vmatprep.subr.bf16.mxu0 %v9633_v29  ;;  %3395 = vmatprep.subr.bf16.mxu1 %v9636_v30  ;;  %v9718_v29 = vld [vmem:[%s11899_s17 + $0xb48] ss:$48 sps:$4 sm:$0xff]   ;;  %v9723_v30 = vld [vmem:[%s11899_s17 + $0xba4] ss:$48 sps:$4 sm:$0xff]  }
 0x21d   : > { %3299 = vmatmul.mubr.bf16.vlgmr.msra.gmra.mrb[0].mxu0 %v12043_v33  ;;  %3385 = vmatmul.mubr.bf16.vlgmr.msra.gmra.mrb[0].mxu1 %v12043_v33 }
 0x21e   : > { %3310 = vmatpush1.bf16.msra.mxu0 %v9631_v31  ;;  %3396 = vmatpush1.bf16.msra.mxu1 %v9634_v32  ;;  %v9726_v31 = vld [vmem:[%s11899_s17 + $0xbac] ss:$48 sps:$4 sm:$0xff]   ;;  %v9721_v32 = vld [vmem:[%s11899_s17 + $0xba0] ss:$48 sps:$4 sm:$0xff]  }
 0x21f   : > { %3311 = vmatprep.subr.bf16.mxu0 %v9639_v34  ;;  %3397 = vmatprep.subr.bf16.mxu1 %v9642_v35  ;;  %v9724_v34 = vld [vmem:[%s11899_s17 + $0xba8] ss:$48 sps:$4 sm:$0xff]   ;;  %v9729_v35 = vld [vmem:[%s11899_s17 + $0x14] ss:$48 sps:$4 sm:$0xff]  }
 0x220   : > { %3341 = vmatprep.mubr.bf16.mxu0 %v12069_v56  ;;  %3427 = vmatprep.mubr.bf16.mxu1 %v12069_v56 }
 0x222   : > { %3312 = vmatpush1.bf16.msra.mxu0 %v9637_v36  ;;  %3398 = vmatpush1.bf16.msra.mxu1 %v9640_v37  ;;  %v9732_v36 = vld [vmem:[%s11899_s17 + $0x1c] ss:$48 sps:$4 sm:$0xff]   ;;  %v12113_v37 = vld [vmem:[#allocation2 + $0x10] sm:$0xff] }
 0x223   : > { %3313 = vmatprep.subr.bf16.mxu0 %v9645_v38  ;;  %3399 = vmatprep.subr.bf16.mxu1 %v9648_v39  ;;  %v9727_v38 = vld [vmem:[%s11899_s17 + $0x10] ss:$48 sps:$4 sm:$0xff]   ;;  %v9730_v39 = vld [vmem:[%s11899_s17 + $0x18] ss:$48 sps:$4 sm:$0xff]  }
 0x226   : > { %3314 = vmatpush1.bf16.msra.mxu0 %v9643_v40  ;;  %3400 = vmatpush1.bf16.msra.mxu1 %v9646_v41  ;;  %v9735_v40 = vld [vmem:[%s11899_s17 + $0x74] ss:$48 sps:$4 sm:$0xff]   ;;  %v9738_v41 = vld [vmem:[%s11899_s17 + $0x7c] ss:$48 sps:$4 sm:$0xff]  }
 0x227   : > { %3315 = vmatprep.subr.bf16.mxu0 %v9651_v42  ;;  %3401 = vmatprep.subr.bf16.mxu1 %v9654_v43  ;;  %v9733_v42 = vld [vmem:[%s11899_s17 + $0x70] ss:$48 sps:$4 sm:$0xff]   ;;  %v9736_v43 = vld [vmem:[%s11899_s17 + $0x78] ss:$48 sps:$4 sm:$0xff]  }
 0x22a   : > { %3316 = vmatpush1.bf16.msra.mxu0 %v9649_v44  ;;  %3402 = vmatpush1.bf16.msra.mxu1 %v9652_v45  ;;  %v9741_v44 = vld [vmem:[%s11899_s17 + $0xd4] ss:$48 sps:$4 sm:$0xff]   ;;  %v9744_v45 = vld [vmem:[%s11899_s17 + $0xdc] ss:$48 sps:$4 sm:$0xff]  }
 0x22b   : > { %3317 = vmatprep.subr.bf16.mxu0 %v9657_v46  ;;  %3403 = vmatprep.subr.bf16.mxu1 %v9660_v47  ;;  %v9739_v46 = vld [vmem:[%s11899_s17 + $0xd0] ss:$48 sps:$4 sm:$0xff]   ;;  %v9742_v47 = vld [vmem:[%s11899_s17 + $0xd8] ss:$48 sps:$4 sm:$0xff]  }
 0x22e   : > { %3318 = vmatpush1.bf16.msra.mxu0 %v9655_v48  ;;  %3404 = vmatpush1.bf16.msra.mxu1 %v9658_v49  ;;  %v9747_v48 = vld [vmem:[%s11899_s17 + $0x134] ss:$48 sps:$4 sm:$0xff]   ;;  %v9750_v49 = vld [vmem:[%s11899_s17 + $0x13c] ss:$48 sps:$4 sm:$0xff]  }
 0x22f   : > { %3319 = vmatprep.subr.bf16.mxu0 %v9663_v50  ;;  %3405 = vmatprep.subr.bf16.mxu1 %v9666_v51  ;;  %v9745_v50 = vld [vmem:[%s11899_s17 + $0x130] ss:$48 sps:$4 sm:$0xff]   ;;  %v9748_v51 = vld [vmem:[%s11899_s17 + $0x138] ss:$48 sps:$4 sm:$0xff]  }
 0x232   : > { %3320 = vmatpush1.bf16.msra.mxu0 %v9661_v52  ;;  %3406 = vmatpush1.bf16.msra.mxu1 %v9664_v53  ;;  %v9756_v52 = vld [vmem:[%s11899_s17 + $0x19c] ss:$48 sps:$4 sm:$0xff]   ;;  %v9751_v53 = vld [vmem:[%s11899_s17 + $0x190] ss:$48 sps:$4 sm:$0xff]  }
 0x233   : > { %3321 = vmatprep.subr.bf16.mxu0 %v9669_v54  ;;  %3407 = vmatprep.subr.bf16.mxu1 %v9672_v55  ;;  %v9754_v54 = vld [vmem:[%s11899_s17 + $0x198] ss:$48 sps:$4 sm:$0xff]   ;;  %v9759_v55 = vld [vmem:[%s11899_s17 + $0x1f4] ss:$48 sps:$4 sm:$0xff]  }
 0x236   : > { %3322 = vmatpush1.bf16.msra.mxu0 %v9667_v57  ;;  %3408 = vmatpush1.bf16.msra.mxu1 %v9670_v58  ;;  %v9762_v57 = vld [vmem:[%s11899_s17 + $0x1fc] ss:$48 sps:$4 sm:$0xff]   ;;  %v9757_v58 = vld [vmem:[%s11899_s17 + $0x1f0] ss:$48 sps:$4 sm:$0xff]  }
 0x237   : > { %3323 = vmatprep.subr.bf16.mxu0 %v9675_v59  ;;  %3409 = vmatprep.subr.bf16.mxu1 %v9678_v60  ;;  %v9760_v59 = vld [vmem:[%s11899_s17 + $0x1f8] ss:$48 sps:$4 sm:$0xff]   ;;  %v9765_v60 = vld [vmem:[%s11899_s17 + $0x254] ss:$48 sps:$4 sm:$0xff]  }
 0x23a   : > { %3324 = vmatpush1.bf16.msra.mxu0 %v9673_v61  ;;  %3410 = vmatpush1.bf16.msra.mxu1 %v9676_v62  ;;  %v9768_v61 = vld [vmem:[%s11899_s17 + $0x25c] ss:$48 sps:$4 sm:$0xff]   ;;  %v9763_v62 = vld [vmem:[%s11899_s17 + $0x250] ss:$48 sps:$4 sm:$0xff]  }
 0x23b   : > { %3325 = vmatprep.subr.bf16.mxu0 %v9681_v63  ;;  %3411 = vmatprep.subr.bf16.mxu1 %v9684_v2  ;;  %v9766_v63 = vld [vmem:[%s11899_s17 + $0x258] ss:$48 sps:$4 sm:$0xff]   ;;  %v9771_v2 = vld [vmem:[%s11899_s17 + $0x2b4] ss:$48 sps:$4 sm:$0xff]  }
 0x23e   : > { %3326 = vmatpush1.bf16.msra.mxu0 %v9679_v3  ;;  %3412 = vmatpush1.bf16.msra.mxu1 %v9682_v4  ;;  %v9774_v3 = vld [vmem:[%s11899_s17 + $0x2bc] ss:$48 sps:$4 sm:$0xff]   ;;  %v9769_v4 = vld [vmem:[%s11899_s17 + $0x2b0] ss:$48 sps:$4 sm:$0xff]  }
 0x23f   : > { %3327 = vmatprep.subr.bf16.mxu0 %v9687_v5  ;;  %3413 = vmatprep.subr.bf16.mxu1 %v9690_v6  ;;  %v9772_v5 = vld [vmem:[%s11899_s17 + $0x2b8] ss:$48 sps:$4 sm:$0xff]   ;;  %v9777_v6 = vld [vmem:[%s11899_s17 + $0x314] ss:$48 sps:$4 sm:$0xff]  }
 0x242   : > { %3328 = vmatpush1.bf16.msra.mxu0 %v9685_v7  ;;  %3414 = vmatpush1.bf16.msra.mxu1 %v9688_v8  ;;  %v9780_v7 = vld [vmem:[%s11899_s17 + $0x31c] ss:$48 sps:$4 sm:$0xff]   ;;  %v9775_v8 = vld [vmem:[%s11899_s17 + $0x310] ss:$48 sps:$4 sm:$0xff]  }
 0x243   : > { %3329 = vmatprep.subr.bf16.mxu0 %v9693_v9  ;;  %3415 = vmatprep.subr.bf16.mxu1 %v9696_v11  ;;  %v9778_v9 = vld [vmem:[%s11899_s17 + $0x318] ss:$48 sps:$4 sm:$0xff]   ;;  %v9783_v11 = vld [vmem:[%s11899_s17 + $0x374] ss:$48 sps:$4 sm:$0xff]  }
 0x246   : > { %3330 = vmatpush1.bf16.msra.mxu0 %v9691_v12  ;;  %3416 = vmatpush1.bf16.msra.mxu1 %v9694_v13  ;;  %v9786_v12 = vld [vmem:[%s11899_s17 + $0x37c] ss:$48 sps:$4 sm:$0xff]   ;;  %v9781_v13 = vld [vmem:[%s11899_s17 + $0x370] ss:$48 sps:$4 sm:$0xff]  }
 0x247   : > { %3331 = vmatprep.subr.bf16.mxu0 %v9699_v14  ;;  %3417 = vmatprep.subr.bf16.mxu1 %v9702_v15  ;;  %v9784_v14 = vld [vmem:[%s11899_s17 + $0x378] ss:$48 sps:$4 sm:$0xff]   ;;  %v9789_v15 = vld [vmem:[%s11899_s17 + $0x3d4] ss:$48 sps:$4 sm:$0xff]  }
 0x24a   : > { %3332 = vmatpush1.bf16.msra.mxu0 %v9697_v16  ;;  %3418 = vmatpush1.bf16.msra.mxu1 %v9700_v17  ;;  %v9792_v16 = vld [vmem:[%s11899_s17 + $0x3dc] ss:$48 sps:$4 sm:$0xff]   ;;  %v9787_v17 = vld [vmem:[%s11899_s17 + $0x3d0] ss:$48 sps:$4 sm:$0xff]  }
 0x24b   : > { %3333 = vmatprep.subr.bf16.mxu0 %v9705_v18  ;;  %3419 = vmatprep.subr.bf16.mxu1 %v9708_v20  ;;  %v9790_v18 = vld [vmem:[%s11899_s17 + $0x3d8] ss:$48 sps:$4 sm:$0xff]   ;;  %v9795_v20 = vld [vmem:[%s11899_s17 + $0x434] ss:$48 sps:$4 sm:$0xff]  }
 0x24e   : > { %3334 = vmatpush1.bf16.msra.mxu0 %v9703_v21  ;;  %3420 = vmatpush1.bf16.msra.mxu1 %v9706_v24  ;;  %v9798_v21 = vld [vmem:[%s11899_s17 + $0x43c] ss:$48 sps:$4 sm:$0xff]   ;;  %v9793_v24 = vld [vmem:[%s11899_s17 + $0x430] ss:$48 sps:$4 sm:$0xff]  }
 0x24f   : > { %3335 = vmatprep.subr.bf16.mxu0 %v9711_v25  ;;  %3421 = vmatprep.subr.bf16.mxu1 %v9714_v22  ;;  %v9796_v25 = vld [vmem:[%s11899_s17 + $0x438] ss:$48 sps:$4 sm:$0xff]   ;;  %v9801_v22 = vld [vmem:[%s11899_s17 + $0x494] ss:$48 sps:$4 sm:$0xff]  }
 0x252   : > { %3336 = vmatpush1.bf16.msra.mxu0 %v9709_v19  ;;  %3422 = vmatpush1.bf16.msra.mxu1 %v9712_v23  ;;  %v9804_v19 = vld [vmem:[%s11899_s17 + $0x49c] ss:$48 sps:$4 sm:$0xff]   ;;  %v9799_v23 = vld [vmem:[%s11899_s17 + $0x490] ss:$48 sps:$4 sm:$0xff]  }
 0x253   : > { %3337 = vmatprep.subr.bf16.mxu0 %v9717_v26  ;;  %3423 = vmatprep.subr.bf16.mxu1 %v9720_v27  ;;  %v9802_v26 = vld [vmem:[%s11899_s17 + $0x498] ss:$48 sps:$4 sm:$0xff]   ;;  %v9807_v27 = vld [vmem:[%s11899_s17 + $0x4f4] ss:$48 sps:$4 sm:$0xff]  }
 0x256   : > { %3338 = vmatpush1.bf16.msra.mxu0 %v9715_v28  ;;  %3424 = vmatpush1.bf16.msra.mxu1 %v9718_v29  ;;  %v9810_v28 = vld [vmem:[%s11899_s17 + $0x4fc] ss:$48 sps:$4 sm:$0xff]   ;;  %v9805_v29 = vld [vmem:[%s11899_s17 + $0x4f0] ss:$48 sps:$4 sm:$0xff]  }
 0x257   : > { %3339 = vmatprep.subr.bf16.mxu0 %v9723_v30  ;;  %3425 = vmatprep.subr.bf16.mxu1 %v9726_v31  ;;  %v9808_v30 = vld [vmem:[%s11899_s17 + $0x4f8] ss:$48 sps:$4 sm:$0xff]   ;;  %v9813_v31 = vld [vmem:[%s11899_s17 + $0x554] ss:$48 sps:$4 sm:$0xff]  }
 0x25a   : > { %3340 = vmatpush1.bf16.msra.mxu0 %v9721_v32  ;;  %3426 = vmatpush1.bf16.msra.mxu1 %v9724_v34  ;;  %v9816_v32 = vld [vmem:[%s11899_s17 + $0x55c] ss:$48 sps:$4 sm:$0xff]   ;;  %v9811_v34 = vld [vmem:[%s11899_s17 + $0x550] ss:$48 sps:$4 sm:$0xff]  }
 0x25b   : > { %3438 = vmatprep.subr.bf16.mxu0 %v9729_v35  ;;  %3524 = vmatprep.subr.bf16.mxu1 %v9732_v36  ;;  %v9814_v35 = vld [vmem:[%s11899_s17 + $0x558] ss:$48 sps:$4 sm:$0xff]   ;;  %v9819_v36 = vld [vmem:[%s11899_s17 + $0x5b4] ss:$48 sps:$4 sm:$0xff]  }
 0x25d   : > { %3342 = vmatmul.mubr.bf16.vlgmr.msra.gmra.mrb[0].mxu0 %v12113_v37  ;;  %3428 = vmatmul.mubr.bf16.vlgmr.msra.gmra.mrb[0].mxu1 %v12113_v37 }
 0x25e   : > { %3439 = vmatpush1.bf16.msra.mxu0 %v9727_v38  ;;  %3525 = vmatpush1.bf16.msra.mxu1 %v9730_v39  ;;  %v9822_v38 = vld [vmem:[%s11899_s17 + $0x5bc] ss:$48 sps:$4 sm:$0xff]   ;;  %v9817_v39 = vld [vmem:[%s11899_s17 + $0x5b0] ss:$48 sps:$4 sm:$0xff]  }
 0x25f   : > { %3440 = vmatprep.subr.bf16.mxu0 %v9735_v40  ;;  %3526 = vmatprep.subr.bf16.mxu1 %v9738_v41  ;;  %v9820_v40 = vld [vmem:[%s11899_s17 + $0x5b8] ss:$48 sps:$4 sm:$0xff]   ;;  %v9825_v41 = vld [vmem:[%s11899_s17 + $0x614] ss:$48 sps:$4 sm:$0xff]  }
 0x260   : > { %3470 = vmatprep.mubr.bf16.mxu0 %v12017_v10  ;;  %3556 = vmatprep.mubr.bf16.mxu1 %v12017_v10  ;;  %v9753_v10 = vld [vmem:[%s11899_s17 + $0x194] ss:$48 sps:$4 sm:$0xff]  }
 0x262   : > { %3441 = vmatpush1.bf16.msra.mxu0 %v9733_v42  ;;  %3527 = vmatpush1.bf16.msra.mxu1 %v9736_v43  ;;  %v9828_v42 = vld [vmem:[%s11899_s17 + $0x61c] ss:$48 sps:$4 sm:$0xff]   ;;  %v9823_v43 = vld [vmem:[%s11899_s17 + $0x610] ss:$48 sps:$4 sm:$0xff]  }
 0x263   : > { %3442 = vmatprep.subr.bf16.mxu0 %v9741_v44  ;;  %3528 = vmatprep.subr.bf16.mxu1 %v9744_v45  ;;  %v9826_v44 = vld [vmem:[%s11899_s17 + $0x618] ss:$48 sps:$4 sm:$0xff]   ;;  %v9831_v45 = vld [vmem:[%s11899_s17 + $0x674] ss:$48 sps:$4 sm:$0xff]  }
 0x266   : > { %3443 = vmatpush1.bf16.msra.mxu0 %v9739_v46  ;;  %3529 = vmatpush1.bf16.msra.mxu1 %v9742_v47  ;;  %v9834_v46 = vld [vmem:[%s11899_s17 + $0x67c] ss:$48 sps:$4 sm:$0xff]   ;;  %v9829_v47 = vld [vmem:[%s11899_s17 + $0x670] ss:$48 sps:$4 sm:$0xff]  }
 0x267   : > { %3444 = vmatprep.subr.bf16.mxu0 %v9747_v48  ;;  %3530 = vmatprep.subr.bf16.mxu1 %v9750_v49  ;;  %v9832_v48 = vld [vmem:[%s11899_s17 + $0x678] ss:$48 sps:$4 sm:$0xff]   ;;  %v9837_v49 = vld [vmem:[%s11899_s17 + $0x6d4] ss:$48 sps:$4 sm:$0xff]  }
 0x26a   : > { %3445 = vmatpush1.bf16.msra.mxu0 %v9745_v50  ;;  %3531 = vmatpush1.bf16.msra.mxu1 %v9748_v51  ;;  %v9840_v50 = vld [vmem:[%s11899_s17 + $0x6dc] ss:$48 sps:$4 sm:$0xff]   ;;  %v9835_v51 = vld [vmem:[%s11899_s17 + $0x6d0] ss:$48 sps:$4 sm:$0xff]  }
 0x26b   : > { %3446 = vmatprep.subr.bf16.mxu0 %v9753_v10  ;;  %3532 = vmatprep.subr.bf16.mxu1 %v9756_v52  ;;  %v9843_v10 = vld [vmem:[%s11899_s17 + $0x734] ss:$48 sps:$4 sm:$0xff]   ;;  %v9846_v52 = vld [vmem:[%s11899_s17 + $0x73c] ss:$48 sps:$4 sm:$0xff]  }
 0x26e   : > { %3447 = vmatpush1.bf16.msra.mxu0 %v9751_v53  ;;  %3533 = vmatpush1.bf16.msra.mxu1 %v9754_v54  ;;  %v9841_v53 = vld [vmem:[%s11899_s17 + $0x730] ss:$48 sps:$4 sm:$0xff]   ;;  %v9844_v54 = vld [vmem:[%s11899_s17 + $0x738] ss:$48 sps:$4 sm:$0xff]  }
 0x26f   : > { %3448 = vmatprep.subr.bf16.mxu0 %v9759_v55  ;;  %3534 = vmatprep.subr.bf16.mxu1 %v9762_v57  ;;  %v9852_v55 = vld [vmem:[%s11899_s17 + $0x79c] ss:$48 sps:$4 sm:$0xff]   ;;  %v9847_v57 = vld [vmem:[%s11899_s17 + $0x790] ss:$48 sps:$4 sm:$0xff]  }
 0x272   : > { %3449 = vmatpush1.bf16.msra.mxu0 %v9757_v58  ;;  %3535 = vmatpush1.bf16.msra.mxu1 %v9760_v59  ;;  %v9850_v58 = vld [vmem:[%s11899_s17 + $0x798] ss:$48 sps:$4 sm:$0xff]   ;;  %v9855_v59 = vld [vmem:[%s11899_s17 + $0x7f4] ss:$48 sps:$4 sm:$0xff]  }
 0x273   : > { %3450 = vmatprep.subr.bf16.mxu0 %v9765_v60  ;;  %3536 = vmatprep.subr.bf16.mxu1 %v9768_v61  ;;  %v9858_v60 = vld [vmem:[%s11899_s17 + $0x7fc] ss:$48 sps:$4 sm:$0xff]   ;;  %v9853_v61 = vld [vmem:[%s11899_s17 + $0x7f0] ss:$48 sps:$4 sm:$0xff]  }
 0x276   : > { %3451 = vmatpush1.bf16.msra.mxu0 %v9763_v62  ;;  %3537 = vmatpush1.bf16.msra.mxu1 %v9766_v63  ;;  %v9856_v62 = vld [vmem:[%s11899_s17 + $0x7f8] ss:$48 sps:$4 sm:$0xff]   ;;  %v9861_v63 = vld [vmem:[%s11899_s17 + $0x854] ss:$48 sps:$4 sm:$0xff]  }
 0x277   : > { %3452 = vmatprep.subr.bf16.mxu0 %v9771_v2  ;;  %3538 = vmatprep.subr.bf16.mxu1 %v9774_v3  ;;  %v9864_v2 = vld [vmem:[%s11899_s17 + $0x85c] ss:$48 sps:$4 sm:$0xff]   ;;  %v9859_v3 = vld [vmem:[%s11899_s17 + $0x850] ss:$48 sps:$4 sm:$0xff]  }
 0x27a   : > { %3453 = vmatpush1.bf16.msra.mxu0 %v9769_v4  ;;  %3539 = vmatpush1.bf16.msra.mxu1 %v9772_v5  ;;  %v9862_v4 = vld [vmem:[%s11899_s17 + $0x858] ss:$48 sps:$4 sm:$0xff]   ;;  %v9867_v5 = vld [vmem:[%s11899_s17 + $0x8b4] ss:$48 sps:$4 sm:$0xff]  }
 0x27b   : > { %3454 = vmatprep.subr.bf16.mxu0 %v9777_v6  ;;  %3540 = vmatprep.subr.bf16.mxu1 %v9780_v7  ;;  %v9870_v6 = vld [vmem:[%s11899_s17 + $0x8bc] ss:$48 sps:$4 sm:$0xff]   ;;  %v9865_v7 = vld [vmem:[%s11899_s17 + $0x8b0] ss:$48 sps:$4 sm:$0xff]  }
 0x27e   : > { %3455 = vmatpush1.bf16.msra.mxu0 %v9775_v8  ;;  %3541 = vmatpush1.bf16.msra.mxu1 %v9778_v9  ;;  %v9868_v8 = vld [vmem:[%s11899_s17 + $0x8b8] ss:$48 sps:$4 sm:$0xff]   ;;  %v9873_v9 = vld [vmem:[%s11899_s17 + $0x914] ss:$48 sps:$4 sm:$0xff]  }
 0x27f   : > { %3456 = vmatprep.subr.bf16.mxu0 %v9783_v11  ;;  %3542 = vmatprep.subr.bf16.mxu1 %v9786_v12  ;;  %v9876_v11 = vld [vmem:[%s11899_s17 + $0x91c] ss:$48 sps:$4 sm:$0xff]   ;;  %v9871_v12 = vld [vmem:[%s11899_s17 + $0x910] ss:$48 sps:$4 sm:$0xff]  }
 0x282   : > { %3457 = vmatpush1.bf16.msra.mxu0 %v9781_v13  ;;  %3543 = vmatpush1.bf16.msra.mxu1 %v9784_v14  ;;  %v9874_v13 = vld [vmem:[%s11899_s17 + $0x918] ss:$48 sps:$4 sm:$0xff]   ;;  %v9879_v14 = vld [vmem:[%s11899_s17 + $0x974] ss:$48 sps:$4 sm:$0xff]  }
 0x283   : > { %3458 = vmatprep.subr.bf16.mxu0 %v9789_v15  ;;  %3544 = vmatprep.subr.bf16.mxu1 %v9792_v16  ;;  %v9882_v15 = vld [vmem:[%s11899_s17 + $0x97c] ss:$48 sps:$4 sm:$0xff]   ;;  %v9877_v16 = vld [vmem:[%s11899_s17 + $0x970] ss:$48 sps:$4 sm:$0xff]  }
 0x286   : > { %3459 = vmatpush1.bf16.msra.mxu0 %v9787_v17  ;;  %3545 = vmatpush1.bf16.msra.mxu1 %v9790_v18  ;;  %v9880_v17 = vld [vmem:[%s11899_s17 + $0x978] ss:$48 sps:$4 sm:$0xff]   ;;  %v9885_v18 = vld [vmem:[%s11899_s17 + $0x9d4] ss:$48 sps:$4 sm:$0xff]  }
 0x287   : > { %3460 = vmatprep.subr.bf16.mxu0 %v9795_v20  ;;  %3546 = vmatprep.subr.bf16.mxu1 %v9798_v21  ;;  %v9888_v20 = vld [vmem:[%s11899_s17 + $0x9dc] ss:$48 sps:$4 sm:$0xff]   ;;  %v9883_v21 = vld [vmem:[%s11899_s17 + $0x9d0] ss:$48 sps:$4 sm:$0xff]  }
 0x28a   : > { %3461 = vmatpush1.bf16.msra.mxu0 %v9793_v24  ;;  %3547 = vmatpush1.bf16.msra.mxu1 %v9796_v25  ;;  %v9886_v24 = vld [vmem:[%s11899_s17 + $0x9d8] ss:$48 sps:$4 sm:$0xff]   ;;  %v9891_v25 = vld [vmem:[%s11899_s17 + $0xa34] ss:$48 sps:$4 sm:$0xff]  }
 0x28b   : > { %3462 = vmatprep.subr.bf16.mxu0 %v9801_v22  ;;  %3548 = vmatprep.subr.bf16.mxu1 %v9804_v19  ;;  %v9894_v22 = vld [vmem:[%s11899_s17 + $0xa3c] ss:$48 sps:$4 sm:$0xff]   ;;  %v9889_v19 = vld [vmem:[%s11899_s17 + $0xa30] ss:$48 sps:$4 sm:$0xff]  }
 0x28e   : > { %3463 = vmatpush1.bf16.msra.mxu0 %v9799_v23  ;;  %3549 = vmatpush1.bf16.msra.mxu1 %v9802_v26  ;;  %v9892_v23 = vld [vmem:[%s11899_s17 + $0xa38] ss:$48 sps:$4 sm:$0xff]   ;;  %v9897_v26 = vld [vmem:[%s11899_s17 + $0xa94] ss:$48 sps:$4 sm:$0xff]  }
 0x28f   : > { %3464 = vmatprep.subr.bf16.mxu0 %v9807_v27  ;;  %3550 = vmatprep.subr.bf16.mxu1 %v9810_v28  ;;  %v9900_v27 = vld [vmem:[%s11899_s17 + $0xa9c] ss:$48 sps:$4 sm:$0xff]   ;;  %v9895_v28 = vld [vmem:[%s11899_s17 + $0xa90] ss:$48 sps:$4 sm:$0xff]  }
 0x292   : > { %3465 = vmatpush1.bf16.msra.mxu0 %v9805_v29  ;;  %3551 = vmatpush1.bf16.msra.mxu1 %v9808_v30  ;;  %v9898_v29 = vld [vmem:[%s11899_s17 + $0xa98] ss:$48 sps:$4 sm:$0xff]   ;;  %v9903_v30 = vld [vmem:[%s11899_s17 + $0xaf4] ss:$48 sps:$4 sm:$0xff]  }
 0x293   : > { %3466 = vmatprep.subr.bf16.mxu0 %v9813_v31  ;;  %3552 = vmatprep.subr.bf16.mxu1 %v9816_v32  ;;  %v9906_v31 = vld [vmem:[%s11899_s17 + $0xafc] ss:$48 sps:$4 sm:$0xff]   ;;  %v9901_v32 = vld [vmem:[%s11899_s17 + $0xaf0] ss:$48 sps:$4 sm:$0xff]  }
 0x296   : > { %3467 = vmatpush1.bf16.msra.mxu0 %v9811_v34  ;;  %3553 = vmatpush1.bf16.msra.mxu1 %v9814_v35  ;;  %v9904_v34 = vld [vmem:[%s11899_s17 + $0xaf8] ss:$48 sps:$4 sm:$0xff]   ;;  %v9909_v35 = vld [vmem:[%s11899_s17 + $0xb54] ss:$48 sps:$4 sm:$0xff]  }
 0x297   : > { %3468 = vmatprep.subr.bf16.mxu0 %v9819_v36  ;;  %3554 = vmatprep.subr.bf16.mxu1 %v9822_v38  ;;  %v9912_v36 = vld [vmem:[%s11899_s17 + $0xb5c] ss:$48 sps:$4 sm:$0xff]   ;;  %v9907_v38 = vld [vmem:[%s11899_s17 + $0xb50] ss:$48 sps:$4 sm:$0xff]  }
 0x29a   : > { %3469 = vmatpush1.bf16.msra.mxu0 %v9817_v39  ;;  %3555 = vmatpush1.bf16.msra.mxu1 %v9820_v40  ;;  %v9910_v39 = vld [vmem:[%s11899_s17 + $0xb58] ss:$48 sps:$4 sm:$0xff]   ;;  %v9915_v40 = vld [vmem:[%s11899_s17 + $0xbb4] ss:$48 sps:$4 sm:$0xff]  }
 0x29b   : > { %3481 = vmatprep.subr.bf16.mxu0 %v9825_v41  ;;  %3567 = vmatprep.subr.bf16.mxu1 %v9828_v42  ;;  %v9918_v41 = vld [vmem:[%s11899_s17 + $0xbbc] ss:$48 sps:$4 sm:$0xff]   ;;  %v9913_v42 = vld [vmem:[%s11899_s17 + $0xbb0] ss:$48 sps:$4 sm:$0xff]  }
 0x29d   : > { %3471 = vmatmul.mubr.bf16.vlgmr.msra.gmra.mrb[4].mxu0 %v12043_v33  ;;  %3557 = vmatmul.mubr.bf16.vlgmr.msra.gmra.mrb[4].mxu1 %v12043_v33  ;;  %v9838_v33 = vld [vmem:[%s11899_s17 + $0x6d8] ss:$48 sps:$4 sm:$0xff]  }
 0x29e   : > { %3482 = vmatpush1.bf16.msra.mxu0 %v9823_v43  ;;  %3568 = vmatpush1.bf16.msra.mxu1 %v9826_v44  ;;  %v9916_v43 = vld [vmem:[%s11899_s17 + $0xbb8] ss:$48 sps:$4 sm:$0xff]   ;;  %v9921_v44 = vld [vmem:[%s11899_s17 + $0x24] ss:$48 sps:$4 sm:$0xff]  }
 0x29f   : > { %3483 = vmatprep.subr.bf16.mxu0 %v9831_v45  ;;  %3569 = vmatprep.subr.bf16.mxu1 %v9834_v46  ;;  %v9924_v45 = vld [vmem:[%s11899_s17 + $0x2c] ss:$48 sps:$4 sm:$0xff]   ;;  %v9919_v46 = vld [vmem:[%s11899_s17 + $0x20] ss:$48 sps:$4 sm:$0xff]  }
 0x2a0   : > { %3513 = vmatprep.mubr.bf16.mxu0 %v12069_v56  ;;  %3599 = vmatprep.mubr.bf16.mxu1 %v12069_v56  ;;  %v9849_v56 = vld [vmem:[%s11899_s17 + $0x794] ss:$48 sps:$4 sm:$0xff]  }
 0x2a2   : > { %3484 = vmatpush1.bf16.msra.mxu0 %v9829_v47  ;;  %3570 = vmatpush1.bf16.msra.mxu1 %v9832_v48  ;;  %v9922_v47 = vld [vmem:[%s11899_s17 + $0x28] ss:$48 sps:$4 sm:$0xff]   ;;  %v9927_v48 = vld [vmem:[%s11899_s17 + $0x84] ss:$48 sps:$4 sm:$0xff]  }
 0x2a3   : > { %3485 = vmatprep.subr.bf16.mxu0 %v9837_v49  ;;  %3571 = vmatprep.subr.bf16.mxu1 %v9840_v50  ;;  %v9930_v49 = vld [vmem:[%s11899_s17 + $0x8c] ss:$48 sps:$4 sm:$0xff]   ;;  %v9925_v50 = vld [vmem:[%s11899_s17 + $0x80] ss:$48 sps:$4 sm:$0xff]  }
 0x2a6   : > { %3486 = vmatpush1.bf16.msra.mxu0 %v9835_v51  ;;  %3572 = vmatpush1.bf16.msra.mxu1 %v9838_v33  ;;  %v9928_v51 = vld [vmem:[%s11899_s17 + $0x88] ss:$48 sps:$4 sm:$0xff]   ;;  %v9933_v33 = vld [vmem:[%s11899_s17 + $0xe4] ss:$48 sps:$4 sm:$0xff]  }
 0x2a7   : > { %3487 = vmatprep.subr.bf16.mxu0 %v9843_v10  ;;  %3573 = vmatprep.subr.bf16.mxu1 %v9846_v52  ;;  %v9936_v10 = vld [vmem:[%s11899_s17 + $0xec] ss:$48 sps:$4 sm:$0xff]  }
 0x2a8   : > { %v10111_v52 = vld [vmem:[#allocation2 + $0x8] sm:$0xff] }
 0x2aa   : > { %3488 = vmatpush1.bf16.msra.mxu0 %v9841_v53  ;;  %3574 = vmatpush1.bf16.msra.mxu1 %v9844_v54  ;;  %v9934_v53 = vld [vmem:[%s11899_s17 + $0xe8] ss:$48 sps:$4 sm:$0xff]   ;;  %v9939_v54 = vld [vmem:[%s11899_s17 + $0x144] ss:$48 sps:$4 sm:$0xff]  }
 0x2ab   : > { %3489 = vmatprep.subr.bf16.mxu0 %v9849_v56  ;;  %3575 = vmatprep.subr.bf16.mxu1 %v9852_v55  ;;  %v9942_v56 = vld [vmem:[%s11899_s17 + $0x14c] ss:$48 sps:$4 sm:$0xff]   ;;  %v9937_v55 = vld [vmem:[%s11899_s17 + $0x140] ss:$48 sps:$4 sm:$0xff]  }
 0x2ae   : > { %3490 = vmatpush1.bf16.msra.mxu0 %v9847_v57  ;;  %3576 = vmatpush1.bf16.msra.mxu1 %v9850_v58  ;;  %v9940_v57 = vld [vmem:[%s11899_s17 + $0x148] ss:$48 sps:$4 sm:$0xff]   ;;  %v9945_v58 = vld [vmem:[%s11899_s17 + $0x1a4] ss:$48 sps:$4 sm:$0xff]  }
 0x2af   : > { %3491 = vmatprep.subr.bf16.mxu0 %v9855_v59  ;;  %3577 = vmatprep.subr.bf16.mxu1 %v9858_v60  ;;  %v9948_v59 = vld [vmem:[%s11899_s17 + $0x1ac] ss:$48 sps:$4 sm:$0xff]   ;;  %v9943_v60 = vld [vmem:[%s11899_s17 + $0x1a0] ss:$48 sps:$4 sm:$0xff]  }
 0x2b2   : > { %3492 = vmatpush1.bf16.msra.mxu0 %v9853_v61  ;;  %3578 = vmatpush1.bf16.msra.mxu1 %v9856_v62  ;;  %v9946_v61 = vld [vmem:[%s11899_s17 + $0x1a8] ss:$48 sps:$4 sm:$0xff]   ;;  %v9951_v62 = vld [vmem:[%s11899_s17 + $0x204] ss:$48 sps:$4 sm:$0xff]  }
 0x2b3   : > { %3493 = vmatprep.subr.bf16.mxu0 %v9861_v63  ;;  %3579 = vmatprep.subr.bf16.mxu1 %v9864_v2  ;;  %v9954_v63 = vld [vmem:[%s11899_s17 + $0x20c] ss:$48 sps:$4 sm:$0xff]   ;;  %v9949_v2 = vld [vmem:[%s11899_s17 + $0x200] ss:$48 sps:$4 sm:$0xff]  }
 0x2b6   : > { %3494 = vmatpush1.bf16.msra.mxu0 %v9859_v3  ;;  %3580 = vmatpush1.bf16.msra.mxu1 %v9862_v4  ;;  %v9952_v3 = vld [vmem:[%s11899_s17 + $0x208] ss:$48 sps:$4 sm:$0xff]   ;;  %v9957_v4 = vld [vmem:[%s11899_s17 + $0x264] ss:$48 sps:$4 sm:$0xff]  }
 0x2b7   : > { %3495 = vmatprep.subr.bf16.mxu0 %v9867_v5  ;;  %3581 = vmatprep.subr.bf16.mxu1 %v9870_v6  ;;  %v9960_v5 = vld [vmem:[%s11899_s17 + $0x26c] ss:$48 sps:$4 sm:$0xff]   ;;  %v9955_v6 = vld [vmem:[%s11899_s17 + $0x260] ss:$48 sps:$4 sm:$0xff]  }
 0x2ba   : > { %3496 = vmatpush1.bf16.msra.mxu0 %v9865_v7  ;;  %3582 = vmatpush1.bf16.msra.mxu1 %v9868_v8  ;;  %v9958_v7 = vld [vmem:[%s11899_s17 + $0x268] ss:$48 sps:$4 sm:$0xff]   ;;  %v9963_v8 = vld [vmem:[%s11899_s17 + $0x2c4] ss:$48 sps:$4 sm:$0xff]  }
 0x2bb   : > { %3497 = vmatprep.subr.bf16.mxu0 %v9873_v9  ;;  %3583 = vmatprep.subr.bf16.mxu1 %v9876_v11  ;;  %v9966_v9 = vld [vmem:[%s11899_s17 + $0x2cc] ss:$48 sps:$4 sm:$0xff]   ;;  %v9961_v11 = vld [vmem:[%s11899_s17 + $0x2c0] ss:$48 sps:$4 sm:$0xff]  }
 0x2be   : > { %3498 = vmatpush1.bf16.msra.mxu0 %v9871_v12  ;;  %3584 = vmatpush1.bf16.msra.mxu1 %v9874_v13  ;;  %v9964_v12 = vld [vmem:[%s11899_s17 + $0x2c8] ss:$48 sps:$4 sm:$0xff]   ;;  %v9969_v13 = vld [vmem:[%s11899_s17 + $0x324] ss:$48 sps:$4 sm:$0xff]  }
 0x2bf   : > { %3499 = vmatprep.subr.bf16.mxu0 %v9879_v14  ;;  %3585 = vmatprep.subr.bf16.mxu1 %v9882_v15  ;;  %v9972_v14 = vld [vmem:[%s11899_s17 + $0x32c] ss:$48 sps:$4 sm:$0xff]   ;;  %v9967_v15 = vld [vmem:[%s11899_s17 + $0x320] ss:$48 sps:$4 sm:$0xff]  }
 0x2c2   : > { %3500 = vmatpush1.bf16.msra.mxu0 %v9877_v16  ;;  %3586 = vmatpush1.bf16.msra.mxu1 %v9880_v17  ;;  %v9970_v16 = vld [vmem:[%s11899_s17 + $0x328] ss:$48 sps:$4 sm:$0xff]   ;;  %v9975_v17 = vld [vmem:[%s11899_s17 + $0x384] ss:$48 sps:$4 sm:$0xff]  }
 0x2c3   : > { %3501 = vmatprep.subr.bf16.mxu0 %v9885_v18  ;;  %3587 = vmatprep.subr.bf16.mxu1 %v9888_v20  ;;  %v9978_v18 = vld [vmem:[%s11899_s17 + $0x38c] ss:$48 sps:$4 sm:$0xff]   ;;  %v9973_v20 = vld [vmem:[%s11899_s17 + $0x380] ss:$48 sps:$4 sm:$0xff]  }
 0x2c6   : > { %3502 = vmatpush1.bf16.msra.mxu0 %v9883_v21  ;;  %3588 = vmatpush1.bf16.msra.mxu1 %v9886_v24  ;;  %v9976_v21 = vld [vmem:[%s11899_s17 + $0x388] ss:$48 sps:$4 sm:$0xff]   ;;  %v9981_v24 = vld [vmem:[%s11899_s17 + $0x3e4] ss:$48 sps:$4 sm:$0xff]  }
 0x2c7   : > { %3503 = vmatprep.subr.bf16.mxu0 %v9891_v25  ;;  %3589 = vmatprep.subr.bf16.mxu1 %v9894_v22  ;;  %v9984_v25 = vld [vmem:[%s11899_s17 + $0x3ec] ss:$48 sps:$4 sm:$0xff]   ;;  %v9979_v22 = vld [vmem:[%s11899_s17 + $0x3e0] ss:$48 sps:$4 sm:$0xff]  }
 0x2ca   : > { %3504 = vmatpush1.bf16.msra.mxu0 %v9889_v19  ;;  %3590 = vmatpush1.bf16.msra.mxu1 %v9892_v23  ;;  %v9982_v19 = vld [vmem:[%s11899_s17 + $0x3e8] ss:$48 sps:$4 sm:$0xff]   ;;  %v9987_v23 = vld [vmem:[%s11899_s17 + $0x444] ss:$48 sps:$4 sm:$0xff]  }
 0x2cb   : > { %3505 = vmatprep.subr.bf16.mxu0 %v9897_v26  ;;  %3591 = vmatprep.subr.bf16.mxu1 %v9900_v27  ;;  %v9990_v26 = vld [vmem:[%s11899_s17 + $0x44c] ss:$48 sps:$4 sm:$0xff]   ;;  %v9985_v27 = vld [vmem:[%s11899_s17 + $0x440] ss:$48 sps:$4 sm:$0xff]  }
 0x2ce   : > { %3506 = vmatpush1.bf16.msra.mxu0 %v9895_v28  ;;  %3592 = vmatpush1.bf16.msra.mxu1 %v9898_v29  ;;  %v9988_v28 = vld [vmem:[%s11899_s17 + $0x448] ss:$48 sps:$4 sm:$0xff]   ;;  %v9993_v29 = vld [vmem:[%s11899_s17 + $0x4a4] ss:$48 sps:$4 sm:$0xff]  }
 0x2cf   : > { %3507 = vmatprep.subr.bf16.mxu0 %v9903_v30  ;;  %3593 = vmatprep.subr.bf16.mxu1 %v9906_v31  ;;  %v9996_v30 = vld [vmem:[%s11899_s17 + $0x4ac] ss:$48 sps:$4 sm:$0xff]   ;;  %v9991_v31 = vld [vmem:[%s11899_s17 + $0x4a0] ss:$48 sps:$4 sm:$0xff]  }
 0x2d2   : > { %3508 = vmatpush1.bf16.msra.mxu0 %v9901_v32  ;;  %3594 = vmatpush1.bf16.msra.mxu1 %v9904_v34  ;;  %v9994_v32 = vld [vmem:[%s11899_s17 + $0x4a8] ss:$48 sps:$4 sm:$0xff]   ;;  %v9999_v34 = vld [vmem:[%s11899_s17 + $0x504] ss:$48 sps:$4 sm:$0xff]  }
 0x2d3   : > { %3509 = vmatprep.subr.bf16.mxu0 %v9909_v35  ;;  %3595 = vmatprep.subr.bf16.mxu1 %v9912_v36  ;;  %v10002_v35 = vld [vmem:[%s11899_s17 + $0x50c] ss:$48 sps:$4 sm:$0xff]   ;;  %v9997_v36 = vld [vmem:[%s11899_s17 + $0x500] ss:$48 sps:$4 sm:$0xff]  }
 0x2d6   : > { %3510 = vmatpush1.bf16.msra.mxu0 %v9907_v38  ;;  %3596 = vmatpush1.bf16.msra.mxu1 %v9910_v39  ;;  %v10000_v38 = vld [vmem:[%s11899_s17 + $0x508] ss:$48 sps:$4 sm:$0xff]   ;;  %v10005_v39 = vld [vmem:[%s11899_s17 + $0x564] ss:$48 sps:$4 sm:$0xff]  }
 0x2d7   : > { %3511 = vmatprep.subr.bf16.mxu0 %v9915_v40  ;;  %3597 = vmatprep.subr.bf16.mxu1 %v9918_v41  ;;  %v10008_v40 = vld [vmem:[%s11899_s17 + $0x56c] ss:$48 sps:$4 sm:$0xff]   ;;  %v10003_v41 = vld [vmem:[%s11899_s17 + $0x560] ss:$48 sps:$4 sm:$0xff]  }
 0x2da   : > { %3512 = vmatpush1.bf16.msra.mxu0 %v9913_v42  ;;  %3598 = vmatpush1.bf16.msra.mxu1 %v9916_v43  ;;  %v10006_v42 = vld [vmem:[%s11899_s17 + $0x568] ss:$48 sps:$4 sm:$0xff]   ;;  %v10011_v43 = vld [vmem:[%s11899_s17 + $0x5c4] ss:$48 sps:$4 sm:$0xff]  }
 0x2db   : > { %3610 = vmatprep.subr.bf16.mxu0 %v9921_v44  ;;  %3696 = vmatprep.subr.bf16.mxu1 %v9924_v45  ;;  %v10014_v44 = vld [vmem:[%s11899_s17 + $0x5cc] ss:$48 sps:$4 sm:$0xff]   ;;  %v10009_v45 = vld [vmem:[%s11899_s17 + $0x5c0] ss:$48 sps:$4 sm:$0xff]  }
 0x2dd   : > { %3514 = vmatmul.mubr.bf16.vlgmr.msra.gmra.mrb[4].mxu0 %v12113_v37  ;;  %3600 = vmatmul.mubr.bf16.vlgmr.msra.gmra.mrb[4].mxu1 %v12113_v37  ;;  %v9931_v37 = vld [vmem:[%s11899_s17 + $0xe0] ss:$48 sps:$4 sm:$0xff]  }
 0x2de   : > { %3611 = vmatpush1.bf16.msra.mxu0 %v9919_v46  ;;  %3697 = vmatpush1.bf16.msra.mxu1 %v9922_v47  ;;  %v10012_v46 = vld [vmem:[%s11899_s17 + $0x5c8] ss:$48 sps:$4 sm:$0xff]   ;;  %v10017_v47 = vld [vmem:[%s11899_s17 + $0x624] ss:$48 sps:$4 sm:$0xff]  }
 0x2df   : > { %3612 = vmatprep.subr.bf16.mxu0 %v9927_v48  ;;  %3698 = vmatprep.subr.bf16.mxu1 %v9930_v49  ;;  %v10020_v48 = vld [vmem:[%s11899_s17 + $0x62c] ss:$48 sps:$4 sm:$0xff]   ;;  %v10015_v49 = vld [vmem:[%s11899_s17 + $0x620] ss:$48 sps:$4 sm:$0xff]  }
 0x2e0   : > { %3642 = vmatprep.mubr.bf16.mxu0 %v10111_v52  ;;  %3728 = vmatprep.mubr.bf16.mxu1 %v10111_v52  ;;  %v10021_v52 = vld [vmem:[%s11899_s17 + $0x680] ss:$48 sps:$4 sm:$0xff]  }
 0x2e2   : > { %3613 = vmatpush1.bf16.msra.mxu0 %v9925_v50  ;;  %3699 = vmatpush1.bf16.msra.mxu1 %v9928_v51  ;;  %v10018_v50 = vld [vmem:[%s11899_s17 + $0x628] ss:$48 sps:$4 sm:$0xff]   ;;  %v10023_v51 = vld [vmem:[%s11899_s17 + $0x684] ss:$48 sps:$4 sm:$0xff]  }
 0x2e3   : > { %3614 = vmatprep.subr.bf16.mxu0 %v9933_v33  ;;  %3700 = vmatprep.subr.bf16.mxu1 %v9936_v10  ;;  %v10026_v33 = vld [vmem:[%s11899_s17 + $0x68c] ss:$48 sps:$4 sm:$0xff]   ;;  %v10112_v10 = vld [vmem:[#allocation2] sm:$0xff] }
 0x2e6   : > { %3615 = vmatpush1.bf16.msra.mxu0 %v9931_v37  ;;  %3701 = vmatpush1.bf16.msra.mxu1 %v9934_v53  ;;  %v10024_v37 = vld [vmem:[%s11899_s17 + $0x688] ss:$48 sps:$4 sm:$0xff]   ;;  %v10029_v53 = vld [vmem:[%s11899_s17 + $0x6e4] ss:$48 sps:$4 sm:$0xff]  }
 0x2e7   : > { %3616 = vmatprep.subr.bf16.mxu0 %v9939_v54  ;;  %3702 = vmatprep.subr.bf16.mxu1 %v9942_v56  ;;  %v10032_v54 = vld [vmem:[%s11899_s17 + $0x6ec] ss:$48 sps:$4 sm:$0xff]  }
 0x2e8   : > { %v10113_v56 = vld [vmem:[#allocation2 + $0x18] sm:$0xff] }
 0x2ea   : > { %3617 = vmatpush1.bf16.msra.mxu0 %v9937_v55  ;;  %3703 = vmatpush1.bf16.msra.mxu1 %v9940_v57  ;;  %v1286_v55 = vlaneseq  ;;  %v10027_v57 = vld [vmem:[%s11899_s17 + $0x6e0] ss:$48 sps:$4 sm:$0xff]  }
 0x2eb   : > { %3618 = vmatprep.subr.bf16.mxu0 %v9945_v58  ;;  %3704 = vmatprep.subr.bf16.mxu1 %v9948_v59  ;;  %v10030_v58 = vld [vmem:[%s11899_s17 + $0x6e8] ss:$48 sps:$4 sm:$0xff]   ;;  %v10035_v59 = vld [vmem:[%s11899_s17 + $0x744] ss:$48 sps:$4 sm:$0xff]  }
 0x2ee   : > { %3619 = vmatpush1.bf16.msra.mxu0 %v9943_v60  ;;  %3705 = vmatpush1.bf16.msra.mxu1 %v9946_v61  ;;  %v10038_v60 = vld [vmem:[%s11899_s17 + $0x74c] ss:$48 sps:$4 sm:$0xff]   ;;  %v12329_v61 = vshrl.u32 %v1286_v55, 7  ;;  %v10081_v55 = vld [vmem:[%s11899_s17 + $0xa40] ss:$48 sps:$4 sm:$0xff]  }
 0x2ef   : > { %3620 = vmatprep.subr.bf16.mxu0 %v9951_v62  ;;  %3706 = vmatprep.subr.bf16.mxu1 %v9954_v63  ;;  %v10033_v62 = vld [vmem:[%s11899_s17 + $0x740] ss:$48 sps:$4 sm:$0xff]   ;;  %v10036_v63 = vld [vmem:[%s11899_s17 + $0x748] ss:$48 sps:$4 sm:$0xff]  }
 0x2f2   : > { %3621 = vmatpush1.bf16.msra.mxu0 %v9949_v2  ;;  %3707 = vmatpush1.bf16.msra.mxu1 %v9952_v3  ;;  %v10041_v2 = vld [vmem:[%s11899_s17 + $0x7a4] ss:$48 sps:$4 sm:$0xff]   ;;  %v10044_v3 = vld [vmem:[%s11899_s17 + $0x7ac] ss:$48 sps:$4 sm:$0xff]  }
 0x2f3   : > { %3622 = vmatprep.subr.bf16.mxu0 %v9957_v4  ;;  %3708 = vmatprep.subr.bf16.mxu1 %v9960_v5  ;;  %v1288_v4 = vsub.s32 0, %v12329_v61  ;;  %v1296_v5 = vsub.s32 2, %v12329_v61 }
 0x2f6   : > { %3623 = vmatpush1.bf16.msra.mxu0 %v9955_v6  ;;  %3709 = vmatpush1.bf16.msra.mxu1 %v9958_v7  ;;  %v10039_v6 = vld [vmem:[%s11899_s17 + $0x7a0] ss:$48 sps:$4 sm:$0xff]   ;;  %v10042_v7 = vld [vmem:[%s11899_s17 + $0x7a8] ss:$48 sps:$4 sm:$0xff]  }
 0x2f7   : > { %3624 = vmatprep.subr.bf16.mxu0 %v9963_v8  ;;  %3710 = vmatprep.subr.bf16.mxu1 %v9966_v9  ;;  %v1292_v8 = vsub.s32 1, %v12329_v61  ;;  %v1300_v9 = vsub.s32 3, %v12329_v61 }
 0x2fa   : > { %3625 = vmatpush1.bf16.msra.mxu0 %v9961_v11  ;;  %3711 = vmatpush1.bf16.msra.mxu1 %v9964_v12  ;;  %v10047_v11 = vld [vmem:[%s11899_s17 + $0x804] ss:$48 sps:$4 sm:$0xff]   ;;  %v10050_v12 = vld [vmem:[%s11899_s17 + $0x80c] ss:$48 sps:$4 sm:$0xff]  }
 0x2fb   : > { %3626 = vmatprep.subr.bf16.mxu0 %v9969_v13  ;;  %3712 = vmatprep.subr.bf16.mxu1 %v9972_v14  ;;  %v1289_v13 = vrot.slane %v11922_v0, %v1288_v4  ;;  %v1297_v14 = vrot.slane %v11922_v0, %v1296_v5 }
 0x2fe   : > { %3627 = vmatpush1.bf16.msra.mxu0 %v9967_v15  ;;  %3713 = vmatpush1.bf16.msra.mxu1 %v9970_v16  ;;  %v1293_v15 = vrot.slane %v11922_v0, %v1292_v8  ;;  %v1301_v16 = vrot.slane %v11922_v0, %v1300_v9 }
 0x2ff   : > { %3628 = vmatprep.subr.bf16.mxu0 %v9975_v17  ;;  %3714 = vmatprep.subr.bf16.mxu1 %v9978_v18  ;;  %v10045_v17 = vld [vmem:[%s11899_s17 + $0x800] ss:$48 sps:$4 sm:$0xff]   ;;  %v10048_v18 = vld [vmem:[%s11899_s17 + $0x808] ss:$48 sps:$4 sm:$0xff]  }
 0x302   : > { %3629 = vmatpush1.bf16.msra.mxu0 %v9973_v20  ;;  %3715 = vmatpush1.bf16.msra.mxu1 %v9976_v21  ;;  %v10053_v20 = vld [vmem:[%s11899_s17 + $0x864] ss:$48 sps:$4 sm:$0xff]   ;;  %v10056_v21 = vld [vmem:[%s11899_s17 + $0x86c] ss:$48 sps:$4 sm:$0xff]  }
 0x303   : > { %3630 = vmatprep.subr.bf16.mxu0 %v9981_v24  ;;  %3716 = vmatprep.subr.bf16.mxu1 %v9984_v25 }
 0x306   : > { %3631 = vmatpush1.bf16.msra.mxu0 %v9979_v22  ;;  %3717 = vmatpush1.bf16.msra.mxu1 %v9982_v19 }
 0x307   : > { %3632 = vmatprep.subr.bf16.mxu0 %v9987_v23  ;;  %3718 = vmatprep.subr.bf16.mxu1 %v9990_v26 }
 0x30a   : > { %3633 = vmatpush1.bf16.msra.mxu0 %v9985_v27  ;;  %3719 = vmatpush1.bf16.msra.mxu1 %v9988_v28 }
 0x30b   : > { %3634 = vmatprep.subr.bf16.mxu0 %v9993_v29  ;;  %3720 = vmatprep.subr.bf16.mxu1 %v9996_v30 }
 0x30e   : > { %3635 = vmatpush1.bf16.msra.mxu0 %v9991_v31  ;;  %3721 = vmatpush1.bf16.msra.mxu1 %v9994_v32  ;;  %v10051_v31 = vld [vmem:[%s11899_s17 + $0x860] ss:$48 sps:$4 sm:$0xff]   ;;  %v10054_v32 = vld [vmem:[%s11899_s17 + $0x868] ss:$48 sps:$4 sm:$0xff]  }
 0x30f   : > { %3636 = vmatprep.subr.bf16.mxu0 %v9999_v34  ;;  %3722 = vmatprep.subr.bf16.mxu1 %v10002_v35 }
 0x312   : > { %3637 = vmatpush1.bf16.msra.mxu0 %v9997_v36  ;;  %3723 = vmatpush1.bf16.msra.mxu1 %v10000_v38 }
 0x313   : > { %3638 = vmatprep.subr.bf16.mxu0 %v10005_v39  ;;  %3724 = vmatprep.subr.bf16.mxu1 %v10008_v40  ;;  %v10059_v39 = vld [vmem:[%s11899_s17 + $0x8c4] ss:$48 sps:$4 sm:$0xff]   ;;  %v10062_v40 = vld [vmem:[%s11899_s17 + $0x8cc] ss:$48 sps:$4 sm:$0xff]  }
 0x316   : > { %3639 = vmatpush1.bf16.msra.mxu0 %v10003_v41  ;;  %3725 = vmatpush1.bf16.msra.mxu1 %v10006_v42 }
 0x317   : > { %3640 = vmatprep.subr.bf16.mxu0 %v10011_v43  ;;  %3726 = vmatprep.subr.bf16.mxu1 %v10014_v44  ;;  %v10057_v43 = vld [vmem:[%s11899_s17 + $0x8c0] ss:$48 sps:$4 sm:$0xff]   ;;  %v10060_v44 = vld [vmem:[%s11899_s17 + $0x8c8] ss:$48 sps:$4 sm:$0xff]  }
 0x31a   : > { %3641 = vmatpush1.bf16.msra.mxu0 %v10009_v45  ;;  %3727 = vmatpush1.bf16.msra.mxu1 %v10012_v46  ;;  %v10065_v45 = vld [vmem:[%s11899_s17 + $0x924] ss:$48 sps:$4 sm:$0xff]   ;;  %v10068_v46 = vld [vmem:[%s11899_s17 + $0x92c] ss:$48 sps:$4 sm:$0xff]  }
 0x31b   : > { %3653 = vmatprep.subr.bf16.mxu0 %v10017_v47  ;;  %3739 = vmatprep.subr.bf16.mxu1 %v10020_v48  ;;  %v10063_v47 = vld [vmem:[%s11899_s17 + $0x920] ss:$48 sps:$4 sm:$0xff]   ;;  %v10066_v48 = vld [vmem:[%s11899_s17 + $0x928] ss:$48 sps:$4 sm:$0xff]  }
 0x31d   : > { %3643 = vmatmul.mubr.bf16.vlgmr.msra.gmra.mrb[8].mxu0 %v10112_v10  ;;  %3729 = vmatmul.mubr.bf16.vlgmr.msra.gmra.mrb[8].mxu1 %v10112_v10  ;;  %v10077_v10 = vld [vmem:[%s11899_s17 + $0x9e4] ss:$48 sps:$4 sm:$0xff]  }
 0x31e   : > { %3654 = vmatpush1.bf16.msra.mxu0 %v10015_v49  ;;  %3740 = vmatpush1.bf16.msra.mxu1 %v10018_v50  ;;  %v10071_v49 = vld [vmem:[%s11899_s17 + $0x984] ss:$48 sps:$4 sm:$0xff]   ;;  %v10074_v50 = vld [vmem:[%s11899_s17 + $0x98c] ss:$48 sps:$4 sm:$0xff]  }
 0x31f   : > { %3655 = vmatprep.subr.bf16.mxu0 %v10023_v51  ;;  %3741 = vmatprep.subr.bf16.mxu1 %v10026_v33  ;;  %v10069_v51 = vld [vmem:[%s11899_s17 + $0x980] ss:$48 sps:$4 sm:$0xff]   ;;  %v10072_v33 = vld [vmem:[%s11899_s17 + $0x988] ss:$48 sps:$4 sm:$0xff]  }
 0x320   : > { %3685 = vmatprep.mubr.bf16.mxu0 %v10113_v56  ;;  %3771 = vmatprep.mubr.bf16.mxu1 %v10113_v56  ;;  %v10086_v56 = vld [vmem:[%s11899_s17 + $0xa4c] ss:$48 sps:$4 sm:$0xff]  }
 0x322   : > { %3656 = vmatpush1.bf16.msra.mxu0 %v10021_v52  ;;  %3742 = vmatpush1.bf16.msra.mxu1 %v10024_v37  ;;  %v10080_v52 = vld [vmem:[%s11899_s17 + $0x9ec] ss:$48 sps:$4 sm:$0xff]   ;;  %v10075_v37 = vld [vmem:[%s11899_s17 + $0x9e0] ss:$48 sps:$4 sm:$0xff]  }
 0x323   : > { %3657 = vmatprep.subr.bf16.mxu0 %v10029_v53  ;;  %3743 = vmatprep.subr.bf16.mxu1 %v10032_v54  ;;  %v10078_v53 = vld [vmem:[%s11899_s17 + $0x9e8] ss:$48 sps:$4 sm:$0xff]   ;;  %v10083_v54 = vld [vmem:[%s11899_s17 + $0xa44] ss:$48 sps:$4 sm:$0xff]  }
 0x326   : > { %3658 = vmatpush1.bf16.msra.mxu0 %v10027_v57  ;;  %3744 = vmatpush1.bf16.msra.mxu1 %v10030_v58  ;;  %v10084_v57 = vld [vmem:[%s11899_s17 + $0xa48] ss:$48 sps:$4 sm:$0xff]   ;;  %v10089_v58 = vld [vmem:[%s11899_s17 + $0xaa4] ss:$48 sps:$4 sm:$0xff]  }
 0x327   : > { %3659 = vmatprep.subr.bf16.mxu0 %v10035_v59  ;;  %3745 = vmatprep.subr.bf16.mxu1 %v10038_v60  ;;  %v10092_v59 = vld [vmem:[%s11899_s17 + $0xaac] ss:$48 sps:$4 sm:$0xff]   ;;  %v10087_v60 = vld [vmem:[%s11899_s17 + $0xaa0] ss:$48 sps:$4 sm:$0xff]  }
 0x32a   : > { %3660 = vmatpush1.bf16.msra.mxu0 %v10033_v62  ;;  %3746 = vmatpush1.bf16.msra.mxu1 %v10036_v63  ;;  %v10090_v62 = vld [vmem:[%s11899_s17 + $0xaa8] ss:$48 sps:$4 sm:$0xff]   ;;  %v10095_v63 = vld [vmem:[%s11899_s17 + $0xb04] ss:$48 sps:$4 sm:$0xff]  }
 0x32b   : > { %3661 = vmatprep.subr.bf16.mxu0 %v10041_v2  ;;  %3747 = vmatprep.subr.bf16.mxu1 %v10044_v3  ;;  %v10098_v2 = vld [vmem:[%s11899_s17 + $0xb0c] ss:$48 sps:$4 sm:$0xff]   ;;  %v10093_v3 = vld [vmem:[%s11899_s17 + $0xb00] ss:$48 sps:$4 sm:$0xff]  }
 0x32e   : > { %3662 = vmatpush1.bf16.msra.mxu0 %v10039_v6  ;;  %3748 = vmatpush1.bf16.msra.mxu1 %v10042_v7  ;;  %v10096_v6 = vld [vmem:[%s11899_s17 + $0xb08] ss:$48 sps:$4 sm:$0xff]   ;;  %v10101_v7 = vld [vmem:[%s11899_s17 + $0xb64] ss:$48 sps:$4 sm:$0xff]  }
 0x32f   : > { %3663 = vmatprep.subr.bf16.mxu0 %v10047_v11  ;;  %3749 = vmatprep.subr.bf16.mxu1 %v10050_v12  ;;  %v10104_v11 = vld [vmem:[%s11899_s17 + $0xb6c] ss:$48 sps:$4 sm:$0xff]   ;;  %v10099_v12 = vld [vmem:[%s11899_s17 + $0xb60] ss:$48 sps:$4 sm:$0xff]  }
 0x330   : > { %v3343_v24 = vpop.f32.mrb[0].mxu0  ;;  %v3429_v25 = vpop.f32.mrb[0].mxu1 }
 0x331   : > { %v9346_v22 = vadd.f32 %v3343_v24, %v1289_v13  ;;  %v9350_v19 = vadd.f32 %v3429_v25, %v1297_v14  ;;  %v3345_v23 = vpop.f32.mrb[1].mxu0  ;;  %v3431_v26 = vpop.f32.mrb[1].mxu1  ;;  %v1308_v24 = vsub.s32 5, %v12329_v61  ;;  %v1316_v25 = vsub.s32 7, %v12329_v61 }
 0x332   : > { %v9347_v27 = vadd.f32 %v3345_v23, %v1293_v15  ;;  %v9351_v28 = vadd.f32 %v3431_v26, %v1301_v16  ;;  %v3347_v29 = vpop.f32.mrb[2].mxu0  ;;  %v3433_v30 = vpop.f32.mrb[2].mxu1  ;;  %3664 = vmatpush1.bf16.msra.mxu0 %v10045_v17  ;;  %3750 = vmatpush1.bf16.msra.mxu1 %v10048_v18  ;;  %v10108_v17 = vld [vmem:[%s11899_s17 + $0xbc8] ss:$48 sps:$4 sm:$0xff]   ;;  %v10114_v18 = vld [vmem:[#allocation2 + $0x10] sm:$0xff] }
 0x333   : > { %3782 = vst [vmem:[#allocation3] sm:$0xff] %v9346_v22  ;;  %3784 = vst [vmem:[#allocation3 + $0x10] sm:$0xff] %v9350_v19  ;;  %v9348_v34 = vadd.f32 %v3347_v29, %v1289_v13  ;;  %v9352_v35 = vadd.f32 %v3433_v30, %v1297_v14  ;;  %v3349_v36 = vpop.f32.mrb[3].mxu0  ;;  %v3435_v38 = vpop.f32.mrb[3].mxu1  ;;  %3665 = vmatprep.subr.bf16.mxu0 %v10053_v20  ;;  %3751 = vmatprep.subr.bf16.mxu1 %v10056_v21  ;;  %v10102_v13 = vld [vmem:[%s11899_s17 + $0xb68] ss:$48 sps:$4 sm:$0xff]  }
 0x334   : > { %3783 = vst [vmem:[#allocation3 + $0x8] sm:$0xff] %v9347_v27  ;;  %3785 = vst [vmem:[#allocation3 + $0x18] sm:$0xff] %v9351_v28  ;;  %v9349_v41 = vadd.f32 %v3349_v36, %v1293_v15  ;;  %v9353_v42 = vadd.f32 %v3435_v38, %v1301_v16  ;;  %v10107_v14 = vld [vmem:[%s11899_s17 + $0xbc4] ss:$48 sps:$4 sm:$0xff]   ;;  %v10110_v15 = vld [vmem:[%s11899_s17 + $0xbcc] ss:$48 sps:$4 sm:$0xff]   ;;  %v1309_v23 = vrot.slane %v11922_v0, %v1308_v24 }
 0x335   : > { %3794 = vst [vmem:[#allocation3 + $0x60] sm:$0xff] %v9348_v34  ;;  %3796 = vst [vmem:[#allocation3 + $0x70] sm:$0xff] %v9352_v35  ;;  %v10105_v16 = vld [vmem:[%s11899_s17 + $0xbc0] ss:$48 sps:$4 sm:$0xff]   ;;  %v1304_v20 = vsub.s32 4, %v12329_v61  ;;  %v1312_v21 = vsub.s32 6, %v12329_v61  ;;  %v1317_v26 = vrot.slane %v11922_v0, %v1316_v25 }
 0x336   : > { %3795 = vst [vmem:[#allocation3 + $0x68] sm:$0xff] %v9349_v41  ;;  %3797 = vst [vmem:[#allocation3 + $0x78] sm:$0xff] %v9353_v42  ;;  %3666 = vmatpush1.bf16.msra.mxu0 %v10051_v31  ;;  %3752 = vmatpush1.bf16.msra.mxu1 %v10054_v32 }
 0x337   : > { %3667 = vmatprep.subr.bf16.mxu0 %v10059_v39  ;;  %3753 = vmatprep.subr.bf16.mxu1 %v10062_v40  ;;  %v1305_v22 = vrot.slane %v11922_v0, %v1304_v20  ;;  %v1313_v19 = vrot.slane %v11922_v0, %v1312_v21 }
 0x33a   : > { %3668 = vmatpush1.bf16.msra.mxu0 %v10057_v43  ;;  %3754 = vmatpush1.bf16.msra.mxu1 %v10060_v44  ;;  %v1321_v44 = vrot.slane %v11924_v1, %v1288_v4 }
 0x33b   : > { %3669 = vmatprep.subr.bf16.mxu0 %v10065_v45  ;;  %3755 = vmatprep.subr.bf16.mxu1 %v10068_v46  ;;  %v1329_v45 = vrot.slane %v11924_v1, %v1296_v5  ;;  %v1325_v46 = vrot.slane %v11924_v1, %v1292_v8 }
 0x33e   : > { %3670 = vmatpush1.bf16.msra.mxu0 %v10063_v47  ;;  %3756 = vmatpush1.bf16.msra.mxu1 %v10066_v48  ;;  %v1333_v47 = vrot.slane %v11924_v1, %v1300_v9 }
 0x33f   : > { %3671 = vmatprep.subr.bf16.mxu0 %v10071_v49  ;;  %3757 = vmatprep.subr.bf16.mxu1 %v10074_v50 }
 0x342   : > { %3672 = vmatpush1.bf16.msra.mxu0 %v10069_v51  ;;  %3758 = vmatpush1.bf16.msra.mxu1 %v10072_v33 }
 0x343   : > { %3673 = vmatprep.subr.bf16.mxu0 %v10077_v10  ;;  %3759 = vmatprep.subr.bf16.mxu1 %v10080_v52 }
 0x346   : > { %3674 = vmatpush1.bf16.msra.mxu0 %v10075_v37  ;;  %3760 = vmatpush1.bf16.msra.mxu1 %v10078_v53 }
 0x347   : > { %3675 = vmatprep.subr.bf16.mxu0 %v10083_v54  ;;  %3761 = vmatprep.subr.bf16.mxu1 %v10086_v56 }
 0x34a   : > { %3676 = vmatpush1.bf16.msra.mxu0 %v10081_v55  ;;  %3762 = vmatpush1.bf16.msra.mxu1 %v10084_v57 }
 0x34b   : > { %3677 = vmatprep.subr.bf16.mxu0 %v10089_v58  ;;  %3763 = vmatprep.subr.bf16.mxu1 %v10092_v59 }
 0x34e   : > { %3678 = vmatpush1.bf16.msra.mxu0 %v10087_v60  ;;  %3764 = vmatpush1.bf16.msra.mxu1 %v10090_v62 }
 0x34f   : > { %3679 = vmatprep.subr.bf16.mxu0 %v10095_v63  ;;  %3765 = vmatprep.subr.bf16.mxu1 %v10098_v2 }
 0x352   : > { %3680 = vmatpush1.bf16.msra.mxu0 %v10093_v3  ;;  %3766 = vmatpush1.bf16.msra.mxu1 %v10096_v6 }
 0x353   : > { %3681 = vmatprep.subr.bf16.mxu0 %v10101_v7  ;;  %3767 = vmatprep.subr.bf16.mxu1 %v10104_v11 }
 0x356   : > { %3682 = vmatpush1.bf16.msra.mxu0 %v10099_v12  ;;  %3768 = vmatpush1.bf16.msra.mxu1 %v10102_v13 }
 0x357   : > { %3683 = vmatprep.subr.bf16.mxu0 %v10107_v14  ;;  %3769 = vmatprep.subr.bf16.mxu1 %v10110_v15 }
 0x35a   : > { %3684 = vmatpush1.bf16.msra.mxu0 %v10105_v16  ;;  %3770 = vmatpush1.bf16.msra.mxu1 %v10108_v17 }
 0x35d   : > { %3686 = vmatmul.mubr.bf16.vlgmr.msra.gmra.mrb[8].mxu0 %v10114_v18  ;;  %3772 = vmatmul.mubr.bf16.vlgmr.msra.gmra.mrb[8].mxu1 %v10114_v18 }
 0x3b0   : > { %v3515_v27 = vpop.f32.mrb[4].mxu0  ;;  %v3601_v28 = vpop.f32.mrb[4].mxu1 }
 0x3b1   : > { %v9354_v29 = vadd.f32 %v3515_v27, %v1305_v22  ;;  %v9358_v30 = vadd.f32 %v3601_v28, %v1313_v19  ;;  %v3517_v31 = vpop.f32.mrb[5].mxu0  ;;  %v3603_v32 = vpop.f32.mrb[5].mxu1 }
 0x3b2   : > { %v9355_v34 = vadd.f32 %v3517_v31, %v1309_v23  ;;  %v9359_v35 = vadd.f32 %v3603_v32, %v1317_v26  ;;  %v3519_v36 = vpop.f32.mrb[6].mxu0  ;;  %v3605_v38 = vpop.f32.mrb[6].mxu1 }
 0x3b3   : > { %3786 = vst [vmem:[#allocation3 + $0x20] sm:$0xff] %v9354_v29  ;;  %3788 = vst [vmem:[#allocation3 + $0x30] sm:$0xff] %v9358_v30  ;;  %v9356_v39 = vadd.f32 %v3519_v36, %v1305_v22  ;;  %v9360_v40 = vadd.f32 %v3605_v38, %v1313_v19  ;;  %v3521_v41 = vpop.f32.mrb[7].mxu0  ;;  %v3607_v42 = vpop.f32.mrb[7].mxu1 }
 0x3b4   : > { %3787 = vst [vmem:[#allocation3 + $0x28] sm:$0xff] %v9355_v34  ;;  %3789 = vst [vmem:[#allocation3 + $0x38] sm:$0xff] %v9359_v35  ;;  %v9357_v43 = vadd.f32 %v3521_v41, %v1309_v23  ;;  %v9361_v0 = vadd.f32 %v3607_v42, %v1317_v26 }
 0x3b5   : > { %3798 = vst [vmem:[#allocation3 + $0x80] sm:$0xff] %v9356_v39  ;;  %3800 = vst [vmem:[#allocation3 + $0x90] sm:$0xff] %v9360_v40 }
 0x3b6   : > { %3799 = vst [vmem:[#allocation3 + $0x88] sm:$0xff] %v9357_v43  ;;  %3801 = vst [vmem:[#allocation3 + $0x98] sm:$0xff] %v9361_v0 }
 0x430   : > { %v3687_v48 = vpop.f32.mrb[8].mxu0  ;;  %v3773_v49 = vpop.f32.mrb[8].mxu1 }
 0x431   : > { %v9362_v50 = vadd.f32 %v3687_v48, %v1321_v44  ;;  %v9366_v51 = vadd.f32 %v3773_v49, %v1329_v45  ;;  %v3689_v33 = vpop.f32.mrb[9].mxu0  ;;  %v3775_v10 = vpop.f32.mrb[9].mxu1 }
 0x432   : > { %v9363_v52 = vadd.f32 %v3689_v33, %v1325_v46  ;;  %v9367_v4 = vadd.f32 %v3775_v10, %v1333_v47  ;;  %v3691_v37 = vpop.f32.mrb[10].mxu0  ;;  %v3777_v53 = vpop.f32.mrb[10].mxu1 }
 0x433   : > { %3790 = vst [vmem:[#allocation3 + $0x40] sm:$0xff] %v9362_v50  ;;  %3792 = vst [vmem:[#allocation3 + $0x50] sm:$0xff] %v9366_v51  ;;  %v9364_v5 = vadd.f32 %v3691_v37, %v1321_v44  ;;  %v9368_v54 = vadd.f32 %v3777_v53, %v1329_v45  ;;  %v3693_v56 = vpop.f32.mrb[11].mxu0  ;;  %v3779_v8 = vpop.f32.mrb[11].mxu1 }
 0x434   : > { %3791 = vst [vmem:[#allocation3 + $0x48] sm:$0xff] %v9363_v52  ;;  %3793 = vst [vmem:[#allocation3 + $0x58] sm:$0xff] %v9367_v4  ;;  %v9365_v61 = vadd.f32 %v3693_v56, %v1325_v46  ;;  %v9369_v1 = vadd.f32 %v3779_v8, %v1333_v47 }
 0x435   : > { %3802 = vst [vmem:[#allocation3 + $0xa0] sm:$0xff] %v9364_v5  ;;  %3804 = vst [vmem:[#allocation3 + $0xb0] sm:$0xff] %v9368_v54 }
 0x436   : > { %3803 = vst [vmem:[#allocation3 + $0xa8] sm:$0xff] %v9365_v61  ;;  %3805 = vst [vmem:[#allocation3 + $0xb8] sm:$0xff] %v9369_v1 }
 0x437 PF: > { %v10115_v9 = vld [vmem:[%s11906_s6 + $0x4] ss:$24 sps:$4 sm:$0xff]   ;;  %v16742_v57 = vmov 0.0|0.0   ;;  %v10119_v58 = vld [vmem:[%s11906_s6] ss:$24 sps:$4 sm:$0xff]   ;;  %vm4036_vm1 = vcmask 1041408  }
 0x438   : > { %v10117_v55 = vld [vmem:[%s11906_s6 + $0x304] ss:$24 sps:$4 sm:$0xff]   ;;  %5088 = vmatprep.mubr.bf16.mxu0 %v16742_v57  ;;  %5129 = vmatprep.mubr.bf16.mxu1 %v16742_v57  ;;  %v10120_v59 = vld [vmem:[%s11906_s6 + $0x300] ss:$24 sps:$4 sm:$0xff]   ;;  %v10121_v60 = vld [vmem:[%s11906_s6 + $0x34] ss:$24 sps:$4 sm:$0xff]  }
 0x439   : > { %5056 = vmatprep.subr.bf16.mxu0 %v10115_v9  ;;  %5097 = vmatprep.subr.bf16.mxu1 %v10117_v55  ;;  %v10123_v62 = vld [vmem:[%s11906_s6 + $0x334] ss:$24 sps:$4 sm:$0xff]   ;;  %v10125_v63 = vld [vmem:[%s11906_s6 + $0x30] ss:$24 sps:$4 sm:$0xff]   ;;  %v10127_v3 = vld [vmem:[%s11906_s6 + $0x64] ss:$24 sps:$4 sm:$0xff]  }
 0x43a   : > { %5057 = vmatpush1.bf16.msra.mxu0 %v10119_v58  ;;  %5098 = vmatpush1.bf16.msra.mxu1 %v10120_v59  ;;  %v10126_v2 = vld [vmem:[%s11906_s6 + $0x330] ss:$24 sps:$4 sm:$0xff]   ;;  %v10129_v6 = vld [vmem:[%s11906_s6 + $0x364] ss:$24 sps:$4 sm:$0xff]   ;;  %v10131_v7 = vld [vmem:[%s11906_s6 + $0x60] ss:$24 sps:$4 sm:$0xff]  }
 0x43b   : > { %5058 = vmatprep.subr.bf16.mxu0 %v10121_v60  ;;  %5099 = vmatprep.subr.bf16.mxu1 %v10123_v62  ;;  %v10132_v11 = vld [vmem:[%s11906_s6 + $0x360] ss:$24 sps:$4 sm:$0xff]   ;;  %v10133_v12 = vld [vmem:[%s11906_s6 + $0x94] ss:$24 sps:$4 sm:$0xff]   ;;  %v10137_v14 = vld [vmem:[%s11906_s6 + $0x90] ss:$24 sps:$4 sm:$0xff]  }
 0x43c   : > { %v10135_v13 = vld [vmem:[%s11906_s6 + $0x394] ss:$24 sps:$4 sm:$0xff]   ;;  %v10138_v15 = vld [vmem:[%s11906_s6 + $0x390] ss:$24 sps:$4 sm:$0xff]   ;;  %v10139_v16 = vld [vmem:[%s11906_s6 + $0xc4] ss:$24 sps:$4 sm:$0xff]  }
 0x43d   : > { %v10141_v17 = vld [vmem:[%s11906_s6 + $0x3c4] ss:$24 sps:$4 sm:$0xff]   ;;  %v10143_v18 = vld [vmem:[%s11906_s6 + $0xc0] ss:$24 sps:$4 sm:$0xff]   ;;  %v10145_v21 = vld [vmem:[%s11906_s6 + $0xf4] ss:$24 sps:$4 sm:$0xff]  }
 0x43e   : > { %5059 = vmatpush1.bf16.msra.mxu0 %v10125_v63  ;;  %5100 = vmatpush1.bf16.msra.mxu1 %v10126_v2  ;;  %v10144_v20 = vld [vmem:[%s11906_s6 + $0x3c0] ss:$24 sps:$4 sm:$0xff]   ;;  %v10147_v24 = vld [vmem:[%s11906_s6 + $0x3f4] ss:$24 sps:$4 sm:$0xff]   ;;  %v10149_v25 = vld [vmem:[%s11906_s6 + $0xf0] ss:$24 sps:$4 sm:$0xff]  }
 0x43f   : > { %5060 = vmatprep.subr.bf16.mxu0 %v10127_v3  ;;  %5101 = vmatprep.subr.bf16.mxu1 %v10129_v6  ;;  %v10150_v22 = vld [vmem:[%s11906_s6 + $0x3f0] ss:$24 sps:$4 sm:$0xff]   ;;  %v10151_v19 = vld [vmem:[%s11906_s6 + $0x124] ss:$24 sps:$4 sm:$0xff]   ;;  %v10155_v26 = vld [vmem:[%s11906_s6 + $0x120] ss:$24 sps:$4 sm:$0xff]  }
 0x440   : > { %v10153_v23 = vld [vmem:[%s11906_s6 + $0x424] ss:$24 sps:$4 sm:$0xff]   ;;  %v10156_v27 = vld [vmem:[%s11906_s6 + $0x420] ss:$24 sps:$4 sm:$0xff]   ;;  %v10157_v28 = vld [vmem:[%s11906_s6 + $0x154] ss:$24 sps:$4 sm:$0xff]  }
 0x441   : > { %v10159_v29 = vld [vmem:[%s11906_s6 + $0x454] ss:$24 sps:$4 sm:$0xff]   ;;  %v10161_v30 = vld [vmem:[%s11906_s6 + $0x150] ss:$24 sps:$4 sm:$0xff]   ;;  %v10163_v32 = vld [vmem:[%s11906_s6 + $0x184] ss:$24 sps:$4 sm:$0xff]  }
 0x442   : > { %5061 = vmatpush1.bf16.msra.mxu0 %v10131_v7  ;;  %5102 = vmatpush1.bf16.msra.mxu1 %v10132_v11  ;;  %v10162_v31 = vld [vmem:[%s11906_s6 + $0x450] ss:$24 sps:$4 sm:$0xff]   ;;  %v10165_v34 = vld [vmem:[%s11906_s6 + $0x484] ss:$24 sps:$4 sm:$0xff]   ;;  %v12454_v35 = vld [vmem:[%s11906_s6 + $0x180] ss:$24 sps:$4 sm:$0xff]  }
 0x443   : > { %5062 = vmatprep.subr.bf16.mxu0 %v10133_v12  ;;  %5103 = vmatprep.subr.bf16.mxu1 %v10135_v13  ;;  %v12457_v36 = vld [vmem:[%s11906_s6 + $0x480] ss:$24 sps:$4 sm:$0xff]   ;;  %v12460_v38 = vld [vmem:[%s11906_s6 + $0x1b4] ss:$24 sps:$4 sm:$0xff]   ;;  %v12466_v40 = vld [vmem:[%s11906_s6 + $0x1b0] ss:$24 sps:$4 sm:$0xff]  }
 0x444   : > { %v12463_v39 = vld [vmem:[%s11906_s6 + $0x4b4] ss:$24 sps:$4 sm:$0xff]   ;;  %v12471_v41 = vld [vmem:[%s11906_s6 + $0x4b0] ss:$24 sps:$4 sm:$0xff]   ;;  %v12474_v42 = vld [vmem:[%s11906_s6 + $0x1e4] ss:$24 sps:$4 sm:$0xff]  }
 0x445   : > { %v12479_v43 = vld [vmem:[%s11906_s6 + $0x4e4] ss:$24 sps:$4 sm:$0xff]   ;;  %v12482_v0 = vld [vmem:[%s11906_s6 + $0x1e0] ss:$24 sps:$4 sm:$0xff]   ;;  %v12490_v45 = vld [vmem:[%s11906_s6 + $0x214] ss:$24 sps:$4 sm:$0xff]  }
 0x446   : > { %5063 = vmatpush1.bf16.msra.mxu0 %v10137_v14  ;;  %5104 = vmatpush1.bf16.msra.mxu1 %v10138_v15  ;;  %v12485_v44 = vld [vmem:[%s11906_s6 + $0x4e0] ss:$24 sps:$4 sm:$0xff]   ;;  %v12495_v46 = vld [vmem:[%s11906_s6 + $0x514] ss:$24 sps:$4 sm:$0xff]   ;;  %v12498_v47 = vld [vmem:[%s11906_s6 + $0x210] ss:$24 sps:$4 sm:$0xff]  }
 0x447   : > { %5064 = vmatprep.subr.bf16.mxu0 %v10139_v16  ;;  %5105 = vmatprep.subr.bf16.mxu1 %v10141_v17  ;;  %v12503_v48 = vld [vmem:[%s11906_s6 + $0x510] ss:$24 sps:$4 sm:$0xff]   ;;  %v12506_v49 = vld [vmem:[%s11906_s6 + $0x244] ss:$24 sps:$4 sm:$0xff]   ;;  %v12514_v51 = vld [vmem:[%s11906_s6 + $0x240] ss:$24 sps:$4 sm:$0xff]  }
 0x448   : > { %v12511_v50 = vld [vmem:[%s11906_s6 + $0x544] ss:$24 sps:$4 sm:$0xff]   ;;  %v12517_v33 = vld [vmem:[%s11906_s6 + $0x540] ss:$24 sps:$4 sm:$0xff]   ;;  %v12522_v10 = vld [vmem:[%s11906_s6 + $0x274] ss:$24 sps:$4 sm:$0xff]  }
 0x449   : > { %v12527_v52 = vld [vmem:[%s11906_s6 + $0x574] ss:$24 sps:$4 sm:$0xff]   ;;  %v12530_v4 = vld [vmem:[%s11906_s6 + $0x270] ss:$24 sps:$4 sm:$0xff]   ;;  %v12538_v53 = vld [vmem:[%s11906_s6 + $0x2a4] ss:$24 sps:$4 sm:$0xff]  }
 0x44a   : > { %5065 = vmatpush1.bf16.msra.mxu0 %v10143_v18  ;;  %5106 = vmatpush1.bf16.msra.mxu1 %v10144_v20  ;;  %v12535_v37 = vld [vmem:[%s11906_s6 + $0x570] ss:$24 sps:$4 sm:$0xff]   ;;  %v12543_v5 = vld [vmem:[%s11906_s6 + $0x5a4] ss:$24 sps:$4 sm:$0xff]   ;;  %v12546_v54 = vld [vmem:[%s11906_s6 + $0x2a0] ss:$24 sps:$4 sm:$0xff]  }
 0x44b   : > { %5066 = vmatprep.subr.bf16.mxu0 %v10145_v21  ;;  %5107 = vmatprep.subr.bf16.mxu1 %v10147_v24  ;;  %v12549_v56 = vld [vmem:[%s11906_s6 + $0x5a0] ss:$24 sps:$4 sm:$0xff]   ;;  %v12554_v8 = vld [vmem:[%s11906_s6 + $0x2d4] ss:$24 sps:$4 sm:$0xff]   ;;  %v12562_v1 = vld [vmem:[%s11906_s6 + $0x2d0] ss:$24 sps:$4 sm:$0xff]  }
 0x44c   : > { %v12559_v61 = vld [vmem:[%s11906_s6 + $0x5d4] ss:$24 sps:$4 sm:$0xff]   ;;  %v12567_v9 = vld [vmem:[%s11906_s6 + $0x5d0] ss:$24 sps:$4 sm:$0xff]   ;;  %vm11519_vm3 = vmmov 1   ;;  %p9263_p2 = scmp.ne.s32.totalorder %s11603_s12, 2 }
 0x44d   : > { %v12570_v55 = vld [vmem:[%s11906_s6 + $0xc] ss:$24 sps:$4 sm:$0xff]   ;;  %v10215_v59 = vld [vmem:[%s11906_s6 + $0x8] ss:$24 sps:$4 sm:$0xff]   ;;  %v10217_v62 = vld [vmem:[%s11906_s6 + $0x3c] ss:$24 sps:$4 sm:$0xff]  }
 0x44e   : > { %5067 = vmatpush1.bf16.msra.mxu0 %v10149_v25  ;;  %5108 = vmatpush1.bf16.msra.mxu1 %v10150_v22  ;;  %v12575_v58 = vld [vmem:[%s11906_s6 + $0x30c] ss:$24 sps:$4 sm:$0xff]   ;;  %v10216_v60 = vld [vmem:[%s11906_s6 + $0x308] ss:$24 sps:$4 sm:$0xff]   ;;  %v10219_v63 = vld [vmem:[%s11906_s6 + $0x33c] ss:$24 sps:$4 sm:$0xff]  }
 0x44f   : > { %5068 = vmatprep.subr.bf16.mxu0 %v10151_v19  ;;  %5109 = vmatprep.subr.bf16.mxu1 %v10153_v23  ;;  %v10221_v2 = vld [vmem:[%s11906_s6 + $0x38] ss:$24 sps:$4 sm:$0xff]   ;;  %v10223_v6 = vld [vmem:[%s11906_s6 + $0x6c] ss:$24 sps:$4 sm:$0xff]   ;;  %v10227_v11 = vld [vmem:[%s11906_s6 + $0x68] ss:$24 sps:$4 sm:$0xff]  }
 0x450   : > { %v10222_v3 = vld [vmem:[%s11906_s6 + $0x338] ss:$24 sps:$4 sm:$0xff]   ;;  %v10225_v7 = vld [vmem:[%s11906_s6 + $0x36c] ss:$24 sps:$4 sm:$0xff]   ;;  %v10228_v12 = vld [vmem:[%s11906_s6 + $0x368] ss:$24 sps:$4 sm:$0xff]  }
 0x451   : > { %v10229_v13 = vld [vmem:[%s11906_s6 + $0x9c] ss:$24 sps:$4 sm:$0xff]   ;;  %v10233_v15 = vld [vmem:[%s11906_s6 + $0x98] ss:$24 sps:$4 sm:$0xff]   ;;  %v10235_v17 = vld [vmem:[%s11906_s6 + $0xcc] ss:$24 sps:$4 sm:$0xff]  }
 0x452   : > { %5069 = vmatpush1.bf16.msra.mxu0 %v10155_v26  ;;  %5110 = vmatpush1.bf16.msra.mxu1 %v10156_v27  ;;  %v10231_v14 = vld [vmem:[%s11906_s6 + $0x39c] ss:$24 sps:$4 sm:$0xff]   ;;  %v10234_v16 = vld [vmem:[%s11906_s6 + $0x398] ss:$24 sps:$4 sm:$0xff]   ;;  %v10237_v18 = vld [vmem:[%s11906_s6 + $0x3cc] ss:$24 sps:$4 sm:$0xff]  }
 0x453   : > { %5070 = vmatprep.subr.bf16.mxu0 %v10157_v28  ;;  %5111 = vmatprep.subr.bf16.mxu1 %v10159_v29  ;;  %v10239_v20 = vld [vmem:[%s11906_s6 + $0xc8] ss:$24 sps:$4 sm:$0xff]   ;;  %v10241_v24 = vld [vmem:[%s11906_s6 + $0xfc] ss:$24 sps:$4 sm:$0xff]   ;;  %v12606_v22 = vld [vmem:[%s11906_s6 + $0xf8] ss:$24 sps:$4 sm:$0xff]  }
 0x454   : > { %v10240_v21 = vld [vmem:[%s11906_s6 + $0x3c8] ss:$24 sps:$4 sm:$0xff]   ;;  %v10243_v25 = vld [vmem:[%s11906_s6 + $0x3fc] ss:$24 sps:$4 sm:$0xff]   ;;  %v12609_v19 = vld [vmem:[%s11906_s6 + $0x3f8] ss:$24 sps:$4 sm:$0xff]  }
 0x455   : > { %v12612_v23 = vld [vmem:[%s11906_s6 + $0x12c] ss:$24 sps:$4 sm:$0xff]   ;;  %v12618_v27 = vld [vmem:[%s11906_s6 + $0x128] ss:$24 sps:$4 sm:$0xff]   ;;  %v12626_v29 = vld [vmem:[%s11906_s6 + $0x15c] ss:$24 sps:$4 sm:$0xff]  }
 0x456   : > { %5071 = vmatpush1.bf16.msra.mxu0 %v10161_v30  ;;  %5112 = vmatpush1.bf16.msra.mxu1 %v10162_v31  ;;  %v12615_v26 = vld [vmem:[%s11906_s6 + $0x42c] ss:$24 sps:$4 sm:$0xff]   ;;  %v12621_v28 = vld [vmem:[%s11906_s6 + $0x428] ss:$24 sps:$4 sm:$0xff]   ;;  %v12631_v30 = vld [vmem:[%s11906_s6 + $0x45c] ss:$24 sps:$4 sm:$0xff]  }
 0x457   : > { %5072 = vmatprep.subr.bf16.mxu0 %v10163_v32  ;;  %5113 = vmatprep.subr.bf16.mxu1 %v10165_v34  ;;  %v12634_v31 = vld [vmem:[%s11906_s6 + $0x158] ss:$24 sps:$4 sm:$0xff]   ;;  %v12642_v34 = vld [vmem:[%s11906_s6 + $0x18c] ss:$24 sps:$4 sm:$0xff]   ;;  %s18127_s14 = sld [smem:[#allocation155_spill]] (!%p9263_p2)  ;;  %s18128_s11 = sld [smem:[#allocation152_spill]] (!%p9263_p2) }
 0x458   : > { %v12639_v32 = vld [vmem:[%s11906_s6 + $0x458] ss:$24 sps:$4 sm:$0xff]   ;;  %vm8221_vm8 = vcmask (!%p9263_p2), 123904  }
 0x45a   : > { %5073 = vmatpush1.bf16.msra.mxu0 %v12454_v35  ;;  %5114 = vmatpush1.bf16.msra.mxu1 %v12457_v36 }
 0x45b   : > { %5074 = vmatprep.subr.bf16.mxu0 %v12460_v38  ;;  %5115 = vmatprep.subr.bf16.mxu1 %v12463_v39 }
 0x45e   : > { %5075 = vmatpush1.bf16.msra.mxu0 %v12466_v40  ;;  %5116 = vmatpush1.bf16.msra.mxu1 %v12471_v41 }
 0x45f   : > { %5076 = vmatprep.subr.bf16.mxu0 %v12474_v42  ;;  %5117 = vmatprep.subr.bf16.mxu1 %v12479_v43 }
 0x462   : > { %5077 = vmatpush1.bf16.msra.mxu0 %v12482_v0  ;;  %5118 = vmatpush1.bf16.msra.mxu1 %v12485_v44 }
 0x463   : > { %5078 = vmatprep.subr.bf16.mxu0 %v12490_v45  ;;  %5119 = vmatprep.subr.bf16.mxu1 %v12495_v46 }
 0x466   : > { %5079 = vmatpush1.bf16.msra.mxu0 %v12498_v47  ;;  %5120 = vmatpush1.bf16.msra.mxu1 %v12503_v48 }
 0x467   : > { %5080 = vmatprep.subr.bf16.mxu0 %v12506_v49  ;;  %5121 = vmatprep.subr.bf16.mxu1 %v12511_v50 }
 0x46a   : > { %5081 = vmatpush1.bf16.msra.mxu0 %v12514_v51  ;;  %5122 = vmatpush1.bf16.msra.mxu1 %v12517_v33 }
 0x46b   : > { %5082 = vmatprep.subr.bf16.mxu0 %v12522_v10  ;;  %5123 = vmatprep.subr.bf16.mxu1 %v12527_v52 }
 0x46e   : > { %5083 = vmatpush1.bf16.msra.mxu0 %v12530_v4  ;;  %5124 = vmatpush1.bf16.msra.mxu1 %v12535_v37 }
 0x46f   : > { %5084 = vmatprep.subr.bf16.mxu0 %v12538_v53  ;;  %5125 = vmatprep.subr.bf16.mxu1 %v12543_v5 }
 0x472   : > { %5085 = vmatpush1.bf16.msra.mxu0 %v12546_v54  ;;  %5126 = vmatpush1.bf16.msra.mxu1 %v12549_v56 }
 0x473   : > { %5086 = vmatprep.subr.bf16.mxu0 %v12554_v8  ;;  %5127 = vmatprep.subr.bf16.mxu1 %v12559_v61 }
 0x476   : > { %5087 = vmatpush1.bf16.msra.mxu0 %v12562_v1  ;;  %5128 = vmatpush1.bf16.msra.mxu1 %v12567_v9 }
 0x477   : > { %5138 = vmatprep.subr.bf16.mxu0 %v12570_v55  ;;  %5179 = vmatprep.subr.bf16.mxu1 %v12575_v58 }
 0x479   : > { %5089 = vmatmul.mubr.bf16.vlgmr.msra.gmra.mrb[0].mxu0 %v16742_v57  ;;  %5130 = vmatmul.mubr.bf16.vlgmr.msra.gmra.mrb[0].mxu1 %v16742_v57 }
 0x47a   : > { %5139 = vmatpush1.bf16.msra.mxu0 %v10215_v59  ;;  %5180 = vmatpush1.bf16.msra.mxu1 %v10216_v60  ;;  %v12647_v59 = vld [vmem:[%s11906_s6 + $0x48c] ss:$24 sps:$4 sm:$0xff]   ;;  %v12650_v60 = vld [vmem:[%s11906_s6 + $0x188] ss:$24 sps:$4 sm:$0xff]  }
 0x47b   : > { %5140 = vmatprep.subr.bf16.mxu0 %v10217_v62  ;;  %5181 = vmatprep.subr.bf16.mxu1 %v10219_v63  ;;  %v12653_v62 = vld [vmem:[%s11906_s6 + $0x488] ss:$24 sps:$4 sm:$0xff]   ;;  %v12658_v63 = vld [vmem:[%s11906_s6 + $0x1bc] ss:$24 sps:$4 sm:$0xff]  }
 0x47c   : > { %5170 = vmatprep.mubr.bf16.mxu0 %v16742_v57  ;;  %5211 = vmatprep.mubr.bf16.mxu1 %v16742_v57  ;;  %v12727_v57 = vld [vmem:[%s11906_s6 + $0x57c] ss:$24 sps:$4 sm:$0xff]  }
 0x47d   : > { %17238 = vst [vmem:[#allocation36_spill] sm:$0xff] %v12727_v57 }
 0x47e   : > { %5141 = vmatpush1.bf16.msra.mxu0 %v10221_v2  ;;  %5182 = vmatpush1.bf16.msra.mxu1 %v10222_v3  ;;  %v12663_v2 = vld [vmem:[%s11906_s6 + $0x4bc] ss:$24 sps:$4 sm:$0xff]   ;;  %v12666_v3 = vld [vmem:[%s11906_s6 + $0x1b8] ss:$24 sps:$4 sm:$0xff]  }
 0x47f   : > { %5142 = vmatprep.subr.bf16.mxu0 %v10223_v6  ;;  %5183 = vmatprep.subr.bf16.mxu1 %v10225_v7  ;;  %v12671_v6 = vld [vmem:[%s11906_s6 + $0x4b8] ss:$24 sps:$4 sm:$0xff]   ;;  %v12674_v7 = vld [vmem:[%s11906_s6 + $0x1ec] ss:$24 sps:$4 sm:$0xff]  }
 0x482   : > { %5143 = vmatpush1.bf16.msra.mxu0 %v10227_v11  ;;  %5184 = vmatpush1.bf16.msra.mxu1 %v10228_v12  ;;  %v12679_v11 = vld [vmem:[%s11906_s6 + $0x4ec] ss:$24 sps:$4 sm:$0xff]   ;;  %v12682_v12 = vld [vmem:[%s11906_s6 + $0x1e8] ss:$24 sps:$4 sm:$0xff]  }
 0x483   : > { %5144 = vmatprep.subr.bf16.mxu0 %v10229_v13  ;;  %5185 = vmatprep.subr.bf16.mxu1 %v10231_v14  ;;  %v12685_v13 = vld [vmem:[%s11906_s6 + $0x4e8] ss:$24 sps:$4 sm:$0xff]   ;;  %v12690_v14 = vld [vmem:[%s11906_s6 + $0x21c] ss:$24 sps:$4 sm:$0xff]  }
 0x484   : > { %17230 = vst [vmem:[#allocation28_spill] sm:$0xff] %v12690_v14 }
 0x486   : > { %5145 = vmatpush1.bf16.msra.mxu0 %v10233_v15  ;;  %5186 = vmatpush1.bf16.msra.mxu1 %v10234_v16  ;;  %v12695_v15 = vld [vmem:[%s11906_s6 + $0x51c] ss:$24 sps:$4 sm:$0xff]   ;;  %v12698_v16 = vld [vmem:[%s11906_s6 + $0x218] ss:$24 sps:$4 sm:$0xff]  }
 0x487   : > { %5146 = vmatprep.subr.bf16.mxu0 %v10235_v17  ;;  %5187 = vmatprep.subr.bf16.mxu1 %v10237_v18  ;;  %17231 = vst [vmem:[#allocation29_spill] sm:$0xff] %v12695_v15  ;;  %17232 = vst [vmem:[#allocation30_spill] sm:$0xff] %v12698_v16  ;;  %v12703_v17 = vld [vmem:[%s11906_s6 + $0x518] ss:$24 sps:$4 sm:$0xff]   ;;  %v12706_v18 = vld [vmem:[%s11906_s6 + $0x24c] ss:$24 sps:$4 sm:$0xff]  }
 0x488   : > { %17233 = vst [vmem:[#allocation31_spill] sm:$0xff] %v12703_v17  ;;  %17234 = vst [vmem:[#allocation32_spill] sm:$0xff] %v12706_v18 }
 0x48a   : > { %5147 = vmatpush1.bf16.msra.mxu0 %v10239_v20  ;;  %5188 = vmatpush1.bf16.msra.mxu1 %v10240_v21  ;;  %v12711_v20 = vld [vmem:[%s11906_s6 + $0x54c] ss:$24 sps:$4 sm:$0xff]   ;;  %v12714_v21 = vld [vmem:[%s11906_s6 + $0x248] ss:$24 sps:$4 sm:$0xff]  }
 0x48b   : > { %5148 = vmatprep.subr.bf16.mxu0 %v10241_v24  ;;  %5189 = vmatprep.subr.bf16.mxu1 %v10243_v25  ;;  %17235 = vst [vmem:[#allocation33_spill] sm:$0xff] %v12711_v20  ;;  %v12717_v24 = vld [vmem:[%s11906_s6 + $0x548] ss:$24 sps:$4 sm:$0xff]   ;;  %v12722_v25 = vld [vmem:[%s11906_s6 + $0x27c] ss:$24 sps:$4 sm:$0xff]  }
 0x48c   : > { %17236 = vst [vmem:[#allocation34_spill] sm:$0xff] %v12717_v24  ;;  %17237 = vst [vmem:[#allocation35_spill] sm:$0xff] %v12722_v25 }
 0x48e   : > { %5149 = vmatpush1.bf16.msra.mxu0 %v12606_v22  ;;  %5190 = vmatpush1.bf16.msra.mxu1 %v12609_v19 }
 0x48f   : > { %5150 = vmatprep.subr.bf16.mxu0 %v12612_v23  ;;  %5191 = vmatprep.subr.bf16.mxu1 %v12615_v26 }
 0x492   : > { %5151 = vmatpush1.bf16.msra.mxu0 %v12618_v27  ;;  %5192 = vmatpush1.bf16.msra.mxu1 %v12621_v28 }
 0x493   : > { %5152 = vmatprep.subr.bf16.mxu0 %v12626_v29  ;;  %5193 = vmatprep.subr.bf16.mxu1 %v12631_v30 }
 0x496   : > { %5153 = vmatpush1.bf16.msra.mxu0 %v12634_v31  ;;  %5194 = vmatpush1.bf16.msra.mxu1 %v12639_v32 }
 0x497   : > { %5154 = vmatprep.subr.bf16.mxu0 %v12642_v34  ;;  %5195 = vmatprep.subr.bf16.mxu1 %v12647_v59 }
 0x49a   : > { %5155 = vmatpush1.bf16.msra.mxu0 %v12650_v60  ;;  %5196 = vmatpush1.bf16.msra.mxu1 %v12653_v62 }
 0x49b   : > { %5156 = vmatprep.subr.bf16.mxu0 %v12658_v63  ;;  %5197 = vmatprep.subr.bf16.mxu1 %v12663_v2 }
 0x49e   : > { %5157 = vmatpush1.bf16.msra.mxu0 %v12666_v3  ;;  %5198 = vmatpush1.bf16.msra.mxu1 %v12671_v6 }
 0x49f   : > { %5158 = vmatprep.subr.bf16.mxu0 %v12674_v7  ;;  %5199 = vmatprep.subr.bf16.mxu1 %v12679_v11 }
 0x4a2   : > { %5159 = vmatpush1.bf16.msra.mxu0 %v12682_v12  ;;  %5200 = vmatpush1.bf16.msra.mxu1 %v12685_v13 }
 0x4a3   : > { %5160 = vmatprep.subr.bf16.mxu0 %v12690_v14  ;;  %5201 = vmatprep.subr.bf16.mxu1 %v12695_v15  ;;  %v12730_v15 = vld [vmem:[%s11906_s6 + $0x278] ss:$24 sps:$4 sm:$0xff]   ;;  %v12749_v14 = vld [vmem:[%s11906_s6 + $0x5a8] ss:$24 sps:$4 sm:$0xff]  }
 0x4a4   : > { %17239 = vst [vmem:[#allocation37_spill] sm:$0xff] %v12730_v15  ;;  %17244 = vst [vmem:[#allocation42_spill] sm:$0xff] %v12749_v14 }
 0x4a6   : > { %5161 = vmatpush1.bf16.msra.mxu0 %v12698_v16  ;;  %5202 = vmatpush1.bf16.msra.mxu1 %v12703_v17  ;;  %v12735_v16 = vld [vmem:[%s11906_s6 + $0x578] ss:$24 sps:$4 sm:$0xff]   ;;  %v12738_v17 = vld [vmem:[%s11906_s6 + $0x2ac] ss:$24 sps:$4 sm:$0xff]  }
 0x4a7   : > { %5162 = vmatprep.subr.bf16.mxu0 %v12706_v18  ;;  %5203 = vmatprep.subr.bf16.mxu1 %v12711_v20  ;;  %17240 = vst [vmem:[#allocation38_spill] sm:$0xff] %v12735_v16  ;;  %17241 = vst [vmem:[#allocation39_spill] sm:$0xff] %v12738_v17  ;;  %v12743_v20 = vld [vmem:[%s11906_s6 + $0x5ac] ss:$24 sps:$4 sm:$0xff]   ;;  %v12746_v18 = vld [vmem:[%s11906_s6 + $0x2a8] ss:$24 sps:$4 sm:$0xff]  }
 0x4a8   : > { %17242 = vst [vmem:[#allocation40_spill] sm:$0xff] %v12743_v20  ;;  %17243 = vst [vmem:[#allocation41_spill] sm:$0xff] %v12746_v18 }
 0x4aa   : > { %5163 = vmatpush1.bf16.msra.mxu0 %v12714_v21  ;;  %5204 = vmatpush1.bf16.msra.mxu1 %v12717_v24  ;;  %v12754_v24 = vld [vmem:[%s11906_s6 + $0x2dc] ss:$24 sps:$4 sm:$0xff]  }
 0x4ab   : > { %5164 = vmatprep.subr.bf16.mxu0 %v12722_v25  ;;  %5205 = vmatprep.subr.bf16.mxu1 %v12727_v57  ;;  %17245 = vst [vmem:[#allocation43_spill] sm:$0xff] %v12754_v24  ;;  %v12759_v57 = vld [vmem:[%s11906_s6 + $0x5dc] ss:$24 sps:$4 sm:$0xff]   ;;  %v12762_v25 = vld [vmem:[%s11906_s6 + $0x2d8] ss:$24 sps:$4 sm:$0xff]  }
 0x4ac   : > { %17246 = vst [vmem:[#allocation44_spill] sm:$0xff] %v12759_v57  ;;  %17247 = vst [vmem:[#allocation45_spill] sm:$0xff] %v12762_v25 }
 0x4ae   : > { %5165 = vmatpush1.bf16.msra.mxu0 %v12730_v15  ;;  %5206 = vmatpush1.bf16.msra.mxu1 %v12735_v16  ;;  %v12767_v15 = vld [vmem:[%s11906_s6 + $0x5d8] ss:$24 sps:$4 sm:$0xff]   ;;  %v12770_v16 = vld [vmem:[%s11906_s6 + $0x14] ss:$24 sps:$4 sm:$0xff]  }
 0x4af   : > { %5166 = vmatprep.subr.bf16.mxu0 %v12738_v17  ;;  %5207 = vmatprep.subr.bf16.mxu1 %v12743_v20  ;;  %17248 = vst [vmem:[#allocation46_spill] sm:$0xff] %v12767_v15  ;;  %17249 = vst [vmem:[#allocation47_spill] sm:$0xff] %v12770_v16  ;;  %v12775_v20 = vld [vmem:[%s11906_s6 + $0x314] ss:$24 sps:$4 sm:$0xff]   ;;  %v17255_v17 = vmov 0.0|0.0  }
 0x4b0   : > { %17250 = vst [vmem:[#allocation48_spill] sm:$0xff] %v12775_v20 }
 0x4b2   : > { %5167 = vmatpush1.bf16.msra.mxu0 %v12746_v18  ;;  %5208 = vmatpush1.bf16.msra.mxu1 %v12749_v14  ;;  %v12780_v18 = vld [vmem:[%s11906_s6 + $0x10] ss:$24 sps:$4 sm:$0xff]  }
 0x4b3   : > { %5168 = vmatprep.subr.bf16.mxu0 %v12754_v24  ;;  %5209 = vmatprep.subr.bf16.mxu1 %v12759_v57  ;;  %17251 = vst [vmem:[#allocation49_spill] sm:$0xff] %v12780_v18  ;;  %v12783_v14 = vld [vmem:[%s11906_s6 + $0x310] ss:$24 sps:$4 sm:$0xff]   ;;  %v12788_v24 = vld [vmem:[%s11906_s6 + $0x44] ss:$24 sps:$4 sm:$0xff]  }
 0x4b4   : > { %17252 = vst [vmem:[#allocation50_spill] sm:$0xff] %v12783_v14  ;;  %17253 = vst [vmem:[#allocation51_spill] sm:$0xff] %v12788_v24  ;;  %v12791_v57 = vld [vmem:[%s11906_s6 + $0x344] ss:$24 sps:$4 sm:$0xff]  }
 0x4b5   : > { %17254 = vst [vmem:[#allocation52_spill] sm:$0xff] %v12791_v57 }
 0x4b6   : > { %5169 = vmatpush1.bf16.msra.mxu0 %v12762_v25  ;;  %5210 = vmatpush1.bf16.msra.mxu1 %v12767_v15  ;;  %v12798_v15 = vld [vmem:[%s11906_s6 + $0x40] ss:$24 sps:$4 sm:$0xff]   ;;  %v12809_v25 = vld [vmem:[%s11906_s6 + $0x374] ss:$24 sps:$4 sm:$0xff]  }
 0x4b7   : > { %5220 = vmatprep.subr.bf16.mxu0 %v12770_v16  ;;  %5261 = vmatprep.subr.bf16.mxu1 %v12775_v20  ;;  %17256 = vst [vmem:[#allocation53_spill] sm:$0xff] %v12798_v15  ;;  %v12801_v16 = vld [vmem:[%s11906_s6 + $0x340] ss:$24 sps:$4 sm:$0xff]   ;;  %v12806_v20 = vld [vmem:[%s11906_s6 + $0x74] ss:$24 sps:$4 sm:$0xff]   ;;  %17259 = vst [vmem:[#allocation56_spill] sm:$0xff] %v12809_v25 }
 0x4b8   : > { %17257 = vst [vmem:[#allocation54_spill] sm:$0xff] %v12801_v16  ;;  %17258 = vst [vmem:[#allocation55_spill] sm:$0xff] %v12806_v20 }
 0x4b9   : > { %5171 = vmatmul.mubr.bf16.vlgmr.msra.gmra.mrb[4].mxu0 %v17255_v17  ;;  %5212 = vmatmul.mubr.bf16.vlgmr.msra.gmra.mrb[4].mxu1 %v17255_v17 }
 0x4ba   : > { %5221 = vmatpush1.bf16.msra.mxu0 %v12780_v18  ;;  %5262 = vmatpush1.bf16.msra.mxu1 %v12783_v14  ;;  %v12816_v14 = vld [vmem:[%s11906_s6 + $0x70] ss:$24 sps:$4 sm:$0xff]   ;;  %v12827_v18 = vld [vmem:[%s11906_s6 + $0x3a4] ss:$24 sps:$4 sm:$0xff]  }
 0x4bb   : > { %5222 = vmatprep.subr.bf16.mxu0 %v12788_v24  ;;  %5263 = vmatprep.subr.bf16.mxu1 %v12791_v57  ;;  %17260 = vst [vmem:[#allocation57_spill] sm:$0xff] %v12816_v14  ;;  %v12819_v24 = vld [vmem:[%s11906_s6 + $0x370] ss:$24 sps:$4 sm:$0xff]   ;;  %v12824_v57 = vld [vmem:[%s11906_s6 + $0xa4] ss:$24 sps:$4 sm:$0xff]   ;;  %17263 = vst [vmem:[#allocation60_spill] sm:$0xff] %v12827_v18 }
 0x4bc   : > { %5252 = vmatprep.mubr.bf16.mxu0 %v17255_v17  ;;  %5293 = vmatprep.mubr.bf16.mxu1 %v17255_v17  ;;  %17261 = vst [vmem:[#allocation58_spill] sm:$0xff] %v12819_v24  ;;  %17262 = vst [vmem:[#allocation59_spill] sm:$0xff] %v12824_v57 }
 0x4be   : > { %5223 = vmatpush1.bf16.msra.mxu0 %v12798_v15  ;;  %5264 = vmatpush1.bf16.msra.mxu1 %v12801_v16  ;;  %v12832_v16 = vld [vmem:[%s11906_s6 + $0xa0] ss:$24 sps:$4 sm:$0xff]  }
 0x4bf   : > { %5224 = vmatprep.subr.bf16.mxu0 %v12806_v20  ;;  %5265 = vmatprep.subr.bf16.mxu1 %v12809_v25  ;;  %17264 = vst [vmem:[#allocation61_spill] sm:$0xff] %v12832_v16  ;;  %v12835_v15 = vld [vmem:[%s11906_s6 + $0x3a0] ss:$24 sps:$4 sm:$0xff]   ;;  %v12840_v25 = vld [vmem:[%s11906_s6 + $0xd4] ss:$24 sps:$4 sm:$0xff]  }
 0x4c0   : > { %17265 = vst [vmem:[#allocation62_spill] sm:$0xff] %v12835_v15  ;;  %17266 = vst [vmem:[#allocation63_spill] sm:$0xff] %v12840_v25  ;;  %v12843_v20 = vld [vmem:[%s11906_s6 + $0x3d4] ss:$24 sps:$4 sm:$0xff]  }
 0x4c1   : > { %17267 = vst [vmem:[#allocation64_spill] sm:$0xff] %v12843_v20 }
 0x4c2   : > { %5225 = vmatpush1.bf16.msra.mxu0 %v12816_v14  ;;  %5266 = vmatpush1.bf16.msra.mxu1 %v12819_v24  ;;  %v12848_v24 = vld [vmem:[%s11906_s6 + $0xd0] ss:$24 sps:$4 sm:$0xff]  }
 0x4c3   : > { %5226 = vmatprep.subr.bf16.mxu0 %v12824_v57  ;;  %5267 = vmatprep.subr.bf16.mxu1 %v12827_v18  ;;  %17268 = vst [vmem:[#allocation65_spill] sm:$0xff] %v12848_v24  ;;  %v12851_v14 = vld [vmem:[%s11906_s6 + $0x3d0] ss:$24 sps:$4 sm:$0xff]   ;;  %v12856_v18 = vld [vmem:[%s11906_s6 + $0x104] ss:$24 sps:$4 sm:$0xff]  }
 0x4c4   : > { %17269 = vst [vmem:[#allocation66_spill] sm:$0xff] %v12851_v14  ;;  %17270 = vst [vmem:[#allocation67_spill] sm:$0xff] %v12856_v18  ;;  %v12859_v57 = vld [vmem:[%s11906_s6 + $0x404] ss:$24 sps:$4 sm:$0xff]  }
 0x4c5   : > { %17271 = vst [vmem:[#allocation68_spill] sm:$0xff] %v12859_v57 }
 0x4c6   : > { %5227 = vmatpush1.bf16.msra.mxu0 %v12832_v16  ;;  %5268 = vmatpush1.bf16.msra.mxu1 %v12835_v15  ;;  %v12864_v15 = vld [vmem:[%s11906_s6 + $0x100] ss:$24 sps:$4 sm:$0xff]  }
 0x4c7   : > { %5228 = vmatprep.subr.bf16.mxu0 %v12840_v25  ;;  %5269 = vmatprep.subr.bf16.mxu1 %v12843_v20  ;;  %17272 = vst [vmem:[#allocation69_spill] sm:$0xff] %v12864_v15  ;;  %v12867_v16 = vld [vmem:[%s11906_s6 + $0x400] ss:$24 sps:$4 sm:$0xff]   ;;  %v12872_v20 = vld [vmem:[%s11906_s6 + $0x134] ss:$24 sps:$4 sm:$0xff]  }
 0x4c8   : > { %17273 = vst [vmem:[#allocation70_spill] sm:$0xff] %v12867_v16  ;;  %17274 = vst [vmem:[#allocation71_spill] sm:$0xff] %v12872_v20  ;;  %v12875_v25 = vld [vmem:[%s11906_s6 + $0x434] ss:$24 sps:$4 sm:$0xff]  }
 0x4c9   : > { %17275 = vst [vmem:[#allocation72_spill] sm:$0xff] %v12875_v25 }
 0x4ca   : > { %5229 = vmatpush1.bf16.msra.mxu0 %v12848_v24  ;;  %5270 = vmatpush1.bf16.msra.mxu1 %v12851_v14  ;;  %v12880_v14 = vld [vmem:[%s11906_s6 + $0x130] ss:$24 sps:$4 sm:$0xff]  }
 0x4cb   : > { %5230 = vmatprep.subr.bf16.mxu0 %v12856_v18  ;;  %5271 = vmatprep.subr.bf16.mxu1 %v12859_v57  ;;  %17276 = vst [vmem:[#allocation73_spill] sm:$0xff] %v12880_v14  ;;  %v12883_v24 = vld [vmem:[%s11906_s6 + $0x430] ss:$24 sps:$4 sm:$0xff]   ;;  %v12888_v57 = vld [vmem:[%s11906_s6 + $0x164] ss:$24 sps:$4 sm:$0xff]  }
 0x4cc   : > { %17277 = vst [vmem:[#allocation74_spill] sm:$0xff] %v12883_v24  ;;  %17278 = vst [vmem:[#allocation75_spill] sm:$0xff] %v12888_v57  ;;  %v12891_v18 = vld [vmem:[%s11906_s6 + $0x464] ss:$24 sps:$4 sm:$0xff]  }
 0x4cd   : > { %17279 = vst [vmem:[#allocation76_spill] sm:$0xff] %v12891_v18 }
 0x4ce   : > { %5231 = vmatpush1.bf16.msra.mxu0 %v12864_v15  ;;  %5272 = vmatpush1.bf16.msra.mxu1 %v12867_v16  ;;  %v12896_v16 = vld [vmem:[%s11906_s6 + $0x160] ss:$24 sps:$4 sm:$0xff]  }
 0x4cf   : > { %5232 = vmatprep.subr.bf16.mxu0 %v12872_v20  ;;  %5273 = vmatprep.subr.bf16.mxu1 %v12875_v25  ;;  %17280 = vst [vmem:[#allocation77_spill] sm:$0xff] %v12896_v16  ;;  %v12899_v15 = vld [vmem:[%s11906_s6 + $0x460] ss:$24 sps:$4 sm:$0xff]   ;;  %v12904_v25 = vld [vmem:[%s11906_s6 + $0x194] ss:$24 sps:$4 sm:$0xff]  }
 0x4d0   : > { %17281 = vst [vmem:[#allocation78_spill] sm:$0xff] %v12899_v15  ;;  %17282 = vst [vmem:[#allocation79_spill] sm:$0xff] %v12904_v25  ;;  %v12907_v20 = vld [vmem:[%s11906_s6 + $0x494] ss:$24 sps:$4 sm:$0xff]  }
 0x4d1   : > { %17283 = vst [vmem:[#allocation80_spill] sm:$0xff] %v12907_v20 }
 0x4d2   : > { %5233 = vmatpush1.bf16.msra.mxu0 %v12880_v14  ;;  %5274 = vmatpush1.bf16.msra.mxu1 %v12883_v24  ;;  %v12912_v24 = vld [vmem:[%s11906_s6 + $0x190] ss:$24 sps:$4 sm:$0xff]  }
 0x4d3   : > { %5234 = vmatprep.subr.bf16.mxu0 %v12888_v57  ;;  %5275 = vmatprep.subr.bf16.mxu1 %v12891_v18  ;;  %17284 = vst [vmem:[#allocation81_spill] sm:$0xff] %v12912_v24  ;;  %v12915_v14 = vld [vmem:[%s11906_s6 + $0x490] ss:$24 sps:$4 sm:$0xff]   ;;  %v12920_v18 = vld [vmem:[%s11906_s6 + $0x1c4] ss:$24 sps:$4 sm:$0xff]  }
 0x4d4   : > { %17285 = vst [vmem:[#allocation82_spill] sm:$0xff] %v12915_v14  ;;  %17286 = vst [vmem:[#allocation83_spill] sm:$0xff] %v12920_v18  ;;  %v12923_v57 = vld [vmem:[%s11906_s6 + $0x4c4] ss:$24 sps:$4 sm:$0xff]  }
 0x4d5   : > { %17287 = vst [vmem:[#allocation84_spill] sm:$0xff] %v12923_v57 }
 0x4d6   : > { %5235 = vmatpush1.bf16.msra.mxu0 %v12896_v16  ;;  %5276 = vmatpush1.bf16.msra.mxu1 %v12899_v15  ;;  %v12928_v15 = vld [vmem:[%s11906_s6 + $0x1c0] ss:$24 sps:$4 sm:$0xff]  }
 0x4d7   : > { %5236 = vmatprep.subr.bf16.mxu0 %v12904_v25  ;;  %5277 = vmatprep.subr.bf16.mxu1 %v12907_v20  ;;  %17288 = vst [vmem:[#allocation85_spill] sm:$0xff] %v12928_v15  ;;  %v12931_v16 = vld [vmem:[%s11906_s6 + $0x4c0] ss:$24 sps:$4 sm:$0xff]   ;;  %v12936_v20 = vld [vmem:[%s11906_s6 + $0x1f4] ss:$24 sps:$4 sm:$0xff]  }
 0x4d8   : > { %17289 = vst [vmem:[#allocation86_spill] sm:$0xff] %v12931_v16  ;;  %17290 = vst [vmem:[#allocation87_spill] sm:$0xff] %v12936_v20  ;;  %v12939_v25 = vld [vmem:[%s11906_s6 + $0x4f4] ss:$24 sps:$4 sm:$0xff]  }
 0x4d9   : > { %17291 = vst [vmem:[#allocation88_spill] sm:$0xff] %v12939_v25 }
 0x4da   : > { %5237 = vmatpush1.bf16.msra.mxu0 %v12912_v24  ;;  %5278 = vmatpush1.bf16.msra.mxu1 %v12915_v14  ;;  %v12944_v14 = vld [vmem:[%s11906_s6 + $0x1f0] ss:$24 sps:$4 sm:$0xff]  }
 0x4db   : > { %5238 = vmatprep.subr.bf16.mxu0 %v12920_v18  ;;  %5279 = vmatprep.subr.bf16.mxu1 %v12923_v57  ;;  %17292 = vst [vmem:[#allocation89_spill] sm:$0xff] %v12944_v14  ;;  %v12947_v24 = vld [vmem:[%s11906_s6 + $0x4f0] ss:$24 sps:$4 sm:$0xff]   ;;  %v12952_v57 = vld [vmem:[%s11906_s6 + $0x224] ss:$24 sps:$4 sm:$0xff]  }
 0x4dc   : > { %17293 = vst [vmem:[#allocation90_spill] sm:$0xff] %v12947_v24  ;;  %17294 = vst [vmem:[#allocation91_spill] sm:$0xff] %v12952_v57  ;;  %v12955_v18 = vld [vmem:[%s11906_s6 + $0x524] ss:$24 sps:$4 sm:$0xff]  }
 0x4dd   : > { %17295 = vst [vmem:[#allocation92_spill] sm:$0xff] %v12955_v18 }
 0x4de   : > { %5239 = vmatpush1.bf16.msra.mxu0 %v12928_v15  ;;  %5280 = vmatpush1.bf16.msra.mxu1 %v12931_v16  ;;  %v12960_v16 = vld [vmem:[%s11906_s6 + $0x220] ss:$24 sps:$4 sm:$0xff]  }
 0x4df   : > { %5240 = vmatprep.subr.bf16.mxu0 %v12936_v20  ;;  %5281 = vmatprep.subr.bf16.mxu1 %v12939_v25  ;;  %17296 = vst [vmem:[#allocation93_spill] sm:$0xff] %v12960_v16  ;;  %v12963_v15 = vld [vmem:[%s11906_s6 + $0x520] ss:$24 sps:$4 sm:$0xff]   ;;  %v12968_v25 = vld [vmem:[%s11906_s6 + $0x254] ss:$24 sps:$4 sm:$0xff]  }
 0x4e0   : > { %17297 = vst [vmem:[#allocation94_spill] sm:$0xff] %v12963_v15  ;;  %17298 = vst [vmem:[#allocation95_spill] sm:$0xff] %v12968_v25  ;;  %v12971_v20 = vld [vmem:[%s11906_s6 + $0x554] ss:$24 sps:$4 sm:$0xff]  }
 0x4e1   : > { %17299 = vst [vmem:[#allocation96_spill] sm:$0xff] %v12971_v20 }
 0x4e2   : > { %5241 = vmatpush1.bf16.msra.mxu0 %v12944_v14  ;;  %5282 = vmatpush1.bf16.msra.mxu1 %v12947_v24  ;;  %v12976_v24 = vld [vmem:[%s11906_s6 + $0x250] ss:$24 sps:$4 sm:$0xff]  }
 0x4e3   : > { %5242 = vmatprep.subr.bf16.mxu0 %v12952_v57  ;;  %5283 = vmatprep.subr.bf16.mxu1 %v12955_v18  ;;  %17300 = vst [vmem:[#allocation97_spill] sm:$0xff] %v12976_v24  ;;  %v12979_v14 = vld [vmem:[%s11906_s6 + $0x550] ss:$24 sps:$4 sm:$0xff]   ;;  %v12984_v18 = vld [vmem:[%s11906_s6 + $0x284] ss:$24 sps:$4 sm:$0xff]  }
 0x4e4   : > { %17301 = vst [vmem:[#allocation98_spill] sm:$0xff] %v12979_v14  ;;  %17302 = vst [vmem:[#allocation99_spill] sm:$0xff] %v12984_v18  ;;  %v12987_v57 = vld [vmem:[%s11906_s6 + $0x584] ss:$24 sps:$4 sm:$0xff]  }
 0x4e5   : > { %17303 = vst [vmem:[#allocation100_spill] sm:$0xff] %v12987_v57 }
 0x4e6   : > { %5243 = vmatpush1.bf16.msra.mxu0 %v12960_v16  ;;  %5284 = vmatpush1.bf16.msra.mxu1 %v12963_v15  ;;  %v12992_v15 = vld [vmem:[%s11906_s6 + $0x280] ss:$24 sps:$4 sm:$0xff]  }
 0x4e7   : > { %5244 = vmatprep.subr.bf16.mxu0 %v12968_v25  ;;  %5285 = vmatprep.subr.bf16.mxu1 %v12971_v20  ;;  %17304 = vst [vmem:[#allocation101_spill] sm:$0xff] %v12992_v15  ;;  %v12995_v16 = vld [vmem:[%s11906_s6 + $0x580] ss:$24 sps:$4 sm:$0xff]   ;;  %v13000_v20 = vld [vmem:[%s11906_s6 + $0x2b4] ss:$24 sps:$4 sm:$0xff]  }
 0x4e8   : > { %17305 = vst [vmem:[#allocation102_spill] sm:$0xff] %v12995_v16  ;;  %v13003_v25 = vld [vmem:[%s11906_s6 + $0x5b4] ss:$24 sps:$4 sm:$0xff]  }
 0x4e9   : > { %17306 = vst [vmem:[#allocation103_spill] sm:$0xff] %v13003_v25 }
 0x4ea   : > { %5245 = vmatpush1.bf16.msra.mxu0 %v12976_v24  ;;  %5286 = vmatpush1.bf16.msra.mxu1 %v12979_v14  ;;  %v13008_v14 = vld [vmem:[%s11906_s6 + $0x2b0] ss:$24 sps:$4 sm:$0xff]  }
 0x4eb   : > { %5246 = vmatprep.subr.bf16.mxu0 %v12984_v18  ;;  %5287 = vmatprep.subr.bf16.mxu1 %v12987_v57  ;;  %v13011_v24 = vld [vmem:[%s11906_s6 + $0x5b0] ss:$24 sps:$4 sm:$0xff]   ;;  %v13016_v18 = vld [vmem:[%s11906_s6 + $0x2e4] ss:$24 sps:$4 sm:$0xff]  }
 0x4ec   : > { %17307 = vst [vmem:[#allocation104_spill] sm:$0xff] %v13011_v24  ;;  %v13019_v57 = vld [vmem:[%s11906_s6 + $0x5e4] ss:$24 sps:$4 sm:$0xff]  }
 0x4ed   : > { %17308 = vst [vmem:[#allocation105_spill] sm:$0xff] %v13019_v57 }
 0x4ee   : > { %5247 = vmatpush1.bf16.msra.mxu0 %v12992_v15  ;;  %5288 = vmatpush1.bf16.msra.mxu1 %v12995_v16  ;;  %v13024_v16 = vld [vmem:[%s11906_s6 + $0x2e0] ss:$24 sps:$4 sm:$0xff]  }
 0x4ef   : > { %5248 = vmatprep.subr.bf16.mxu0 %v13000_v20  ;;  %5289 = vmatprep.subr.bf16.mxu1 %v13003_v25  ;;  %17309 = vst [vmem:[#allocation106_spill] sm:$0xff] %v13024_v16  ;;  %v13027_v15 = vld [vmem:[%s11906_s6 + $0x5e0] ss:$24 sps:$4 sm:$0xff]   ;;  %v13034_v25 = vld [vmem:[%s11906_s6 + $0x4] ss:$24 sps:$4 sm:$0xff]  }
 0x4f0   : > { %17310 = vst [vmem:[#allocation107_spill] sm:$0xff] %v13027_v15  ;;  %17311 = vst [vmem:[#allocation108_spill] sm:$0xff] %v13034_v25 }
 0x4f2   : > { %5249 = vmatpush1.bf16.msra.mxu0 %v13008_v14  ;;  %5290 = vmatpush1.bf16.msra.mxu1 %v13011_v24  ;;  %v13038_v24 = vld [vmem:[%s11906_s6 + $0x304] ss:$24 sps:$4 sm:$0xff]  }
 0x4f3   : > { %5250 = vmatprep.subr.bf16.mxu0 %v13016_v18  ;;  %5291 = vmatprep.subr.bf16.mxu1 %v13019_v57  ;;  %17312 = vst [vmem:[#allocation109_spill] sm:$0xff] %v13038_v24  ;;  %v13044_v57 = vld [vmem:[%s11906_s6] ss:$24 sps:$4 sm:$0xff]  }
 0x4f4   : > { %17313 = vst [vmem:[#allocation110_spill] sm:$0xff] %v13044_v57 }
 0x4f6   : > { %5251 = vmatpush1.bf16.msra.mxu0 %v13024_v16  ;;  %5292 = vmatpush1.bf16.msra.mxu1 %v13027_v15  ;;  %v13048_v15 = vld [vmem:[%s11906_s6 + $0x300] ss:$24 sps:$4 sm:$0xff]   ;;  %v13148_v16 = vld [vmem:[%s11906_s6 + $0x154] ss:$24 sps:$4 sm:$0xff]  }
 0x4f7   : > { %5418 = vmatprep.subr.bf16.mxu0 %v13034_v25  ;;  %5459 = vmatprep.subr.bf16.mxu1 %v13038_v24  ;;  %17314 = vst [vmem:[#allocation111_spill] sm:$0xff] %v13048_v15  ;;  %v13052_v25 = vld [vmem:[%s11906_s6 + $0x34] ss:$24 sps:$4 sm:$0xff]  }
 0x4f8   : > { %17315 = vst [vmem:[#allocation112_spill] sm:$0xff] %v13052_v25  ;;  %v13056_v24 = vld [vmem:[%s11906_s6 + $0x334] ss:$24 sps:$4 sm:$0xff]  }
 0x4f9   : > { %5253 = vmatmul.mubr.bf16.vlgmr.msra.gmra.mrb[8].mxu0 %v17255_v17  ;;  %5294 = vmatmul.mubr.bf16.vlgmr.msra.gmra.mrb[8].mxu1 %v17255_v17  ;;  %17316 = vst [vmem:[#allocation113_spill] sm:$0xff] %v13056_v24  ;;  %v13060_v17 = vld [vmem:[%s11906_s6 + $0x30] ss:$24 sps:$4 sm:$0xff]  }
 0x4fa   : > { %5419 = vmatpush1.bf16.msra.mxu0 %v13044_v57  ;;  %5460 = vmatpush1.bf16.msra.mxu1 %v13048_v15  ;;  %17317 = vst [vmem:[#allocation114_spill] sm:$0xff] %v13060_v17  ;;  %v13064_v57 = vld [vmem:[%s11906_s6 + $0x330] ss:$24 sps:$4 sm:$0xff]   ;;  %v13068_v15 = vld [vmem:[%s11906_s6 + $0x64] ss:$24 sps:$4 sm:$0xff]  }
 0x4fb   : > { %5420 = vmatprep.subr.bf16.mxu0 %v13052_v25  ;;  %5461 = vmatprep.subr.bf16.mxu1 %v13056_v24  ;;  %17318 = vst [vmem:[#allocation115_spill] sm:$0xff] %v13064_v57  ;;  %17319 = vst [vmem:[#allocation116_spill] sm:$0xff] %v13068_v15  ;;  %v13072_v25 = vld [vmem:[%s11906_s6 + $0x364] ss:$24 sps:$4 sm:$0xff]   ;;  %v13076_v24 = vld [vmem:[%s11906_s6 + $0x60] ss:$24 sps:$4 sm:$0xff]  }
 0x4fc   : > { %17320 = vst [vmem:[#allocation117_spill] sm:$0xff] %v13072_v25  ;;  %17321 = vst [vmem:[#allocation118_spill] sm:$0xff] %v13076_v24 }
 0x4fe   : > { %5421 = vmatpush1.bf16.msra.mxu0 %v13060_v17  ;;  %5462 = vmatpush1.bf16.msra.mxu1 %v13064_v57  ;;  %v13080_v17 = vld [vmem:[%s11906_s6 + $0x360] ss:$24 sps:$4 sm:$0xff]   ;;  %v13084_v57 = vld [vmem:[%s11906_s6 + $0x94] ss:$24 sps:$4 sm:$0xff]  }
 0x4ff   : > { %5422 = vmatprep.subr.bf16.mxu0 %v13068_v15  ;;  %5463 = vmatprep.subr.bf16.mxu1 %v13072_v25  ;;  %17322 = vst [vmem:[#allocation119_spill] sm:$0xff] %v13080_v17  ;;  %17323 = vst [vmem:[#allocation120_spill] sm:$0xff] %v13084_v57  ;;  %v13088_v15 = vld [vmem:[%s11906_s6 + $0x394] ss:$24 sps:$4 sm:$0xff]   ;;  %v13092_v25 = vld [vmem:[%s11906_s6 + $0x90] ss:$24 sps:$4 sm:$0xff]  }
 0x500   : > { %17324 = vst [vmem:[#allocation121_spill] sm:$0xff] %v13088_v15  ;;  %17325 = vst [vmem:[#allocation122_spill] sm:$0xff] %v13092_v25 }
 0x502   : > { %5423 = vmatpush1.bf16.msra.mxu0 %v13076_v24  ;;  %5464 = vmatpush1.bf16.msra.mxu1 %v13080_v17  ;;  %v13096_v24 = vld [vmem:[%s11906_s6 + $0x390] ss:$24 sps:$4 sm:$0xff]   ;;  %v13100_v17 = vld [vmem:[%s11906_s6 + $0xc4] ss:$24 sps:$4 sm:$0xff]  }
 0x503   : > { %5424 = vmatprep.subr.bf16.mxu0 %v13084_v57  ;;  %5465 = vmatprep.subr.bf16.mxu1 %v13088_v15  ;;  %17326 = vst [vmem:[#allocation123_spill] sm:$0xff] %v13096_v24  ;;  %17327 = vst [vmem:[#allocation124_spill] sm:$0xff] %v13100_v17  ;;  %v13104_v57 = vld [vmem:[%s11906_s6 + $0x3c4] ss:$24 sps:$4 sm:$0xff]   ;;  %v13108_v15 = vld [vmem:[%s11906_s6 + $0xc0] ss:$24 sps:$4 sm:$0xff]  }
 0x504   : > { %17328 = vst [vmem:[#allocation125_spill] sm:$0xff] %v13104_v57  ;;  %17329 = vst [vmem:[#allocation126_spill] sm:$0xff] %v13108_v15 }
 0x506   : > { %5425 = vmatpush1.bf16.msra.mxu0 %v13092_v25  ;;  %5466 = vmatpush1.bf16.msra.mxu1 %v13096_v24  ;;  %v13112_v25 = vld [vmem:[%s11906_s6 + $0x3c0] ss:$24 sps:$4 sm:$0xff]   ;;  %v13116_v24 = vld [vmem:[%s11906_s6 + $0xf4] ss:$24 sps:$4 sm:$0xff]  }
 0x507   : > { %5426 = vmatprep.subr.bf16.mxu0 %v13100_v17  ;;  %5467 = vmatprep.subr.bf16.mxu1 %v13104_v57  ;;  %17330 = vst [vmem:[#allocation127_spill] sm:$0xff] %v13112_v25  ;;  %17331 = vst [vmem:[#allocation128_spill] sm:$0xff] %v13116_v24  ;;  %v13120_v17 = vld [vmem:[%s11906_s6 + $0x3f4] ss:$24 sps:$4 sm:$0xff]   ;;  %v13124_v57 = vld [vmem:[%s11906_s6 + $0xf0] ss:$24 sps:$4 sm:$0xff]  }
 0x508   : > { %17332 = vst [vmem:[#allocation129_spill] sm:$0xff] %v13120_v17  ;;  %17333 = vst [vmem:[#allocation130_spill] sm:$0xff] %v13124_v57 }
 0x50a   : > { %5427 = vmatpush1.bf16.msra.mxu0 %v13108_v15  ;;  %5468 = vmatpush1.bf16.msra.mxu1 %v13112_v25  ;;  %v13128_v15 = vld [vmem:[%s11906_s6 + $0x3f0] ss:$24 sps:$4 sm:$0xff]   ;;  %v13132_v25 = vld [vmem:[%s11906_s6 + $0x124] ss:$24 sps:$4 sm:$0xff]  }
 0x50b   : > { %5428 = vmatprep.subr.bf16.mxu0 %v13116_v24  ;;  %5469 = vmatprep.subr.bf16.mxu1 %v13120_v17  ;;  %17334 = vst [vmem:[#allocation131_spill] sm:$0xff] %v13128_v15  ;;  %17335 = vst [vmem:[#allocation132_spill] sm:$0xff] %v13132_v25  ;;  %v13136_v24 = vld [vmem:[%s11906_s6 + $0x424] ss:$24 sps:$4 sm:$0xff]   ;;  %v13140_v17 = vld [vmem:[%s11906_s6 + $0x120] ss:$24 sps:$4 sm:$0xff]  }
 0x50c   : > { %17336 = vst [vmem:[#allocation133_spill] sm:$0xff] %v13136_v24  ;;  %17337 = vst [vmem:[#allocation134_spill] sm:$0xff] %v13140_v17 }
 0x50e   : > { %5429 = vmatpush1.bf16.msra.mxu0 %v13124_v57  ;;  %5470 = vmatpush1.bf16.msra.mxu1 %v13128_v15  ;;  %v13144_v57 = vld [vmem:[%s11906_s6 + $0x420] ss:$24 sps:$4 sm:$0xff]   ;;  %v13152_v15 = vld [vmem:[%s11906_s6 + $0x454] ss:$24 sps:$4 sm:$0xff]  }
 0x50f   : > { %5430 = vmatprep.subr.bf16.mxu0 %v13132_v25  ;;  %5471 = vmatprep.subr.bf16.mxu1 %v13136_v24  ;;  %17338 = vst [vmem:[#allocation135_spill] sm:$0xff] %v13144_v57  ;;  %v13156_v25 = vld [vmem:[%s11906_s6 + $0x150] ss:$24 sps:$4 sm:$0xff]  }
 0x510   : > { %v13160_v24 = vld [vmem:[%s11906_s6 + $0x450] ss:$24 sps:$4 sm:$0xff]  }
 0x512   : > { %5431 = vmatpush1.bf16.msra.mxu0 %v13140_v17  ;;  %5472 = vmatpush1.bf16.msra.mxu1 %v13144_v57  ;;  %v13164_v17 = vld [vmem:[%s11906_s6 + $0x184] ss:$24 sps:$4 sm:$0xff]  }
 0x513   : > { %5432 = vmatprep.subr.bf16.mxu0 %v13148_v16  ;;  %5473 = vmatprep.subr.bf16.mxu1 %v13152_v15  ;;  %v13168_v57 = vld [vmem:[%s11906_s6 + $0x484] ss:$24 sps:$4 sm:$0xff]  }
 0x516   : > { %5433 = vmatpush1.bf16.msra.mxu0 %v13156_v25  ;;  %5474 = vmatpush1.bf16.msra.mxu1 %v13160_v24 }
 0x517   : > { %5434 = vmatprep.subr.bf16.mxu0 %v13164_v17  ;;  %5475 = vmatprep.subr.bf16.mxu1 %v13168_v57 }
 0x51a   : > { %5435 = vmatpush1.bf16.msra.mxu0 %v12454_v35  ;;  %5476 = vmatpush1.bf16.msra.mxu1 %v12457_v36 }
 0x51b   : > { %5436 = vmatprep.subr.bf16.mxu0 %v12460_v38  ;;  %5477 = vmatprep.subr.bf16.mxu1 %v12463_v39 }
 0x51e   : > { %5437 = vmatpush1.bf16.msra.mxu0 %v12466_v40  ;;  %5478 = vmatpush1.bf16.msra.mxu1 %v12471_v41 }
 0x51f   : > { %5438 = vmatprep.subr.bf16.mxu0 %v12474_v42  ;;  %5479 = vmatprep.subr.bf16.mxu1 %v12479_v43 }
 0x522   : > { %5439 = vmatpush1.bf16.msra.mxu0 %v12482_v0  ;;  %5480 = vmatpush1.bf16.msra.mxu1 %v12485_v44 }
 0x523   : > { %5440 = vmatprep.subr.bf16.mxu0 %v12490_v45  ;;  %5481 = vmatprep.subr.bf16.mxu1 %v12495_v46 }
 0x526   : > { %5441 = vmatpush1.bf16.msra.mxu0 %v12498_v47  ;;  %5482 = vmatpush1.bf16.msra.mxu1 %v12503_v48 }
 0x527   : > { %5442 = vmatprep.subr.bf16.mxu0 %v12506_v49  ;;  %5483 = vmatprep.subr.bf16.mxu1 %v12511_v50 }
 0x52a   : > { %5443 = vmatpush1.bf16.msra.mxu0 %v12514_v51  ;;  %5484 = vmatpush1.bf16.msra.mxu1 %v12517_v33 }
 0x52b   : > { %5444 = vmatprep.subr.bf16.mxu0 %v12522_v10  ;;  %5485 = vmatprep.subr.bf16.mxu1 %v12527_v52 }
 0x52e   : > { %5445 = vmatpush1.bf16.msra.mxu0 %v12530_v4  ;;  %5486 = vmatpush1.bf16.msra.mxu1 %v12535_v37  ;;  %v4065_v4 = vld [vmem:[#allocation3 + $0x90] sm:$0xc0]  ;;  %v4066_v37 = vld [vmem:[#allocation3 + $0x98] sm:$0xc0] }
 0x52f   : > { %5446 = vmatprep.subr.bf16.mxu0 %v12538_v53  ;;  %5487 = vmatprep.subr.bf16.mxu1 %v12543_v5  ;;  %v4077_v53 = vrot.slane %v4065_v4, 4  ;;  %v4059_v5 = vld [vmem:[#allocation3] sm:$0x3]  ;;  %v3998_v4 = vld [vmem:[%s11916_s21] sm:$0xf] }
 0x532   : > { %5447 = vmatpush1.bf16.msra.mxu0 %v12546_v54  ;;  %5488 = vmatpush1.bf16.msra.mxu1 %v12549_v56  ;;  %v4078_v54 = vrot.slane %v4066_v37, 4  ;;  %v4060_v56 = vld [vmem:[#allocation3 + $0x8] sm:$0x3] }
 0x533   : > { %5448 = vmatprep.subr.bf16.mxu0 %v12554_v8  ;;  %5489 = vmatprep.subr.bf16.mxu1 %v12559_v61  ;;  %v4089_v8 = vsel %vm4036_vm1, %v4059_v5, %v4077_v53 }
 0x534   : > { %v4090_v61 = vsel %vm4036_vm1, %v4060_v56, %v4078_v54 }
 0x536   : > { %5449 = vmatpush1.bf16.msra.mxu0 %v12562_v1  ;;  %5490 = vmatpush1.bf16.msra.mxu1 %v12567_v9 }
 0x537   : > { %5500 = vmatprep.subr.bf16.mxu0 %v12570_v55  ;;  %5541 = vmatprep.subr.bf16.mxu1 %v12575_v58 }
 0x54c   : > { %v5090_v35 = vpop.f32.mrb[0].mxu0  ;;  %v5131_v36 = vpop.f32.mrb[0].mxu1 }
 0x54d   : > { %v5132_v38 = vadd.f32 %v5131_v36, %v5090_v35  ;;  %v5092_v39 = vpop.f32.mrb[1].mxu0  ;;  %v5133_v40 = vpop.f32.mrb[1].mxu1  ;;  %v4067_v35 = vld [vmem:[#allocation3 + $0xa0] sm:$0xc0]  ;;  %v4068_v36 = vld [vmem:[#allocation3 + $0xa8] sm:$0xc0] }
 0x54e   : > { %v5134_v41 = vadd.f32 %v5133_v40, %v5092_v39  ;;  %v5094_v42 = vpop.f32.mrb[2].mxu0  ;;  %v5135_v43 = vpop.f32.mrb[2].mxu1  ;;  %v4079_v39 = vrot.slane %v4067_v35, 4  ;;  %v4061_v40 = vld [vmem:[#allocation3 + $0x10] sm:$0x3] }
 0x54f   : > { %v5095_v0 = vpop.f32.mrb[3].mxu0  ;;  %v5136_v44 = vpop.f32.mrb[3].mxu1  ;;  %v5302_v1 = vadd.f32 %v5132_v38, %v4089_v8  ;;  %v4080_v42 = vrot.slane %v4068_v36, 4  ;;  %v4000_v43 = vlaneseq  ;;  %v4070_v35 = vld [vmem:[#allocation3 + $0xb8] sm:$0xc0] }
 0x550   : > { %v5303_v9 = vadd.f32 %v5134_v41, %v4090_v61  ;;  %v4062_v0 = vld [vmem:[#allocation3 + $0x18] sm:$0x3]  ;;  %v4091_v44 = vsel %vm4036_vm1, %v4061_v40, %v4079_v39 }
 0x551   : > { %v8979_v55 = vmul.f32 -1.442695, %v5302_v1 }
 0x552   : > { %v8980_v58 = vmul.f32 -1.442695, %v5303_v9  ;;  %v4069_v9 = vld [vmem:[#allocation3 + $0xb0] sm:$0xc0] }
 0x553   : > { %10403 = vpow2.f32 %v8979_v55  ;;  %v4081_v40 = vrot.slane %v4069_v9, 4 }
 0x554   : > { %10405 = vpow2.f32 %v8980_v58 }
 0x55d   : > { %v10404_v38 = vpop.eup %10403 }
 0x55e   : > { %v10406_v41 = vpop.eup %10405 }
 0x58c   : > { %v5172_v45 = vpop.f32.mrb[4].mxu0  ;;  %v5213_v46 = vpop.f32.mrb[4].mxu1 }
 0x58d   : > { %v5214_v47 = vadd.f32 %v5213_v46, %v5172_v45  ;;  %v5174_v48 = vpop.f32.mrb[5].mxu0  ;;  %v5215_v49 = vpop.f32.mrb[5].mxu1  ;;  %v4092_v45 = vsel %vm4036_vm1, %v4062_v0, %v4080_v42  ;;  %v13207_v46 = vshrl.u32 %v4000_v43, 7  ;;  %v4063_v43 = vld [vmem:[#allocation3 + $0x20] sm:$0x3] }
 0x58e   : > { %v5216_v50 = vadd.f32 %v5215_v49, %v5174_v48  ;;  %v5176_v51 = vpop.f32.mrb[6].mxu0  ;;  %v5217_v33 = vpop.f32.mrb[6].mxu1 }
 0x58f   : > { %v5177_v10 = vpop.f32.mrb[7].mxu0  ;;  %v5218_v52 = vpop.f32.mrb[7].mxu1  ;;  %v5316_v48 = vadd.f32 %v5214_v47, %v4091_v44  ;;  %v5310_v51 = vadd.f32 1.0, %v10404_v38  ;;  %v4002_v33 = vsub.s32 0, %v13207_v46  ;;  %v4006_v37 = vsub.s32 2, %v13207_v46 }
 0x590   : > { %v5317_v49 = vadd.f32 %v5216_v50, %v4092_v45  ;;  %v4020_v10 = vsub.s32 1, %v13207_v46  ;;  %v5311_v52 = vadd.f32 1.0, %v10406_v41  ;;  %v4024_v53 = vsub.s32 3, %v13207_v46 }
 0x591   : > { %v8981_v5 = vmul.f32 -1.442695, %v5316_v48  ;;  %10407 = vrcp.f32 %v5310_v51  ;;  %v4003_v56 = vrot.slane %v3998_v4, %v4002_v33  ;;  %v4007_v61 = vrot.slane %v3998_v4, %v4006_v37 }
 0x592   : > { %v8982_v54 = vmul.f32 -1.442695, %v5317_v49  ;;  %v4021_v8 = vrot.slane %v3998_v4, %v4020_v10  ;;  %10409 = vrcp.f32 %v5311_v52  ;;  %v4025_v47 = vrot.slane %v3998_v4, %v4024_v53  ;;  %v4064_v49 = vld [vmem:[#allocation3 + $0x28] sm:$0x3] }
 0x593   : > { %10411 = vpow2.f32 %v8981_v5  ;;  %v4013_v50 = vrot.slane %v4003_v56, %v4002_v33  ;;  %v4017_v55 = vrot.slane %v4007_v61, %v4002_v33  ;;  %v4082_v38 = vrot.slane %v4070_v35, 4 }
 0x594   : > { %10413 = vpow2.f32 %v8982_v54  ;;  %v4031_v1 = vrot.slane %v4021_v8, %v4020_v10  ;;  %v4035_v58 = vrot.slane %v4025_v47, %v4020_v10  ;;  %v4093_v54 = vsel %vm4036_vm1, %v4063_v43, %v4081_v40 }
 0x595   : > { %v4094_v47 = vsel %vm4036_vm1, %v4064_v49, %v4082_v38  ;;  %vm4046_vm2 = vcmp.lt.s32.totalorder %v13207_v46, 2 }
 0x596   : > { %v13215_v39 = vsel %vm4036_vm1, %v4013_v50, %v4031_v1  ;;  %v13218_v45 = vsel %vm4036_vm1, %v4017_v55, %v4035_v58  ;;  %vm4051_vm4 = vmxor %vm4046_vm2, %vm11519_vm3 }
 0x597   : > { %vm4055_vm5 = vmxor %vm4051_vm4, %vm11519_vm3 }
 0x598   : > { %vm13227_vm6 = vmpackc.low %vm4055_vm5, %vm4055_vm5 }
 0x599   : > { %vm13237_vm7 = vmpackc.low %vm4051_vm4, %vm4051_vm4 }
 0x59b   : > { %v10408_v48 = vpop.eup %10407 }
 0x59c   : > { %v10410_v52 = vpop.eup %10409 }
 0x59d   : > { %v10412_v5 = vpop.eup %10411 }
 0x59e   : > { %v10414_v8 = vpop.eup %10413  ;;  %v5324_v1 = vadd.f32 1.0, %v10412_v5  ;;  %v13280_v5 = vld [vmem:[%s11906_s6 + $0x33c] ss:$24 sps:$4 sm:$0xff]  }
 0x59f   : > { %v5325_v55 = vadd.f32 1.0, %v10414_v8  ;;  %v13292_v8 = vld [vmem:[%s11906_s6 + $0x6c] ss:$24 sps:$4 sm:$0xff]  }
 0x5cc   : > { %v5254_v36 = vpop.f32.mrb[8].mxu0  ;;  %v5295_v42 = vpop.f32.mrb[8].mxu1 }
 0x5cd   : > { %v5296_v0 = vadd.f32 %v5295_v42, %v5254_v36  ;;  %v5256_v44 = vpop.f32.mrb[9].mxu0  ;;  %v5297_v41 = vpop.f32.mrb[9].mxu1 }
 0x5ce   : > { %v5298_v51 = vadd.f32 %v5297_v41, %v5256_v44  ;;  %v5258_v33 = vpop.f32.mrb[10].mxu0  ;;  %v5299_v10 = vpop.f32.mrb[10].mxu1 }
 0x5cf   : > { %v5330_v4 = vadd.f32 %v5296_v0, %v13215_v39  ;;  %v5259_v37 = vpop.f32.mrb[11].mxu0  ;;  %v5300_v53 = vpop.f32.mrb[11].mxu1 }
 0x5d0   : > { %v5331_v56 = vadd.f32 %v5298_v51, %v13218_v45  ;;  %v13266_v37 = vld [vmem:[%s11906_s6 + $0x308] ss:$24 sps:$4 sm:$0xff]   ;;  %v13276_v53 = vld [vmem:[%s11906_s6 + $0x3c] ss:$24 sps:$4 sm:$0xff]  }
 0x5d1   : > { %v5332_v61 = vmul.f32 %v10408_v48, %v5330_v4  ;;  %v13262_v4 = vld [vmem:[%s11906_s6 + $0x8] ss:$24 sps:$4 sm:$0xff]  }
 0x5d2   : > { %v5333_v50 = vmul.f32 %v10410_v52, %v5331_v56  ;;  %v13288_v56 = vld [vmem:[%s11906_s6 + $0x338] ss:$24 sps:$4 sm:$0xff]  }
 0x5d3   : > { %v5334_v9 = vadd.f32 %v5332_v61, %v4093_v54  ;;  %v13284_v54 = vld [vmem:[%s11906_s6 + $0x38] ss:$24 sps:$4 sm:$0xff]   ;;  %v13296_v61 = vld [vmem:[%s11906_s6 + $0x36c] ss:$24 sps:$4 sm:$0xff]  }
 0x5d4   : > { %v5335_v58 = vadd.f32 %v5333_v50, %v4094_v47  ;;  %v13300_v47 = vld [vmem:[%s11906_s6 + $0x68] ss:$24 sps:$4 sm:$0xff]  }
 0x5d5   : > { %10415 = vtanh.f32 %v5334_v9  ;;  %v13304_v50 = vld [vmem:[%s11906_s6 + $0x368] ss:$24 sps:$4 sm:$0xff]   ;;  %v13312_v9 = vld [vmem:[%s11906_s6 + $0x39c] ss:$24 sps:$4 sm:$0xff]  }
 0x5d6   : > { %10417 = vtanh.f32 %v5335_v58  ;;  %v13320_v58 = vld [vmem:[%s11906_s6 + $0x398] ss:$24 sps:$4 sm:$0xff]  }
 0x5d7   : > { %10419 = vrcp.f32 %v5324_v1  ;;  %v13308_v1 = vld [vmem:[%s11906_s6 + $0x9c] ss:$24 sps:$4 sm:$0xff]  }
 0x5d8   : > { %10421 = vrcp.f32 %v5325_v55  ;;  %v13316_v55 = vld [vmem:[%s11906_s6 + $0x98] ss:$24 sps:$4 sm:$0xff]  }
 0x5df   : > { %v10416_v35 = vpop.eup %10415 }
 0x5e0   : > { %v10418_v36 = vpop.eup %10417  ;;  %v5338_v40 = vsub.f32 0.0, %v10416_v35 }
 0x5e1   : > { %v10420_v42 = vpop.eup %10419  ;;  %v5339_v43 = vsub.f32 0.0, %v10418_v36 }
 0x5e2   : > { %v10422_v0 = vpop.eup %10421  ;;  %v5340_v44 = vmul.f32 %v10420_v42, %v5338_v40  ;;  %v13332_v40 = vld [vmem:[%s11906_s6 + $0xc8] ss:$24 sps:$4 sm:$0xff]  }
 0x5e3   : > { %v5341_v38 = vmul.f32 %v10422_v0, %v5339_v43  ;;  %v13336_v42 = vld [vmem:[%s11906_s6 + $0x3c8] ss:$24 sps:$4 sm:$0xff]   ;;  %v13340_v43 = vld [vmem:[%s11906_s6 + $0xfc] ss:$24 sps:$4 sm:$0xff]  }
 0x5e4   : > { %v13225_v41 = vadd.f32 %v10416_v35, %v5340_v44  ;;  %v13324_v35 = vld [vmem:[%s11906_s6 + $0xcc] ss:$24 sps:$4 sm:$0xff]   ;;  %v13344_v0 = vld [vmem:[%s11906_s6 + $0x3fc] ss:$24 sps:$4 sm:$0xff]  }
 0x5e5   : > { %v13231_v49 = vadd.f32 %v10418_v36, %v5341_v38  ;;  %v13328_v36 = vld [vmem:[%s11906_s6 + $0x3cc] ss:$24 sps:$4 sm:$0xff]   ;;  %v17366_v44 = vld [vmem:[#allocation51_spill] sm:$0xff] }
 0x5e6   : > { %v13235_v46 = vpack.c.bf16 %v13225_v41, %v13225_v41  ;;  %v17367_v38 = vld [vmem:[#allocation52_spill] sm:$0xff] }
 0x5e7   : > { %v13243_v33 = vpack.c.bf16 %v13231_v49, %v13231_v49 }
 0x5e8   : > { %5346 = vst [vmem:[#allocation2] sm:$0x1] %v13235_v46  ;;  %v5350_v10 = vrot.slane %v13235_v46, 2 }
 0x5e9   : > { %5347 = vst [vmem:[#allocation2 + $0x8] sm:$0x1] %v13243_v33  ;;  %v5351_v52 = vrot.slane %v13243_v33, 2  ;;  %8985 = vmatprep.mubr.msk.bf16.mxu0 %vm13227_vm6, %v13243_v33  ;;  %8991 = vmatprep.mubr.msk.bf16.mxu1 %vm13237_vm7, %v13243_v33 }
 0x5ea   : > { %5354 = vst [vmem:[#allocation2 + $0x10] sm:$0x80] %v5350_v10  ;;  %8988 = vmatmul.mubr.msk.bf16.vlgmr.msra.gmra.mrb[12].mxu0 %vm13227_vm6, %v13235_v46  ;;  %8994 = vmatmul.mubr.msk.bf16.vlgmr.msra.gmra.mrb[12].mxu1 %vm13237_vm7, %v13235_v46  ;;  %v17368_v10 = vld [vmem:[#allocation53_spill] sm:$0xff] }
 0x5eb   : > { %5355 = vst [vmem:[#allocation2 + $0x18] sm:$0x80] %v5351_v52  ;;  %5501 = vmatpush1.bf16.msra.mxu0 %v13262_v4  ;;  %5542 = vmatpush1.bf16.msra.mxu1 %v13266_v37  ;;  %v17369_v52 = vld [vmem:[#allocation54_spill] sm:$0xff] }
 0x5ec   : > { %8997 = vmatprep.mubr.msk.bf16.mxu0 %vm13227_vm6, %v13243_v33  ;;  %9003 = vmatprep.mubr.msk.bf16.mxu1 %vm13237_vm7, %v13243_v33 }
 0x5ed   : > { %5502 = vmatprep.subr.bf16.mxu0 %v13276_v53  ;;  %5543 = vmatprep.subr.bf16.mxu1 %v13280_v5 }
 0x5ef   : > { %5503 = vmatpush1.bf16.msra.mxu0 %v13284_v54  ;;  %5544 = vmatpush1.bf16.msra.mxu1 %v13288_v56 }
 0x5f0   : > { %5504 = vmatprep.subr.bf16.mxu0 %v13292_v8  ;;  %5545 = vmatprep.subr.bf16.mxu1 %v13296_v61 }
 0x5f3   : > { %5505 = vmatpush1.bf16.msra.mxu0 %v13300_v47  ;;  %5546 = vmatpush1.bf16.msra.mxu1 %v13304_v50 }
 0x5f4   : > { %5506 = vmatprep.subr.bf16.mxu0 %v13308_v1  ;;  %5547 = vmatprep.subr.bf16.mxu1 %v13312_v9 }
 0x5f7   : > { %5507 = vmatpush1.bf16.msra.mxu0 %v13316_v55  ;;  %5548 = vmatpush1.bf16.msra.mxu1 %v13320_v58 }
 0x5f8   : > { %5508 = vmatprep.subr.bf16.mxu0 %v13324_v35  ;;  %5549 = vmatprep.subr.bf16.mxu1 %v13328_v36 }
 0x5fb   : > { %5509 = vmatpush1.bf16.msra.mxu0 %v13332_v40  ;;  %5550 = vmatpush1.bf16.msra.mxu1 %v13336_v42 }
 0x5fc   : > { %5510 = vmatprep.subr.bf16.mxu0 %v13340_v43  ;;  %5551 = vmatprep.subr.bf16.mxu1 %v13344_v0 }
 0x5ff   : > { %5511 = vmatpush1.bf16.msra.mxu0 %v12606_v22  ;;  %5552 = vmatpush1.bf16.msra.mxu1 %v12609_v19  ;;  %v17343_v22 = vld [vmem:[#allocation28_spill] sm:$0xff]  ;;  %v17344_v19 = vld [vmem:[#allocation29_spill] sm:$0xff] }
 0x600   : > { %5512 = vmatprep.subr.bf16.mxu0 %v12612_v23  ;;  %5553 = vmatprep.subr.bf16.mxu1 %v12615_v26  ;;  %v17345_v23 = vld [vmem:[#allocation30_spill] sm:$0xff]  ;;  %v17346_v26 = vld [vmem:[#allocation31_spill] sm:$0xff] }
 0x603   : > { %5513 = vmatpush1.bf16.msra.mxu0 %v12618_v27  ;;  %5554 = vmatpush1.bf16.msra.mxu1 %v12621_v28  ;;  %v17347_v27 = vld [vmem:[#allocation32_spill] sm:$0xff]  ;;  %v17348_v28 = vld [vmem:[#allocation33_spill] sm:$0xff] }
 0x604   : > { %5514 = vmatprep.subr.bf16.mxu0 %v12626_v29  ;;  %5555 = vmatprep.subr.bf16.mxu1 %v12631_v30  ;;  %v17349_v29 = vld [vmem:[#allocation34_spill] sm:$0xff]  ;;  %v17350_v30 = vld [vmem:[#allocation35_spill] sm:$0xff] }
 0x607   : > { %5515 = vmatpush1.bf16.msra.mxu0 %v12634_v31  ;;  %5556 = vmatpush1.bf16.msra.mxu1 %v12639_v32  ;;  %v17351_v31 = vld [vmem:[#allocation36_spill] sm:$0xff]  ;;  %v17352_v32 = vld [vmem:[#allocation37_spill] sm:$0xff] }
 0x608   : > { %5516 = vmatprep.subr.bf16.mxu0 %v12642_v34  ;;  %5557 = vmatprep.subr.bf16.mxu1 %v12647_v59  ;;  %v17353_v34 = vld [vmem:[#allocation38_spill] sm:$0xff]  ;;  %v17354_v59 = vld [vmem:[#allocation39_spill] sm:$0xff] }
 0x60b   : > { %5517 = vmatpush1.bf16.msra.mxu0 %v12650_v60  ;;  %5558 = vmatpush1.bf16.msra.mxu1 %v12653_v62  ;;  %v17355_v60 = vld [vmem:[#allocation40_spill] sm:$0xff]  ;;  %v17356_v62 = vld [vmem:[#allocation41_spill] sm:$0xff] }
 0x60c   : > { %5518 = vmatprep.subr.bf16.mxu0 %v12658_v63  ;;  %5559 = vmatprep.subr.bf16.mxu1 %v12663_v2  ;;  %v17357_v63 = vld [vmem:[#allocation42_spill] sm:$0xff]  ;;  %v17358_v2 = vld [vmem:[#allocation43_spill] sm:$0xff] }
 0x60f   : > { %5519 = vmatpush1.bf16.msra.mxu0 %v12666_v3  ;;  %5560 = vmatpush1.bf16.msra.mxu1 %v12671_v6  ;;  %v17359_v3 = vld [vmem:[#allocation44_spill] sm:$0xff]  ;;  %v17360_v6 = vld [vmem:[#allocation45_spill] sm:$0xff] }
 0x610   : > { %5520 = vmatprep.subr.bf16.mxu0 %v12674_v7  ;;  %5561 = vmatprep.subr.bf16.mxu1 %v12679_v11  ;;  %v17361_v7 = vld [vmem:[#allocation46_spill] sm:$0xff]  ;;  %v17362_v11 = vld [vmem:[#allocation47_spill] sm:$0xff] }
 0x613   : > { %5521 = vmatpush1.bf16.msra.mxu0 %v12682_v12  ;;  %5562 = vmatpush1.bf16.msra.mxu1 %v12685_v13  ;;  %v17363_v12 = vld [vmem:[#allocation48_spill] sm:$0xff]  ;;  %v17364_v13 = vld [vmem:[#allocation49_spill] sm:$0xff] }
 0x614   : > { %5522 = vmatprep.subr.bf16.mxu0 %v17343_v22  ;;  %5563 = vmatprep.subr.bf16.mxu1 %v17344_v19  ;;  %v17370_v22 = vld [vmem:[#allocation55_spill] sm:$0xff]  ;;  %v17371_v19 = vld [vmem:[#allocation56_spill] sm:$0xff] }
 0x617   : > { %5523 = vmatpush1.bf16.msra.mxu0 %v17345_v23  ;;  %5564 = vmatpush1.bf16.msra.mxu1 %v17346_v26  ;;  %v17372_v23 = vld [vmem:[#allocation57_spill] sm:$0xff]  ;;  %v17373_v26 = vld [vmem:[#allocation58_spill] sm:$0xff] }
 0x618   : > { %5524 = vmatprep.subr.bf16.mxu0 %v17347_v27  ;;  %5565 = vmatprep.subr.bf16.mxu1 %v17348_v28  ;;  %v17374_v27 = vld [vmem:[#allocation59_spill] sm:$0xff]  ;;  %v17375_v28 = vld [vmem:[#allocation60_spill] sm:$0xff] }
 0x61b   : > { %5525 = vmatpush1.bf16.msra.mxu0 %v12714_v21  ;;  %5566 = vmatpush1.bf16.msra.mxu1 %v17349_v29  ;;  %v17365_v21 = vld [vmem:[#allocation50_spill] sm:$0xff] }
 0x61c   : > { %5526 = vmatprep.subr.bf16.mxu0 %v17350_v30  ;;  %5567 = vmatprep.subr.bf16.mxu1 %v17351_v31  ;;  %v17377_v29 = vld [vmem:[#allocation62_spill] sm:$0xff]  ;;  %v17378_v30 = vld [vmem:[#allocation63_spill] sm:$0xff]  ;;  %v17379_v31 = vld [vmem:[#allocation64_spill] sm:$0xff] }
 0x61f   : > { %5527 = vmatpush1.bf16.msra.mxu0 %v17352_v32  ;;  %5568 = vmatpush1.bf16.msra.mxu1 %v17353_v34  ;;  %v17380_v32 = vld [vmem:[#allocation65_spill] sm:$0xff]  ;;  %v17381_v34 = vld [vmem:[#allocation66_spill] sm:$0xff] }
 0x620   : > { %5528 = vmatprep.subr.bf16.mxu0 %v17354_v59  ;;  %5569 = vmatprep.subr.bf16.mxu1 %v17355_v60  ;;  %v17382_v59 = vld [vmem:[#allocation67_spill] sm:$0xff]  ;;  %v17383_v60 = vld [vmem:[#allocation68_spill] sm:$0xff] }
 0x623   : > { %5529 = vmatpush1.bf16.msra.mxu0 %v17356_v62  ;;  %5570 = vmatpush1.bf16.msra.mxu1 %v17357_v63  ;;  %v17384_v62 = vld [vmem:[#allocation69_spill] sm:$0xff]  ;;  %v17385_v63 = vld [vmem:[#allocation70_spill] sm:$0xff] }
 0x624   : > { %5530 = vmatprep.subr.bf16.mxu0 %v17358_v2  ;;  %5571 = vmatprep.subr.bf16.mxu1 %v17359_v3  ;;  %v17386_v2 = vld [vmem:[#allocation71_spill] sm:$0xff]  ;;  %v17387_v3 = vld [vmem:[#allocation72_spill] sm:$0xff] }
 0x627   : > { %5531 = vmatpush1.bf16.msra.mxu0 %v17360_v6  ;;  %5572 = vmatpush1.bf16.msra.mxu1 %v17361_v7  ;;  %v17388_v6 = vld [vmem:[#allocation73_spill] sm:$0xff]  ;;  %v17389_v7 = vld [vmem:[#allocation74_spill] sm:$0xff] }
 0x628   : > { %5582 = vmatprep.subr.bf16.mxu0 %v17362_v11  ;;  %5623 = vmatprep.subr.bf16.mxu1 %v17363_v12  ;;  %v17390_v11 = vld [vmem:[#allocation75_spill] sm:$0xff]  ;;  %v17391_v12 = vld [vmem:[#allocation76_spill] sm:$0xff] }
 0x62a   : > { %9000 = vmatmul.mubr.msk.bf16.vlgmr.msra.gmra.mrb[16].mxu0 %vm13227_vm6, %v13235_v46  ;;  %9006 = vmatmul.mubr.msk.bf16.vlgmr.msra.gmra.mrb[16].mxu1 %vm13237_vm7, %v13235_v46 }
 0x62b   : > { %5583 = vmatpush1.bf16.msra.mxu0 %v17364_v13  ;;  %9009 = vmatprep.mubr.msk.bf16.mxu0 %vm13227_vm6, %v13243_v33  ;;  %v17392_v13 = vld [vmem:[#allocation77_spill] sm:$0xff] }
 0x62c   : > { %5624 = vmatpush1.bf16.msra.mxu1 %v17365_v21  ;;  %9015 = vmatprep.mubr.msk.bf16.mxu1 %vm13237_vm7, %v13243_v33  ;;  %v17376_v33 = vld [vmem:[#allocation61_spill] sm:$0xff]  ;;  %v17393_v21 = vld [vmem:[#allocation78_spill] sm:$0xff] }
 0x62d   : > { %5584 = vmatprep.subr.bf16.mxu0 %v17366_v44  ;;  %5625 = vmatprep.subr.bf16.mxu1 %v17367_v38  ;;  %v17394_v44 = vld [vmem:[#allocation79_spill] sm:$0xff]  ;;  %v17395_v38 = vld [vmem:[#allocation80_spill] sm:$0xff] }
 0x62f   : > { %5585 = vmatpush1.bf16.msra.mxu0 %v17368_v10  ;;  %v17396_v10 = vld [vmem:[#allocation81_spill] sm:$0xff] }
 0x630   : > { %5626 = vmatpush1.bf16.msra.mxu1 %v17369_v52  ;;  %5586 = vmatprep.subr.bf16.mxu0 %v17370_v22  ;;  %v17397_v52 = vld [vmem:[#allocation82_spill] sm:$0xff]  ;;  %v17398_v22 = vld [vmem:[#allocation83_spill] sm:$0xff] }
 0x631   : > { %5627 = vmatprep.subr.bf16.mxu1 %v17371_v19  ;;  %v17399_v19 = vld [vmem:[#allocation84_spill] sm:$0xff] }
 0x633   : > { %5587 = vmatpush1.bf16.msra.mxu0 %v17372_v23  ;;  %v17400_v23 = vld [vmem:[#allocation85_spill] sm:$0xff] }
 0x634   : > { %5628 = vmatpush1.bf16.msra.mxu1 %v17373_v26  ;;  %5588 = vmatprep.subr.bf16.mxu0 %v17374_v27  ;;  %v17401_v26 = vld [vmem:[#allocation86_spill] sm:$0xff]  ;;  %v17402_v27 = vld [vmem:[#allocation87_spill] sm:$0xff] }
 0x635   : > { %5629 = vmatprep.subr.bf16.mxu1 %v17375_v28  ;;  %v17403_v28 = vld [vmem:[#allocation88_spill] sm:$0xff] }
 0x637   : > { %5589 = vmatpush1.bf16.msra.mxu0 %v17376_v33  ;;  %v17404_v33 = vld [vmem:[#allocation89_spill] sm:$0xff] }
 0x638   : > { %5630 = vmatpush1.bf16.msra.mxu1 %v17377_v29  ;;  %5590 = vmatprep.subr.bf16.mxu0 %v17378_v30  ;;  %v17405_v29 = vld [vmem:[#allocation90_spill] sm:$0xff]  ;;  %v17406_v30 = vld [vmem:[#allocation91_spill] sm:$0xff] }
 0x639   : > { %5631 = vmatprep.subr.bf16.mxu1 %v17379_v31  ;;  %v17407_v31 = vld [vmem:[#allocation92_spill] sm:$0xff] }
 0x63b   : > { %5591 = vmatpush1.bf16.msra.mxu0 %v17380_v32  ;;  %v17408_v32 = vld [vmem:[#allocation93_spill] sm:$0xff] }
 0x63c   : > { %5632 = vmatpush1.bf16.msra.mxu1 %v17381_v34  ;;  %5592 = vmatprep.subr.bf16.mxu0 %v17382_v59  ;;  %v17409_v34 = vld [vmem:[#allocation94_spill] sm:$0xff]  ;;  %v17410_v59 = vld [vmem:[#allocation95_spill] sm:$0xff] }
 0x63d   : > { %5633 = vmatprep.subr.bf16.mxu1 %v17383_v60  ;;  %v17411_v60 = vld [vmem:[#allocation96_spill] sm:$0xff] }
 0x63f   : > { %5593 = vmatpush1.bf16.msra.mxu0 %v17384_v62  ;;  %v17412_v62 = vld [vmem:[#allocation97_spill] sm:$0xff] }
 0x640   : > { %5634 = vmatpush1.bf16.msra.mxu1 %v17385_v63  ;;  %5594 = vmatprep.subr.bf16.mxu0 %v17386_v2  ;;  %v17413_v63 = vld [vmem:[#allocation98_spill] sm:$0xff]  ;;  %v17414_v2 = vld [vmem:[#allocation99_spill] sm:$0xff] }
 0x641   : > { %5635 = vmatprep.subr.bf16.mxu1 %v17387_v3  ;;  %v17415_v3 = vld [vmem:[#allocation100_spill] sm:$0xff] }
 0x643   : > { %5595 = vmatpush1.bf16.msra.mxu0 %v17388_v6  ;;  %v17416_v6 = vld [vmem:[#allocation101_spill] sm:$0xff] }
 0x644   : > { %5636 = vmatpush1.bf16.msra.mxu1 %v17389_v7  ;;  %5596 = vmatprep.subr.bf16.mxu0 %v17390_v11  ;;  %v17417_v7 = vld [vmem:[#allocation102_spill] sm:$0xff]  ;;  %v17418_v11 = vld [vmem:[#allocation103_spill] sm:$0xff] }
 0x645   : > { %5637 = vmatprep.subr.bf16.mxu1 %v17391_v12  ;;  %v17419_v12 = vld [vmem:[#allocation104_spill] sm:$0xff] }
 0x647   : > { %5597 = vmatpush1.bf16.msra.mxu0 %v17392_v13  ;;  %v17420_v13 = vld [vmem:[#allocation105_spill] sm:$0xff] }
 0x648   : > { %5638 = vmatpush1.bf16.msra.mxu1 %v17393_v21  ;;  %5598 = vmatprep.subr.bf16.mxu0 %v17394_v44  ;;  %v17421_v21 = vld [vmem:[#allocation106_spill] sm:$0xff]  ;;  %v17422_v44 = vld [vmem:[#allocation107_spill] sm:$0xff] }
 0x649   : > { %5639 = vmatprep.subr.bf16.mxu1 %v17395_v38  ;;  %v17423_v38 = vld [vmem:[#allocation108_spill] sm:$0xff] }
 0x64b   : > { %5599 = vmatpush1.bf16.msra.mxu0 %v17396_v10  ;;  %v17424_v10 = vld [vmem:[#allocation109_spill] sm:$0xff] }
 0x64c   : > { %5640 = vmatpush1.bf16.msra.mxu1 %v17397_v52  ;;  %5600 = vmatprep.subr.bf16.mxu0 %v17398_v22  ;;  %v17428_v52 = vld [vmem:[#allocation113_spill] sm:$0xff]  ;;  %v17429_v22 = vld [vmem:[#allocation114_spill] sm:$0xff] }
 0x64d   : > { %5641 = vmatprep.subr.bf16.mxu1 %v17399_v19  ;;  %v17430_v19 = vld [vmem:[#allocation115_spill] sm:$0xff] }
 0x64f   : > { %5601 = vmatpush1.bf16.msra.mxu0 %v17400_v23  ;;  %v17431_v23 = vld [vmem:[#allocation116_spill] sm:$0xff] }
 0x650   : > { %5642 = vmatpush1.bf16.msra.mxu1 %v17401_v26  ;;  %5602 = vmatprep.subr.bf16.mxu0 %v17402_v27  ;;  %v17432_v26 = vld [vmem:[#allocation117_spill] sm:$0xff]  ;;  %v17433_v27 = vld [vmem:[#allocation118_spill] sm:$0xff] }
 0x651   : > { %5643 = vmatprep.subr.bf16.mxu1 %v17403_v28  ;;  %v17434_v28 = vld [vmem:[#allocation119_spill] sm:$0xff] }
 0x653   : > { %5603 = vmatpush1.bf16.msra.mxu0 %v17404_v33  ;;  %v17436_v33 = vld [vmem:[#allocation121_spill] sm:$0xff] }
 0x654   : > { %5644 = vmatpush1.bf16.msra.mxu1 %v17405_v29  ;;  %5604 = vmatprep.subr.bf16.mxu0 %v17406_v30  ;;  %v17437_v29 = vld [vmem:[#allocation122_spill] sm:$0xff]  ;;  %v17438_v30 = vld [vmem:[#allocation123_spill] sm:$0xff] }
 0x655   : > { %5645 = vmatprep.subr.bf16.mxu1 %v17407_v31  ;;  %v17439_v31 = vld [vmem:[#allocation124_spill] sm:$0xff] }
 0x657   : > { %5605 = vmatpush1.bf16.msra.mxu0 %v17408_v32  ;;  %v17440_v32 = vld [vmem:[#allocation125_spill] sm:$0xff] }
 0x658   : > { %5646 = vmatpush1.bf16.msra.mxu1 %v17409_v34  ;;  %5606 = vmatprep.subr.bf16.mxu0 %v17410_v59  ;;  %v17441_v34 = vld [vmem:[#allocation126_spill] sm:$0xff]  ;;  %v17442_v59 = vld [vmem:[#allocation127_spill] sm:$0xff] }
 0x659   : > { %5647 = vmatprep.subr.bf16.mxu1 %v17411_v60  ;;  %v17443_v60 = vld [vmem:[#allocation128_spill] sm:$0xff] }
 0x65b   : > { %5607 = vmatpush1.bf16.msra.mxu0 %v17412_v62  ;;  %v17444_v62 = vld [vmem:[#allocation129_spill] sm:$0xff] }
 0x65c   : > { %5648 = vmatpush1.bf16.msra.mxu1 %v17413_v63  ;;  %5608 = vmatprep.subr.bf16.mxu0 %v17414_v2  ;;  %v17445_v63 = vld [vmem:[#allocation130_spill] sm:$0xff]  ;;  %v17446_v2 = vld [vmem:[#allocation131_spill] sm:$0xff] }
 0x65d   : > { %5649 = vmatprep.subr.bf16.mxu1 %v17415_v3  ;;  %v17447_v3 = vld [vmem:[#allocation132_spill] sm:$0xff] }
 0x65f   : > { %5609 = vmatpush1.bf16.msra.mxu0 %v17416_v6  ;;  %v17448_v6 = vld [vmem:[#allocation133_spill] sm:$0xff] }
 0x660   : > { %5650 = vmatpush1.bf16.msra.mxu1 %v17417_v7  ;;  %5610 = vmatprep.subr.bf16.mxu0 %v13000_v20  ;;  %v17427_v20 = vld [vmem:[#allocation112_spill] sm:$0xff]  ;;  %v17449_v7 = vld [vmem:[#allocation134_spill] sm:$0xff] }
 0x661   : > { %5651 = vmatprep.subr.bf16.mxu1 %v17418_v11  ;;  %v17450_v11 = vld [vmem:[#allocation135_spill] sm:$0xff] }
 0x663   : > { %5611 = vmatpush1.bf16.msra.mxu0 %v13008_v14  ;;  %v17425_v14 = vld [vmem:[#allocation110_spill] sm:$0xff] }
 0x664   : > { %5652 = vmatpush1.bf16.msra.mxu1 %v17419_v12  ;;  %5612 = vmatprep.subr.bf16.mxu0 %v13016_v18  ;;  %v17426_v18 = vld [vmem:[#allocation111_spill] sm:$0xff] }
 0x665   : > { %5653 = vmatprep.subr.bf16.mxu1 %v17420_v13  ;;  %v13506_v12 = vld [vmem:[%s11906_s6 + $0x180] ss:$24 sps:$4 sm:$0xff]  }
 0x666   : > { %v13510_v13 = vld [vmem:[%s11906_s6 + $0x480] ss:$24 sps:$4 sm:$0xff]  }
 0x667   : > { %5613 = vmatpush1.bf16.msra.mxu0 %v17421_v21  ;;  %v13538_v21 = vld [vmem:[%s11906_s6 + $0x1e0] ss:$24 sps:$4 sm:$0xff]  }
 0x668   : > { %5654 = vmatpush1.bf16.msra.mxu1 %v17422_v44  ;;  %5766 = vmatprep.subr.bf16.mxu0 %v17423_v38  ;;  %v13542_v44 = vld [vmem:[%s11906_s6 + $0x4e0] ss:$24 sps:$4 sm:$0xff]   ;;  %v13546_v38 = vld [vmem:[%s11906_s6 + $0x214] ss:$24 sps:$4 sm:$0xff]  }
 0x669   : > { %5807 = vmatprep.subr.bf16.mxu1 %v17424_v10  ;;  %v13550_v10 = vld [vmem:[%s11906_s6 + $0x514] ss:$24 sps:$4 sm:$0xff]  }
 0x66a   : > { %9012 = vmatmul.mubr.msk.bf16.vlgmr.msra.gmra.mrb[20].mxu0 %vm13227_vm6, %v13235_v46 }
 0x66b   : > { %9018 = vmatmul.mubr.msk.bf16.vlgmr.msra.gmra.mrb[20].mxu1 %vm13237_vm7, %v13235_v46  ;;  %5767 = vmatpush1.bf16.msra.mxu0 %v17425_v14  ;;  %v17435_v46 = vld [vmem:[#allocation120_spill] sm:$0xff] }
 0x66c   : > { %5808 = vmatpush1.bf16.msra.mxu1 %v17426_v18  ;;  %5768 = vmatprep.subr.bf16.mxu0 %v17427_v20  ;;  %v13554_v14 = vld [vmem:[%s11906_s6 + $0x210] ss:$24 sps:$4 sm:$0xff]   ;;  %v13562_v20 = vld [vmem:[%s11906_s6 + $0x244] ss:$24 sps:$4 sm:$0xff]  }
 0x66d   : > { %5809 = vmatprep.subr.bf16.mxu1 %v17428_v52  ;;  %v13558_v18 = vld [vmem:[%s11906_s6 + $0x510] ss:$24 sps:$4 sm:$0xff]   ;;  %17451 = vst [vmem:[#allocation28_spill] sm:$0xff] %v13562_v20  ;;  %v13566_v52 = vld [vmem:[%s11906_s6 + $0x544] ss:$24 sps:$4 sm:$0xff]  }
 0x66e   : > { %17452 = vst [vmem:[#allocation29_spill] sm:$0xff] %v13566_v52 }
 0x66f   : > { %5769 = vmatpush1.bf16.msra.mxu0 %v17429_v22  ;;  %v13570_v22 = vld [vmem:[%s11906_s6 + $0x240] ss:$24 sps:$4 sm:$0xff]  }
 0x670   : > { %5810 = vmatpush1.bf16.msra.mxu1 %v17430_v19  ;;  %5770 = vmatprep.subr.bf16.mxu0 %v17431_v23  ;;  %17453 = vst [vmem:[#allocation30_spill] sm:$0xff] %v13570_v22  ;;  %v13574_v19 = vld [vmem:[%s11906_s6 + $0x540] ss:$24 sps:$4 sm:$0xff]   ;;  %v13578_v23 = vld [vmem:[%s11906_s6 + $0x274] ss:$24 sps:$4 sm:$0xff]  }
 0x671   : > { %5811 = vmatprep.subr.bf16.mxu1 %v17432_v26  ;;  %17454 = vst [vmem:[#allocation31_spill] sm:$0xff] %v13574_v19  ;;  %17455 = vst [vmem:[#allocation32_spill] sm:$0xff] %v13578_v23  ;;  %v13582_v26 = vld [vmem:[%s11906_s6 + $0x574] ss:$24 sps:$4 sm:$0xff]  }
 0x672   : > { %17456 = vst [vmem:[#allocation33_spill] sm:$0xff] %v13582_v26 }
 0x673   : > { %5771 = vmatpush1.bf16.msra.mxu0 %v17433_v27  ;;  %v13586_v27 = vld [vmem:[%s11906_s6 + $0x270] ss:$24 sps:$4 sm:$0xff]  }
 0x674   : > { %5812 = vmatpush1.bf16.msra.mxu1 %v17434_v28  ;;  %5772 = vmatprep.subr.bf16.mxu0 %v17435_v46  ;;  %17457 = vst [vmem:[#allocation34_spill] sm:$0xff] %v13586_v27  ;;  %v13590_v28 = vld [vmem:[%s11906_s6 + $0x570] ss:$24 sps:$4 sm:$0xff]   ;;  %v13594_v46 = vld [vmem:[%s11906_s6 + $0x2a4] ss:$24 sps:$4 sm:$0xff]  }
 0x675   : > { %5813 = vmatprep.subr.bf16.mxu1 %v17436_v33  ;;  %17458 = vst [vmem:[#allocation35_spill] sm:$0xff] %v13590_v28  ;;  %17459 = vst [vmem:[#allocation36_spill] sm:$0xff] %v13594_v46  ;;  %v13598_v33 = vld [vmem:[%s11906_s6 + $0x5a4] ss:$24 sps:$4 sm:$0xff]  }
 0x676   : > { %17460 = vst [vmem:[#allocation37_spill] sm:$0xff] %v13598_v33 }
 0x677   : > { %5773 = vmatpush1.bf16.msra.mxu0 %v17437_v29  ;;  %v13602_v29 = vld [vmem:[%s11906_s6 + $0x2a0] ss:$24 sps:$4 sm:$0xff]  }
 0x678   : > { %5814 = vmatpush1.bf16.msra.mxu1 %v17438_v30  ;;  %5774 = vmatprep.subr.bf16.mxu0 %v17439_v31  ;;  %17461 = vst [vmem:[#allocation38_spill] sm:$0xff] %v13602_v29  ;;  %v13606_v30 = vld [vmem:[%s11906_s6 + $0x5a0] ss:$24 sps:$4 sm:$0xff]   ;;  %v13610_v31 = vld [vmem:[%s11906_s6 + $0x2d4] ss:$24 sps:$4 sm:$0xff]  }
 0x679   : > { %5815 = vmatprep.subr.bf16.mxu1 %v17440_v32  ;;  %17462 = vst [vmem:[#allocation39_spill] sm:$0xff] %v13606_v30  ;;  %17463 = vst [vmem:[#allocation40_spill] sm:$0xff] %v13610_v31  ;;  %v13614_v32 = vld [vmem:[%s11906_s6 + $0x5d4] ss:$24 sps:$4 sm:$0xff]  }
 0x67a   : > { %17464 = vst [vmem:[#allocation41_spill] sm:$0xff] %v13614_v32 }
 0x67b   : > { %5775 = vmatpush1.bf16.msra.mxu0 %v17441_v34  ;;  %v13618_v34 = vld [vmem:[%s11906_s6 + $0x2d0] ss:$24 sps:$4 sm:$0xff]  }
 0x67c   : > { %5816 = vmatpush1.bf16.msra.mxu1 %v17442_v59  ;;  %5776 = vmatprep.subr.bf16.mxu0 %v17443_v60  ;;  %17465 = vst [vmem:[#allocation42_spill] sm:$0xff] %v13618_v34  ;;  %v13622_v59 = vld [vmem:[%s11906_s6 + $0x5d0] ss:$24 sps:$4 sm:$0xff]   ;;  %v13626_v60 = vld [vmem:[%s11906_s6 + $0xc] ss:$24 sps:$4 sm:$0xff]  }
 0x67d   : > { %5817 = vmatprep.subr.bf16.mxu1 %v17444_v62  ;;  %17466 = vst [vmem:[#allocation43_spill] sm:$0xff] %v13622_v59  ;;  %17467 = vst [vmem:[#allocation44_spill] sm:$0xff] %v13626_v60  ;;  %v13630_v62 = vld [vmem:[%s11906_s6 + $0x30c] ss:$24 sps:$4 sm:$0xff]  }
 0x67e   : > { %17468 = vst [vmem:[#allocation45_spill] sm:$0xff] %v13630_v62 }
 0x67f   : > { %5777 = vmatpush1.bf16.msra.mxu0 %v17445_v63 }
 0x680   : > { %5818 = vmatpush1.bf16.msra.mxu1 %v17446_v2  ;;  %5778 = vmatprep.subr.bf16.mxu0 %v17447_v3 }
 0x681   : > { %5819 = vmatprep.subr.bf16.mxu1 %v17448_v6 }
 0x683   : > { %5779 = vmatpush1.bf16.msra.mxu0 %v17449_v7 }
 0x684   : > { %5820 = vmatpush1.bf16.msra.mxu1 %v17450_v11  ;;  %5780 = vmatprep.subr.bf16.mxu0 %v13148_v16  ;;  %v13518_v16 = vld [vmem:[%s11906_s6 + $0x4b4] ss:$24 sps:$4 sm:$0xff]  }
 0x685   : > { %5821 = vmatprep.subr.bf16.mxu1 %v13152_v15  ;;  %v13514_v15 = vld [vmem:[%s11906_s6 + $0x1b4] ss:$24 sps:$4 sm:$0xff]  }
 0x687   : > { %5781 = vmatpush1.bf16.msra.mxu0 %v13156_v25  ;;  %v13530_v25 = vld [vmem:[%s11906_s6 + $0x1e4] ss:$24 sps:$4 sm:$0xff]  }
 0x688   : > { %5822 = vmatpush1.bf16.msra.mxu1 %v13160_v24  ;;  %5782 = vmatprep.subr.bf16.mxu0 %v13164_v17  ;;  %v13526_v24 = vld [vmem:[%s11906_s6 + $0x4b0] ss:$24 sps:$4 sm:$0xff]   ;;  %v13534_v17 = vld [vmem:[%s11906_s6 + $0x4e4] ss:$24 sps:$4 sm:$0xff]  }
 0x689   : > { %5823 = vmatprep.subr.bf16.mxu1 %v13168_v57  ;;  %v13522_v57 = vld [vmem:[%s11906_s6 + $0x1b0] ss:$24 sps:$4 sm:$0xff]  }
 0x68b   : > { %5783 = vmatpush1.bf16.msra.mxu0 %v13506_v12 }
 0x68c   : > { %5824 = vmatpush1.bf16.msra.mxu1 %v13510_v13  ;;  %5784 = vmatprep.subr.bf16.mxu0 %v13514_v15 }
 0x68d   : > { %5825 = vmatprep.subr.bf16.mxu1 %v13518_v16 }
 0x68f   : > { %5785 = vmatpush1.bf16.msra.mxu0 %v13522_v57 }
 0x690   : > { %5826 = vmatpush1.bf16.msra.mxu1 %v13526_v24  ;;  %5786 = vmatprep.subr.bf16.mxu0 %v13530_v25 }
 0x691   : > { %5827 = vmatprep.subr.bf16.mxu1 %v13534_v17 }
 0x693   : > { %5787 = vmatpush1.bf16.msra.mxu0 %v13538_v21 }
 0x694   : > { %5828 = vmatpush1.bf16.msra.mxu1 %v13542_v44  ;;  %5788 = vmatprep.subr.bf16.mxu0 %v13546_v38 }
 0x695   : > { %5829 = vmatprep.subr.bf16.mxu1 %v13550_v10 }
 0x697   : > { %5789 = vmatpush1.bf16.msra.mxu0 %v13554_v14 }
 0x698   : > { %5830 = vmatpush1.bf16.msra.mxu1 %v13558_v18  ;;  %5790 = vmatprep.subr.bf16.mxu0 %v13562_v20 }
 0x699   : > { %5831 = vmatprep.subr.bf16.mxu1 %v13566_v52 }
 0x69b   : > { %5791 = vmatpush1.bf16.msra.mxu0 %v13570_v22  ;;  %v5362_v22 = vld [vmem:[#allocation3 + $0x90] sm:$0x30] }
 0x69c   : > { %5832 = vmatpush1.bf16.msra.mxu1 %v13574_v19  ;;  %5792 = vmatprep.subr.bf16.mxu0 %v13578_v23  ;;  %v5356_v19 = vld [vmem:[#allocation3] sm:$0xc] }
 0x69d   : > { %5833 = vmatprep.subr.bf16.mxu1 %v13582_v26  ;;  %v5374_v52 = vrot.slane %v5356_v19, 2 }
 0x69f   : > { %5793 = vmatpush1.bf16.msra.mxu0 %v13586_v27 }
 0x6a0   : > { %5834 = vmatpush1.bf16.msra.mxu1 %v13590_v28  ;;  %5794 = vmatprep.subr.bf16.mxu0 %v13594_v46 }
 0x6a1   : > { %5835 = vmatprep.subr.bf16.mxu1 %v13598_v33 }
 0x6a3   : > { %5795 = vmatpush1.bf16.msra.mxu0 %v13602_v29 }
 0x6a4   : > { %5836 = vmatpush1.bf16.msra.mxu1 %v13606_v30  ;;  %5796 = vmatprep.subr.bf16.mxu0 %v13610_v31 }
 0x6a5   : > { %5837 = vmatprep.subr.bf16.mxu1 %v13614_v32 }
 0x6a7   : > { %5797 = vmatpush1.bf16.msra.mxu0 %v13618_v34 }
 0x6a8   : > { %5838 = vmatpush1.bf16.msra.mxu1 %v13622_v59  ;;  %5848 = vmatprep.subr.bf16.mxu0 %v13626_v60 }
 0x6a9   : > { %5889 = vmatprep.subr.bf16.mxu1 %v13630_v62 }
 0x6bd   : > { %v5452_v63 = vpop.f32.mrb[12].mxu0  ;;  %v5493_v2 = vpop.f32.mrb[12].mxu1 }
 0x6be   : > { %v5494_v3 = vadd.f32 %v5493_v2, %v5452_v63  ;;  %v5454_v6 = vpop.f32.mrb[13].mxu0  ;;  %v5495_v7 = vpop.f32.mrb[13].mxu1  ;;  %v5357_v63 = vld [vmem:[#allocation3 + $0x8] sm:$0xc]  ;;  %v5363_v2 = vld [vmem:[#allocation3 + $0x98] sm:$0x30] }
 0x6bf   : > { %v5496_v11 = vadd.f32 %v5495_v7, %v5454_v6  ;;  %v5456_v32 = vpop.f32.mrb[14].mxu0  ;;  %v5497_v34 = vpop.f32.mrb[14].mxu1  ;;  %v5392_v6 = vrot.slane %v5362_v22, 2 }
 0x6c0   : > { %v5457_v31 = vpop.f32.mrb[15].mxu0  ;;  %v5498_v30 = vpop.f32.mrb[15].mxu1  ;;  %v5375_v32 = vrot.slane %v5357_v63, 2  ;;  %v5393_v34 = vrot.slane %v5363_v2, 2 }
 0x6c1   : > { %v5404_v30 = vsel %vm4036_vm1, %v5374_v52, %v5392_v6 }
 0x6c2   : > { %v5405_v31 = vsel %vm4036_vm1, %v5375_v32, %v5393_v34 }
 0x6fd   : > { %v5534_v29 = vpop.f32.mrb[16].mxu0  ;;  %v5575_v59 = vpop.f32.mrb[16].mxu1 }
 0x6fe   : > { %v5576_v33 = vadd.f32 %v5575_v59, %v5534_v29  ;;  %v5536_v46 = vpop.f32.mrb[17].mxu0  ;;  %v5577_v28 = vpop.f32.mrb[17].mxu1  ;;  %v5664_v29 = vadd.f32 %v5494_v3, %v5404_v30  ;;  %v5665_v59 = vadd.f32 %v5496_v11, %v5405_v31 }
 0x6ff   : > { %v5578_v60 = vadd.f32 %v5577_v28, %v5536_v46  ;;  %v5538_v27 = vpop.f32.mrb[18].mxu0  ;;  %v5579_v26 = vpop.f32.mrb[18].mxu1  ;;  %v5365_v46 = vld [vmem:[#allocation3 + $0xa8] sm:$0x30] }
 0x700   : > { %v5539_v23 = vpop.f32.mrb[19].mxu0  ;;  %v5580_v62 = vpop.f32.mrb[19].mxu1  ;;  %v9019_v7 = vmul.f32 -1.442695, %v5664_v29  ;;  %v9020_v28 = vmul.f32 -1.442695, %v5665_v59 }
 0x701   : > { %v5358_v23 = vld [vmem:[#allocation3 + $0x10] sm:$0xc]  ;;  %v5364_v26 = vld [vmem:[#allocation3 + $0xa0] sm:$0x30]  ;;  %v5359_v27 = vld [vmem:[#allocation3 + $0x18] sm:$0xc] }
 0x702   : > { %10423 = vpow2.f32 %v9019_v7  ;;  %v5376_v62 = vrot.slane %v5358_v23, 2  ;;  %v5394_v20 = vrot.slane %v5364_v26, 2  ;;  %v5377_v19 = vrot.slane %v5359_v27, 2  ;;  %v5360_v29 = vld [vmem:[#allocation3 + $0x20] sm:$0xc] }
 0x703   : > { %10425 = vpow2.f32 %v9020_v28  ;;  %v5395_v22 = vrot.slane %v5365_v46, 2  ;;  %v5366_v59 = vld [vmem:[#allocation3 + $0xb0] sm:$0x30]  ;;  %v5361_v7 = vld [vmem:[#allocation3 + $0x28] sm:$0xc] }
 0x704   : > { %v5406_v63 = vsel %vm4036_vm1, %v5376_v62, %v5394_v20  ;;  %v5367_v28 = vld [vmem:[#allocation3 + $0xb8] sm:$0x30]  ;;  %v5378_v20 = vrot.slane %v5360_v29, 2  ;;  %v5396_v26 = vrot.slane %v5366_v59, 2 }
 0x705   : > { %v5407_v52 = vsel %vm4036_vm1, %v5377_v19, %v5395_v22  ;;  %v5678_v3 = vadd.f32 %v5576_v33, %v5406_v63  ;;  %v5379_v33 = vrot.slane %v5361_v7, 2 }
 0x706   : > { %v5679_v11 = vadd.f32 %v5578_v60, %v5407_v52  ;;  %v5397_v60 = vrot.slane %v5367_v28, 2 }
 0x707   : > { %v9021_v30 = vmul.f32 -1.442695, %v5678_v3 }
 0x708   : > { %v9022_v31 = vmul.f32 -1.442695, %v5679_v11  ;;  %v5409_v7 = vsel %vm4036_vm1, %v5379_v33, %v5397_v60 }
 0x70c   : > { %v10424_v2 = vpop.eup %10423 }
 0x70d   : > { %v10426_v6 = vpop.eup %10425  ;;  %v5672_v32 = vadd.f32 1.0, %v10424_v2 }
 0x70e   : > { %v5673_v34 = vadd.f32 1.0, %v10426_v6 }
 0x70f   : > { %10427 = vrcp.f32 %v5672_v32 }
 0x710   : > { %10429 = vrcp.f32 %v5673_v34 }
 0x711   : > { %10431 = vpow2.f32 %v9021_v30  ;;  %v5408_v30 = vsel %vm4036_vm1, %v5378_v20, %v5396_v26 }
 0x712   : > { %10433 = vpow2.f32 %v9022_v31 }
 0x719   : > { %v10428_v63 = vpop.eup %10427 }
 0x71a   : > { %v10430_v3 = vpop.eup %10429 }
 0x71b   : > { %v10432_v34 = vpop.eup %10431 }
 0x71c   : > { %v10434_v29 = vpop.eup %10433 }
 0x73d   : > { %v5616_v23 = vpop.f32.mrb[20].mxu0 }
 0x73e   : > { %v5657_v27 = vpop.f32.mrb[20].mxu1  ;;  %v5618_v46 = vpop.f32.mrb[21].mxu0 }
 0x73f   : > { %v5658_v62 = vadd.f32 %v5657_v27, %v5616_v23  ;;  %v5659_v19 = vpop.f32.mrb[21].mxu1  ;;  %v5620_v22 = vpop.f32.mrb[22].mxu0  ;;  %v5686_v23 = vadd.f32 1.0, %v10432_v34 }
 0x740   : > { %v5660_v52 = vadd.f32 %v5659_v19, %v5618_v46  ;;  %v5661_v2 = vpop.f32.mrb[22].mxu1  ;;  %v5621_v6 = vpop.f32.mrb[23].mxu0  ;;  %v5687_v22 = vadd.f32 1.0, %v10434_v29  ;;  %v13786_v29 = vld [vmem:[%s11906_s6 + $0x21c] ss:$24 sps:$4 sm:$0xff]  }
 0x741   : > { %v5692_v11 = vadd.f32 %v5658_v62, %v13215_v39  ;;  %v5662_v32 = vpop.f32.mrb[23].mxu1 }
 0x742   : > { %v5693_v31 = vadd.f32 %v5660_v52, %v13218_v45 }
 0x743   : > { %v5694_v59 = vmul.f32 %v10428_v63, %v5692_v11 }
 0x744   : > { %v5695_v28 = vmul.f32 %v10430_v3, %v5693_v31  ;;  %v13782_v31 = vld [vmem:[%s11906_s6 + $0x4e8] ss:$24 sps:$4 sm:$0xff]  }
 0x745   : > { %v5696_v27 = vadd.f32 %v5694_v59, %v5408_v30  ;;  %v13778_v30 = vld [vmem:[%s11906_s6 + $0x1e8] ss:$24 sps:$4 sm:$0xff]   ;;  %v13790_v59 = vld [vmem:[%s11906_s6 + $0x51c] ss:$24 sps:$4 sm:$0xff]  }
 0x746   : > { %v5697_v46 = vadd.f32 %v5695_v28, %v5409_v7  ;;  %v13794_v7 = vld [vmem:[%s11906_s6 + $0x218] ss:$24 sps:$4 sm:$0xff]  }
 0x747   : > { %10435 = vtanh.f32 %v5696_v27  ;;  %v13798_v28 = vld [vmem:[%s11906_s6 + $0x518] ss:$24 sps:$4 sm:$0xff]   ;;  %v13806_v27 = vld [vmem:[%s11906_s6 + $0x54c] ss:$24 sps:$4 sm:$0xff]  }
 0x748   : > { %10437 = vtanh.f32 %v5697_v46  ;;  %v13814_v46 = vld [vmem:[%s11906_s6 + $0x548] ss:$24 sps:$4 sm:$0xff]  }
 0x749   : > { %10439 = vrcp.f32 %v5686_v23  ;;  %v13802_v23 = vld [vmem:[%s11906_s6 + $0x24c] ss:$24 sps:$4 sm:$0xff]  }
 0x74a   : > { %10441 = vrcp.f32 %v5687_v22  ;;  %v13810_v22 = vld [vmem:[%s11906_s6 + $0x248] ss:$24 sps:$4 sm:$0xff]  }
 0x751   : > { %v10436_v62 = vpop.eup %10435 }
 0x752   : > { %v10438_v19 = vpop.eup %10437  ;;  %v5700_v2 = vsub.f32 %v13225_v41, %v10436_v62 }
 0x753   : > { %v10440_v20 = vpop.eup %10439  ;;  %v5701_v26 = vsub.f32 %v13231_v49, %v10438_v19 }
 0x754   : > { %v10442_v52 = vpop.eup %10441  ;;  %v5702_v63 = vmul.f32 %v10440_v20, %v5700_v2  ;;  %v13826_v2 = vld [vmem:[%s11906_s6 + $0x278] ss:$24 sps:$4 sm:$0xff]  }
 0x755   : > { %v5703_v6 = vmul.f32 %v10442_v52, %v5701_v26  ;;  %v13830_v20 = vld [vmem:[%s11906_s6 + $0x578] ss:$24 sps:$4 sm:$0xff]   ;;  %v13834_v26 = vld [vmem:[%s11906_s6 + $0x2ac] ss:$24 sps:$4 sm:$0xff]  }
 0x756   : > { %v13643_v33 = vadd.f32 %v10436_v62, %v5702_v63  ;;  %v13818_v62 = vld [vmem:[%s11906_s6 + $0x27c] ss:$24 sps:$4 sm:$0xff]   ;;  %17469 = vst [vmem:[#allocation46_spill] sm:$0xff] %v13834_v26  ;;  %v13838_v52 = vld [vmem:[%s11906_s6 + $0x5ac] ss:$24 sps:$4 sm:$0xff]  }
 0x757   : > { %v13645_v60 = vadd.f32 %v10438_v19, %v5703_v6  ;;  %v13822_v19 = vld [vmem:[%s11906_s6 + $0x57c] ss:$24 sps:$4 sm:$0xff]   ;;  %17470 = vst [vmem:[#allocation47_spill] sm:$0xff] %v13838_v52  ;;  %v13842_v63 = vld [vmem:[%s11906_s6 + $0x2a8] ss:$24 sps:$4 sm:$0xff]  }
 0x758   : > { %v13649_v3 = vpack.c.bf16 %v13643_v33, %v13643_v33  ;;  %17471 = vst [vmem:[#allocation48_spill] sm:$0xff] %v13842_v63  ;;  %v13846_v6 = vld [vmem:[%s11906_s6 + $0x5a8] ss:$24 sps:$4 sm:$0xff]  }
 0x759   : > { %v13653_v11 = vpack.c.bf16 %v13645_v60, %v13645_v60  ;;  %17472 = vst [vmem:[#allocation49_spill] sm:$0xff] %v13846_v6 }
 0x75a   : > { %v5710_v41 = vrot.slane %v13649_v3, 7  ;;  %v5716_v32 = vrot.slane %v13649_v3, 3 }
 0x75b   : > { %v5711_v49 = vrot.slane %v13653_v11, 7  ;;  %v5717_v34 = vrot.slane %v13653_v11, 3  ;;  %9025 = vmatprep.mubr.msk.bf16.mxu0 %vm13227_vm6, %v13653_v11  ;;  %9031 = vmatprep.mubr.msk.bf16.mxu1 %vm13237_vm7, %v13653_v11 }
 0x75c   : > { %5714 = vst [vmem:[#allocation2] sm:$0x2] %v5710_v41  ;;  %5720 = vst [vmem:[#allocation2 + $0x10] sm:$0x40] %v5716_v32  ;;  %9028 = vmatmul.mubr.msk.bf16.vlgmr.msra.gmra.mrb[24].mxu0 %vm13227_vm6, %v13649_v3  ;;  %9034 = vmatmul.mubr.msk.bf16.vlgmr.msra.gmra.mrb[24].mxu1 %vm13237_vm7, %v13649_v3  ;;  %v13850_v41 = vld [vmem:[%s11906_s6 + $0x2dc] ss:$24 sps:$4 sm:$0xff]  }
 0x75d   : > { %5715 = vst [vmem:[#allocation2 + $0x8] sm:$0x2] %v5711_v49  ;;  %5721 = vst [vmem:[#allocation2 + $0x18] sm:$0x40] %v5717_v34  ;;  %5849 = vmatpush1.bf16.msra.mxu0 %v13262_v4  ;;  %5890 = vmatpush1.bf16.msra.mxu1 %v13266_v37  ;;  %v13698_v4 = vld [vmem:[%s11906_s6 + $0xf8] ss:$24 sps:$4 sm:$0xff]  }
 0x75e   : > { %9037 = vmatprep.mubr.msk.bf16.mxu0 %vm13227_vm6, %v13653_v11  ;;  %9043 = vmatprep.mubr.msk.bf16.mxu1 %vm13237_vm7, %v13653_v11  ;;  %v13702_v37 = vld [vmem:[%s11906_s6 + $0x3f8] ss:$24 sps:$4 sm:$0xff]   ;;  %17473 = vst [vmem:[#allocation50_spill] sm:$0xff] %v13850_v41  ;;  %v13854_v32 = vld [vmem:[%s11906_s6 + $0x5dc] ss:$24 sps:$4 sm:$0xff]  }
 0x75f   : > { %5850 = vmatprep.subr.bf16.mxu0 %v13276_v53  ;;  %5891 = vmatprep.subr.bf16.mxu1 %v13280_v5  ;;  %v13706_v53 = vld [vmem:[%s11906_s6 + $0x12c] ss:$24 sps:$4 sm:$0xff]   ;;  %17474 = vst [vmem:[#allocation51_spill] sm:$0xff] %v13854_v32  ;;  %v13858_v49 = vld [vmem:[%s11906_s6 + $0x2d8] ss:$24 sps:$4 sm:$0xff]  }
 0x760   : > { %v13710_v5 = vld [vmem:[%s11906_s6 + $0x42c] ss:$24 sps:$4 sm:$0xff]   ;;  %17475 = vst [vmem:[#allocation52_spill] sm:$0xff] %v13858_v49  ;;  %v13862_v34 = vld [vmem:[%s11906_s6 + $0x5d8] ss:$24 sps:$4 sm:$0xff]  }
 0x761   : > { %5851 = vmatpush1.bf16.msra.mxu0 %v13284_v54  ;;  %5892 = vmatpush1.bf16.msra.mxu1 %v13288_v56  ;;  %v13714_v54 = vld [vmem:[%s11906_s6 + $0x128] ss:$24 sps:$4 sm:$0xff]   ;;  %17476 = vst [vmem:[#allocation53_spill] sm:$0xff] %v13862_v34 }
 0x762   : > { %5852 = vmatprep.subr.bf16.mxu0 %v13292_v8  ;;  %5893 = vmatprep.subr.bf16.mxu1 %v13296_v61  ;;  %v13718_v56 = vld [vmem:[%s11906_s6 + $0x428] ss:$24 sps:$4 sm:$0xff]   ;;  %v13722_v8 = vld [vmem:[%s11906_s6 + $0x15c] ss:$24 sps:$4 sm:$0xff]  }
 0x763   : > { %v13726_v61 = vld [vmem:[%s11906_s6 + $0x45c] ss:$24 sps:$4 sm:$0xff]  }
 0x765   : > { %5853 = vmatpush1.bf16.msra.mxu0 %v13300_v47  ;;  %5894 = vmatpush1.bf16.msra.mxu1 %v13304_v50  ;;  %v13730_v47 = vld [vmem:[%s11906_s6 + $0x158] ss:$24 sps:$4 sm:$0xff]  }
 0x766   : > { %5854 = vmatprep.subr.bf16.mxu0 %v13308_v1  ;;  %5895 = vmatprep.subr.bf16.mxu1 %v13312_v9  ;;  %v13734_v50 = vld [vmem:[%s11906_s6 + $0x458] ss:$24 sps:$4 sm:$0xff]   ;;  %v13738_v1 = vld [vmem:[%s11906_s6 + $0x18c] ss:$24 sps:$4 sm:$0xff]  }
 0x767   : > { %v13742_v9 = vld [vmem:[%s11906_s6 + $0x48c] ss:$24 sps:$4 sm:$0xff]  }
 0x769   : > { %5855 = vmatpush1.bf16.msra.mxu0 %v13316_v55  ;;  %5896 = vmatpush1.bf16.msra.mxu1 %v13320_v58  ;;  %v13746_v55 = vld [vmem:[%s11906_s6 + $0x188] ss:$24 sps:$4 sm:$0xff]  }
 0x76a   : > { %5856 = vmatprep.subr.bf16.mxu0 %v13324_v35  ;;  %5897 = vmatprep.subr.bf16.mxu1 %v13328_v36  ;;  %v13750_v58 = vld [vmem:[%s11906_s6 + $0x488] ss:$24 sps:$4 sm:$0xff]   ;;  %v13754_v35 = vld [vmem:[%s11906_s6 + $0x1bc] ss:$24 sps:$4 sm:$0xff]  }
 0x76b   : > { %v13758_v36 = vld [vmem:[%s11906_s6 + $0x4bc] ss:$24 sps:$4 sm:$0xff]  }
 0x76d   : > { %5857 = vmatpush1.bf16.msra.mxu0 %v13332_v40  ;;  %5898 = vmatpush1.bf16.msra.mxu1 %v13336_v42  ;;  %v13762_v40 = vld [vmem:[%s11906_s6 + $0x1b8] ss:$24 sps:$4 sm:$0xff]  }
 0x76e   : > { %5858 = vmatprep.subr.bf16.mxu0 %v13340_v43  ;;  %5899 = vmatprep.subr.bf16.mxu1 %v13344_v0  ;;  %v13766_v42 = vld [vmem:[%s11906_s6 + $0x4b8] ss:$24 sps:$4 sm:$0xff]   ;;  %v13770_v43 = vld [vmem:[%s11906_s6 + $0x1ec] ss:$24 sps:$4 sm:$0xff]  }
 0x76f   : > { %v13774_v0 = vld [vmem:[%s11906_s6 + $0x4ec] ss:$24 sps:$4 sm:$0xff]  }
 0x771   : > { %5859 = vmatpush1.bf16.msra.mxu0 %v13698_v4  ;;  %5900 = vmatpush1.bf16.msra.mxu1 %v13702_v37 }
 0x772   : > { %5860 = vmatprep.subr.bf16.mxu0 %v13706_v53  ;;  %5901 = vmatprep.subr.bf16.mxu1 %v13710_v5 }
 0x775   : > { %5861 = vmatpush1.bf16.msra.mxu0 %v13714_v54  ;;  %5902 = vmatpush1.bf16.msra.mxu1 %v13718_v56 }
 0x776   : > { %5862 = vmatprep.subr.bf16.mxu0 %v13722_v8  ;;  %5903 = vmatprep.subr.bf16.mxu1 %v13726_v61 }
 0x779   : > { %5863 = vmatpush1.bf16.msra.mxu0 %v13730_v47  ;;  %5904 = vmatpush1.bf16.msra.mxu1 %v13734_v50 }
 0x77a   : > { %5864 = vmatprep.subr.bf16.mxu0 %v13738_v1  ;;  %5905 = vmatprep.subr.bf16.mxu1 %v13742_v9 }
 0x77d   : > { %5865 = vmatpush1.bf16.msra.mxu0 %v13746_v55  ;;  %5906 = vmatpush1.bf16.msra.mxu1 %v13750_v58 }
 0x77e   : > { %5866 = vmatprep.subr.bf16.mxu0 %v13754_v35  ;;  %5907 = vmatprep.subr.bf16.mxu1 %v13758_v36 }
 0x781   : > { %5867 = vmatpush1.bf16.msra.mxu0 %v13762_v40  ;;  %5908 = vmatpush1.bf16.msra.mxu1 %v13766_v42 }
 0x782   : > { %5868 = vmatprep.subr.bf16.mxu0 %v13770_v43  ;;  %5909 = vmatprep.subr.bf16.mxu1 %v13774_v0 }
 0x785   : > { %5869 = vmatpush1.bf16.msra.mxu0 %v13778_v30  ;;  %5910 = vmatpush1.bf16.msra.mxu1 %v13782_v31 }
 0x786   : > { %5870 = vmatprep.subr.bf16.mxu0 %v13786_v29  ;;  %5911 = vmatprep.subr.bf16.mxu1 %v13790_v59 }
 0x789   : > { %5871 = vmatpush1.bf16.msra.mxu0 %v13794_v7  ;;  %5912 = vmatpush1.bf16.msra.mxu1 %v13798_v28 }
 0x78a   : > { %5872 = vmatprep.subr.bf16.mxu0 %v13802_v23  ;;  %5913 = vmatprep.subr.bf16.mxu1 %v13806_v27 }
 0x78d   : > { %5873 = vmatpush1.bf16.msra.mxu0 %v13810_v22  ;;  %5914 = vmatpush1.bf16.msra.mxu1 %v13814_v46 }
 0x78e   : > { %5874 = vmatprep.subr.bf16.mxu0 %v13818_v62  ;;  %5915 = vmatprep.subr.bf16.mxu1 %v13822_v19 }
 0x791   : > { %5875 = vmatpush1.bf16.msra.mxu0 %v13826_v2  ;;  %5916 = vmatpush1.bf16.msra.mxu1 %v13830_v20 }
 0x792   : > { %5876 = vmatprep.subr.bf16.mxu0 %v13834_v26  ;;  %5917 = vmatprep.subr.bf16.mxu1 %v13838_v52 }
 0x795   : > { %5877 = vmatpush1.bf16.msra.mxu0 %v13842_v63  ;;  %5918 = vmatpush1.bf16.msra.mxu1 %v13846_v6  ;;  %v13866_v6 = vld [vmem:[%s11906_s6 + $0x14] ss:$24 sps:$4 sm:$0xff]  }
 0x796   : > { %5878 = vmatprep.subr.bf16.mxu0 %v13850_v41  ;;  %5919 = vmatprep.subr.bf16.mxu1 %v13854_v32  ;;  %17477 = vst [vmem:[#allocation54_spill] sm:$0xff] %v13866_v6  ;;  %v13870_v41 = vld [vmem:[%s11906_s6 + $0x314] ss:$24 sps:$4 sm:$0xff]   ;;  %v5722_v32 = vld [vmem:[#allocation3] sm:$0x30] }
 0x797   : > { %17478 = vst [vmem:[#allocation55_spill] sm:$0xff] %v13870_v41  ;;  %v5723_v63 = vld [vmem:[#allocation3 + $0x8] sm:$0x30] }
 0x798   : > { %v5741_v52 = vrot.slane %v5723_v63, 4 }
 0x799   : > { %5879 = vmatpush1.bf16.msra.mxu0 %v13858_v49  ;;  %5920 = vmatpush1.bf16.msra.mxu1 %v13862_v34  ;;  %v13880_v34 = vld [vmem:[%s11906_s6 + $0x10] ss:$24 sps:$4 sm:$0xff]   ;;  %v13902_v49 = vld [vmem:[%s11906_s6 + $0x40] ss:$24 sps:$4 sm:$0xff]  }
 0x79a   : > { %5930 = vmatprep.subr.bf16.mxu0 %v13866_v6  ;;  %5971 = vmatprep.subr.bf16.mxu1 %v13870_v41  ;;  %17479 = vst [vmem:[#allocation56_spill] sm:$0xff] %v13880_v34  ;;  %v13887_v41 = vld [vmem:[%s11906_s6 + $0x310] ss:$24 sps:$4 sm:$0xff]   ;;  %v13894_v6 = vld [vmem:[%s11906_s6 + $0x44] ss:$24 sps:$4 sm:$0xff]   ;;  %17483 = vst [vmem:[#allocation60_spill] sm:$0xff] %v13902_v49 }
 0x79b   : > { %17480 = vst [vmem:[#allocation57_spill] sm:$0xff] %v13887_v41  ;;  %17481 = vst [vmem:[#allocation58_spill] sm:$0xff] %v13894_v6 }
 0x79c   : > { %9040 = vmatmul.mubr.msk.bf16.vlgmr.msra.gmra.mrb[28].mxu0 %vm13227_vm6, %v13649_v3  ;;  %9046 = vmatmul.mubr.msk.bf16.vlgmr.msra.gmra.mrb[28].mxu1 %vm13237_vm7, %v13649_v3 }
 0x79d   : > { %5931 = vmatpush1.bf16.msra.mxu0 %v13880_v34  ;;  %9049 = vmatprep.mubr.msk.bf16.mxu0 %vm13227_vm6, %v13653_v11  ;;  %v13898_v34 = vld [vmem:[%s11906_s6 + $0x344] ss:$24 sps:$4 sm:$0xff]  }
 0x79e   : > { %5972 = vmatpush1.bf16.msra.mxu1 %v13887_v41  ;;  %9055 = vmatprep.mubr.msk.bf16.mxu1 %vm13237_vm7, %v13653_v11  ;;  %17482 = vst [vmem:[#allocation59_spill] sm:$0xff] %v13898_v34  ;;  %v13906_v41 = vld [vmem:[%s11906_s6 + $0x340] ss:$24 sps:$4 sm:$0xff]   ;;  %v13910_v11 = vld [vmem:[%s11906_s6 + $0x74] ss:$24 sps:$4 sm:$0xff]  }
 0x79f   : > { %5932 = vmatprep.subr.bf16.mxu0 %v13894_v6  ;;  %5973 = vmatprep.subr.bf16.mxu1 %v13898_v34  ;;  %17484 = vst [vmem:[#allocation61_spill] sm:$0xff] %v13906_v41  ;;  %17485 = vst [vmem:[#allocation62_spill] sm:$0xff] %v13910_v11  ;;  %v13914_v6 = vld [vmem:[%s11906_s6 + $0x374] ss:$24 sps:$4 sm:$0xff]   ;;  %v13918_v34 = vld [vmem:[%s11906_s6 + $0x70] ss:$24 sps:$4 sm:$0xff]  }
 0x7a0   : > { %17486 = vst [vmem:[#allocation63_spill] sm:$0xff] %v13914_v6  ;;  %17487 = vst [vmem:[#allocation64_spill] sm:$0xff] %v13918_v34 }
 0x7a1   : > { %5933 = vmatpush1.bf16.msra.mxu0 %v13902_v49  ;;  %v13922_v49 = vld [vmem:[%s11906_s6 + $0x370] ss:$24 sps:$4 sm:$0xff]  }
 0x7a2   : > { %5974 = vmatpush1.bf16.msra.mxu1 %v13906_v41  ;;  %5934 = vmatprep.subr.bf16.mxu0 %v13910_v11  ;;  %17488 = vst [vmem:[#allocation65_spill] sm:$0xff] %v13922_v49  ;;  %v13926_v41 = vld [vmem:[%s11906_s6 + $0xa4] ss:$24 sps:$4 sm:$0xff]  }
 0x7a3   : > { %5975 = vmatprep.subr.bf16.mxu1 %v13914_v6  ;;  %17489 = vst [vmem:[#allocation66_spill] sm:$0xff] %v13926_v41  ;;  %v13930_v11 = vld [vmem:[%s11906_s6 + $0x3a4] ss:$24 sps:$4 sm:$0xff]   ;;  %v13934_v6 = vld [vmem:[%s11906_s6 + $0xa0] ss:$24 sps:$4 sm:$0xff]  }
 0x7a4   : > { %17490 = vst [vmem:[#allocation67_spill] sm:$0xff] %v13930_v11  ;;  %17491 = vst [vmem:[#allocation68_spill] sm:$0xff] %v13934_v6 }
 0x7a5   : > { %5935 = vmatpush1.bf16.msra.mxu0 %v13918_v34  ;;  %v13938_v34 = vld [vmem:[%s11906_s6 + $0x3a0] ss:$24 sps:$4 sm:$0xff]  }
 0x7a6   : > { %5976 = vmatpush1.bf16.msra.mxu1 %v13922_v49  ;;  %5936 = vmatprep.subr.bf16.mxu0 %v13926_v41  ;;  %17492 = vst [vmem:[#allocation69_spill] sm:$0xff] %v13938_v34  ;;  %v13942_v49 = vld [vmem:[%s11906_s6 + $0xd4] ss:$24 sps:$4 sm:$0xff]  }
 0x7a7   : > { %5977 = vmatprep.subr.bf16.mxu1 %v13930_v11  ;;  %17493 = vst [vmem:[#allocation70_spill] sm:$0xff] %v13942_v49  ;;  %v13946_v41 = vld [vmem:[%s11906_s6 + $0x3d4] ss:$24 sps:$4 sm:$0xff]   ;;  %v13950_v11 = vld [vmem:[%s11906_s6 + $0xd0] ss:$24 sps:$4 sm:$0xff]  }
 0x7a8   : > { %17494 = vst [vmem:[#allocation71_spill] sm:$0xff] %v13946_v41  ;;  %17495 = vst [vmem:[#allocation72_spill] sm:$0xff] %v13950_v11 }
 0x7a9   : > { %5937 = vmatpush1.bf16.msra.mxu0 %v13934_v6  ;;  %v13954_v6 = vld [vmem:[%s11906_s6 + $0x3d0] ss:$24 sps:$4 sm:$0xff]  }
 0x7aa   : > { %5978 = vmatpush1.bf16.msra.mxu1 %v13938_v34  ;;  %5938 = vmatprep.subr.bf16.mxu0 %v13942_v49  ;;  %17496 = vst [vmem:[#allocation73_spill] sm:$0xff] %v13954_v6  ;;  %v13958_v34 = vld [vmem:[%s11906_s6 + $0x104] ss:$24 sps:$4 sm:$0xff]  }
 0x7ab   : > { %5979 = vmatprep.subr.bf16.mxu1 %v13946_v41  ;;  %17497 = vst [vmem:[#allocation74_spill] sm:$0xff] %v13958_v34  ;;  %v13962_v49 = vld [vmem:[%s11906_s6 + $0x404] ss:$24 sps:$4 sm:$0xff]   ;;  %v13966_v41 = vld [vmem:[%s11906_s6 + $0x100] ss:$24 sps:$4 sm:$0xff]  }
 0x7ac   : > { %17498 = vst [vmem:[#allocation75_spill] sm:$0xff] %v13962_v49  ;;  %17499 = vst [vmem:[#allocation76_spill] sm:$0xff] %v13966_v41 }
 0x7ad   : > { %5939 = vmatpush1.bf16.msra.mxu0 %v13950_v11  ;;  %v13970_v11 = vld [vmem:[%s11906_s6 + $0x400] ss:$24 sps:$4 sm:$0xff]  }
 0x7ae   : > { %5980 = vmatpush1.bf16.msra.mxu1 %v13954_v6  ;;  %5940 = vmatprep.subr.bf16.mxu0 %v13958_v34  ;;  %17500 = vst [vmem:[#allocation77_spill] sm:$0xff] %v13970_v11  ;;  %v13974_v6 = vld [vmem:[%s11906_s6 + $0x134] ss:$24 sps:$4 sm:$0xff]  }
 0x7af   : > { %5981 = vmatprep.subr.bf16.mxu1 %v13962_v49  ;;  %17501 = vst [vmem:[#allocation78_spill] sm:$0xff] %v13974_v6  ;;  %v13978_v34 = vld [vmem:[%s11906_s6 + $0x434] ss:$24 sps:$4 sm:$0xff]   ;;  %v13982_v49 = vld [vmem:[%s11906_s6 + $0x130] ss:$24 sps:$4 sm:$0xff]  }
 0x7b0   : > { %17502 = vst [vmem:[#allocation79_spill] sm:$0xff] %v13978_v34  ;;  %17503 = vst [vmem:[#allocation80_spill] sm:$0xff] %v13982_v49 }
 0x7b1   : > { %5941 = vmatpush1.bf16.msra.mxu0 %v13966_v41  ;;  %v13986_v41 = vld [vmem:[%s11906_s6 + $0x430] ss:$24 sps:$4 sm:$0xff]  }
 0x7b2   : > { %5982 = vmatpush1.bf16.msra.mxu1 %v13970_v11  ;;  %5942 = vmatprep.subr.bf16.mxu0 %v13974_v6  ;;  %17504 = vst [vmem:[#allocation81_spill] sm:$0xff] %v13986_v41  ;;  %v13990_v11 = vld [vmem:[%s11906_s6 + $0x164] ss:$24 sps:$4 sm:$0xff]  }
 0x7b3   : > { %5983 = vmatprep.subr.bf16.mxu1 %v13978_v34  ;;  %17505 = vst [vmem:[#allocation82_spill] sm:$0xff] %v13990_v11  ;;  %v13994_v6 = vld [vmem:[%s11906_s6 + $0x464] ss:$24 sps:$4 sm:$0xff]   ;;  %v13998_v34 = vld [vmem:[%s11906_s6 + $0x160] ss:$24 sps:$4 sm:$0xff]  }
 0x7b4   : > { %17506 = vst [vmem:[#allocation83_spill] sm:$0xff] %v13994_v6  ;;  %17507 = vst [vmem:[#allocation84_spill] sm:$0xff] %v13998_v34 }
 0x7b5   : > { %5943 = vmatpush1.bf16.msra.mxu0 %v13982_v49  ;;  %v14002_v49 = vld [vmem:[%s11906_s6 + $0x460] ss:$24 sps:$4 sm:$0xff]  }
 0x7b6   : > { %5984 = vmatpush1.bf16.msra.mxu1 %v13986_v41  ;;  %5944 = vmatprep.subr.bf16.mxu0 %v13990_v11  ;;  %17508 = vst [vmem:[#allocation85_spill] sm:$0xff] %v14002_v49  ;;  %v14006_v41 = vld [vmem:[%s11906_s6 + $0x194] ss:$24 sps:$4 sm:$0xff]  }
 0x7b7   : > { %5985 = vmatprep.subr.bf16.mxu1 %v13994_v6  ;;  %17509 = vst [vmem:[#allocation86_spill] sm:$0xff] %v14006_v41  ;;  %v14010_v11 = vld [vmem:[%s11906_s6 + $0x494] ss:$24 sps:$4 sm:$0xff]   ;;  %v14014_v6 = vld [vmem:[%s11906_s6 + $0x190] ss:$24 sps:$4 sm:$0xff]  }
 0x7b8   : > { %17510 = vst [vmem:[#allocation87_spill] sm:$0xff] %v14010_v11  ;;  %17511 = vst [vmem:[#allocation88_spill] sm:$0xff] %v14014_v6 }
 0x7b9   : > { %5945 = vmatpush1.bf16.msra.mxu0 %v13998_v34  ;;  %v14018_v34 = vld [vmem:[%s11906_s6 + $0x490] ss:$24 sps:$4 sm:$0xff]  }
 0x7ba   : > { %5986 = vmatpush1.bf16.msra.mxu1 %v14002_v49  ;;  %5946 = vmatprep.subr.bf16.mxu0 %v14006_v41  ;;  %17512 = vst [vmem:[#allocation89_spill] sm:$0xff] %v14018_v34  ;;  %v14022_v49 = vld [vmem:[%s11906_s6 + $0x1c4] ss:$24 sps:$4 sm:$0xff]  }
 0x7bb   : > { %5987 = vmatprep.subr.bf16.mxu1 %v14010_v11  ;;  %17513 = vst [vmem:[#allocation90_spill] sm:$0xff] %v14022_v49  ;;  %v14026_v41 = vld [vmem:[%s11906_s6 + $0x4c4] ss:$24 sps:$4 sm:$0xff]   ;;  %v14030_v11 = vld [vmem:[%s11906_s6 + $0x1c0] ss:$24 sps:$4 sm:$0xff]  }
 0x7bc   : > { %17514 = vst [vmem:[#allocation91_spill] sm:$0xff] %v14026_v41  ;;  %17515 = vst [vmem:[#allocation92_spill] sm:$0xff] %v14030_v11 }
 0x7bd   : > { %5947 = vmatpush1.bf16.msra.mxu0 %v14014_v6  ;;  %v14034_v6 = vld [vmem:[%s11906_s6 + $0x4c0] ss:$24 sps:$4 sm:$0xff]  }
 0x7be   : > { %5988 = vmatpush1.bf16.msra.mxu1 %v14018_v34  ;;  %5948 = vmatprep.subr.bf16.mxu0 %v14022_v49  ;;  %17516 = vst [vmem:[#allocation93_spill] sm:$0xff] %v14034_v6  ;;  %v14038_v34 = vld [vmem:[%s11906_s6 + $0x1f4] ss:$24 sps:$4 sm:$0xff]  }
 0x7bf   : > { %5989 = vmatprep.subr.bf16.mxu1 %v14026_v41  ;;  %17517 = vst [vmem:[#allocation94_spill] sm:$0xff] %v14038_v34  ;;  %v14042_v49 = vld [vmem:[%s11906_s6 + $0x4f4] ss:$24 sps:$4 sm:$0xff]   ;;  %v14046_v41 = vld [vmem:[%s11906_s6 + $0x1f0] ss:$24 sps:$4 sm:$0xff]  }
 0x7c0   : > { %17518 = vst [vmem:[#allocation95_spill] sm:$0xff] %v14042_v49  ;;  %17519 = vst [vmem:[#allocation96_spill] sm:$0xff] %v14046_v41 }
 0x7c1   : > { %5949 = vmatpush1.bf16.msra.mxu0 %v14030_v11  ;;  %v14050_v11 = vld [vmem:[%s11906_s6 + $0x4f0] ss:$24 sps:$4 sm:$0xff]  }
 0x7c2   : > { %5990 = vmatpush1.bf16.msra.mxu1 %v14034_v6  ;;  %5950 = vmatprep.subr.bf16.mxu0 %v14038_v34  ;;  %17520 = vst [vmem:[#allocation97_spill] sm:$0xff] %v14050_v11  ;;  %v14054_v6 = vld [vmem:[%s11906_s6 + $0x224] ss:$24 sps:$4 sm:$0xff]  }
 0x7c3   : > { %5991 = vmatprep.subr.bf16.mxu1 %v14042_v49  ;;  %17521 = vst [vmem:[#allocation98_spill] sm:$0xff] %v14054_v6  ;;  %v14058_v34 = vld [vmem:[%s11906_s6 + $0x524] ss:$24 sps:$4 sm:$0xff]   ;;  %v14062_v49 = vld [vmem:[%s11906_s6 + $0x220] ss:$24 sps:$4 sm:$0xff]  }
 0x7c4   : > { %17522 = vst [vmem:[#allocation99_spill] sm:$0xff] %v14058_v34  ;;  %17523 = vst [vmem:[#allocation100_spill] sm:$0xff] %v14062_v49 }
 0x7c5   : > { %5951 = vmatpush1.bf16.msra.mxu0 %v14046_v41  ;;  %v14066_v41 = vld [vmem:[%s11906_s6 + $0x520] ss:$24 sps:$4 sm:$0xff]  }
 0x7c6   : > { %5992 = vmatpush1.bf16.msra.mxu1 %v14050_v11  ;;  %5952 = vmatprep.subr.bf16.mxu0 %v14054_v6  ;;  %17524 = vst [vmem:[#allocation101_spill] sm:$0xff] %v14066_v41  ;;  %v14070_v11 = vld [vmem:[%s11906_s6 + $0x254] ss:$24 sps:$4 sm:$0xff]  }
 0x7c7   : > { %5993 = vmatprep.subr.bf16.mxu1 %v14058_v34  ;;  %17525 = vst [vmem:[#allocation102_spill] sm:$0xff] %v14070_v11  ;;  %v14074_v6 = vld [vmem:[%s11906_s6 + $0x554] ss:$24 sps:$4 sm:$0xff]   ;;  %v14078_v34 = vld [vmem:[%s11906_s6 + $0x250] ss:$24 sps:$4 sm:$0xff]  }
 0x7c8   : > { %17526 = vst [vmem:[#allocation103_spill] sm:$0xff] %v14074_v6  ;;  %17527 = vst [vmem:[#allocation104_spill] sm:$0xff] %v14078_v34 }
 0x7c9   : > { %5953 = vmatpush1.bf16.msra.mxu0 %v14062_v49  ;;  %v14082_v49 = vld [vmem:[%s11906_s6 + $0x550] ss:$24 sps:$4 sm:$0xff]  }
 0x7ca   : > { %5994 = vmatpush1.bf16.msra.mxu1 %v14066_v41  ;;  %5954 = vmatprep.subr.bf16.mxu0 %v14070_v11  ;;  %17528 = vst [vmem:[#allocation105_spill] sm:$0xff] %v14082_v49  ;;  %v14086_v41 = vld [vmem:[%s11906_s6 + $0x284] ss:$24 sps:$4 sm:$0xff]  }
 0x7cb   : > { %5995 = vmatprep.subr.bf16.mxu1 %v14074_v6  ;;  %17529 = vst [vmem:[#allocation106_spill] sm:$0xff] %v14086_v41  ;;  %v14090_v11 = vld [vmem:[%s11906_s6 + $0x584] ss:$24 sps:$4 sm:$0xff]   ;;  %v14094_v6 = vld [vmem:[%s11906_s6 + $0x280] ss:$24 sps:$4 sm:$0xff]  }
 0x7cc   : > { %17530 = vst [vmem:[#allocation107_spill] sm:$0xff] %v14090_v11  ;;  %17531 = vst [vmem:[#allocation108_spill] sm:$0xff] %v14094_v6 }
 0x7cd   : > { %5955 = vmatpush1.bf16.msra.mxu0 %v14078_v34  ;;  %v14098_v34 = vld [vmem:[%s11906_s6 + $0x580] ss:$24 sps:$4 sm:$0xff]  }
 0x7ce   : > { %5996 = vmatpush1.bf16.msra.mxu1 %v14082_v49  ;;  %5956 = vmatprep.subr.bf16.mxu0 %v14086_v41  ;;  %17532 = vst [vmem:[#allocation109_spill] sm:$0xff] %v14098_v34  ;;  %v14102_v49 = vld [vmem:[%s11906_s6 + $0x2b4] ss:$24 sps:$4 sm:$0xff]  }
 0x7cf   : > { %5997 = vmatprep.subr.bf16.mxu1 %v14090_v11  ;;  %17533 = vst [vmem:[#allocation110_spill] sm:$0xff] %v14102_v49  ;;  %v14106_v41 = vld [vmem:[%s11906_s6 + $0x5b4] ss:$24 sps:$4 sm:$0xff]   ;;  %v14110_v11 = vld [vmem:[%s11906_s6 + $0x2b0] ss:$24 sps:$4 sm:$0xff]  }
 0x7d0   : > { %17534 = vst [vmem:[#allocation111_spill] sm:$0xff] %v14106_v41  ;;  %17535 = vst [vmem:[#allocation112_spill] sm:$0xff] %v14110_v11 }
 0x7d1   : > { %5957 = vmatpush1.bf16.msra.mxu0 %v14094_v6  ;;  %v14114_v6 = vld [vmem:[%s11906_s6 + $0x5b0] ss:$24 sps:$4 sm:$0xff]  }
 0x7d2   : > { %5998 = vmatpush1.bf16.msra.mxu1 %v14098_v34  ;;  %5958 = vmatprep.subr.bf16.mxu0 %v14102_v49  ;;  %17536 = vst [vmem:[#allocation113_spill] sm:$0xff] %v14114_v6  ;;  %v14118_v34 = vld [vmem:[%s11906_s6 + $0x2e4] ss:$24 sps:$4 sm:$0xff]  }
 0x7d3   : > { %5999 = vmatprep.subr.bf16.mxu1 %v14106_v41  ;;  %17537 = vst [vmem:[#allocation114_spill] sm:$0xff] %v14118_v34  ;;  %v14122_v49 = vld [vmem:[%s11906_s6 + $0x5e4] ss:$24 sps:$4 sm:$0xff]   ;;  %v14126_v41 = vld [vmem:[%s11906_s6 + $0x2e0] ss:$24 sps:$4 sm:$0xff]  }
 0x7d4   : > { %17538 = vst [vmem:[#allocation115_spill] sm:$0xff] %v14122_v49  ;;  %17539 = vst [vmem:[#allocation116_spill] sm:$0xff] %v14126_v41 }
 0x7d5   : > { %5959 = vmatpush1.bf16.msra.mxu0 %v14110_v11  ;;  %v14130_v11 = vld [vmem:[%s11906_s6 + $0x5e0] ss:$24 sps:$4 sm:$0xff]  }
 0x7d6   : > { %6000 = vmatpush1.bf16.msra.mxu1 %v14114_v6  ;;  %5960 = vmatprep.subr.bf16.mxu0 %v14118_v34  ;;  %17540 = vst [vmem:[#allocation117_spill] sm:$0xff] %v14130_v11  ;;  %v14134_v6 = vld [vmem:[%s11906_s6 + $0x4] ss:$24 sps:$4 sm:$0xff]  }
 0x7d7   : > { %6001 = vmatprep.subr.bf16.mxu1 %v14122_v49  ;;  %17541 = vst [vmem:[#allocation118_spill] sm:$0xff] %v14134_v6  ;;  %v14138_v34 = vld [vmem:[%s11906_s6 + $0x304] ss:$24 sps:$4 sm:$0xff]   ;;  %v14252_v49 = vld [vmem:[%s11906_s6 + $0x154] ss:$24 sps:$4 sm:$0xff]  }
 0x7d8   : > { %17542 = vst [vmem:[#allocation119_spill] sm:$0xff] %v14138_v34  ;;  %17569 = vst [vmem:[#allocation146_spill] sm:$0xff] %v14252_v49 }
 0x7d9   : > { %5961 = vmatpush1.bf16.msra.mxu0 %v14126_v41  ;;  %v14160_v41 = vld [vmem:[%s11906_s6 + $0x334] ss:$24 sps:$4 sm:$0xff]  }
 0x7da   : > { %6002 = vmatpush1.bf16.msra.mxu1 %v14130_v11  ;;  %6132 = vmatprep.subr.bf16.mxu0 %v14134_v6  ;;  %v14148_v11 = vld [vmem:[%s11906_s6] ss:$24 sps:$4 sm:$0xff]   ;;  %17546 = vst [vmem:[#allocation123_spill] sm:$0xff] %v14160_v41 }
 0x7db   : > { %6173 = vmatprep.subr.bf16.mxu1 %v14138_v34  ;;  %17543 = vst [vmem:[#allocation120_spill] sm:$0xff] %v14148_v11  ;;  %v14152_v6 = vld [vmem:[%s11906_s6 + $0x300] ss:$24 sps:$4 sm:$0xff]   ;;  %v14156_v34 = vld [vmem:[%s11906_s6 + $0x34] ss:$24 sps:$4 sm:$0xff]  }
 0x7dc   : > { %9052 = vmatmul.mubr.msk.bf16.vlgmr.msra.gmra.mrb[32].mxu0 %vm13227_vm6, %v13649_v3  ;;  %17544 = vst [vmem:[#allocation121_spill] sm:$0xff] %v14152_v6  ;;  %17545 = vst [vmem:[#allocation122_spill] sm:$0xff] %v14156_v34 }
 0x7dd   : > { %9058 = vmatmul.mubr.msk.bf16.vlgmr.msra.gmra.mrb[32].mxu1 %vm13237_vm7, %v13649_v3  ;;  %6133 = vmatpush1.bf16.msra.mxu0 %v14148_v11  ;;  %v14164_v3 = vld [vmem:[%s11906_s6 + $0x30] ss:$24 sps:$4 sm:$0xff]  }
 0x7de   : > { %6174 = vmatpush1.bf16.msra.mxu1 %v14152_v6  ;;  %6134 = vmatprep.subr.bf16.mxu0 %v14156_v34  ;;  %17547 = vst [vmem:[#allocation124_spill] sm:$0xff] %v14164_v3  ;;  %v14168_v11 = vld [vmem:[%s11906_s6 + $0x330] ss:$24 sps:$4 sm:$0xff]   ;;  %v14172_v6 = vld [vmem:[%s11906_s6 + $0x64] ss:$24 sps:$4 sm:$0xff]  }
 0x7df   : > { %6175 = vmatprep.subr.bf16.mxu1 %v14160_v41  ;;  %17548 = vst [vmem:[#allocation125_spill] sm:$0xff] %v14168_v11  ;;  %17549 = vst [vmem:[#allocation126_spill] sm:$0xff] %v14172_v6  ;;  %v14176_v34 = vld [vmem:[%s11906_s6 + $0x364] ss:$24 sps:$4 sm:$0xff]   ;;  %v14180_v41 = vld [vmem:[%s11906_s6 + $0x60] ss:$24 sps:$4 sm:$0xff]  }
 0x7e0   : > { %17550 = vst [vmem:[#allocation127_spill] sm:$0xff] %v14176_v34  ;;  %17551 = vst [vmem:[#allocation128_spill] sm:$0xff] %v14180_v41 }
 0x7e1   : > { %6135 = vmatpush1.bf16.msra.mxu0 %v14164_v3  ;;  %v14184_v3 = vld [vmem:[%s11906_s6 + $0x360] ss:$24 sps:$4 sm:$0xff]  }
 0x7e2   : > { %6176 = vmatpush1.bf16.msra.mxu1 %v14168_v11  ;;  %6136 = vmatprep.subr.bf16.mxu0 %v14172_v6  ;;  %17552 = vst [vmem:[#allocation129_spill] sm:$0xff] %v14184_v3  ;;  %v14188_v11 = vld [vmem:[%s11906_s6 + $0x94] ss:$24 sps:$4 sm:$0xff]  }
 0x7e3   : > { %6177 = vmatprep.subr.bf16.mxu1 %v14176_v34  ;;  %17553 = vst [vmem:[#allocation130_spill] sm:$0xff] %v14188_v11  ;;  %v14192_v6 = vld [vmem:[%s11906_s6 + $0x394] ss:$24 sps:$4 sm:$0xff]   ;;  %v14196_v34 = vld [vmem:[%s11906_s6 + $0x90] ss:$24 sps:$4 sm:$0xff]  }
 0x7e4   : > { %17554 = vst [vmem:[#allocation131_spill] sm:$0xff] %v14192_v6  ;;  %17555 = vst [vmem:[#allocation132_spill] sm:$0xff] %v14196_v34 }
 0x7e5   : > { %6137 = vmatpush1.bf16.msra.mxu0 %v14180_v41  ;;  %v14200_v41 = vld [vmem:[%s11906_s6 + $0x390] ss:$24 sps:$4 sm:$0xff]  }
 0x7e6   : > { %6178 = vmatpush1.bf16.msra.mxu1 %v14184_v3  ;;  %6138 = vmatprep.subr.bf16.mxu0 %v14188_v11  ;;  %17556 = vst [vmem:[#allocation133_spill] sm:$0xff] %v14200_v41  ;;  %v14204_v3 = vld [vmem:[%s11906_s6 + $0xc4] ss:$24 sps:$4 sm:$0xff]  }
 0x7e7   : > { %6179 = vmatprep.subr.bf16.mxu1 %v14192_v6  ;;  %17557 = vst [vmem:[#allocation134_spill] sm:$0xff] %v14204_v3  ;;  %v14208_v11 = vld [vmem:[%s11906_s6 + $0x3c4] ss:$24 sps:$4 sm:$0xff]   ;;  %v14212_v6 = vld [vmem:[%s11906_s6 + $0xc0] ss:$24 sps:$4 sm:$0xff]  }
 0x7e8   : > { %17558 = vst [vmem:[#allocation135_spill] sm:$0xff] %v14208_v11  ;;  %17559 = vst [vmem:[#allocation136_spill] sm:$0xff] %v14212_v6 }
 0x7e9   : > { %6139 = vmatpush1.bf16.msra.mxu0 %v14196_v34  ;;  %v14216_v34 = vld [vmem:[%s11906_s6 + $0x3c0] ss:$24 sps:$4 sm:$0xff]  }
 0x7ea   : > { %6180 = vmatpush1.bf16.msra.mxu1 %v14200_v41  ;;  %6140 = vmatprep.subr.bf16.mxu0 %v14204_v3  ;;  %17560 = vst [vmem:[#allocation137_spill] sm:$0xff] %v14216_v34  ;;  %v14220_v41 = vld [vmem:[%s11906_s6 + $0xf4] ss:$24 sps:$4 sm:$0xff]  }
 0x7eb   : > { %6181 = vmatprep.subr.bf16.mxu1 %v14208_v11  ;;  %17561 = vst [vmem:[#allocation138_spill] sm:$0xff] %v14220_v41  ;;  %v14224_v3 = vld [vmem:[%s11906_s6 + $0x3f4] ss:$24 sps:$4 sm:$0xff]   ;;  %v14228_v11 = vld [vmem:[%s11906_s6 + $0xf0] ss:$24 sps:$4 sm:$0xff]  }
 0x7ec   : > { %17562 = vst [vmem:[#allocation139_spill] sm:$0xff] %v14224_v3  ;;  %17563 = vst [vmem:[#allocation140_spill] sm:$0xff] %v14228_v11 }
 0x7ed   : > { %6141 = vmatpush1.bf16.msra.mxu0 %v14212_v6  ;;  %v14232_v6 = vld [vmem:[%s11906_s6 + $0x3f0] ss:$24 sps:$4 sm:$0xff]  }
 0x7ee   : > { %6182 = vmatpush1.bf16.msra.mxu1 %v14216_v34  ;;  %6142 = vmatprep.subr.bf16.mxu0 %v14220_v41  ;;  %17564 = vst [vmem:[#allocation141_spill] sm:$0xff] %v14232_v6  ;;  %v14236_v34 = vld [vmem:[%s11906_s6 + $0x124] ss:$24 sps:$4 sm:$0xff]  }
 0x7ef   : > { %6183 = vmatprep.subr.bf16.mxu1 %v14224_v3  ;;  %17565 = vst [vmem:[#allocation142_spill] sm:$0xff] %v14236_v34  ;;  %v14240_v41 = vld [vmem:[%s11906_s6 + $0x424] ss:$24 sps:$4 sm:$0xff]   ;;  %v14244_v3 = vld [vmem:[%s11906_s6 + $0x120] ss:$24 sps:$4 sm:$0xff]  }
 0x7f0   : > { %17566 = vst [vmem:[#allocation143_spill] sm:$0xff] %v14240_v41  ;;  %17567 = vst [vmem:[#allocation144_spill] sm:$0xff] %v14244_v3 }
 0x7f1   : > { %6143 = vmatpush1.bf16.msra.mxu0 %v14228_v11  ;;  %v14248_v11 = vld [vmem:[%s11906_s6 + $0x420] ss:$24 sps:$4 sm:$0xff]  }
 0x7f2   : > { %6184 = vmatpush1.bf16.msra.mxu1 %v14232_v6  ;;  %6144 = vmatprep.subr.bf16.mxu0 %v14236_v34  ;;  %17568 = vst [vmem:[#allocation145_spill] sm:$0xff] %v14248_v11  ;;  %v14256_v6 = vld [vmem:[%s11906_s6 + $0x454] ss:$24 sps:$4 sm:$0xff]   ;;  %v14260_v34 = vld [vmem:[%s11906_s6 + $0x150] ss:$24 sps:$4 sm:$0xff]  }
 0x7f3   : > { %6185 = vmatprep.subr.bf16.mxu1 %v14240_v41  ;;  %17570 = vst [vmem:[#allocation147_spill] sm:$0xff] %v14256_v6  ;;  %17571 = vst [vmem:[#allocation148_spill] sm:$0xff] %v14260_v34  ;;  %v14264_v41 = vld [vmem:[%s11906_s6 + $0x450] ss:$24 sps:$4 sm:$0xff]  }
 0x7f4   : > { %17572 = vst [vmem:[#allocation149_spill] sm:$0xff] %v14264_v41 }
 0x7f5   : > { %6145 = vmatpush1.bf16.msra.mxu0 %v14244_v3  ;;  %v14268_v3 = vld [vmem:[%s11906_s6 + $0x184] ss:$24 sps:$4 sm:$0xff]  }
 0x7f6   : > { %6186 = vmatpush1.bf16.msra.mxu1 %v14248_v11  ;;  %6146 = vmatprep.subr.bf16.mxu0 %v14252_v49  ;;  %17573 = vst [vmem:[#allocation150_spill] sm:$0xff] %v14268_v3  ;;  %v14272_v11 = vld [vmem:[%s11906_s6 + $0x484] ss:$24 sps:$4 sm:$0xff]  }
 0x7f7   : > { %6187 = vmatprep.subr.bf16.mxu1 %v14256_v6  ;;  %17574 = vst [vmem:[#allocation151_spill] sm:$0xff] %v14272_v11 }
 0x7f9   : > { %6147 = vmatpush1.bf16.msra.mxu0 %v14260_v34 }
 0x7fa   : > { %6188 = vmatpush1.bf16.msra.mxu1 %v14264_v41  ;;  %6148 = vmatprep.subr.bf16.mxu0 %v14268_v3 }
 0x7fb   : > { %6189 = vmatprep.subr.bf16.mxu1 %v14272_v11 }
 0x7fd   : > { %6149 = vmatpush1.bf16.msra.mxu0 %v13506_v12  ;;  %v17575_v12 = vld [vmem:[#allocation28_spill] sm:$0xff] }
 0x7fe   : > { %6190 = vmatpush1.bf16.msra.mxu1 %v13510_v13  ;;  %6150 = vmatprep.subr.bf16.mxu0 %v13514_v15  ;;  %v17576_v13 = vld [vmem:[#allocation29_spill] sm:$0xff]  ;;  %v17577_v15 = vld [vmem:[#allocation30_spill] sm:$0xff] }
 0x7ff   : > { %6191 = vmatprep.subr.bf16.mxu1 %v13518_v16  ;;  %v17578_v16 = vld [vmem:[#allocation31_spill] sm:$0xff] }
 0x801   : > { %6151 = vmatpush1.bf16.msra.mxu0 %v13522_v57  ;;  %v17579_v57 = vld [vmem:[#allocation32_spill] sm:$0xff] }
 0x802   : > { %6192 = vmatpush1.bf16.msra.mxu1 %v13526_v24  ;;  %6152 = vmatprep.subr.bf16.mxu0 %v13530_v25  ;;  %v17580_v24 = vld [vmem:[#allocation33_spill] sm:$0xff]  ;;  %v17581_v25 = vld [vmem:[#allocation34_spill] sm:$0xff] }
 0x803   : > { %6193 = vmatprep.subr.bf16.mxu1 %v13534_v17  ;;  %v17582_v17 = vld [vmem:[#allocation35_spill] sm:$0xff] }
 0x805   : > { %6153 = vmatpush1.bf16.msra.mxu0 %v13538_v21  ;;  %v17583_v21 = vld [vmem:[#allocation36_spill] sm:$0xff] }
 0x806   : > { %6194 = vmatpush1.bf16.msra.mxu1 %v13542_v44  ;;  %6154 = vmatprep.subr.bf16.mxu0 %v13546_v38  ;;  %v17584_v44 = vld [vmem:[#allocation37_spill] sm:$0xff]  ;;  %v17585_v38 = vld [vmem:[#allocation38_spill] sm:$0xff] }
 0x807   : > { %6195 = vmatprep.subr.bf16.mxu1 %v13550_v10  ;;  %v17586_v10 = vld [vmem:[#allocation39_spill] sm:$0xff] }
 0x809   : > { %6155 = vmatpush1.bf16.msra.mxu0 %v13554_v14  ;;  %v17587_v14 = vld [vmem:[#allocation40_spill] sm:$0xff] }
 0x80a   : > { %6196 = vmatpush1.bf16.msra.mxu1 %v13558_v18  ;;  %6156 = vmatprep.subr.bf16.mxu0 %v17575_v12  ;;  %v17588_v18 = vld [vmem:[#allocation41_spill] sm:$0xff]  ;;  %v17589_v12 = vld [vmem:[#allocation42_spill] sm:$0xff] }
 0x80b   : > { %6197 = vmatprep.subr.bf16.mxu1 %v17576_v13  ;;  %v17590_v13 = vld [vmem:[#allocation43_spill] sm:$0xff] }
 0x80d   : > { %6157 = vmatpush1.bf16.msra.mxu0 %v17577_v15  ;;  %v17591_v15 = vld [vmem:[#allocation44_spill] sm:$0xff] }
 0x80e   : > { %6198 = vmatpush1.bf16.msra.mxu1 %v17578_v16  ;;  %6158 = vmatprep.subr.bf16.mxu0 %v17579_v57  ;;  %v17592_v16 = vld [vmem:[#allocation45_spill] sm:$0xff] }
 0x80f   : > { %6199 = vmatprep.subr.bf16.mxu1 %v17580_v24 }
 0x811   : > { %6159 = vmatpush1.bf16.msra.mxu0 %v17581_v25 }
 0x812   : > { %6200 = vmatpush1.bf16.msra.mxu1 %v17582_v17  ;;  %6160 = vmatprep.subr.bf16.mxu0 %v17583_v21 }
 0x813   : > { %6201 = vmatprep.subr.bf16.mxu1 %v17584_v44 }
 0x815   : > { %6161 = vmatpush1.bf16.msra.mxu0 %v17585_v38 }
 0x816   : > { %6202 = vmatpush1.bf16.msra.mxu1 %v17586_v10  ;;  %6162 = vmatprep.subr.bf16.mxu0 %v17587_v14 }
 0x817   : > { %6203 = vmatprep.subr.bf16.mxu1 %v17588_v18 }
 0x819   : > { %6163 = vmatpush1.bf16.msra.mxu0 %v17589_v12 }
 0x81a   : > { %6204 = vmatpush1.bf16.msra.mxu1 %v17590_v13  ;;  %6214 = vmatprep.subr.bf16.mxu0 %v17591_v15 }
 0x81b   : > { %6255 = vmatprep.subr.bf16.mxu1 %v17592_v16 }
 0x82f   : > { %v5800_v57 = vpop.f32.mrb[24].mxu0  ;;  %v5841_v24 = vpop.f32.mrb[24].mxu1 }
 0x830   : > { %v5842_v25 = vadd.f32 %v5841_v24, %v5800_v57  ;;  %v5802_v17 = vpop.f32.mrb[25].mxu0  ;;  %v5843_v21 = vpop.f32.mrb[25].mxu1  ;;  %v5740_v57 = vrot.slane %v5722_v32, 4  ;;  %v5728_v24 = vld [vmem:[#allocation3 + $0x90] sm:$0xc] }
 0x831   : > { %v5844_v44 = vadd.f32 %v5843_v21, %v5802_v17  ;;  %v5804_v38 = vpop.f32.mrb[26].mxu0  ;;  %v5845_v10 = vpop.f32.mrb[26].mxu1  ;;  %v5729_v17 = vld [vmem:[#allocation3 + $0x98] sm:$0xc] }
 0x832   : > { %v5805_v11 = vpop.f32.mrb[27].mxu0  ;;  %v5846_v14 = vpop.f32.mrb[27].mxu1  ;;  %v5752_v21 = vsel %vm4036_vm1, %v5740_v57, %v5728_v24 }
 0x833   : > { %v5753_v11 = vsel %vm4036_vm1, %v5741_v52, %v5729_v17  ;;  %v6012_v38 = vadd.f32 %v5842_v25, %v5752_v21 }
 0x834   : > { %v6013_v10 = vadd.f32 %v5844_v44, %v5753_v11  ;;  %v5726_v11 = vld [vmem:[#allocation3 + $0x20] sm:$0x30] }
 0x836   : > { %v9060_v14 = vmul.f32 -1.442695, %v6013_v10 }
 0x86f   : > { %v5882_v3 = vpop.f32.mrb[28].mxu0  ;;  %v5923_v18 = vpop.f32.mrb[28].mxu1 }
 0x870   : > { %v5924_v41 = vadd.f32 %v5923_v18, %v5882_v3  ;;  %v5884_v12 = vpop.f32.mrb[29].mxu0  ;;  %v5925_v34 = vpop.f32.mrb[29].mxu1  ;;  %v9059_v3 = vmul.f32 -1.442695, %v6012_v38  ;;  %v5730_v18 = vld [vmem:[#allocation3 + $0xa0] sm:$0xc] }
 0x871   : > { %v5926_v13 = vadd.f32 %v5925_v34, %v5884_v12  ;;  %v5886_v6 = vpop.f32.mrb[30].mxu0  ;;  %v5927_v15 = vpop.f32.mrb[30].mxu1  ;;  %v5725_v34 = vld [vmem:[#allocation3 + $0x18] sm:$0x30]  ;;  %v5727_v38 = vld [vmem:[#allocation3 + $0x28] sm:$0x30] }
 0x872   : > { %v5887_v49 = vpop.f32.mrb[31].mxu0  ;;  %v5928_v16 = vpop.f32.mrb[31].mxu1  ;;  %10443 = vpow2.f32 %v9059_v3  ;;  %v5724_v6 = vld [vmem:[#allocation3 + $0x10] sm:$0x30]  ;;  %v5743_v12 = vrot.slane %v5725_v34, 4  ;;  %v5744_v3 = vrot.slane %v5726_v11, 4 }
 0x873   : > { %10445 = vpow2.f32 %v9060_v14  ;;  %v5742_v49 = vrot.slane %v5724_v6, 4  ;;  %v5731_v15 = vld [vmem:[#allocation3 + $0xa8] sm:$0xc]  ;;  %v5732_v34 = vld [vmem:[#allocation3 + $0xb0] sm:$0xc] }
 0x874   : > { %v5755_v63 = vsel %vm4036_vm1, %v5743_v12, %v5731_v15  ;;  %v5733_v15 = vld [vmem:[#allocation3 + $0xb8] sm:$0xc] }
 0x875   : > { %v5754_v32 = vsel %vm4036_vm1, %v5742_v49, %v5730_v18  ;;  %v6027_v52 = vadd.f32 %v5926_v13, %v5755_v63  ;;  %v5745_v18 = vrot.slane %v5727_v38, 4 }
 0x876   : > { %v6026_v24 = vadd.f32 %v5924_v41, %v5754_v32 }
 0x877   : > { %v9062_v21 = vmul.f32 -1.442695, %v6027_v52  ;;  %v5757_v38 = vsel %vm4036_vm1, %v5745_v18, %v5733_v15 }
 0x878   : > { %v9061_v17 = vmul.f32 -1.442695, %v6026_v24 }
 0x87c   : > { %v10444_v16 = vpop.eup %10443 }
 0x87d   : > { %v10446_v57 = vpop.eup %10445  ;;  %v6020_v25 = vadd.f32 1.0, %v10444_v16 }
 0x87e   : > { %v6021_v44 = vadd.f32 1.0, %v10446_v57 }
 0x87f   : > { %10447 = vrcp.f32 %v6020_v25 }
 0x880   : > { %10449 = vrcp.f32 %v6021_v44  ;;  %v5756_v44 = vsel %vm4036_vm1, %v5744_v3, %v5732_v34 }
 0x881   : > { %10451 = vpow2.f32 %v9061_v17 }
 0x882   : > { %10453 = vpow2.f32 %v9062_v21 }
 0x889   : > { %v10448_v13 = vpop.eup %10447 }
 0x88a   : > { %v10450_v57 = vpop.eup %10449 }
 0x88b   : > { %v10452_v25 = vpop.eup %10451 }
 0x88c   : > { %v10454_v21 = vpop.eup %10453 }
 0x88d   : > { %v6035_v26 = vadd.f32 1.0, %v10454_v21  ;;  %v14364_v21 = vld [vmem:[%s11906_s6 + $0x33c] ss:$24 sps:$4 sm:$0xff]  }
 0x8af   : > { %v5964_v10 = vpop.f32.mrb[32].mxu0 }
 0x8b0   : > { %v6005_v14 = vpop.f32.mrb[32].mxu1  ;;  %v5966_v6 = vpop.f32.mrb[33].mxu0 }
 0x8b1   : > { %v6006_v49 = vadd.f32 %v6005_v14, %v5964_v10  ;;  %v6007_v12 = vpop.f32.mrb[33].mxu1  ;;  %v5968_v41 = vpop.f32.mrb[34].mxu0  ;;  %v6034_v14 = vadd.f32 1.0, %v10452_v25  ;;  %v14346_v25 = vld [vmem:[%s11906_s6 + $0x8] ss:$24 sps:$4 sm:$0xff]  }
 0x8b2   : > { %v6008_v32 = vadd.f32 %v6007_v12, %v5966_v6  ;;  %v6009_v63 = vpop.f32.mrb[34].mxu1  ;;  %v5969_v16 = vpop.f32.mrb[35].mxu0 }
 0x8b3   : > { %v6040_v24 = vadd.f32 %v6006_v49, %v13215_v39  ;;  %v6010_v52 = vpop.f32.mrb[35].mxu1 }
 0x8b4   : > { %v6041_v17 = vadd.f32 %v6008_v32, %v13218_v45 }
 0x8b5   : > { %v6042_v11 = vmul.f32 %v10448_v13, %v6040_v24 }
 0x8b6   : > { %v6043_v10 = vmul.f32 %v10450_v57, %v6041_v17  ;;  %v14360_v17 = vld [vmem:[%s11906_s6 + $0x3c] ss:$24 sps:$4 sm:$0xff]  }
 0x8b7   : > { %v6044_v41 = vadd.f32 %v6042_v11, %v5756_v44  ;;  %v14350_v44 = vld [vmem:[%s11906_s6 + $0x308] ss:$24 sps:$4 sm:$0xff]   ;;  %v14368_v11 = vld [vmem:[%s11906_s6 + $0x38] ss:$24 sps:$4 sm:$0xff]  }
 0x8b8   : > { %v6045_v6 = vadd.f32 %v6043_v10, %v5757_v38  ;;  %v14372_v38 = vld [vmem:[%s11906_s6 + $0x338] ss:$24 sps:$4 sm:$0xff]   ;;  %v14376_v10 = vld [vmem:[%s11906_s6 + $0x6c] ss:$24 sps:$4 sm:$0xff]  }
 0x8b9   : > { %10455 = vtanh.f32 %v6044_v41  ;;  %v14384_v41 = vld [vmem:[%s11906_s6 + $0x68] ss:$24 sps:$4 sm:$0xff]  }
 0x8ba   : > { %10457 = vtanh.f32 %v6045_v6  ;;  %v14388_v6 = vld [vmem:[%s11906_s6 + $0x368] ss:$24 sps:$4 sm:$0xff]  }
 0x8bb   : > { %10459 = vrcp.f32 %v6034_v14  ;;  %v14380_v14 = vld [vmem:[%s11906_s6 + $0x36c] ss:$24 sps:$4 sm:$0xff]  }
 0x8bc   : > { %10461 = vrcp.f32 %v6035_v26 }
 0x8c3   : > { %v10456_v49 = vpop.eup %10455 }
 0x8c4   : > { %v10458_v12 = vpop.eup %10457  ;;  %v6048_v63 = vsub.f32 %v13643_v33, %v10456_v49 }
 0x8c5   : > { %v10460_v3 = vpop.eup %10459  ;;  %v6049_v34 = vsub.f32 %v13645_v60, %v10458_v12 }
 0x8c6   : > { %v10462_v32 = vpop.eup %10461  ;;  %v6050_v13 = vmul.f32 %v10460_v3, %v6048_v63  ;;  %v14400_v63 = vld [vmem:[%s11906_s6 + $0x98] ss:$24 sps:$4 sm:$0xff]  }
 0x8c7   : > { %v6051_v16 = vmul.f32 %v10462_v32, %v6049_v34  ;;  %v14404_v3 = vld [vmem:[%s11906_s6 + $0x398] ss:$24 sps:$4 sm:$0xff]   ;;  %v14408_v34 = vld [vmem:[%s11906_s6 + $0xcc] ss:$24 sps:$4 sm:$0xff]  }
 0x8c8   : > { %v14317_v18 = vadd.f32 %v10456_v49, %v6050_v13  ;;  %v14392_v49 = vld [vmem:[%s11906_s6 + $0x9c] ss:$24 sps:$4 sm:$0xff]   ;;  %v14412_v32 = vld [vmem:[%s11906_s6 + $0x3cc] ss:$24 sps:$4 sm:$0xff]   ;;  %v14416_v13 = vld [vmem:[%s11906_s6 + $0xc8] ss:$24 sps:$4 sm:$0xff]  }
 0x8c9   : > { %v14319_v15 = vadd.f32 %v10458_v12, %v6051_v16  ;;  %v14396_v12 = vld [vmem:[%s11906_s6 + $0x39c] ss:$24 sps:$4 sm:$0xff]   ;;  %v14420_v16 = vld [vmem:[%s11906_s6 + $0x3c8] ss:$24 sps:$4 sm:$0xff]  }
 0x8ca   : > { %v14323_v57 = vpack.c.bf16 %v14317_v18, %v14317_v18 }
 0x8cb   : > { %v14327_v26 = vpack.c.bf16 %v14319_v15, %v14319_v15 }
 0x8cc   : > { %v6058_v33 = vrot.slane %v14323_v57, 6  ;;  %v6064_v60 = vrot.slane %v14323_v57, 4 }
 0x8cd   : > { %v6059_v24 = vrot.slane %v14327_v26, 6  ;;  %v6065_v52 = vrot.slane %v14327_v26, 4  ;;  %9065 = vmatprep.mubr.msk.bf16.mxu0 %vm13227_vm6, %v14327_v26  ;;  %9071 = vmatprep.mubr.msk.bf16.mxu1 %vm13237_vm7, %v14327_v26 }
 0x8ce   : > { %6062 = vst [vmem:[#allocation2] sm:$0x4] %v6058_v33  ;;  %6068 = vst [vmem:[#allocation2 + $0x10] sm:$0x20] %v6064_v60  ;;  %9068 = vmatmul.mubr.msk.bf16.vlgmr.msra.gmra.mrb[36].mxu0 %vm13227_vm6, %v14323_v57  ;;  %9074 = vmatmul.mubr.msk.bf16.vlgmr.msra.gmra.mrb[36].mxu1 %vm13237_vm7, %v14323_v57  ;;  %v14424_v33 = vld [vmem:[%s11906_s6 + $0xfc] ss:$24 sps:$4 sm:$0xff]  }
 0x8cf   : > { %6063 = vst [vmem:[#allocation2 + $0x8] sm:$0x4] %v6059_v24  ;;  %6069 = vst [vmem:[#allocation2 + $0x18] sm:$0x20] %v6065_v52  ;;  %6215 = vmatpush1.bf16.msra.mxu0 %v14346_v25  ;;  %6256 = vmatpush1.bf16.msra.mxu1 %v14350_v44  ;;  %v14428_v60 = vld [vmem:[%s11906_s6 + $0x3fc] ss:$24 sps:$4 sm:$0xff]  }
 0x8d0   : > { %9077 = vmatprep.mubr.msk.bf16.mxu0 %vm13227_vm6, %v14327_v26  ;;  %9083 = vmatprep.mubr.msk.bf16.mxu1 %vm13237_vm7, %v14327_v26  ;;  %v17628_v24 = vld [vmem:[#allocation81_spill] sm:$0xff]  ;;  %v17629_v52 = vld [vmem:[#allocation82_spill] sm:$0xff] }
 0x8d1   : > { %6216 = vmatprep.subr.bf16.mxu0 %v14360_v17  ;;  %6257 = vmatprep.subr.bf16.mxu1 %v14364_v21 }
 0x8d3   : > { %6217 = vmatpush1.bf16.msra.mxu0 %v14368_v11  ;;  %6258 = vmatpush1.bf16.msra.mxu1 %v14372_v38 }
 0x8d4   : > { %6218 = vmatprep.subr.bf16.mxu0 %v14376_v10  ;;  %6259 = vmatprep.subr.bf16.mxu1 %v14380_v14 }
 0x8d7   : > { %6219 = vmatpush1.bf16.msra.mxu0 %v14384_v41  ;;  %6260 = vmatpush1.bf16.msra.mxu1 %v14388_v6 }
 0x8d8   : > { %6220 = vmatprep.subr.bf16.mxu0 %v14392_v49  ;;  %6261 = vmatprep.subr.bf16.mxu1 %v14396_v12 }
 0x8db   : > { %6221 = vmatpush1.bf16.msra.mxu0 %v14400_v63  ;;  %6262 = vmatpush1.bf16.msra.mxu1 %v14404_v3 }
 0x8dc   : > { %6222 = vmatprep.subr.bf16.mxu0 %v14408_v34  ;;  %6263 = vmatprep.subr.bf16.mxu1 %v14412_v32 }
 0x8df   : > { %6223 = vmatpush1.bf16.msra.mxu0 %v14416_v13  ;;  %6264 = vmatpush1.bf16.msra.mxu1 %v14420_v16 }
 0x8e0   : > { %6224 = vmatprep.subr.bf16.mxu0 %v14424_v33  ;;  %6265 = vmatprep.subr.bf16.mxu1 %v14428_v60 }
 0x8e3   : > { %6225 = vmatpush1.bf16.msra.mxu0 %v13698_v4  ;;  %6266 = vmatpush1.bf16.msra.mxu1 %v13702_v37  ;;  %v17593_v4 = vld [vmem:[#allocation46_spill] sm:$0xff]  ;;  %v17594_v37 = vld [vmem:[#allocation47_spill] sm:$0xff] }
 0x8e4   : > { %6226 = vmatprep.subr.bf16.mxu0 %v13706_v53  ;;  %6267 = vmatprep.subr.bf16.mxu1 %v13710_v5  ;;  %v17595_v53 = vld [vmem:[#allocation48_spill] sm:$0xff]  ;;  %v17596_v5 = vld [vmem:[#allocation49_spill] sm:$0xff] }
 0x8e7   : > { %6227 = vmatpush1.bf16.msra.mxu0 %v13714_v54  ;;  %6268 = vmatpush1.bf16.msra.mxu1 %v13718_v56  ;;  %v17597_v54 = vld [vmem:[#allocation50_spill] sm:$0xff]  ;;  %v17598_v56 = vld [vmem:[#allocation51_spill] sm:$0xff] }
 0x8e8   : > { %6228 = vmatprep.subr.bf16.mxu0 %v13722_v8  ;;  %6269 = vmatprep.subr.bf16.mxu1 %v13726_v61  ;;  %v17599_v8 = vld [vmem:[#allocation52_spill] sm:$0xff]  ;;  %v17600_v61 = vld [vmem:[#allocation53_spill] sm:$0xff] }
 0x8eb   : > { %6229 = vmatpush1.bf16.msra.mxu0 %v13730_v47  ;;  %6270 = vmatpush1.bf16.msra.mxu1 %v13734_v50  ;;  %v17601_v47 = vld [vmem:[#allocation54_spill] sm:$0xff]  ;;  %v17602_v50 = vld [vmem:[#allocation55_spill] sm:$0xff] }
 0x8ec   : > { %6230 = vmatprep.subr.bf16.mxu0 %v13738_v1  ;;  %6271 = vmatprep.subr.bf16.mxu1 %v13742_v9  ;;  %v17603_v1 = vld [vmem:[#allocation56_spill] sm:$0xff]  ;;  %v17604_v9 = vld [vmem:[#allocation57_spill] sm:$0xff] }
 0x8ef   : > { %6231 = vmatpush1.bf16.msra.mxu0 %v13746_v55  ;;  %6272 = vmatpush1.bf16.msra.mxu1 %v13750_v58  ;;  %v17605_v55 = vld [vmem:[#allocation58_spill] sm:$0xff]  ;;  %v17606_v58 = vld [vmem:[#allocation59_spill] sm:$0xff] }
 0x8f0   : > { %6232 = vmatprep.subr.bf16.mxu0 %v13754_v35  ;;  %6273 = vmatprep.subr.bf16.mxu1 %v13758_v36  ;;  %v17607_v35 = vld [vmem:[#allocation60_spill] sm:$0xff]  ;;  %v17608_v36 = vld [vmem:[#allocation61_spill] sm:$0xff] }
 0x8f3   : > { %6233 = vmatpush1.bf16.msra.mxu0 %v13762_v40  ;;  %6274 = vmatpush1.bf16.msra.mxu1 %v13766_v42  ;;  %v17609_v40 = vld [vmem:[#allocation62_spill] sm:$0xff]  ;;  %v17610_v42 = vld [vmem:[#allocation63_spill] sm:$0xff] }
 0x8f4   : > { %6234 = vmatprep.subr.bf16.mxu0 %v13770_v43  ;;  %6275 = vmatprep.subr.bf16.mxu1 %v13774_v0  ;;  %v17611_v43 = vld [vmem:[#allocation64_spill] sm:$0xff]  ;;  %v17612_v0 = vld [vmem:[#allocation65_spill] sm:$0xff] }
 0x8f7   : > { %6235 = vmatpush1.bf16.msra.mxu0 %v13778_v30  ;;  %6276 = vmatpush1.bf16.msra.mxu1 %v13782_v31  ;;  %v17613_v30 = vld [vmem:[#allocation66_spill] sm:$0xff]  ;;  %v17614_v31 = vld [vmem:[#allocation67_spill] sm:$0xff] }
 0x8f8   : > { %6236 = vmatprep.subr.bf16.mxu0 %v13786_v29  ;;  %6277 = vmatprep.subr.bf16.mxu1 %v13790_v59  ;;  %v17615_v29 = vld [vmem:[#allocation68_spill] sm:$0xff]  ;;  %v17616_v59 = vld [vmem:[#allocation69_spill] sm:$0xff] }
 0x8fb   : > { %6237 = vmatpush1.bf16.msra.mxu0 %v13794_v7  ;;  %6278 = vmatpush1.bf16.msra.mxu1 %v13798_v28  ;;  %v17617_v7 = vld [vmem:[#allocation70_spill] sm:$0xff]  ;;  %v17618_v28 = vld [vmem:[#allocation71_spill] sm:$0xff] }
 0x8fc   : > { %6238 = vmatprep.subr.bf16.mxu0 %v13802_v23  ;;  %6279 = vmatprep.subr.bf16.mxu1 %v13806_v27  ;;  %v17619_v23 = vld [vmem:[#allocation72_spill] sm:$0xff]  ;;  %v17620_v27 = vld [vmem:[#allocation73_spill] sm:$0xff] }
 0x8ff   : > { %6239 = vmatpush1.bf16.msra.mxu0 %v13810_v22  ;;  %6280 = vmatpush1.bf16.msra.mxu1 %v13814_v46  ;;  %v17621_v22 = vld [vmem:[#allocation74_spill] sm:$0xff]  ;;  %v17622_v46 = vld [vmem:[#allocation75_spill] sm:$0xff] }
 0x900   : > { %6240 = vmatprep.subr.bf16.mxu0 %v13818_v62  ;;  %6281 = vmatprep.subr.bf16.mxu1 %v13822_v19  ;;  %v17623_v62 = vld [vmem:[#allocation76_spill] sm:$0xff]  ;;  %v17624_v19 = vld [vmem:[#allocation77_spill] sm:$0xff] }
 0x903   : > { %6241 = vmatpush1.bf16.msra.mxu0 %v13826_v2  ;;  %6282 = vmatpush1.bf16.msra.mxu1 %v13830_v20  ;;  %v17625_v2 = vld [vmem:[#allocation78_spill] sm:$0xff]  ;;  %v17626_v20 = vld [vmem:[#allocation79_spill] sm:$0xff] }
 0x904   : > { %6242 = vmatprep.subr.bf16.mxu0 %v17593_v4  ;;  %6283 = vmatprep.subr.bf16.mxu1 %v17594_v37  ;;  %v17630_v4 = vld [vmem:[#allocation83_spill] sm:$0xff]  ;;  %v17631_v37 = vld [vmem:[#allocation84_spill] sm:$0xff] }
 0x907   : > { %6243 = vmatpush1.bf16.msra.mxu0 %v17595_v53  ;;  %6284 = vmatpush1.bf16.msra.mxu1 %v17596_v5  ;;  %v17632_v53 = vld [vmem:[#allocation85_spill] sm:$0xff]  ;;  %v17633_v5 = vld [vmem:[#allocation86_spill] sm:$0xff] }
 0x908   : > { %6244 = vmatprep.subr.bf16.mxu0 %v17597_v54  ;;  %6285 = vmatprep.subr.bf16.mxu1 %v17598_v56  ;;  %v17634_v54 = vld [vmem:[#allocation87_spill] sm:$0xff]  ;;  %v17635_v56 = vld [vmem:[#allocation88_spill] sm:$0xff] }
 0x90b   : > { %6245 = vmatpush1.bf16.msra.mxu0 %v17599_v8  ;;  %6286 = vmatpush1.bf16.msra.mxu1 %v17600_v61  ;;  %v17636_v8 = vld [vmem:[#allocation89_spill] sm:$0xff]  ;;  %v17637_v61 = vld [vmem:[#allocation90_spill] sm:$0xff] }
 0x90c   : > { %6296 = vmatprep.subr.bf16.mxu0 %v17601_v47  ;;  %6337 = vmatprep.subr.bf16.mxu1 %v17602_v50  ;;  %v17638_v47 = vld [vmem:[#allocation91_spill] sm:$0xff]  ;;  %v17639_v50 = vld [vmem:[#allocation92_spill] sm:$0xff] }
 0x90e   : > { %9080 = vmatmul.mubr.msk.bf16.vlgmr.msra.gmra.mrb[40].mxu0 %vm13227_vm6, %v14323_v57  ;;  %9086 = vmatmul.mubr.msk.bf16.vlgmr.msra.gmra.mrb[40].mxu1 %vm13237_vm7, %v14323_v57 }
 0x90f   : > { %6297 = vmatpush1.bf16.msra.mxu0 %v17603_v1  ;;  %9089 = vmatprep.mubr.msk.bf16.mxu0 %vm13227_vm6, %v14327_v26  ;;  %v17640_v1 = vld [vmem:[#allocation93_spill] sm:$0xff] }
 0x910   : > { %6338 = vmatpush1.bf16.msra.mxu1 %v17604_v9  ;;  %9095 = vmatprep.mubr.msk.bf16.mxu1 %vm13237_vm7, %v14327_v26  ;;  %v17627_v26 = vld [vmem:[#allocation80_spill] sm:$0xff]  ;;  %v17641_v9 = vld [vmem:[#allocation94_spill] sm:$0xff] }
 0x911   : > { %6298 = vmatprep.subr.bf16.mxu0 %v17605_v55  ;;  %6339 = vmatprep.subr.bf16.mxu1 %v17606_v58  ;;  %v17642_v55 = vld [vmem:[#allocation95_spill] sm:$0xff]  ;;  %v17643_v58 = vld [vmem:[#allocation96_spill] sm:$0xff] }
 0x913   : > { %6299 = vmatpush1.bf16.msra.mxu0 %v17607_v35  ;;  %v17644_v35 = vld [vmem:[#allocation97_spill] sm:$0xff] }
 0x914   : > { %6340 = vmatpush1.bf16.msra.mxu1 %v17608_v36  ;;  %6300 = vmatprep.subr.bf16.mxu0 %v17609_v40  ;;  %v17645_v36 = vld [vmem:[#allocation98_spill] sm:$0xff]  ;;  %v17646_v40 = vld [vmem:[#allocation99_spill] sm:$0xff] }
 0x915   : > { %6341 = vmatprep.subr.bf16.mxu1 %v17610_v42  ;;  %v17647_v42 = vld [vmem:[#allocation100_spill] sm:$0xff] }
 0x917   : > { %6301 = vmatpush1.bf16.msra.mxu0 %v17611_v43  ;;  %v17648_v43 = vld [vmem:[#allocation101_spill] sm:$0xff] }
 0x918   : > { %6342 = vmatpush1.bf16.msra.mxu1 %v17612_v0  ;;  %6302 = vmatprep.subr.bf16.mxu0 %v17613_v30  ;;  %v17649_v0 = vld [vmem:[#allocation102_spill] sm:$0xff]  ;;  %v17650_v30 = vld [vmem:[#allocation103_spill] sm:$0xff] }
 0x919   : > { %6343 = vmatprep.subr.bf16.mxu1 %v17614_v31  ;;  %v17651_v31 = vld [vmem:[#allocation104_spill] sm:$0xff] }
 0x91b   : > { %6303 = vmatpush1.bf16.msra.mxu0 %v17615_v29  ;;  %v17652_v29 = vld [vmem:[#allocation105_spill] sm:$0xff] }
 0x91c   : > { %6344 = vmatpush1.bf16.msra.mxu1 %v17616_v59  ;;  %6304 = vmatprep.subr.bf16.mxu0 %v17617_v7  ;;  %v17653_v59 = vld [vmem:[#allocation106_spill] sm:$0xff]  ;;  %v17654_v7 = vld [vmem:[#allocation107_spill] sm:$0xff] }
 0x91d   : > { %6345 = vmatprep.subr.bf16.mxu1 %v17618_v28  ;;  %v17655_v28 = vld [vmem:[#allocation108_spill] sm:$0xff] }
 0x91f   : > { %6305 = vmatpush1.bf16.msra.mxu0 %v17619_v23  ;;  %v17656_v23 = vld [vmem:[#allocation109_spill] sm:$0xff] }
 0x920   : > { %6346 = vmatpush1.bf16.msra.mxu1 %v17620_v27  ;;  %6306 = vmatprep.subr.bf16.mxu0 %v17621_v22  ;;  %v17657_v27 = vld [vmem:[#allocation110_spill] sm:$0xff]  ;;  %v17658_v22 = vld [vmem:[#allocation111_spill] sm:$0xff] }
 0x921   : > { %6347 = vmatprep.subr.bf16.mxu1 %v17622_v46  ;;  %v17659_v46 = vld [vmem:[#allocation112_spill] sm:$0xff] }
 0x923   : > { %6307 = vmatpush1.bf16.msra.mxu0 %v17623_v62  ;;  %v17660_v62 = vld [vmem:[#allocation113_spill] sm:$0xff] }
 0x924   : > { %6348 = vmatpush1.bf16.msra.mxu1 %v17624_v19  ;;  %6308 = vmatprep.subr.bf16.mxu0 %v17625_v2  ;;  %v17661_v19 = vld [vmem:[#allocation114_spill] sm:$0xff]  ;;  %v17662_v2 = vld [vmem:[#allocation115_spill] sm:$0xff] }
 0x925   : > { %6349 = vmatprep.subr.bf16.mxu1 %v17626_v20  ;;  %v17663_v20 = vld [vmem:[#allocation116_spill] sm:$0xff] }
 0x927   : > { %6309 = vmatpush1.bf16.msra.mxu0 %v17627_v26  ;;  %v17664_v26 = vld [vmem:[#allocation117_spill] sm:$0xff] }
 0x928   : > { %6350 = vmatpush1.bf16.msra.mxu1 %v17628_v24  ;;  %6310 = vmatprep.subr.bf16.mxu0 %v17629_v52  ;;  %v17665_v24 = vld [vmem:[#allocation118_spill] sm:$0xff]  ;;  %v17666_v52 = vld [vmem:[#allocation119_spill] sm:$0xff] }
 0x929   : > { %6351 = vmatprep.subr.bf16.mxu1 %v17630_v4  ;;  %v17667_v4 = vld [vmem:[#allocation120_spill] sm:$0xff] }
 0x92b   : > { %6311 = vmatpush1.bf16.msra.mxu0 %v17631_v37  ;;  %v17668_v37 = vld [vmem:[#allocation121_spill] sm:$0xff] }
 0x92c   : > { %6352 = vmatpush1.bf16.msra.mxu1 %v17632_v53  ;;  %6312 = vmatprep.subr.bf16.mxu0 %v17633_v5  ;;  %v17669_v53 = vld [vmem:[#allocation122_spill] sm:$0xff]  ;;  %v17670_v5 = vld [vmem:[#allocation123_spill] sm:$0xff] }
 0x92d   : > { %6353 = vmatprep.subr.bf16.mxu1 %v17634_v54  ;;  %v17671_v54 = vld [vmem:[#allocation124_spill] sm:$0xff] }
 0x92f   : > { %6313 = vmatpush1.bf16.msra.mxu0 %v17635_v56  ;;  %v17672_v56 = vld [vmem:[#allocation125_spill] sm:$0xff] }
 0x930   : > { %6354 = vmatpush1.bf16.msra.mxu1 %v17636_v8  ;;  %6314 = vmatprep.subr.bf16.mxu0 %v17637_v61  ;;  %v17673_v8 = vld [vmem:[#allocation126_spill] sm:$0xff]  ;;  %v17674_v61 = vld [vmem:[#allocation127_spill] sm:$0xff] }
 0x931   : > { %6355 = vmatprep.subr.bf16.mxu1 %v17638_v47  ;;  %v17675_v47 = vld [vmem:[#allocation128_spill] sm:$0xff] }
 0x933   : > { %6315 = vmatpush1.bf16.msra.mxu0 %v17639_v50  ;;  %v17676_v50 = vld [vmem:[#allocation129_spill] sm:$0xff] }
 0x934   : > { %6356 = vmatpush1.bf16.msra.mxu1 %v17640_v1  ;;  %6316 = vmatprep.subr.bf16.mxu0 %v17641_v9  ;;  %v17678_v1 = vld [vmem:[#allocation131_spill] sm:$0xff]  ;;  %v17679_v9 = vld [vmem:[#allocation132_spill] sm:$0xff] }
 0x935   : > { %6357 = vmatprep.subr.bf16.mxu1 %v17642_v55  ;;  %v17680_v55 = vld [vmem:[#allocation133_spill] sm:$0xff] }
 0x937   : > { %6317 = vmatpush1.bf16.msra.mxu0 %v17643_v58  ;;  %v17681_v58 = vld [vmem:[#allocation134_spill] sm:$0xff] }
 0x938   : > { %6358 = vmatpush1.bf16.msra.mxu1 %v17644_v35  ;;  %6318 = vmatprep.subr.bf16.mxu0 %v17645_v36  ;;  %v17682_v35 = vld [vmem:[#allocation135_spill] sm:$0xff]  ;;  %v17683_v36 = vld [vmem:[#allocation136_spill] sm:$0xff] }
 0x939   : > { %6359 = vmatprep.subr.bf16.mxu1 %v17646_v40  ;;  %v17684_v40 = vld [vmem:[#allocation137_spill] sm:$0xff] }
 0x93b   : > { %6319 = vmatpush1.bf16.msra.mxu0 %v17647_v42  ;;  %v17685_v42 = vld [vmem:[#allocation138_spill] sm:$0xff] }
 0x93c   : > { %6360 = vmatpush1.bf16.msra.mxu1 %v17648_v43  ;;  %6320 = vmatprep.subr.bf16.mxu0 %v17649_v0  ;;  %v17686_v43 = vld [vmem:[#allocation139_spill] sm:$0xff]  ;;  %v17687_v0 = vld [vmem:[#allocation140_spill] sm:$0xff] }
 0x93d   : > { %6361 = vmatprep.subr.bf16.mxu1 %v17650_v30  ;;  %v17688_v30 = vld [vmem:[#allocation141_spill] sm:$0xff] }
 0x93f   : > { %6321 = vmatpush1.bf16.msra.mxu0 %v17651_v31  ;;  %v17689_v31 = vld [vmem:[#allocation142_spill] sm:$0xff] }
 0x940   : > { %6362 = vmatpush1.bf16.msra.mxu1 %v17652_v29  ;;  %6322 = vmatprep.subr.bf16.mxu0 %v17653_v59  ;;  %v17690_v29 = vld [vmem:[#allocation143_spill] sm:$0xff]  ;;  %v17691_v59 = vld [vmem:[#allocation144_spill] sm:$0xff] }
 0x941   : > { %6363 = vmatprep.subr.bf16.mxu1 %v17654_v7  ;;  %v17692_v7 = vld [vmem:[#allocation145_spill] sm:$0xff] }
 0x943   : > { %6323 = vmatpush1.bf16.msra.mxu0 %v17655_v28  ;;  %v17693_v28 = vld [vmem:[#allocation146_spill] sm:$0xff] }
 0x944   : > { %6364 = vmatpush1.bf16.msra.mxu1 %v17656_v23  ;;  %6324 = vmatprep.subr.bf16.mxu0 %v17657_v27  ;;  %v17694_v23 = vld [vmem:[#allocation147_spill] sm:$0xff]  ;;  %v17695_v27 = vld [vmem:[#allocation148_spill] sm:$0xff] }
 0x945   : > { %6365 = vmatprep.subr.bf16.mxu1 %v17658_v22  ;;  %v17696_v22 = vld [vmem:[#allocation149_spill] sm:$0xff] }
 0x947   : > { %6325 = vmatpush1.bf16.msra.mxu0 %v17659_v46  ;;  %v17697_v46 = vld [vmem:[#allocation150_spill] sm:$0xff] }
 0x948   : > { %6366 = vmatpush1.bf16.msra.mxu1 %v17660_v62  ;;  %6326 = vmatprep.subr.bf16.mxu0 %v17661_v19  ;;  %v17698_v62 = vld [vmem:[#allocation151_spill] sm:$0xff] }
 0x949   : > { %6367 = vmatprep.subr.bf16.mxu1 %v17662_v2  ;;  %v14590_v19 = vld [vmem:[%s11906_s6 + $0x180] ss:$24 sps:$4 sm:$0xff]  }
 0x94a   : > { %v14594_v2 = vld [vmem:[%s11906_s6 + $0x480] ss:$24 sps:$4 sm:$0xff]  }
 0x94b   : > { %6327 = vmatpush1.bf16.msra.mxu0 %v17663_v20  ;;  %v14598_v20 = vld [vmem:[%s11906_s6 + $0x1b4] ss:$24 sps:$4 sm:$0xff]  }
 0x94c   : > { %6368 = vmatpush1.bf16.msra.mxu1 %v17664_v26  ;;  %6476 = vmatprep.subr.bf16.mxu0 %v17665_v24  ;;  %v14602_v26 = vld [vmem:[%s11906_s6 + $0x4b4] ss:$24 sps:$4 sm:$0xff]   ;;  %v14606_v24 = vld [vmem:[%s11906_s6 + $0x1b0] ss:$24 sps:$4 sm:$0xff]  }
 0x94d   : > { %6517 = vmatprep.subr.bf16.mxu1 %v17666_v52  ;;  %v14610_v52 = vld [vmem:[%s11906_s6 + $0x4b0] ss:$24 sps:$4 sm:$0xff]  }
 0x94e   : > { %9092 = vmatmul.mubr.msk.bf16.vlgmr.msra.gmra.mrb[44].mxu0 %vm13227_vm6, %v14323_v57 }
 0x94f   : > { %9098 = vmatmul.mubr.msk.bf16.vlgmr.msra.gmra.mrb[44].mxu1 %vm13237_vm7, %v14323_v57  ;;  %6477 = vmatpush1.bf16.msra.mxu0 %v17667_v4  ;;  %v17677_v57 = vld [vmem:[#allocation130_spill] sm:$0xff]  ;;  %v14614_v4 = vld [vmem:[%s11906_s6 + $0x1e4] ss:$24 sps:$4 sm:$0xff]  }
 0x950   : > { %6518 = vmatpush1.bf16.msra.mxu1 %v17668_v37  ;;  %6478 = vmatprep.subr.bf16.mxu0 %v17669_v53  ;;  %v14618_v37 = vld [vmem:[%s11906_s6 + $0x4e4] ss:$24 sps:$4 sm:$0xff]   ;;  %v14622_v53 = vld [vmem:[%s11906_s6 + $0x1e0] ss:$24 sps:$4 sm:$0xff]  }
 0x951   : > { %6519 = vmatprep.subr.bf16.mxu1 %v17670_v5  ;;  %v14626_v5 = vld [vmem:[%s11906_s6 + $0x4e0] ss:$24 sps:$4 sm:$0xff]  }
 0x953   : > { %6479 = vmatpush1.bf16.msra.mxu0 %v17671_v54  ;;  %v14630_v54 = vld [vmem:[%s11906_s6 + $0x214] ss:$24 sps:$4 sm:$0xff]  }
 0x954   : > { %6520 = vmatpush1.bf16.msra.mxu1 %v17672_v56  ;;  %6480 = vmatprep.subr.bf16.mxu0 %v17673_v8  ;;  %v14634_v56 = vld [vmem:[%s11906_s6 + $0x514] ss:$24 sps:$4 sm:$0xff]   ;;  %v14638_v8 = vld [vmem:[%s11906_s6 + $0x210] ss:$24 sps:$4 sm:$0xff]  }
 0x955   : > { %6521 = vmatprep.subr.bf16.mxu1 %v17674_v61  ;;  %v14642_v61 = vld [vmem:[%s11906_s6 + $0x510] ss:$24 sps:$4 sm:$0xff]  }
 0x957   : > { %6481 = vmatpush1.bf16.msra.mxu0 %v17675_v47  ;;  %v14646_v47 = vld [vmem:[%s11906_s6 + $0x244] ss:$24 sps:$4 sm:$0xff]  }
 0x958   : > { %6522 = vmatpush1.bf16.msra.mxu1 %v17676_v50  ;;  %6482 = vmatprep.subr.bf16.mxu0 %v17677_v57  ;;  %17699 = vst [vmem:[#allocation28_spill] sm:$0xff] %v14646_v47  ;;  %v14650_v50 = vld [vmem:[%s11906_s6 + $0x544] ss:$24 sps:$4 sm:$0xff]   ;;  %v14654_v57 = vld [vmem:[%s11906_s6 + $0x240] ss:$24 sps:$4 sm:$0xff]  }
 0x959   : > { %6523 = vmatprep.subr.bf16.mxu1 %v17678_v1  ;;  %17700 = vst [vmem:[#allocation29_spill] sm:$0xff] %v14650_v50  ;;  %17701 = vst [vmem:[#allocation30_spill] sm:$0xff] %v14654_v57  ;;  %v14658_v1 = vld [vmem:[%s11906_s6 + $0x540] ss:$24 sps:$4 sm:$0xff]  }
 0x95a   : > { %17702 = vst [vmem:[#allocation31_spill] sm:$0xff] %v14658_v1 }
 0x95b   : > { %6483 = vmatpush1.bf16.msra.mxu0 %v17679_v9  ;;  %v14662_v9 = vld [vmem:[%s11906_s6 + $0x274] ss:$24 sps:$4 sm:$0xff]  }
 0x95c   : > { %6524 = vmatpush1.bf16.msra.mxu1 %v17680_v55  ;;  %6484 = vmatprep.subr.bf16.mxu0 %v17681_v58  ;;  %17703 = vst [vmem:[#allocation32_spill] sm:$0xff] %v14662_v9  ;;  %v14666_v55 = vld [vmem:[%s11906_s6 + $0x574] ss:$24 sps:$4 sm:$0xff]   ;;  %v14670_v58 = vld [vmem:[%s11906_s6 + $0x270] ss:$24 sps:$4 sm:$0xff]  }
 0x95d   : > { %6525 = vmatprep.subr.bf16.mxu1 %v17682_v35  ;;  %17704 = vst [vmem:[#allocation33_spill] sm:$0xff] %v14666_v55  ;;  %17705 = vst [vmem:[#allocation34_spill] sm:$0xff] %v14670_v58  ;;  %v14674_v35 = vld [vmem:[%s11906_s6 + $0x570] ss:$24 sps:$4 sm:$0xff]  }
 0x95e   : > { %17706 = vst [vmem:[#allocation35_spill] sm:$0xff] %v14674_v35 }
 0x95f   : > { %6485 = vmatpush1.bf16.msra.mxu0 %v17683_v36  ;;  %v14678_v36 = vld [vmem:[%s11906_s6 + $0x2a4] ss:$24 sps:$4 sm:$0xff]  }
 0x960   : > { %6526 = vmatpush1.bf16.msra.mxu1 %v17684_v40  ;;  %6486 = vmatprep.subr.bf16.mxu0 %v17685_v42  ;;  %17707 = vst [vmem:[#allocation36_spill] sm:$0xff] %v14678_v36  ;;  %v14682_v40 = vld [vmem:[%s11906_s6 + $0x5a4] ss:$24 sps:$4 sm:$0xff]   ;;  %v14686_v42 = vld [vmem:[%s11906_s6 + $0x2a0] ss:$24 sps:$4 sm:$0xff]  }
 0x961   : > { %6527 = vmatprep.subr.bf16.mxu1 %v17686_v43  ;;  %17708 = vst [vmem:[#allocation37_spill] sm:$0xff] %v14682_v40  ;;  %17709 = vst [vmem:[#allocation38_spill] sm:$0xff] %v14686_v42  ;;  %v14690_v43 = vld [vmem:[%s11906_s6 + $0x5a0] ss:$24 sps:$4 sm:$0xff]  }
 0x962   : > { %17710 = vst [vmem:[#allocation39_spill] sm:$0xff] %v14690_v43 }
 0x963   : > { %6487 = vmatpush1.bf16.msra.mxu0 %v17687_v0  ;;  %v14694_v0 = vld [vmem:[%s11906_s6 + $0x2d4] ss:$24 sps:$4 sm:$0xff]  }
 0x964   : > { %6528 = vmatpush1.bf16.msra.mxu1 %v17688_v30  ;;  %6488 = vmatprep.subr.bf16.mxu0 %v17689_v31  ;;  %17711 = vst [vmem:[#allocation40_spill] sm:$0xff] %v14694_v0  ;;  %v14698_v30 = vld [vmem:[%s11906_s6 + $0x5d4] ss:$24 sps:$4 sm:$0xff]   ;;  %v14702_v31 = vld [vmem:[%s11906_s6 + $0x2d0] ss:$24 sps:$4 sm:$0xff]  }
 0x965   : > { %6529 = vmatprep.subr.bf16.mxu1 %v17690_v29  ;;  %17712 = vst [vmem:[#allocation41_spill] sm:$0xff] %v14698_v30  ;;  %17713 = vst [vmem:[#allocation42_spill] sm:$0xff] %v14702_v31  ;;  %v14706_v29 = vld [vmem:[%s11906_s6 + $0x5d0] ss:$24 sps:$4 sm:$0xff]  }
 0x966   : > { %17714 = vst [vmem:[#allocation43_spill] sm:$0xff] %v14706_v29 }
 0x967   : > { %6489 = vmatpush1.bf16.msra.mxu0 %v17691_v59  ;;  %v14710_v59 = vld [vmem:[%s11906_s6 + $0xc] ss:$24 sps:$4 sm:$0xff]  }
 0x968   : > { %6530 = vmatpush1.bf16.msra.mxu1 %v17692_v7  ;;  %6490 = vmatprep.subr.bf16.mxu0 %v17693_v28  ;;  %17715 = vst [vmem:[#allocation44_spill] sm:$0xff] %v14710_v59  ;;  %v14714_v7 = vld [vmem:[%s11906_s6 + $0x30c] ss:$24 sps:$4 sm:$0xff]  }
 0x969   : > { %6531 = vmatprep.subr.bf16.mxu1 %v17694_v23  ;;  %17716 = vst [vmem:[#allocation45_spill] sm:$0xff] %v14714_v7 }
 0x96b   : > { %6491 = vmatpush1.bf16.msra.mxu0 %v17695_v27 }
 0x96c   : > { %6532 = vmatpush1.bf16.msra.mxu1 %v17696_v22  ;;  %6492 = vmatprep.subr.bf16.mxu0 %v17697_v46 }
 0x96d   : > { %6533 = vmatprep.subr.bf16.mxu1 %v17698_v62 }
 0x96f   : > { %6493 = vmatpush1.bf16.msra.mxu0 %v14590_v19 }
 0x970   : > { %6534 = vmatpush1.bf16.msra.mxu1 %v14594_v2  ;;  %6494 = vmatprep.subr.bf16.mxu0 %v14598_v20 }
 0x971   : > { %6535 = vmatprep.subr.bf16.mxu1 %v14602_v26 }
 0x973   : > { %6495 = vmatpush1.bf16.msra.mxu0 %v14606_v24 }
 0x974   : > { %6536 = vmatpush1.bf16.msra.mxu1 %v14610_v52  ;;  %6496 = vmatprep.subr.bf16.mxu0 %v14614_v4 }
 0x975   : > { %6537 = vmatprep.subr.bf16.mxu1 %v14618_v37 }
 0x977   : > { %6497 = vmatpush1.bf16.msra.mxu0 %v14622_v53 }
 0x978   : > { %6538 = vmatpush1.bf16.msra.mxu1 %v14626_v5  ;;  %6498 = vmatprep.subr.bf16.mxu0 %v14630_v54 }
 0x979   : > { %6539 = vmatprep.subr.bf16.mxu1 %v14634_v56 }
 0x97b   : > { %6499 = vmatpush1.bf16.msra.mxu0 %v14638_v8 }
 0x97c   : > { %6540 = vmatpush1.bf16.msra.mxu1 %v14642_v61  ;;  %6500 = vmatprep.subr.bf16.mxu0 %v14646_v47 }
 0x97d   : > { %6541 = vmatprep.subr.bf16.mxu1 %v14650_v50 }
 0x97f   : > { %6501 = vmatpush1.bf16.msra.mxu0 %v14654_v57  ;;  %v6076_v57 = vld [vmem:[#allocation3 + $0x90] sm:$0x3] }
 0x980   : > { %6542 = vmatpush1.bf16.msra.mxu1 %v14658_v1  ;;  %6502 = vmatprep.subr.bf16.mxu0 %v14662_v9  ;;  %v6070_v1 = vld [vmem:[#allocation3] sm:$0xc0] }
 0x981   : > { %6543 = vmatprep.subr.bf16.mxu1 %v14666_v55  ;;  %v6088_v50 = vrot.slane %v6070_v1, 6 }
 0x983   : > { %6503 = vmatpush1.bf16.msra.mxu0 %v14670_v58 }
 0x984   : > { %6544 = vmatpush1.bf16.msra.mxu1 %v14674_v35  ;;  %6504 = vmatprep.subr.bf16.mxu0 %v14678_v36 }
 0x985   : > { %6545 = vmatprep.subr.bf16.mxu1 %v14682_v40 }
 0x987   : > { %6505 = vmatpush1.bf16.msra.mxu0 %v14686_v42 }
 0x988   : > { %6546 = vmatpush1.bf16.msra.mxu1 %v14690_v43  ;;  %6506 = vmatprep.subr.bf16.mxu0 %v14694_v0 }
 0x989   : > { %6547 = vmatprep.subr.bf16.mxu1 %v14698_v30 }
 0x98b   : > { %6507 = vmatpush1.bf16.msra.mxu0 %v14702_v31 }
 0x98c   : > { %6548 = vmatpush1.bf16.msra.mxu1 %v14706_v29  ;;  %6558 = vmatprep.subr.bf16.mxu0 %v14710_v59 }
 0x98d   : > { %6599 = vmatprep.subr.bf16.mxu1 %v14714_v7 }
 0x9a1   : > { %v6166_v28 = vpop.f32.mrb[36].mxu0  ;;  %v6207_v23 = vpop.f32.mrb[36].mxu1 }
 0x9a2   : > { %v6208_v27 = vadd.f32 %v6207_v23, %v6166_v28  ;;  %v6168_v22 = vpop.f32.mrb[37].mxu0  ;;  %v6209_v46 = vpop.f32.mrb[37].mxu1  ;;  %v6071_v28 = vld [vmem:[#allocation3 + $0x8] sm:$0xc0]  ;;  %v6077_v23 = vld [vmem:[#allocation3 + $0x98] sm:$0x3] }
 0x9a3   : > { %v6210_v62 = vadd.f32 %v6209_v46, %v6168_v22  ;;  %v6170_v30 = vpop.f32.mrb[38].mxu0  ;;  %v6211_v31 = vpop.f32.mrb[38].mxu1  ;;  %v6106_v22 = vrot.slane %v6076_v57, 6 }
 0x9a4   : > { %v6171_v0 = vpop.f32.mrb[39].mxu0  ;;  %v6212_v43 = vpop.f32.mrb[39].mxu1  ;;  %v6089_v30 = vrot.slane %v6071_v28, 6  ;;  %v6107_v31 = vrot.slane %v6077_v23, 6 }
 0x9a5   : > { %v6118_v43 = vsel %vm4036_vm1, %v6088_v50, %v6106_v22 }
 0x9a6   : > { %v6119_v0 = vsel %vm4036_vm1, %v6089_v30, %v6107_v31 }
 0x9e1   : > { %v6248_v42 = vpop.f32.mrb[40].mxu0  ;;  %v6289_v29 = vpop.f32.mrb[40].mxu1 }
 0x9e2   : > { %v6290_v40 = vadd.f32 %v6289_v29, %v6248_v42  ;;  %v6250_v36 = vpop.f32.mrb[41].mxu0  ;;  %v6291_v35 = vpop.f32.mrb[41].mxu1  ;;  %v6378_v42 = vadd.f32 %v6208_v27, %v6118_v43  ;;  %v6379_v29 = vadd.f32 %v6210_v62, %v6119_v0 }
 0x9e3   : > { %v6292_v59 = vadd.f32 %v6291_v35, %v6250_v36  ;;  %v6252_v58 = vpop.f32.mrb[42].mxu0  ;;  %v6293_v55 = vpop.f32.mrb[42].mxu1  ;;  %v6079_v36 = vld [vmem:[#allocation3 + $0xa8] sm:$0x3] }
 0x9e4   : > { %v6253_v9 = vpop.f32.mrb[43].mxu0  ;;  %v6294_v7 = vpop.f32.mrb[43].mxu1  ;;  %v9099_v46 = vmul.f32 -1.442695, %v6378_v42  ;;  %v9100_v35 = vmul.f32 -1.442695, %v6379_v29 }
 0x9e5   : > { %v6072_v9 = vld [vmem:[#allocation3 + $0x10] sm:$0xc0]  ;;  %v6078_v55 = vld [vmem:[#allocation3 + $0xa0] sm:$0x3]  ;;  %v6073_v58 = vld [vmem:[#allocation3 + $0x18] sm:$0xc0] }
 0x9e6   : > { %10463 = vpow2.f32 %v9099_v46  ;;  %v6090_v7 = vrot.slane %v6072_v9, 6  ;;  %v6108_v47 = vrot.slane %v6078_v55, 6  ;;  %v6091_v1 = vrot.slane %v6073_v58, 6  ;;  %v6074_v42 = vld [vmem:[#allocation3 + $0x20] sm:$0xc0] }
 0x9e7   : > { %10465 = vpow2.f32 %v9100_v35  ;;  %v6109_v57 = vrot.slane %v6079_v36, 6  ;;  %v6080_v29 = vld [vmem:[#allocation3 + $0xb0] sm:$0x3]  ;;  %v6075_v46 = vld [vmem:[#allocation3 + $0x28] sm:$0xc0] }
 0x9e8   : > { %v6120_v28 = vsel %vm4036_vm1, %v6090_v7, %v6108_v47  ;;  %v6081_v35 = vld [vmem:[#allocation3 + $0xb8] sm:$0x3]  ;;  %v6092_v47 = vrot.slane %v6074_v42, 6  ;;  %v6110_v55 = vrot.slane %v6080_v29, 6 }
 0x9e9   : > { %v6121_v50 = vsel %vm4036_vm1, %v6091_v1, %v6109_v57  ;;  %v6392_v27 = vadd.f32 %v6290_v40, %v6120_v28  ;;  %v6093_v40 = vrot.slane %v6075_v46, 6 }
 0x9ea   : > { %v6393_v62 = vadd.f32 %v6292_v59, %v6121_v50  ;;  %v6111_v59 = vrot.slane %v6081_v35, 6 }
 0x9eb   : > { %v9101_v43 = vmul.f32 -1.442695, %v6392_v27 }
 0x9ec   : > { %v9102_v0 = vmul.f32 -1.442695, %v6393_v62  ;;  %v6123_v46 = vsel %vm4036_vm1, %v6093_v40, %v6111_v59 }
 0x9f0   : > { %v10464_v23 = vpop.eup %10463 }
 0x9f1   : > { %v10466_v22 = vpop.eup %10465  ;;  %v6386_v30 = vadd.f32 1.0, %v10464_v23 }
 0x9f2   : > { %v6387_v31 = vadd.f32 1.0, %v10466_v22 }
 0x9f3   : > { %10467 = vrcp.f32 %v6386_v30 }
 0x9f4   : > { %10469 = vrcp.f32 %v6387_v31 }
 0x9f5   : > { %10471 = vpow2.f32 %v9101_v43  ;;  %v6122_v43 = vsel %vm4036_vm1, %v6092_v47, %v6110_v55 }
 0x9f6   : > { %10473 = vpow2.f32 %v9102_v0 }
 0x9fd   : > { %v10468_v28 = vpop.eup %10467 }
 0x9fe   : > { %v10470_v27 = vpop.eup %10469 }
 0x9ff   : > { %v10472_v31 = vpop.eup %10471 }
 0xa00   : > { %v10474_v42 = vpop.eup %10473 }
 0xa21   : > { %v6330_v9 = vpop.f32.mrb[44].mxu0 }
 0xa22   : > { %v6371_v58 = vpop.f32.mrb[44].mxu1  ;;  %v6332_v36 = vpop.f32.mrb[45].mxu0 }
 0xa23   : > { %v6372_v7 = vadd.f32 %v6371_v58, %v6330_v9  ;;  %v6373_v1 = vpop.f32.mrb[45].mxu1  ;;  %v6334_v57 = vpop.f32.mrb[46].mxu0  ;;  %v6400_v9 = vadd.f32 1.0, %v10472_v31  ;;  %v14864_v31 = vld [vmem:[%s11906_s6 + $0x4e8] ss:$24 sps:$4 sm:$0xff]  }
 0xa24   : > { %v6374_v50 = vadd.f32 %v6373_v1, %v6332_v36  ;;  %v6375_v23 = vpop.f32.mrb[46].mxu1  ;;  %v6335_v22 = vpop.f32.mrb[47].mxu0  ;;  %v6401_v57 = vadd.f32 1.0, %v10474_v42  ;;  %v14876_v42 = vld [vmem:[%s11906_s6 + $0x218] ss:$24 sps:$4 sm:$0xff]  }
 0xa25   : > { %v6406_v62 = vadd.f32 %v6372_v7, %v13215_v39  ;;  %v6376_v30 = vpop.f32.mrb[47].mxu1 }
 0xa26   : > { %v6407_v0 = vadd.f32 %v6374_v50, %v13218_v45 }
 0xa27   : > { %v6408_v29 = vmul.f32 %v10468_v28, %v6406_v62 }
 0xa28   : > { %v6409_v35 = vmul.f32 %v10470_v27, %v6407_v0  ;;  %v14872_v0 = vld [vmem:[%s11906_s6 + $0x51c] ss:$24 sps:$4 sm:$0xff]  }
 0xa29   : > { %v6410_v58 = vadd.f32 %v6408_v29, %v6122_v43  ;;  %v14868_v43 = vld [vmem:[%s11906_s6 + $0x21c] ss:$24 sps:$4 sm:$0xff]   ;;  %v14880_v29 = vld [vmem:[%s11906_s6 + $0x518] ss:$24 sps:$4 sm:$0xff]  }
 0xa2a   : > { %v6411_v36 = vadd.f32 %v6409_v35, %v6123_v46  ;;  %v14884_v46 = vld [vmem:[%s11906_s6 + $0x24c] ss:$24 sps:$4 sm:$0xff]  }
 0xa2b   : > { %10475 = vtanh.f32 %v6410_v58  ;;  %v14888_v35 = vld [vmem:[%s11906_s6 + $0x54c] ss:$24 sps:$4 sm:$0xff]   ;;  %v14896_v58 = vld [vmem:[%s11906_s6 + $0x548] ss:$24 sps:$4 sm:$0xff]  }
 0xa2c   : > { %10477 = vtanh.f32 %v6411_v36  ;;  %v14904_v36 = vld [vmem:[%s11906_s6 + $0x57c] ss:$24 sps:$4 sm:$0xff]  }
 0xa2d   : > { %10479 = vrcp.f32 %v6400_v9  ;;  %v14892_v9 = vld [vmem:[%s11906_s6 + $0x248] ss:$24 sps:$4 sm:$0xff]  }
 0xa2e   : > { %10481 = vrcp.f32 %v6401_v57  ;;  %v14900_v57 = vld [vmem:[%s11906_s6 + $0x27c] ss:$24 sps:$4 sm:$0xff]  }
 0xa35   : > { %v10476_v7 = vpop.eup %10475 }
 0xa36   : > { %v10478_v1 = vpop.eup %10477  ;;  %v6414_v23 = vsub.f32 %v14317_v18, %v10476_v7 }
 0xa37   : > { %v10480_v47 = vpop.eup %10479  ;;  %v6415_v55 = vsub.f32 %v14319_v15, %v10478_v1  ;;  %v14780_v15 = vld [vmem:[%s11906_s6 + $0xf8] ss:$24 sps:$4 sm:$0xff]  }
 0xa38   : > { %v10482_v50 = vpop.eup %10481  ;;  %v6416_v28 = vmul.f32 %v10480_v47, %v6414_v23  ;;  %v14916_v23 = vld [vmem:[%s11906_s6 + $0x2ac] ss:$24 sps:$4 sm:$0xff]  }
 0xa39   : > { %v6417_v22 = vmul.f32 %v10482_v50, %v6415_v55  ;;  %17717 = vst [vmem:[#allocation46_spill] sm:$0xff] %v14916_v23  ;;  %v14920_v47 = vld [vmem:[%s11906_s6 + $0x5ac] ss:$24 sps:$4 sm:$0xff]   ;;  %v14924_v55 = vld [vmem:[%s11906_s6 + $0x2a8] ss:$24 sps:$4 sm:$0xff]  }
 0xa3a   : > { %v14727_v40 = vadd.f32 %v10476_v7, %v6416_v28  ;;  %v14908_v7 = vld [vmem:[%s11906_s6 + $0x278] ss:$24 sps:$4 sm:$0xff]   ;;  %17718 = vst [vmem:[#allocation47_spill] sm:$0xff] %v14920_v47  ;;  %17719 = vst [vmem:[#allocation48_spill] sm:$0xff] %v14924_v55  ;;  %v14928_v50 = vld [vmem:[%s11906_s6 + $0x5a8] ss:$24 sps:$4 sm:$0xff]  }
 0xa3b   : > { %v14729_v59 = vadd.f32 %v10478_v1, %v6417_v22  ;;  %v14912_v1 = vld [vmem:[%s11906_s6 + $0x578] ss:$24 sps:$4 sm:$0xff]   ;;  %17720 = vst [vmem:[#allocation49_spill] sm:$0xff] %v14928_v50  ;;  %v14932_v28 = vld [vmem:[%s11906_s6 + $0x2dc] ss:$24 sps:$4 sm:$0xff]  }
 0xa3c   : > { %v14733_v27 = vpack.c.bf16 %v14727_v40, %v14727_v40  ;;  %17721 = vst [vmem:[#allocation50_spill] sm:$0xff] %v14932_v28  ;;  %v14936_v22 = vld [vmem:[%s11906_s6 + $0x5dc] ss:$24 sps:$4 sm:$0xff]  }
 0xa3d   : > { %v14737_v62 = vpack.c.bf16 %v14729_v59, %v14729_v59  ;;  %17722 = vst [vmem:[#allocation51_spill] sm:$0xff] %v14936_v22 }
 0xa3e   : > { %v6424_v18 = vrot.slane %v14733_v27, 5 }
 0xa3f   : > { %v6425_v30 = vrot.slane %v14737_v62, 5  ;;  %9105 = vmatprep.mubr.msk.bf16.mxu0 %vm13227_vm6, %v14737_v62  ;;  %9111 = vmatprep.mubr.msk.bf16.mxu1 %vm13237_vm7, %v14737_v62 }
 0xa40   : > { %6428 = vst [vmem:[#allocation2] ss:$20 sps:$4 sm:$0x18] %v6424_v18   ;;  %9108 = vmatmul.mubr.msk.bf16.vlgmr.msra.gmra.mrb[48].mxu0 %vm13227_vm6, %v14733_v27  ;;  %9114 = vmatmul.mubr.msk.bf16.vlgmr.msra.gmra.mrb[48].mxu1 %vm13237_vm7, %v14733_v27  ;;  %v14940_v18 = vld [vmem:[%s11906_s6 + $0x2d8] ss:$24 sps:$4 sm:$0xff]  }
 0xa41   : > { %6429 = vst [vmem:[#allocation2 + $0x8] ss:$20 sps:$4 sm:$0x18] %v6425_v30   ;;  %6559 = vmatpush1.bf16.msra.mxu0 %v14346_v25  ;;  %6600 = vmatpush1.bf16.msra.mxu1 %v14350_v44  ;;  %v14784_v25 = vld [vmem:[%s11906_s6 + $0x3f8] ss:$24 sps:$4 sm:$0xff]   ;;  %17723 = vst [vmem:[#allocation52_spill] sm:$0xff] %v14940_v18 }
 0xa42   : > { %9117 = vmatprep.mubr.msk.bf16.mxu0 %vm13227_vm6, %v14737_v62  ;;  %9123 = vmatprep.mubr.msk.bf16.mxu1 %vm13237_vm7, %v14737_v62  ;;  %v14788_v44 = vld [vmem:[%s11906_s6 + $0x12c] ss:$24 sps:$4 sm:$0xff]   ;;  %v14944_v30 = vld [vmem:[%s11906_s6 + $0x5d8] ss:$24 sps:$4 sm:$0xff]  }
 0xa43   : > { %6560 = vmatprep.subr.bf16.mxu0 %v14360_v17  ;;  %6601 = vmatprep.subr.bf16.mxu1 %v14364_v21  ;;  %v14792_v17 = vld [vmem:[%s11906_s6 + $0x42c] ss:$24 sps:$4 sm:$0xff]   ;;  %v14796_v21 = vld [vmem:[%s11906_s6 + $0x128] ss:$24 sps:$4 sm:$0xff]   ;;  %17724 = vst [vmem:[#allocation53_spill] sm:$0xff] %v14944_v30 }
 0xa45   : > { %6561 = vmatpush1.bf16.msra.mxu0 %v14368_v11  ;;  %6602 = vmatpush1.bf16.msra.mxu1 %v14372_v38  ;;  %v14800_v11 = vld [vmem:[%s11906_s6 + $0x428] ss:$24 sps:$4 sm:$0xff]   ;;  %v14804_v38 = vld [vmem:[%s11906_s6 + $0x15c] ss:$24 sps:$4 sm:$0xff]  }
 0xa46   : > { %6562 = vmatprep.subr.bf16.mxu0 %v14376_v10  ;;  %6603 = vmatprep.subr.bf16.mxu1 %v14380_v14  ;;  %v14808_v10 = vld [vmem:[%s11906_s6 + $0x45c] ss:$24 sps:$4 sm:$0xff]   ;;  %v14812_v14 = vld [vmem:[%s11906_s6 + $0x158] ss:$24 sps:$4 sm:$0xff]  }
 0xa49   : > { %6563 = vmatpush1.bf16.msra.mxu0 %v14384_v41  ;;  %6604 = vmatpush1.bf16.msra.mxu1 %v14388_v6  ;;  %v14816_v41 = vld [vmem:[%s11906_s6 + $0x458] ss:$24 sps:$4 sm:$0xff]   ;;  %v14820_v6 = vld [vmem:[%s11906_s6 + $0x18c] ss:$24 sps:$4 sm:$0xff]  }
 0xa4a   : > { %6564 = vmatprep.subr.bf16.mxu0 %v14392_v49  ;;  %6605 = vmatprep.subr.bf16.mxu1 %v14396_v12  ;;  %v14824_v49 = vld [vmem:[%s11906_s6 + $0x48c] ss:$24 sps:$4 sm:$0xff]   ;;  %v14828_v12 = vld [vmem:[%s11906_s6 + $0x188] ss:$24 sps:$4 sm:$0xff]  }
 0xa4d   : > { %6565 = vmatpush1.bf16.msra.mxu0 %v14400_v63  ;;  %6606 = vmatpush1.bf16.msra.mxu1 %v14404_v3  ;;  %v14832_v63 = vld [vmem:[%s11906_s6 + $0x488] ss:$24 sps:$4 sm:$0xff]   ;;  %v14836_v3 = vld [vmem:[%s11906_s6 + $0x1bc] ss:$24 sps:$4 sm:$0xff]  }
 0xa4e   : > { %6566 = vmatprep.subr.bf16.mxu0 %v14408_v34  ;;  %6607 = vmatprep.subr.bf16.mxu1 %v14412_v32  ;;  %v14840_v34 = vld [vmem:[%s11906_s6 + $0x4bc] ss:$24 sps:$4 sm:$0xff]   ;;  %v14844_v32 = vld [vmem:[%s11906_s6 + $0x1b8] ss:$24 sps:$4 sm:$0xff]  }
 0xa51   : > { %6567 = vmatpush1.bf16.msra.mxu0 %v14416_v13  ;;  %6608 = vmatpush1.bf16.msra.mxu1 %v14420_v16  ;;  %v14848_v13 = vld [vmem:[%s11906_s6 + $0x4b8] ss:$24 sps:$4 sm:$0xff]   ;;  %v14852_v16 = vld [vmem:[%s11906_s6 + $0x1ec] ss:$24 sps:$4 sm:$0xff]  }
 0xa52   : > { %6568 = vmatprep.subr.bf16.mxu0 %v14424_v33  ;;  %6609 = vmatprep.subr.bf16.mxu1 %v14428_v60  ;;  %v14856_v33 = vld [vmem:[%s11906_s6 + $0x4ec] ss:$24 sps:$4 sm:$0xff]   ;;  %v14860_v60 = vld [vmem:[%s11906_s6 + $0x1e8] ss:$24 sps:$4 sm:$0xff]  }
 0xa55   : > { %6569 = vmatpush1.bf16.msra.mxu0 %v14780_v15  ;;  %6610 = vmatpush1.bf16.msra.mxu1 %v14784_v25 }
 0xa56   : > { %6570 = vmatprep.subr.bf16.mxu0 %v14788_v44  ;;  %6611 = vmatprep.subr.bf16.mxu1 %v14792_v17 }
 0xa59   : > { %6571 = vmatpush1.bf16.msra.mxu0 %v14796_v21  ;;  %6612 = vmatpush1.bf16.msra.mxu1 %v14800_v11 }
 0xa5a   : > { %6572 = vmatprep.subr.bf16.mxu0 %v14804_v38  ;;  %6613 = vmatprep.subr.bf16.mxu1 %v14808_v10 }
 0xa5d   : > { %6573 = vmatpush1.bf16.msra.mxu0 %v14812_v14  ;;  %6614 = vmatpush1.bf16.msra.mxu1 %v14816_v41 }
 0xa5e   : > { %6574 = vmatprep.subr.bf16.mxu0 %v14820_v6  ;;  %6615 = vmatprep.subr.bf16.mxu1 %v14824_v49 }
 0xa61   : > { %6575 = vmatpush1.bf16.msra.mxu0 %v14828_v12  ;;  %6616 = vmatpush1.bf16.msra.mxu1 %v14832_v63 }
 0xa62   : > { %6576 = vmatprep.subr.bf16.mxu0 %v14836_v3  ;;  %6617 = vmatprep.subr.bf16.mxu1 %v14840_v34 }
 0xa65   : > { %6577 = vmatpush1.bf16.msra.mxu0 %v14844_v32  ;;  %6618 = vmatpush1.bf16.msra.mxu1 %v14848_v13 }
 0xa66   : > { %6578 = vmatprep.subr.bf16.mxu0 %v14852_v16  ;;  %6619 = vmatprep.subr.bf16.mxu1 %v14856_v33 }
 0xa69   : > { %6579 = vmatpush1.bf16.msra.mxu0 %v14860_v60  ;;  %6620 = vmatpush1.bf16.msra.mxu1 %v14864_v31 }
 0xa6a   : > { %6580 = vmatprep.subr.bf16.mxu0 %v14868_v43  ;;  %6621 = vmatprep.subr.bf16.mxu1 %v14872_v0 }
 0xa6d   : > { %6581 = vmatpush1.bf16.msra.mxu0 %v14876_v42  ;;  %6622 = vmatpush1.bf16.msra.mxu1 %v14880_v29 }
 0xa6e   : > { %6582 = vmatprep.subr.bf16.mxu0 %v14884_v46  ;;  %6623 = vmatprep.subr.bf16.mxu1 %v14888_v35 }
 0xa71   : > { %6583 = vmatpush1.bf16.msra.mxu0 %v14892_v9  ;;  %6624 = vmatpush1.bf16.msra.mxu1 %v14896_v58 }
 0xa72   : > { %6584 = vmatprep.subr.bf16.mxu0 %v14900_v57  ;;  %6625 = vmatprep.subr.bf16.mxu1 %v14904_v36 }
 0xa75   : > { %6585 = vmatpush1.bf16.msra.mxu0 %v14908_v7  ;;  %6626 = vmatpush1.bf16.msra.mxu1 %v14912_v1 }
 0xa76   : > { %6586 = vmatprep.subr.bf16.mxu0 %v14916_v23  ;;  %6627 = vmatprep.subr.bf16.mxu1 %v14920_v47 }
 0xa79   : > { %6587 = vmatpush1.bf16.msra.mxu0 %v14924_v55  ;;  %6628 = vmatpush1.bf16.msra.mxu1 %v14928_v50  ;;  %v14948_v50 = vld [vmem:[%s11906_s6 + $0x14] ss:$24 sps:$4 sm:$0xff]   ;;  %v6439_v55 = vld [vmem:[#allocation3 + $0x38] sm:$0xc0] }
 0xa7a   : > { %6588 = vmatprep.subr.bf16.mxu0 %v14932_v28  ;;  %6629 = vmatprep.subr.bf16.mxu1 %v14936_v22  ;;  %17725 = vst [vmem:[#allocation54_spill] sm:$0xff] %v14948_v50  ;;  %v14952_v28 = vld [vmem:[%s11906_s6 + $0x314] ss:$24 sps:$4 sm:$0xff]   ;;  %v6451_v47 = vrot.slane %v6439_v55, 4 }
 0xa7b   : > { %17726 = vst [vmem:[#allocation55_spill] sm:$0xff] %v14952_v28  ;;  %v6438_v22 = vld [vmem:[#allocation3 + $0x30] sm:$0xc0] }
 0xa7d   : > { %6589 = vmatpush1.bf16.msra.mxu0 %v14940_v18  ;;  %6630 = vmatpush1.bf16.msra.mxu1 %v14944_v30  ;;  %v14962_v30 = vld [vmem:[%s11906_s6 + $0x10] ss:$24 sps:$4 sm:$0xff]   ;;  %v14984_v18 = vld [vmem:[%s11906_s6 + $0x40] ss:$24 sps:$4 sm:$0xff]  }
 0xa7e   : > { %6640 = vmatprep.subr.bf16.mxu0 %v14948_v50  ;;  %6681 = vmatprep.subr.bf16.mxu1 %v14952_v28  ;;  %17727 = vst [vmem:[#allocation56_spill] sm:$0xff] %v14962_v30  ;;  %v14969_v28 = vld [vmem:[%s11906_s6 + $0x310] ss:$24 sps:$4 sm:$0xff]   ;;  %v14976_v50 = vld [vmem:[%s11906_s6 + $0x44] ss:$24 sps:$4 sm:$0xff]   ;;  %17731 = vst [vmem:[#allocation60_spill] sm:$0xff] %v14984_v18 }
 0xa7f   : > { %17728 = vst [vmem:[#allocation57_spill] sm:$0xff] %v14969_v28  ;;  %17729 = vst [vmem:[#allocation58_spill] sm:$0xff] %v14976_v50 }
 0xa80   : > { %9120 = vmatmul.mubr.msk.bf16.vlgmr.msra.gmra.mrb[52].mxu0 %vm13227_vm6, %v14733_v27  ;;  %9126 = vmatmul.mubr.msk.bf16.vlgmr.msra.gmra.mrb[52].mxu1 %vm13237_vm7, %v14733_v27 }
 0xa81   : > { %6641 = vmatpush1.bf16.msra.mxu0 %v14962_v30  ;;  %9129 = vmatprep.mubr.msk.bf16.mxu0 %vm13227_vm6, %v14737_v62  ;;  %v14980_v30 = vld [vmem:[%s11906_s6 + $0x344] ss:$24 sps:$4 sm:$0xff]  }
 0xa82   : > { %6682 = vmatpush1.bf16.msra.mxu1 %v14969_v28  ;;  %9135 = vmatprep.mubr.msk.bf16.mxu1 %vm13237_vm7, %v14737_v62  ;;  %17730 = vst [vmem:[#allocation59_spill] sm:$0xff] %v14980_v30  ;;  %v14988_v28 = vld [vmem:[%s11906_s6 + $0x340] ss:$24 sps:$4 sm:$0xff]   ;;  %v14992_v62 = vld [vmem:[%s11906_s6 + $0x74] ss:$24 sps:$4 sm:$0xff]  }
 0xa83   : > { %6642 = vmatprep.subr.bf16.mxu0 %v14976_v50  ;;  %6683 = vmatprep.subr.bf16.mxu1 %v14980_v30  ;;  %17732 = vst [vmem:[#allocation61_spill] sm:$0xff] %v14988_v28  ;;  %17733 = vst [vmem:[#allocation62_spill] sm:$0xff] %v14992_v62  ;;  %v14996_v50 = vld [vmem:[%s11906_s6 + $0x374] ss:$24 sps:$4 sm:$0xff]   ;;  %v15000_v30 = vld [vmem:[%s11906_s6 + $0x70] ss:$24 sps:$4 sm:$0xff]  }
 0xa84   : > { %17734 = vst [vmem:[#allocation63_spill] sm:$0xff] %v14996_v50  ;;  %17735 = vst [vmem:[#allocation64_spill] sm:$0xff] %v15000_v30 }
 0xa85   : > { %6643 = vmatpush1.bf16.msra.mxu0 %v14984_v18  ;;  %v15004_v18 = vld [vmem:[%s11906_s6 + $0x370] ss:$24 sps:$4 sm:$0xff]  }
 0xa86   : > { %6684 = vmatpush1.bf16.msra.mxu1 %v14988_v28  ;;  %6644 = vmatprep.subr.bf16.mxu0 %v14992_v62  ;;  %17736 = vst [vmem:[#allocation65_spill] sm:$0xff] %v15004_v18  ;;  %v15008_v28 = vld [vmem:[%s11906_s6 + $0xa4] ss:$24 sps:$4 sm:$0xff]  }
 0xa87   : > { %6685 = vmatprep.subr.bf16.mxu1 %v14996_v50  ;;  %17737 = vst [vmem:[#allocation66_spill] sm:$0xff] %v15008_v28  ;;  %v15012_v62 = vld [vmem:[%s11906_s6 + $0x3a4] ss:$24 sps:$4 sm:$0xff]   ;;  %v15016_v50 = vld [vmem:[%s11906_s6 + $0xa0] ss:$24 sps:$4 sm:$0xff]  }
 0xa88   : > { %17738 = vst [vmem:[#allocation67_spill] sm:$0xff] %v15012_v62  ;;  %17739 = vst [vmem:[#allocation68_spill] sm:$0xff] %v15016_v50 }
 0xa89   : > { %6645 = vmatpush1.bf16.msra.mxu0 %v15000_v30  ;;  %v15020_v30 = vld [vmem:[%s11906_s6 + $0x3a0] ss:$24 sps:$4 sm:$0xff]  }
 0xa8a   : > { %6686 = vmatpush1.bf16.msra.mxu1 %v15004_v18  ;;  %6646 = vmatprep.subr.bf16.mxu0 %v15008_v28  ;;  %17740 = vst [vmem:[#allocation69_spill] sm:$0xff] %v15020_v30  ;;  %v15024_v18 = vld [vmem:[%s11906_s6 + $0xd4] ss:$24 sps:$4 sm:$0xff]  }
 0xa8b   : > { %6687 = vmatprep.subr.bf16.mxu1 %v15012_v62  ;;  %17741 = vst [vmem:[#allocation70_spill] sm:$0xff] %v15024_v18  ;;  %v15028_v28 = vld [vmem:[%s11906_s6 + $0x3d4] ss:$24 sps:$4 sm:$0xff]   ;;  %v15032_v62 = vld [vmem:[%s11906_s6 + $0xd0] ss:$24 sps:$4 sm:$0xff]  }
 0xa8c   : > { %17742 = vst [vmem:[#allocation71_spill] sm:$0xff] %v15028_v28  ;;  %17743 = vst [vmem:[#allocation72_spill] sm:$0xff] %v15032_v62 }
 0xa8d   : > { %6647 = vmatpush1.bf16.msra.mxu0 %v15016_v50  ;;  %v15036_v50 = vld [vmem:[%s11906_s6 + $0x3d0] ss:$24 sps:$4 sm:$0xff]  }
 0xa8e   : > { %6688 = vmatpush1.bf16.msra.mxu1 %v15020_v30  ;;  %6648 = vmatprep.subr.bf16.mxu0 %v15024_v18  ;;  %17744 = vst [vmem:[#allocation73_spill] sm:$0xff] %v15036_v50  ;;  %v15040_v30 = vld [vmem:[%s11906_s6 + $0x104] ss:$24 sps:$4 sm:$0xff]  }
 0xa8f   : > { %6689 = vmatprep.subr.bf16.mxu1 %v15028_v28  ;;  %17745 = vst [vmem:[#allocation74_spill] sm:$0xff] %v15040_v30  ;;  %v15044_v18 = vld [vmem:[%s11906_s6 + $0x404] ss:$24 sps:$4 sm:$0xff]   ;;  %v15048_v28 = vld [vmem:[%s11906_s6 + $0x100] ss:$24 sps:$4 sm:$0xff]  }
 0xa90   : > { %17746 = vst [vmem:[#allocation75_spill] sm:$0xff] %v15044_v18  ;;  %17747 = vst [vmem:[#allocation76_spill] sm:$0xff] %v15048_v28 }
 0xa91   : > { %6649 = vmatpush1.bf16.msra.mxu0 %v15032_v62  ;;  %v15052_v62 = vld [vmem:[%s11906_s6 + $0x400] ss:$24 sps:$4 sm:$0xff]  }
 0xa92   : > { %6690 = vmatpush1.bf16.msra.mxu1 %v15036_v50  ;;  %6650 = vmatprep.subr.bf16.mxu0 %v15040_v30  ;;  %17748 = vst [vmem:[#allocation77_spill] sm:$0xff] %v15052_v62  ;;  %v15056_v50 = vld [vmem:[%s11906_s6 + $0x134] ss:$24 sps:$4 sm:$0xff]  }
 0xa93   : > { %6691 = vmatprep.subr.bf16.mxu1 %v15044_v18  ;;  %17749 = vst [vmem:[#allocation78_spill] sm:$0xff] %v15056_v50  ;;  %v15060_v30 = vld [vmem:[%s11906_s6 + $0x434] ss:$24 sps:$4 sm:$0xff]   ;;  %v15064_v18 = vld [vmem:[%s11906_s6 + $0x130] ss:$24 sps:$4 sm:$0xff]  }
 0xa94   : > { %17750 = vst [vmem:[#allocation79_spill] sm:$0xff] %v15060_v30  ;;  %17751 = vst [vmem:[#allocation80_spill] sm:$0xff] %v15064_v18 }
 0xa95   : > { %6651 = vmatpush1.bf16.msra.mxu0 %v15048_v28  ;;  %v15068_v28 = vld [vmem:[%s11906_s6 + $0x430] ss:$24 sps:$4 sm:$0xff]  }
 0xa96   : > { %6692 = vmatpush1.bf16.msra.mxu1 %v15052_v62  ;;  %6652 = vmatprep.subr.bf16.mxu0 %v15056_v50  ;;  %17752 = vst [vmem:[#allocation81_spill] sm:$0xff] %v15068_v28  ;;  %v15072_v62 = vld [vmem:[%s11906_s6 + $0x164] ss:$24 sps:$4 sm:$0xff]  }
 0xa97   : > { %6693 = vmatprep.subr.bf16.mxu1 %v15060_v30  ;;  %17753 = vst [vmem:[#allocation82_spill] sm:$0xff] %v15072_v62  ;;  %v15076_v50 = vld [vmem:[%s11906_s6 + $0x464] ss:$24 sps:$4 sm:$0xff]   ;;  %v15080_v30 = vld [vmem:[%s11906_s6 + $0x160] ss:$24 sps:$4 sm:$0xff]  }
 0xa98   : > { %17754 = vst [vmem:[#allocation83_spill] sm:$0xff] %v15076_v50  ;;  %17755 = vst [vmem:[#allocation84_spill] sm:$0xff] %v15080_v30 }
 0xa99   : > { %6653 = vmatpush1.bf16.msra.mxu0 %v15064_v18  ;;  %v15084_v18 = vld [vmem:[%s11906_s6 + $0x460] ss:$24 sps:$4 sm:$0xff]  }
 0xa9a   : > { %6694 = vmatpush1.bf16.msra.mxu1 %v15068_v28  ;;  %6654 = vmatprep.subr.bf16.mxu0 %v15072_v62  ;;  %17756 = vst [vmem:[#allocation85_spill] sm:$0xff] %v15084_v18  ;;  %v15088_v28 = vld [vmem:[%s11906_s6 + $0x194] ss:$24 sps:$4 sm:$0xff]  }
 0xa9b   : > { %6695 = vmatprep.subr.bf16.mxu1 %v15076_v50  ;;  %17757 = vst [vmem:[#allocation86_spill] sm:$0xff] %v15088_v28  ;;  %v15092_v62 = vld [vmem:[%s11906_s6 + $0x494] ss:$24 sps:$4 sm:$0xff]   ;;  %v15096_v50 = vld [vmem:[%s11906_s6 + $0x190] ss:$24 sps:$4 sm:$0xff]  }
 0xa9c   : > { %17758 = vst [vmem:[#allocation87_spill] sm:$0xff] %v15092_v62  ;;  %17759 = vst [vmem:[#allocation88_spill] sm:$0xff] %v15096_v50 }
 0xa9d   : > { %6655 = vmatpush1.bf16.msra.mxu0 %v15080_v30  ;;  %v15100_v30 = vld [vmem:[%s11906_s6 + $0x490] ss:$24 sps:$4 sm:$0xff]  }
 0xa9e   : > { %6696 = vmatpush1.bf16.msra.mxu1 %v15084_v18  ;;  %6656 = vmatprep.subr.bf16.mxu0 %v15088_v28  ;;  %17760 = vst [vmem:[#allocation89_spill] sm:$0xff] %v15100_v30  ;;  %v15104_v18 = vld [vmem:[%s11906_s6 + $0x1c4] ss:$24 sps:$4 sm:$0xff]  }
 0xa9f   : > { %6697 = vmatprep.subr.bf16.mxu1 %v15092_v62  ;;  %17761 = vst [vmem:[#allocation90_spill] sm:$0xff] %v15104_v18  ;;  %v15108_v28 = vld [vmem:[%s11906_s6 + $0x4c4] ss:$24 sps:$4 sm:$0xff]   ;;  %v15112_v62 = vld [vmem:[%s11906_s6 + $0x1c0] ss:$24 sps:$4 sm:$0xff]  }
 0xaa0   : > { %17762 = vst [vmem:[#allocation91_spill] sm:$0xff] %v15108_v28  ;;  %17763 = vst [vmem:[#allocation92_spill] sm:$0xff] %v15112_v62 }
 0xaa1   : > { %6657 = vmatpush1.bf16.msra.mxu0 %v15096_v50  ;;  %v15116_v50 = vld [vmem:[%s11906_s6 + $0x4c0] ss:$24 sps:$4 sm:$0xff]  }
 0xaa2   : > { %6698 = vmatpush1.bf16.msra.mxu1 %v15100_v30  ;;  %6658 = vmatprep.subr.bf16.mxu0 %v15104_v18  ;;  %17764 = vst [vmem:[#allocation93_spill] sm:$0xff] %v15116_v50  ;;  %v15120_v30 = vld [vmem:[%s11906_s6 + $0x1f4] ss:$24 sps:$4 sm:$0xff]  }
 0xaa3   : > { %6699 = vmatprep.subr.bf16.mxu1 %v15108_v28  ;;  %17765 = vst [vmem:[#allocation94_spill] sm:$0xff] %v15120_v30  ;;  %v15124_v18 = vld [vmem:[%s11906_s6 + $0x4f4] ss:$24 sps:$4 sm:$0xff]   ;;  %v15128_v28 = vld [vmem:[%s11906_s6 + $0x1f0] ss:$24 sps:$4 sm:$0xff]  }
 0xaa4   : > { %17766 = vst [vmem:[#allocation95_spill] sm:$0xff] %v15124_v18  ;;  %17767 = vst [vmem:[#allocation96_spill] sm:$0xff] %v15128_v28 }
 0xaa5   : > { %6659 = vmatpush1.bf16.msra.mxu0 %v15112_v62  ;;  %v15132_v62 = vld [vmem:[%s11906_s6 + $0x4f0] ss:$24 sps:$4 sm:$0xff]  }
 0xaa6   : > { %6700 = vmatpush1.bf16.msra.mxu1 %v15116_v50  ;;  %6660 = vmatprep.subr.bf16.mxu0 %v15120_v30  ;;  %17768 = vst [vmem:[#allocation97_spill] sm:$0xff] %v15132_v62  ;;  %v15136_v50 = vld [vmem:[%s11906_s6 + $0x224] ss:$24 sps:$4 sm:$0xff]  }
 0xaa7   : > { %6701 = vmatprep.subr.bf16.mxu1 %v15124_v18  ;;  %17769 = vst [vmem:[#allocation98_spill] sm:$0xff] %v15136_v50  ;;  %v15140_v30 = vld [vmem:[%s11906_s6 + $0x524] ss:$24 sps:$4 sm:$0xff]   ;;  %v15144_v18 = vld [vmem:[%s11906_s6 + $0x220] ss:$24 sps:$4 sm:$0xff]  }
 0xaa8   : > { %17770 = vst [vmem:[#allocation99_spill] sm:$0xff] %v15140_v30  ;;  %17771 = vst [vmem:[#allocation100_spill] sm:$0xff] %v15144_v18 }
 0xaa9   : > { %6661 = vmatpush1.bf16.msra.mxu0 %v15128_v28  ;;  %v15148_v28 = vld [vmem:[%s11906_s6 + $0x520] ss:$24 sps:$4 sm:$0xff]  }
 0xaaa   : > { %6702 = vmatpush1.bf16.msra.mxu1 %v15132_v62  ;;  %6662 = vmatprep.subr.bf16.mxu0 %v15136_v50  ;;  %17772 = vst [vmem:[#allocation101_spill] sm:$0xff] %v15148_v28  ;;  %v15152_v62 = vld [vmem:[%s11906_s6 + $0x254] ss:$24 sps:$4 sm:$0xff]  }
 0xaab   : > { %6703 = vmatprep.subr.bf16.mxu1 %v15140_v30  ;;  %17773 = vst [vmem:[#allocation102_spill] sm:$0xff] %v15152_v62  ;;  %v15156_v50 = vld [vmem:[%s11906_s6 + $0x554] ss:$24 sps:$4 sm:$0xff]   ;;  %v15160_v30 = vld [vmem:[%s11906_s6 + $0x250] ss:$24 sps:$4 sm:$0xff]  }
 0xaac   : > { %17774 = vst [vmem:[#allocation103_spill] sm:$0xff] %v15156_v50  ;;  %17775 = vst [vmem:[#allocation104_spill] sm:$0xff] %v15160_v30 }
 0xaad   : > { %6663 = vmatpush1.bf16.msra.mxu0 %v15144_v18  ;;  %v15164_v18 = vld [vmem:[%s11906_s6 + $0x550] ss:$24 sps:$4 sm:$0xff]  }
 0xaae   : > { %6704 = vmatpush1.bf16.msra.mxu1 %v15148_v28  ;;  %6664 = vmatprep.subr.bf16.mxu0 %v15152_v62  ;;  %17776 = vst [vmem:[#allocation105_spill] sm:$0xff] %v15164_v18  ;;  %v15168_v28 = vld [vmem:[%s11906_s6 + $0x284] ss:$24 sps:$4 sm:$0xff]  }
 0xaaf   : > { %6705 = vmatprep.subr.bf16.mxu1 %v15156_v50  ;;  %17777 = vst [vmem:[#allocation106_spill] sm:$0xff] %v15168_v28  ;;  %v15172_v62 = vld [vmem:[%s11906_s6 + $0x584] ss:$24 sps:$4 sm:$0xff]   ;;  %v15176_v50 = vld [vmem:[%s11906_s6 + $0x280] ss:$24 sps:$4 sm:$0xff]  }
 0xab0   : > { %17778 = vst [vmem:[#allocation107_spill] sm:$0xff] %v15172_v62  ;;  %17779 = vst [vmem:[#allocation108_spill] sm:$0xff] %v15176_v50 }
 0xab1   : > { %6665 = vmatpush1.bf16.msra.mxu0 %v15160_v30  ;;  %v15180_v30 = vld [vmem:[%s11906_s6 + $0x580] ss:$24 sps:$4 sm:$0xff]  }
 0xab2   : > { %6706 = vmatpush1.bf16.msra.mxu1 %v15164_v18  ;;  %6666 = vmatprep.subr.bf16.mxu0 %v15168_v28  ;;  %17780 = vst [vmem:[#allocation109_spill] sm:$0xff] %v15180_v30  ;;  %v15184_v18 = vld [vmem:[%s11906_s6 + $0x2b4] ss:$24 sps:$4 sm:$0xff]  }
 0xab3   : > { %6707 = vmatprep.subr.bf16.mxu1 %v15172_v62  ;;  %17781 = vst [vmem:[#allocation110_spill] sm:$0xff] %v15184_v18  ;;  %v15188_v28 = vld [vmem:[%s11906_s6 + $0x5b4] ss:$24 sps:$4 sm:$0xff]   ;;  %v15192_v62 = vld [vmem:[%s11906_s6 + $0x2b0] ss:$24 sps:$4 sm:$0xff]  }
 0xab4   : > { %17782 = vst [vmem:[#allocation111_spill] sm:$0xff] %v15188_v28  ;;  %17783 = vst [vmem:[#allocation112_spill] sm:$0xff] %v15192_v62 }
 0xab5   : > { %6667 = vmatpush1.bf16.msra.mxu0 %v15176_v50  ;;  %v15196_v50 = vld [vmem:[%s11906_s6 + $0x5b0] ss:$24 sps:$4 sm:$0xff]  }
 0xab6   : > { %6708 = vmatpush1.bf16.msra.mxu1 %v15180_v30  ;;  %6668 = vmatprep.subr.bf16.mxu0 %v15184_v18  ;;  %17784 = vst [vmem:[#allocation113_spill] sm:$0xff] %v15196_v50  ;;  %v15200_v30 = vld [vmem:[%s11906_s6 + $0x2e4] ss:$24 sps:$4 sm:$0xff]  }
 0xab7   : > { %6709 = vmatprep.subr.bf16.mxu1 %v15188_v28  ;;  %17785 = vst [vmem:[#allocation114_spill] sm:$0xff] %v15200_v30  ;;  %v15204_v18 = vld [vmem:[%s11906_s6 + $0x5e4] ss:$24 sps:$4 sm:$0xff]   ;;  %v15208_v28 = vld [vmem:[%s11906_s6 + $0x2e0] ss:$24 sps:$4 sm:$0xff]  }
 0xab8   : > { %17786 = vst [vmem:[#allocation115_spill] sm:$0xff] %v15204_v18  ;;  %17787 = vst [vmem:[#allocation116_spill] sm:$0xff] %v15208_v28 }
 0xab9   : > { %6669 = vmatpush1.bf16.msra.mxu0 %v15192_v62  ;;  %v15212_v62 = vld [vmem:[%s11906_s6 + $0x5e0] ss:$24 sps:$4 sm:$0xff]  }
 0xaba   : > { %6710 = vmatpush1.bf16.msra.mxu1 %v15196_v50  ;;  %6670 = vmatprep.subr.bf16.mxu0 %v15200_v30  ;;  %17788 = vst [vmem:[#allocation117_spill] sm:$0xff] %v15212_v62  ;;  %v15216_v50 = vld [vmem:[%s11906_s6 + $0x4] ss:$24 sps:$4 sm:$0xff]  }
 0xabb   : > { %6711 = vmatprep.subr.bf16.mxu1 %v15204_v18  ;;  %17789 = vst [vmem:[#allocation118_spill] sm:$0xff] %v15216_v50  ;;  %v15220_v30 = vld [vmem:[%s11906_s6 + $0x304] ss:$24 sps:$4 sm:$0xff]   ;;  %v15334_v18 = vld [vmem:[%s11906_s6 + $0x154] ss:$24 sps:$4 sm:$0xff]  }
 0xabc   : > { %17790 = vst [vmem:[#allocation119_spill] sm:$0xff] %v15220_v30  ;;  %17817 = vst [vmem:[#allocation146_spill] sm:$0xff] %v15334_v18 }
 0xabd   : > { %6671 = vmatpush1.bf16.msra.mxu0 %v15208_v28  ;;  %v15242_v28 = vld [vmem:[%s11906_s6 + $0x334] ss:$24 sps:$4 sm:$0xff]  }
 0xabe   : > { %6712 = vmatpush1.bf16.msra.mxu1 %v15212_v62  ;;  %6842 = vmatprep.subr.bf16.mxu0 %v15216_v50  ;;  %v15230_v62 = vld [vmem:[%s11906_s6] ss:$24 sps:$4 sm:$0xff]   ;;  %17794 = vst [vmem:[#allocation123_spill] sm:$0xff] %v15242_v28 }
 0xabf   : > { %6883 = vmatprep.subr.bf16.mxu1 %v15220_v30  ;;  %17791 = vst [vmem:[#allocation120_spill] sm:$0xff] %v15230_v62  ;;  %v15234_v50 = vld [vmem:[%s11906_s6 + $0x300] ss:$24 sps:$4 sm:$0xff]   ;;  %v15238_v30 = vld [vmem:[%s11906_s6 + $0x34] ss:$24 sps:$4 sm:$0xff]  }
 0xac0   : > { %9132 = vmatmul.mubr.msk.bf16.vlgmr.msra.gmra.mrb[56].mxu0 %vm13227_vm6, %v14733_v27  ;;  %17792 = vst [vmem:[#allocation121_spill] sm:$0xff] %v15234_v50  ;;  %17793 = vst [vmem:[#allocation122_spill] sm:$0xff] %v15238_v30 }
 0xac1   : > { %9138 = vmatmul.mubr.msk.bf16.vlgmr.msra.gmra.mrb[56].mxu1 %vm13237_vm7, %v14733_v27  ;;  %6843 = vmatpush1.bf16.msra.mxu0 %v15230_v62  ;;  %v15246_v27 = vld [vmem:[%s11906_s6 + $0x30] ss:$24 sps:$4 sm:$0xff]  }
 0xac2   : > { %6884 = vmatpush1.bf16.msra.mxu1 %v15234_v50  ;;  %6844 = vmatprep.subr.bf16.mxu0 %v15238_v30  ;;  %17795 = vst [vmem:[#allocation124_spill] sm:$0xff] %v15246_v27  ;;  %v15250_v62 = vld [vmem:[%s11906_s6 + $0x330] ss:$24 sps:$4 sm:$0xff]   ;;  %v15254_v50 = vld [vmem:[%s11906_s6 + $0x64] ss:$24 sps:$4 sm:$0xff]  }
 0xac3   : > { %6885 = vmatprep.subr.bf16.mxu1 %v15242_v28  ;;  %17796 = vst [vmem:[#allocation125_spill] sm:$0xff] %v15250_v62  ;;  %17797 = vst [vmem:[#allocation126_spill] sm:$0xff] %v15254_v50  ;;  %v15258_v30 = vld [vmem:[%s11906_s6 + $0x364] ss:$24 sps:$4 sm:$0xff]   ;;  %v15262_v28 = vld [vmem:[%s11906_s6 + $0x60] ss:$24 sps:$4 sm:$0xff]  }
 0xac4   : > { %17798 = vst [vmem:[#allocation127_spill] sm:$0xff] %v15258_v30  ;;  %17799 = vst [vmem:[#allocation128_spill] sm:$0xff] %v15262_v28 }
 0xac5   : > { %6845 = vmatpush1.bf16.msra.mxu0 %v15246_v27  ;;  %v15266_v27 = vld [vmem:[%s11906_s6 + $0x360] ss:$24 sps:$4 sm:$0xff]  }
 0xac6   : > { %6886 = vmatpush1.bf16.msra.mxu1 %v15250_v62  ;;  %6846 = vmatprep.subr.bf16.mxu0 %v15254_v50  ;;  %17800 = vst [vmem:[#allocation129_spill] sm:$0xff] %v15266_v27  ;;  %v15270_v62 = vld [vmem:[%s11906_s6 + $0x94] ss:$24 sps:$4 sm:$0xff]  }
 0xac7   : > { %6887 = vmatprep.subr.bf16.mxu1 %v15258_v30  ;;  %17801 = vst [vmem:[#allocation130_spill] sm:$0xff] %v15270_v62  ;;  %v15274_v50 = vld [vmem:[%s11906_s6 + $0x394] ss:$24 sps:$4 sm:$0xff]   ;;  %v15278_v30 = vld [vmem:[%s11906_s6 + $0x90] ss:$24 sps:$4 sm:$0xff]  }
 0xac8   : > { %17802 = vst [vmem:[#allocation131_spill] sm:$0xff] %v15274_v50  ;;  %17803 = vst [vmem:[#allocation132_spill] sm:$0xff] %v15278_v30 }
 0xac9   : > { %6847 = vmatpush1.bf16.msra.mxu0 %v15262_v28  ;;  %v15282_v28 = vld [vmem:[%s11906_s6 + $0x390] ss:$24 sps:$4 sm:$0xff]  }
 0xaca   : > { %6888 = vmatpush1.bf16.msra.mxu1 %v15266_v27  ;;  %6848 = vmatprep.subr.bf16.mxu0 %v15270_v62  ;;  %17804 = vst [vmem:[#allocation133_spill] sm:$0xff] %v15282_v28  ;;  %v15286_v27 = vld [vmem:[%s11906_s6 + $0xc4] ss:$24 sps:$4 sm:$0xff]  }
 0xacb   : > { %6889 = vmatprep.subr.bf16.mxu1 %v15274_v50  ;;  %17805 = vst [vmem:[#allocation134_spill] sm:$0xff] %v15286_v27  ;;  %v15290_v62 = vld [vmem:[%s11906_s6 + $0x3c4] ss:$24 sps:$4 sm:$0xff]   ;;  %v15294_v50 = vld [vmem:[%s11906_s6 + $0xc0] ss:$24 sps:$4 sm:$0xff]  }
 0xacc   : > { %17806 = vst [vmem:[#allocation135_spill] sm:$0xff] %v15290_v62  ;;  %17807 = vst [vmem:[#allocation136_spill] sm:$0xff] %v15294_v50 }
 0xacd   : > { %6849 = vmatpush1.bf16.msra.mxu0 %v15278_v30  ;;  %v15298_v30 = vld [vmem:[%s11906_s6 + $0x3c0] ss:$24 sps:$4 sm:$0xff]  }
 0xace   : > { %6890 = vmatpush1.bf16.msra.mxu1 %v15282_v28  ;;  %6850 = vmatprep.subr.bf16.mxu0 %v15286_v27  ;;  %17808 = vst [vmem:[#allocation137_spill] sm:$0xff] %v15298_v30  ;;  %v15302_v28 = vld [vmem:[%s11906_s6 + $0xf4] ss:$24 sps:$4 sm:$0xff]  }
 0xacf   : > { %6891 = vmatprep.subr.bf16.mxu1 %v15290_v62  ;;  %17809 = vst [vmem:[#allocation138_spill] sm:$0xff] %v15302_v28  ;;  %v15306_v27 = vld [vmem:[%s11906_s6 + $0x3f4] ss:$24 sps:$4 sm:$0xff]   ;;  %v15310_v62 = vld [vmem:[%s11906_s6 + $0xf0] ss:$24 sps:$4 sm:$0xff]  }
 0xad0   : > { %17810 = vst [vmem:[#allocation139_spill] sm:$0xff] %v15306_v27  ;;  %17811 = vst [vmem:[#allocation140_spill] sm:$0xff] %v15310_v62 }
 0xad1   : > { %6851 = vmatpush1.bf16.msra.mxu0 %v15294_v50  ;;  %v15314_v50 = vld [vmem:[%s11906_s6 + $0x3f0] ss:$24 sps:$4 sm:$0xff]  }
 0xad2   : > { %6892 = vmatpush1.bf16.msra.mxu1 %v15298_v30  ;;  %6852 = vmatprep.subr.bf16.mxu0 %v15302_v28  ;;  %17812 = vst [vmem:[#allocation141_spill] sm:$0xff] %v15314_v50  ;;  %v15318_v30 = vld [vmem:[%s11906_s6 + $0x124] ss:$24 sps:$4 sm:$0xff]  }
 0xad3   : > { %6893 = vmatprep.subr.bf16.mxu1 %v15306_v27  ;;  %17813 = vst [vmem:[#allocation142_spill] sm:$0xff] %v15318_v30  ;;  %v15322_v28 = vld [vmem:[%s11906_s6 + $0x424] ss:$24 sps:$4 sm:$0xff]   ;;  %v15326_v27 = vld [vmem:[%s11906_s6 + $0x120] ss:$24 sps:$4 sm:$0xff]  }
 0xad4   : > { %17814 = vst [vmem:[#allocation143_spill] sm:$0xff] %v15322_v28  ;;  %17815 = vst [vmem:[#allocation144_spill] sm:$0xff] %v15326_v27 }
 0xad5   : > { %6853 = vmatpush1.bf16.msra.mxu0 %v15310_v62  ;;  %v15330_v62 = vld [vmem:[%s11906_s6 + $0x420] ss:$24 sps:$4 sm:$0xff]  }
 0xad6   : > { %6894 = vmatpush1.bf16.msra.mxu1 %v15314_v50  ;;  %6854 = vmatprep.subr.bf16.mxu0 %v15318_v30  ;;  %17816 = vst [vmem:[#allocation145_spill] sm:$0xff] %v15330_v62  ;;  %v15338_v50 = vld [vmem:[%s11906_s6 + $0x454] ss:$24 sps:$4 sm:$0xff]   ;;  %v15342_v30 = vld [vmem:[%s11906_s6 + $0x150] ss:$24 sps:$4 sm:$0xff]  }
 0xad7   : > { %6895 = vmatprep.subr.bf16.mxu1 %v15322_v28  ;;  %17818 = vst [vmem:[#allocation147_spill] sm:$0xff] %v15338_v50  ;;  %17819 = vst [vmem:[#allocation148_spill] sm:$0xff] %v15342_v30  ;;  %v15346_v28 = vld [vmem:[%s11906_s6 + $0x450] ss:$24 sps:$4 sm:$0xff]  }
 0xad8   : > { %17820 = vst [vmem:[#allocation149_spill] sm:$0xff] %v15346_v28 }
 0xad9   : > { %6855 = vmatpush1.bf16.msra.mxu0 %v15326_v27  ;;  %v15350_v27 = vld [vmem:[%s11906_s6 + $0x184] ss:$24 sps:$4 sm:$0xff]  }
 0xada   : > { %6896 = vmatpush1.bf16.msra.mxu1 %v15330_v62  ;;  %6856 = vmatprep.subr.bf16.mxu0 %v15334_v18  ;;  %17821 = vst [vmem:[#allocation150_spill] sm:$0xff] %v15350_v27  ;;  %v15354_v62 = vld [vmem:[%s11906_s6 + $0x484] ss:$24 sps:$4 sm:$0xff]  }
 0xadb   : > { %6897 = vmatprep.subr.bf16.mxu1 %v15338_v50  ;;  %17822 = vst [vmem:[#allocation151_spill] sm:$0xff] %v15354_v62 }
 0xadd   : > { %6857 = vmatpush1.bf16.msra.mxu0 %v15342_v30 }
 0xade   : > { %6898 = vmatpush1.bf16.msra.mxu1 %v15346_v28  ;;  %6858 = vmatprep.subr.bf16.mxu0 %v15350_v27 }
 0xadf   : > { %6899 = vmatprep.subr.bf16.mxu1 %v15354_v62 }
 0xae1   : > { %6859 = vmatpush1.bf16.msra.mxu0 %v14590_v19  ;;  %v17823_v19 = vld [vmem:[#allocation28_spill] sm:$0xff] }
 0xae2   : > { %6900 = vmatpush1.bf16.msra.mxu1 %v14594_v2  ;;  %6860 = vmatprep.subr.bf16.mxu0 %v14598_v20  ;;  %v17824_v2 = vld [vmem:[#allocation29_spill] sm:$0xff]  ;;  %v17825_v20 = vld [vmem:[#allocation30_spill] sm:$0xff] }
 0xae3   : > { %6901 = vmatprep.subr.bf16.mxu1 %v14602_v26  ;;  %v17826_v26 = vld [vmem:[#allocation31_spill] sm:$0xff] }
 0xae5   : > { %6861 = vmatpush1.bf16.msra.mxu0 %v14606_v24  ;;  %v17827_v24 = vld [vmem:[#allocation32_spill] sm:$0xff] }
 0xae6   : > { %6902 = vmatpush1.bf16.msra.mxu1 %v14610_v52  ;;  %6862 = vmatprep.subr.bf16.mxu0 %v14614_v4  ;;  %v17828_v52 = vld [vmem:[#allocation33_spill] sm:$0xff]  ;;  %v17829_v4 = vld [vmem:[#allocation34_spill] sm:$0xff] }
 0xae7   : > { %6903 = vmatprep.subr.bf16.mxu1 %v14618_v37  ;;  %v17830_v37 = vld [vmem:[#allocation35_spill] sm:$0xff] }
 0xae9   : > { %6863 = vmatpush1.bf16.msra.mxu0 %v14622_v53  ;;  %v17831_v53 = vld [vmem:[#allocation36_spill] sm:$0xff] }
 0xaea   : > { %6904 = vmatpush1.bf16.msra.mxu1 %v14626_v5  ;;  %6864 = vmatprep.subr.bf16.mxu0 %v14630_v54  ;;  %v17832_v5 = vld [vmem:[#allocation37_spill] sm:$0xff]  ;;  %v17833_v54 = vld [vmem:[#allocation38_spill] sm:$0xff] }
 0xaeb   : > { %6905 = vmatprep.subr.bf16.mxu1 %v14634_v56  ;;  %v17834_v56 = vld [vmem:[#allocation39_spill] sm:$0xff] }
 0xaed   : > { %6865 = vmatpush1.bf16.msra.mxu0 %v14638_v8  ;;  %v17835_v8 = vld [vmem:[#allocation40_spill] sm:$0xff] }
 0xaee   : > { %6906 = vmatpush1.bf16.msra.mxu1 %v14642_v61  ;;  %6866 = vmatprep.subr.bf16.mxu0 %v17823_v19  ;;  %v17836_v61 = vld [vmem:[#allocation41_spill] sm:$0xff]  ;;  %v17837_v19 = vld [vmem:[#allocation42_spill] sm:$0xff] }
 0xaef   : > { %6907 = vmatprep.subr.bf16.mxu1 %v17824_v2  ;;  %v17838_v2 = vld [vmem:[#allocation43_spill] sm:$0xff] }
 0xaf1   : > { %6867 = vmatpush1.bf16.msra.mxu0 %v17825_v20  ;;  %v17839_v20 = vld [vmem:[#allocation44_spill] sm:$0xff] }
 0xaf2   : > { %6908 = vmatpush1.bf16.msra.mxu1 %v17826_v26  ;;  %6868 = vmatprep.subr.bf16.mxu0 %v17827_v24  ;;  %v17840_v26 = vld [vmem:[#allocation45_spill] sm:$0xff] }
 0xaf3   : > { %6909 = vmatprep.subr.bf16.mxu1 %v17828_v52 }
 0xaf5   : > { %6869 = vmatpush1.bf16.msra.mxu0 %v17829_v4 }
 0xaf6   : > { %6910 = vmatpush1.bf16.msra.mxu1 %v17830_v37  ;;  %6870 = vmatprep.subr.bf16.mxu0 %v17831_v53 }
 0xaf7   : > { %6911 = vmatprep.subr.bf16.mxu1 %v17832_v5 }
 0xaf9   : > { %6871 = vmatpush1.bf16.msra.mxu0 %v17833_v54 }
 0xafa   : > { %6912 = vmatpush1.bf16.msra.mxu1 %v17834_v56  ;;  %6872 = vmatprep.subr.bf16.mxu0 %v17835_v8 }
 0xafb   : > { %6913 = vmatprep.subr.bf16.mxu1 %v17836_v61 }
 0xafd   : > { %6873 = vmatpush1.bf16.msra.mxu0 %v17837_v19 }
 0xafe   : > { %6914 = vmatpush1.bf16.msra.mxu1 %v17838_v2  ;;  %6924 = vmatprep.subr.bf16.mxu0 %v17839_v20 }
 0xaff   : > { %6965 = vmatprep.subr.bf16.mxu1 %v17840_v26 }
 0xb13   : > { %v6510_v24 = vpop.f32.mrb[48].mxu0  ;;  %v6551_v52 = vpop.f32.mrb[48].mxu1 }
 0xb14   : > { %v6552_v4 = vadd.f32 %v6551_v52, %v6510_v24  ;;  %v6512_v37 = vpop.f32.mrb[49].mxu0  ;;  %v6553_v53 = vpop.f32.mrb[49].mxu1  ;;  %v6450_v24 = vrot.slane %v6438_v22, 4  ;;  %v6432_v52 = vld [vmem:[#allocation3 + $0x60] sm:$0x3] }
 0xb15   : > { %v6554_v5 = vadd.f32 %v6553_v53, %v6512_v37  ;;  %v6514_v54 = vpop.f32.mrb[50].mxu0  ;;  %v6555_v56 = vpop.f32.mrb[50].mxu1  ;;  %v6433_v37 = vld [vmem:[#allocation3 + $0x68] sm:$0x3] }
 0xb16   : > { %v6515_v62 = vpop.f32.mrb[51].mxu0  ;;  %v6556_v8 = vpop.f32.mrb[51].mxu1  ;;  %v6462_v53 = vsel %vm4036_vm1, %v6432_v52, %v6450_v24 }
 0xb17   : > { %v6463_v62 = vsel %vm4036_vm1, %v6433_v37, %v6451_v47  ;;  %v6722_v54 = vadd.f32 %v6552_v4, %v6462_v53 }
 0xb18   : > { %v6723_v56 = vadd.f32 %v6554_v5, %v6463_v62  ;;  %v6442_v62 = vld [vmem:[#allocation3 + $0x50] sm:$0xc0] }
 0xb1a   : > { %v9140_v8 = vmul.f32 -1.442695, %v6723_v56 }
 0xb53   : > { %v6592_v27 = vpop.f32.mrb[52].mxu0  ;;  %v6633_v61 = vpop.f32.mrb[52].mxu1 }
 0xb54   : > { %v6634_v28 = vadd.f32 %v6633_v61, %v6592_v27  ;;  %v6594_v19 = vpop.f32.mrb[53].mxu0  ;;  %v6635_v30 = vpop.f32.mrb[53].mxu1  ;;  %v9139_v27 = vmul.f32 -1.442695, %v6722_v54  ;;  %v6434_v61 = vld [vmem:[#allocation3 + $0x70] sm:$0x3] }
 0xb55   : > { %v6636_v2 = vadd.f32 %v6635_v30, %v6594_v19  ;;  %v6596_v50 = vpop.f32.mrb[54].mxu0  ;;  %v6637_v20 = vpop.f32.mrb[54].mxu1  ;;  %v6441_v30 = vld [vmem:[#allocation3 + $0x48] sm:$0xc0]  ;;  %v6443_v54 = vld [vmem:[#allocation3 + $0x58] sm:$0xc0] }
 0xb56   : > { %v6597_v18 = vpop.f32.mrb[55].mxu0  ;;  %v6638_v26 = vpop.f32.mrb[55].mxu1  ;;  %10483 = vpow2.f32 %v9139_v27  ;;  %v6440_v50 = vld [vmem:[#allocation3 + $0x40] sm:$0xc0]  ;;  %v6453_v19 = vrot.slane %v6441_v30, 4  ;;  %v6454_v27 = vrot.slane %v6442_v62, 4 }
 0xb57   : > { %10485 = vpow2.f32 %v9140_v8  ;;  %v6452_v18 = vrot.slane %v6440_v50, 4  ;;  %v6435_v20 = vld [vmem:[#allocation3 + $0x78] sm:$0x3]  ;;  %v6436_v30 = vld [vmem:[#allocation3 + $0x80] sm:$0x3] }
 0xb58   : > { %v6465_v55 = vsel %vm4036_vm1, %v6435_v20, %v6453_v19  ;;  %v6437_v20 = vld [vmem:[#allocation3 + $0x88] sm:$0x3] }
 0xb59   : > { %v6464_v22 = vsel %vm4036_vm1, %v6434_v61, %v6452_v18  ;;  %v6737_v47 = vadd.f32 %v6636_v2, %v6465_v55  ;;  %v6455_v61 = vrot.slane %v6443_v54, 4 }
 0xb5a   : > { %v6736_v52 = vadd.f32 %v6634_v28, %v6464_v22 }
 0xb5b   : > { %v9142_v53 = vmul.f32 -1.442695, %v6737_v47  ;;  %v6467_v54 = vsel %vm4036_vm1, %v6437_v20, %v6455_v61 }
 0xb5c   : > { %v9141_v37 = vmul.f32 -1.442695, %v6736_v52 }
 0xb60   : > { %v10484_v26 = vpop.eup %10483 }
 0xb61   : > { %v10486_v24 = vpop.eup %10485  ;;  %v6730_v4 = vadd.f32 1.0, %v10484_v26 }
 0xb62   : > { %v6731_v5 = vadd.f32 1.0, %v10486_v24 }
 0xb63   : > { %10487 = vrcp.f32 %v6730_v4 }
 0xb64   : > { %10489 = vrcp.f32 %v6731_v5  ;;  %v6466_v5 = vsel %vm4036_vm1, %v6436_v30, %v6454_v27 }
 0xb65   : > { %10491 = vpow2.f32 %v9141_v37 }
 0xb66   : > { %10493 = vpow2.f32 %v9142_v53 }
 0xb6d   : > { %v10488_v2 = vpop.eup %10487 }
 0xb6e   : > { %v10490_v24 = vpop.eup %10489 }
 0xb6f   : > { %v10492_v4 = vpop.eup %10491 }
 0xb70   : > { %v10494_v53 = vpop.eup %10493 }
 0xb71   : > { %v6745_v23 = vadd.f32 1.0, %v10494_v53  ;;  %v15446_v53 = vld [vmem:[%s11906_s6 + $0x33c] ss:$24 sps:$4 sm:$0xff]  }
 0xb93   : > { %v6674_v56 = vpop.f32.mrb[56].mxu0 }
 0xb94   : > { %v6715_v8 = vpop.f32.mrb[56].mxu1  ;;  %v6676_v50 = vpop.f32.mrb[57].mxu0 }
 0xb95   : > { %v6716_v18 = vadd.f32 %v6715_v8, %v6674_v56  ;;  %v6717_v19 = vpop.f32.mrb[57].mxu1  ;;  %v6678_v28 = vpop.f32.mrb[58].mxu0  ;;  %v6744_v8 = vadd.f32 1.0, %v10492_v4  ;;  %v15428_v4 = vld [vmem:[%s11906_s6 + $0x8] ss:$24 sps:$4 sm:$0xff]  }
 0xb96   : > { %v6718_v22 = vadd.f32 %v6717_v19, %v6676_v50  ;;  %v6719_v55 = vpop.f32.mrb[58].mxu1  ;;  %v6679_v26 = vpop.f32.mrb[59].mxu0 }
 0xb97   : > { %v6750_v52 = vadd.f32 %v6716_v18, %v13215_v39  ;;  %v6720_v47 = vpop.f32.mrb[59].mxu1 }
 0xb98   : > { %v6751_v37 = vadd.f32 %v6718_v22, %v13218_v45 }
 0xb99   : > { %v6752_v62 = vmul.f32 %v10488_v2, %v6750_v52 }
 0xb9a   : > { %v6753_v56 = vmul.f32 %v10490_v24, %v6751_v37  ;;  %v15442_v37 = vld [vmem:[%s11906_s6 + $0x3c] ss:$24 sps:$4 sm:$0xff]  }
 0xb9b   : > { %v6754_v28 = vadd.f32 %v6752_v62, %v6466_v5  ;;  %v15432_v5 = vld [vmem:[%s11906_s6 + $0x308] ss:$24 sps:$4 sm:$0xff]   ;;  %v15450_v62 = vld [vmem:[%s11906_s6 + $0x38] ss:$24 sps:$4 sm:$0xff]  }
 0xb9c   : > { %v6755_v50 = vadd.f32 %v6753_v56, %v6467_v54  ;;  %v15454_v54 = vld [vmem:[%s11906_s6 + $0x338] ss:$24 sps:$4 sm:$0xff]   ;;  %v15458_v56 = vld [vmem:[%s11906_s6 + $0x6c] ss:$24 sps:$4 sm:$0xff]  }
 0xb9d   : > { %10495 = vtanh.f32 %v6754_v28  ;;  %v15466_v28 = vld [vmem:[%s11906_s6 + $0x68] ss:$24 sps:$4 sm:$0xff]  }
 0xb9e   : > { %10497 = vtanh.f32 %v6755_v50  ;;  %v15470_v50 = vld [vmem:[%s11906_s6 + $0x368] ss:$24 sps:$4 sm:$0xff]  }
 0xb9f   : > { %10499 = vrcp.f32 %v6744_v8  ;;  %v15462_v8 = vld [vmem:[%s11906_s6 + $0x36c] ss:$24 sps:$4 sm:$0xff]  }
 0xba0   : > { %10501 = vrcp.f32 %v6745_v23 }
 0xba7   : > { %v10496_v18 = vpop.eup %10495 }
 0xba8   : > { %v10498_v19 = vpop.eup %10497  ;;  %v6758_v55 = vsub.f32 %v14727_v40, %v10496_v18 }
 0xba9   : > { %v10500_v27 = vpop.eup %10499  ;;  %v6759_v30 = vsub.f32 %v14729_v59, %v10498_v19 }
 0xbaa   : > { %v10502_v22 = vpop.eup %10501  ;;  %v6760_v2 = vmul.f32 %v10500_v27, %v6758_v55  ;;  %v15482_v55 = vld [vmem:[%s11906_s6 + $0x98] ss:$24 sps:$4 sm:$0xff]  }
 0xbab   : > { %v6761_v26 = vmul.f32 %v10502_v22, %v6759_v30  ;;  %v15486_v27 = vld [vmem:[%s11906_s6 + $0x398] ss:$24 sps:$4 sm:$0xff]   ;;  %v15490_v30 = vld [vmem:[%s11906_s6 + $0xcc] ss:$24 sps:$4 sm:$0xff]  }
 0xbac   : > { %v15399_v61 = vadd.f32 %v10496_v18, %v6760_v2  ;;  %v15474_v18 = vld [vmem:[%s11906_s6 + $0x9c] ss:$24 sps:$4 sm:$0xff]   ;;  %v15494_v22 = vld [vmem:[%s11906_s6 + $0x3cc] ss:$24 sps:$4 sm:$0xff]   ;;  %v15498_v2 = vld [vmem:[%s11906_s6 + $0xc8] ss:$24 sps:$4 sm:$0xff]  }
 0xbad   : > { %v15401_v20 = vadd.f32 %v10498_v19, %v6761_v26  ;;  %v15478_v19 = vld [vmem:[%s11906_s6 + $0x39c] ss:$24 sps:$4 sm:$0xff]   ;;  %v15502_v26 = vld [vmem:[%s11906_s6 + $0x3c8] ss:$24 sps:$4 sm:$0xff]  }
 0xbae   : > { %v15405_v24 = vpack.c.bf16 %v15399_v61, %v15399_v61 }
 0xbaf   : > { %v15409_v23 = vpack.c.bf16 %v15401_v20, %v15401_v20 }
 0xbb0   : > { %v6768_v40 = vrot.slane %v15405_v24, 4  ;;  %v6774_v59 = vrot.slane %v15405_v24, 6 }
 0xbb1   : > { %v6769_v52 = vrot.slane %v15409_v23, 4  ;;  %v6775_v47 = vrot.slane %v15409_v23, 6  ;;  %9145 = vmatprep.mubr.msk.bf16.mxu0 %vm13227_vm6, %v15409_v23  ;;  %9151 = vmatprep.mubr.msk.bf16.mxu1 %vm13237_vm7, %v15409_v23 }
 0xbb2   : > { %6772 = vst [vmem:[#allocation2] sm:$0x10] %v6768_v40  ;;  %6778 = vst [vmem:[#allocation2 + $0x10] sm:$0x8] %v6774_v59  ;;  %9148 = vmatmul.mubr.msk.bf16.vlgmr.msra.gmra.mrb[60].mxu0 %vm13227_vm6, %v15405_v24  ;;  %9154 = vmatmul.mubr.msk.bf16.vlgmr.msra.gmra.mrb[60].mxu1 %vm13237_vm7, %v15405_v24  ;;  %v15506_v40 = vld [vmem:[%s11906_s6 + $0xfc] ss:$24 sps:$4 sm:$0xff]  }
 0xbb3   : > { %6773 = vst [vmem:[#allocation2 + $0x8] sm:$0x10] %v6769_v52  ;;  %6779 = vst [vmem:[#allocation2 + $0x18] sm:$0x8] %v6775_v47  ;;  %6925 = vmatpush1.bf16.msra.mxu0 %v15428_v4  ;;  %6966 = vmatpush1.bf16.msra.mxu1 %v15432_v5  ;;  %v15510_v59 = vld [vmem:[%s11906_s6 + $0x3fc] ss:$24 sps:$4 sm:$0xff]  }
 0xbb4   : > { %9157 = vmatprep.mubr.msk.bf16.mxu0 %vm13227_vm6, %v15409_v23  ;;  %9163 = vmatprep.mubr.msk.bf16.mxu1 %vm13237_vm7, %v15409_v23  ;;  %v17876_v52 = vld [vmem:[#allocation81_spill] sm:$0xff]  ;;  %v17877_v47 = vld [vmem:[#allocation82_spill] sm:$0xff] }
 0xbb5   : > { %6926 = vmatprep.subr.bf16.mxu0 %v15442_v37  ;;  %6967 = vmatprep.subr.bf16.mxu1 %v15446_v53 }
 0xbb7   : > { %6927 = vmatpush1.bf16.msra.mxu0 %v15450_v62  ;;  %6968 = vmatpush1.bf16.msra.mxu1 %v15454_v54 }
 0xbb8   : > { %6928 = vmatprep.subr.bf16.mxu0 %v15458_v56  ;;  %6969 = vmatprep.subr.bf16.mxu1 %v15462_v8 }
 0xbbb   : > { %6929 = vmatpush1.bf16.msra.mxu0 %v15466_v28  ;;  %6970 = vmatpush1.bf16.msra.mxu1 %v15470_v50 }
 0xbbc   : > { %6930 = vmatprep.subr.bf16.mxu0 %v15474_v18  ;;  %6971 = vmatprep.subr.bf16.mxu1 %v15478_v19 }
 0xbbf   : > { %6931 = vmatpush1.bf16.msra.mxu0 %v15482_v55  ;;  %6972 = vmatpush1.bf16.msra.mxu1 %v15486_v27 }
 0xbc0   : > { %6932 = vmatprep.subr.bf16.mxu0 %v15490_v30  ;;  %6973 = vmatprep.subr.bf16.mxu1 %v15494_v22 }
 0xbc3   : > { %6933 = vmatpush1.bf16.msra.mxu0 %v15498_v2  ;;  %6974 = vmatpush1.bf16.msra.mxu1 %v15502_v26 }
 0xbc4   : > { %6934 = vmatprep.subr.bf16.mxu0 %v15506_v40  ;;  %6975 = vmatprep.subr.bf16.mxu1 %v15510_v59 }
 0xbc7   : > { %6935 = vmatpush1.bf16.msra.mxu0 %v14780_v15  ;;  %6976 = vmatpush1.bf16.msra.mxu1 %v14784_v25  ;;  %v17841_v15 = vld [vmem:[#allocation46_spill] sm:$0xff]  ;;  %v17842_v25 = vld [vmem:[#allocation47_spill] sm:$0xff] }
 0xbc8   : > { %6936 = vmatprep.subr.bf16.mxu0 %v14788_v44  ;;  %6977 = vmatprep.subr.bf16.mxu1 %v14792_v17  ;;  %v17843_v44 = vld [vmem:[#allocation48_spill] sm:$0xff]  ;;  %v17844_v17 = vld [vmem:[#allocation49_spill] sm:$0xff] }
 0xbcb   : > { %6937 = vmatpush1.bf16.msra.mxu0 %v14796_v21  ;;  %6978 = vmatpush1.bf16.msra.mxu1 %v14800_v11  ;;  %v17845_v21 = vld [vmem:[#allocation50_spill] sm:$0xff]  ;;  %v17846_v11 = vld [vmem:[#allocation51_spill] sm:$0xff] }
 0xbcc   : > { %6938 = vmatprep.subr.bf16.mxu0 %v14804_v38  ;;  %6979 = vmatprep.subr.bf16.mxu1 %v14808_v10  ;;  %v17847_v38 = vld [vmem:[#allocation52_spill] sm:$0xff]  ;;  %v17848_v10 = vld [vmem:[#allocation53_spill] sm:$0xff] }
 0xbcf   : > { %6939 = vmatpush1.bf16.msra.mxu0 %v14812_v14  ;;  %6980 = vmatpush1.bf16.msra.mxu1 %v14816_v41  ;;  %v17849_v14 = vld [vmem:[#allocation54_spill] sm:$0xff]  ;;  %v17850_v41 = vld [vmem:[#allocation55_spill] sm:$0xff] }
 0xbd0   : > { %6940 = vmatprep.subr.bf16.mxu0 %v14820_v6  ;;  %6981 = vmatprep.subr.bf16.mxu1 %v14824_v49  ;;  %v17851_v6 = vld [vmem:[#allocation56_spill] sm:$0xff]  ;;  %v17852_v49 = vld [vmem:[#allocation57_spill] sm:$0xff] }
 0xbd3   : > { %6941 = vmatpush1.bf16.msra.mxu0 %v14828_v12  ;;  %6982 = vmatpush1.bf16.msra.mxu1 %v14832_v63  ;;  %v17853_v12 = vld [vmem:[#allocation58_spill] sm:$0xff]  ;;  %v17854_v63 = vld [vmem:[#allocation59_spill] sm:$0xff] }
 0xbd4   : > { %6942 = vmatprep.subr.bf16.mxu0 %v14836_v3  ;;  %6983 = vmatprep.subr.bf16.mxu1 %v14840_v34  ;;  %v17855_v3 = vld [vmem:[#allocation60_spill] sm:$0xff]  ;;  %v17856_v34 = vld [vmem:[#allocation61_spill] sm:$0xff] }
 0xbd7   : > { %6943 = vmatpush1.bf16.msra.mxu0 %v14844_v32  ;;  %6984 = vmatpush1.bf16.msra.mxu1 %v14848_v13  ;;  %v17857_v32 = vld [vmem:[#allocation62_spill] sm:$0xff]  ;;  %v17858_v13 = vld [vmem:[#allocation63_spill] sm:$0xff] }
 0xbd8   : > { %6944 = vmatprep.subr.bf16.mxu0 %v14852_v16  ;;  %6985 = vmatprep.subr.bf16.mxu1 %v14856_v33  ;;  %v17859_v16 = vld [vmem:[#allocation64_spill] sm:$0xff]  ;;  %v17860_v33 = vld [vmem:[#allocation65_spill] sm:$0xff] }
 0xbdb   : > { %6945 = vmatpush1.bf16.msra.mxu0 %v14860_v60  ;;  %6986 = vmatpush1.bf16.msra.mxu1 %v14864_v31  ;;  %v17861_v60 = vld [vmem:[#allocation66_spill] sm:$0xff]  ;;  %v17862_v31 = vld [vmem:[#allocation67_spill] sm:$0xff] }
 0xbdc   : > { %6946 = vmatprep.subr.bf16.mxu0 %v14868_v43  ;;  %6987 = vmatprep.subr.bf16.mxu1 %v14872_v0  ;;  %v17863_v43 = vld [vmem:[#allocation68_spill] sm:$0xff]  ;;  %v17864_v0 = vld [vmem:[#allocation69_spill] sm:$0xff] }
 0xbdf   : > { %6947 = vmatpush1.bf16.msra.mxu0 %v14876_v42  ;;  %6988 = vmatpush1.bf16.msra.mxu1 %v14880_v29  ;;  %v17865_v42 = vld [vmem:[#allocation70_spill] sm:$0xff]  ;;  %v17866_v29 = vld [vmem:[#allocation71_spill] sm:$0xff] }
 0xbe0   : > { %6948 = vmatprep.subr.bf16.mxu0 %v14884_v46  ;;  %6989 = vmatprep.subr.bf16.mxu1 %v14888_v35  ;;  %v17867_v46 = vld [vmem:[#allocation72_spill] sm:$0xff]  ;;  %v17868_v35 = vld [vmem:[#allocation73_spill] sm:$0xff] }
 0xbe3   : > { %6949 = vmatpush1.bf16.msra.mxu0 %v14892_v9  ;;  %6990 = vmatpush1.bf16.msra.mxu1 %v14896_v58  ;;  %v17869_v9 = vld [vmem:[#allocation74_spill] sm:$0xff]  ;;  %v17870_v58 = vld [vmem:[#allocation75_spill] sm:$0xff] }
 0xbe4   : > { %6950 = vmatprep.subr.bf16.mxu0 %v14900_v57  ;;  %6991 = vmatprep.subr.bf16.mxu1 %v14904_v36  ;;  %v17871_v57 = vld [vmem:[#allocation76_spill] sm:$0xff]  ;;  %v17872_v36 = vld [vmem:[#allocation77_spill] sm:$0xff] }
 0xbe7   : > { %6951 = vmatpush1.bf16.msra.mxu0 %v14908_v7  ;;  %6992 = vmatpush1.bf16.msra.mxu1 %v14912_v1  ;;  %v17873_v7 = vld [vmem:[#allocation78_spill] sm:$0xff]  ;;  %v17874_v1 = vld [vmem:[#allocation79_spill] sm:$0xff] }
 0xbe8   : > { %6952 = vmatprep.subr.bf16.mxu0 %v17841_v15  ;;  %6993 = vmatprep.subr.bf16.mxu1 %v17842_v25  ;;  %v17878_v15 = vld [vmem:[#allocation83_spill] sm:$0xff]  ;;  %v17879_v25 = vld [vmem:[#allocation84_spill] sm:$0xff] }
 0xbeb   : > { %6953 = vmatpush1.bf16.msra.mxu0 %v17843_v44  ;;  %6994 = vmatpush1.bf16.msra.mxu1 %v17844_v17  ;;  %v17880_v44 = vld [vmem:[#allocation85_spill] sm:$0xff]  ;;  %v17881_v17 = vld [vmem:[#allocation86_spill] sm:$0xff] }
 0xbec   : > { %6954 = vmatprep.subr.bf16.mxu0 %v17845_v21  ;;  %6995 = vmatprep.subr.bf16.mxu1 %v17846_v11  ;;  %v17882_v21 = vld [vmem:[#allocation87_spill] sm:$0xff]  ;;  %v17883_v11 = vld [vmem:[#allocation88_spill] sm:$0xff] }
 0xbef   : > { %6955 = vmatpush1.bf16.msra.mxu0 %v17847_v38  ;;  %6996 = vmatpush1.bf16.msra.mxu1 %v17848_v10  ;;  %v17884_v38 = vld [vmem:[#allocation89_spill] sm:$0xff]  ;;  %v17885_v10 = vld [vmem:[#allocation90_spill] sm:$0xff] }
 0xbf0   : > { %7006 = vmatprep.subr.bf16.mxu0 %v17849_v14  ;;  %7047 = vmatprep.subr.bf16.mxu1 %v17850_v41  ;;  %v17886_v14 = vld [vmem:[#allocation91_spill] sm:$0xff]  ;;  %v17887_v41 = vld [vmem:[#allocation92_spill] sm:$0xff] }
 0xbf2   : > { %9160 = vmatmul.mubr.msk.bf16.vlgmr.msra.gmra.mrb[64].mxu0 %vm13227_vm6, %v15405_v24  ;;  %9166 = vmatmul.mubr.msk.bf16.vlgmr.msra.gmra.mrb[64].mxu1 %vm13237_vm7, %v15405_v24 }
 0xbf3   : > { %7007 = vmatpush1.bf16.msra.mxu0 %v17851_v6  ;;  %9169 = vmatprep.mubr.msk.bf16.mxu0 %vm13227_vm6, %v15409_v23  ;;  %v17888_v6 = vld [vmem:[#allocation93_spill] sm:$0xff] }
 0xbf4   : > { %7048 = vmatpush1.bf16.msra.mxu1 %v17852_v49  ;;  %9175 = vmatprep.mubr.msk.bf16.mxu1 %vm13237_vm7, %v15409_v23  ;;  %v17875_v23 = vld [vmem:[#allocation80_spill] sm:$0xff]  ;;  %v17889_v49 = vld [vmem:[#allocation94_spill] sm:$0xff] }
 0xbf5   : > { %7008 = vmatprep.subr.bf16.mxu0 %v17853_v12  ;;  %7049 = vmatprep.subr.bf16.mxu1 %v17854_v63  ;;  %v17890_v12 = vld [vmem:[#allocation95_spill] sm:$0xff]  ;;  %v17891_v63 = vld [vmem:[#allocation96_spill] sm:$0xff] }
 0xbf7   : > { %7009 = vmatpush1.bf16.msra.mxu0 %v17855_v3  ;;  %v17892_v3 = vld [vmem:[#allocation97_spill] sm:$0xff] }
 0xbf8   : > { %7050 = vmatpush1.bf16.msra.mxu1 %v17856_v34  ;;  %7010 = vmatprep.subr.bf16.mxu0 %v17857_v32  ;;  %v17893_v34 = vld [vmem:[#allocation98_spill] sm:$0xff]  ;;  %v17894_v32 = vld [vmem:[#allocation99_spill] sm:$0xff] }
 0xbf9   : > { %7051 = vmatprep.subr.bf16.mxu1 %v17858_v13  ;;  %v17895_v13 = vld [vmem:[#allocation100_spill] sm:$0xff] }
 0xbfb   : > { %7011 = vmatpush1.bf16.msra.mxu0 %v17859_v16  ;;  %v17896_v16 = vld [vmem:[#allocation101_spill] sm:$0xff] }
 0xbfc   : > { %7052 = vmatpush1.bf16.msra.mxu1 %v17860_v33  ;;  %7012 = vmatprep.subr.bf16.mxu0 %v17861_v60  ;;  %v17897_v33 = vld [vmem:[#allocation102_spill] sm:$0xff]  ;;  %v17898_v60 = vld [vmem:[#allocation103_spill] sm:$0xff] }
 0xbfd   : > { %7053 = vmatprep.subr.bf16.mxu1 %v17862_v31  ;;  %v17899_v31 = vld [vmem:[#allocation104_spill] sm:$0xff] }
 0xbff   : > { %7013 = vmatpush1.bf16.msra.mxu0 %v17863_v43  ;;  %v17900_v43 = vld [vmem:[#allocation105_spill] sm:$0xff] }
 0xc00   : > { %7054 = vmatpush1.bf16.msra.mxu1 %v17864_v0  ;;  %7014 = vmatprep.subr.bf16.mxu0 %v17865_v42  ;;  %v17901_v0 = vld [vmem:[#allocation106_spill] sm:$0xff]  ;;  %v17902_v42 = vld [vmem:[#allocation107_spill] sm:$0xff] }
 0xc01   : > { %7055 = vmatprep.subr.bf16.mxu1 %v17866_v29  ;;  %v17903_v29 = vld [vmem:[#allocation108_spill] sm:$0xff] }
 0xc03   : > { %7015 = vmatpush1.bf16.msra.mxu0 %v17867_v46  ;;  %v17904_v46 = vld [vmem:[#allocation109_spill] sm:$0xff] }
 0xc04   : > { %7056 = vmatpush1.bf16.msra.mxu1 %v17868_v35  ;;  %7016 = vmatprep.subr.bf16.mxu0 %v17869_v9  ;;  %v17905_v35 = vld [vmem:[#allocation110_spill] sm:$0xff]  ;;  %v17906_v9 = vld [vmem:[#allocation111_spill] sm:$0xff] }
 0xc05   : > { %7057 = vmatprep.subr.bf16.mxu1 %v17870_v58  ;;  %v17907_v58 = vld [vmem:[#allocation112_spill] sm:$0xff] }
 0xc07   : > { %7017 = vmatpush1.bf16.msra.mxu0 %v17871_v57  ;;  %v17908_v57 = vld [vmem:[#allocation113_spill] sm:$0xff] }
 0xc08   : > { %7058 = vmatpush1.bf16.msra.mxu1 %v17872_v36  ;;  %7018 = vmatprep.subr.bf16.mxu0 %v17873_v7  ;;  %v17909_v36 = vld [vmem:[#allocation114_spill] sm:$0xff]  ;;  %v17910_v7 = vld [vmem:[#allocation115_spill] sm:$0xff] }
 0xc09   : > { %7059 = vmatprep.subr.bf16.mxu1 %v17874_v1  ;;  %v17911_v1 = vld [vmem:[#allocation116_spill] sm:$0xff] }
 0xc0b   : > { %7019 = vmatpush1.bf16.msra.mxu0 %v17875_v23  ;;  %v17912_v23 = vld [vmem:[#allocation117_spill] sm:$0xff] }
 0xc0c   : > { %7060 = vmatpush1.bf16.msra.mxu1 %v17876_v52  ;;  %7020 = vmatprep.subr.bf16.mxu0 %v17877_v47  ;;  %v17913_v52 = vld [vmem:[#allocation118_spill] sm:$0xff]  ;;  %v17914_v47 = vld [vmem:[#allocation119_spill] sm:$0xff] }
 0xc0d   : > { %7061 = vmatprep.subr.bf16.mxu1 %v17878_v15  ;;  %v17915_v15 = vld [vmem:[#allocation120_spill] sm:$0xff] }
 0xc0f   : > { %7021 = vmatpush1.bf16.msra.mxu0 %v17879_v25  ;;  %v17916_v25 = vld [vmem:[#allocation121_spill] sm:$0xff] }
 0xc10   : > { %7062 = vmatpush1.bf16.msra.mxu1 %v17880_v44  ;;  %7022 = vmatprep.subr.bf16.mxu0 %v17881_v17  ;;  %v17917_v44 = vld [vmem:[#allocation122_spill] sm:$0xff]  ;;  %v17918_v17 = vld [vmem:[#allocation123_spill] sm:$0xff] }
 0xc11   : > { %7063 = vmatprep.subr.bf16.mxu1 %v17882_v21  ;;  %v17919_v21 = vld [vmem:[#allocation124_spill] sm:$0xff] }
 0xc13   : > { %7023 = vmatpush1.bf16.msra.mxu0 %v17883_v11  ;;  %v17920_v11 = vld [vmem:[#allocation125_spill] sm:$0xff] }
 0xc14   : > { %7064 = vmatpush1.bf16.msra.mxu1 %v17884_v38  ;;  %7024 = vmatprep.subr.bf16.mxu0 %v17885_v10  ;;  %v17921_v38 = vld [vmem:[#allocation126_spill] sm:$0xff]  ;;  %v17922_v10 = vld [vmem:[#allocation127_spill] sm:$0xff] }
 0xc15   : > { %7065 = vmatprep.subr.bf16.mxu1 %v17886_v14  ;;  %v17923_v14 = vld [vmem:[#allocation128_spill] sm:$0xff] }
 0xc17   : > { %7025 = vmatpush1.bf16.msra.mxu0 %v17887_v41  ;;  %v17924_v41 = vld [vmem:[#allocation129_spill] sm:$0xff] }
 0xc18   : > { %7066 = vmatpush1.bf16.msra.mxu1 %v17888_v6  ;;  %7026 = vmatprep.subr.bf16.mxu0 %v17889_v49  ;;  %v17926_v6 = vld [vmem:[#allocation131_spill] sm:$0xff]  ;;  %v17927_v49 = vld [vmem:[#allocation132_spill] sm:$0xff] }
 0xc19   : > { %7067 = vmatprep.subr.bf16.mxu1 %v17890_v12  ;;  %v17928_v12 = vld [vmem:[#allocation133_spill] sm:$0xff] }
 0xc1b   : > { %7027 = vmatpush1.bf16.msra.mxu0 %v17891_v63  ;;  %v17929_v63 = vld [vmem:[#allocation134_spill] sm:$0xff] }
 0xc1c   : > { %7068 = vmatpush1.bf16.msra.mxu1 %v17892_v3  ;;  %7028 = vmatprep.subr.bf16.mxu0 %v17893_v34  ;;  %v17930_v3 = vld [vmem:[#allocation135_spill] sm:$0xff]  ;;  %v17931_v34 = vld [vmem:[#allocation136_spill] sm:$0xff] }
 0xc1d   : > { %7069 = vmatprep.subr.bf16.mxu1 %v17894_v32  ;;  %v17932_v32 = vld [vmem:[#allocation137_spill] sm:$0xff] }
 0xc1f   : > { %7029 = vmatpush1.bf16.msra.mxu0 %v17895_v13  ;;  %v17933_v13 = vld [vmem:[#allocation138_spill] sm:$0xff] }
 0xc20   : > { %7070 = vmatpush1.bf16.msra.mxu1 %v17896_v16  ;;  %7030 = vmatprep.subr.bf16.mxu0 %v17897_v33  ;;  %v17934_v16 = vld [vmem:[#allocation139_spill] sm:$0xff]  ;;  %v17935_v33 = vld [vmem:[#allocation140_spill] sm:$0xff] }
 0xc21   : > { %7071 = vmatprep.subr.bf16.mxu1 %v17898_v60  ;;  %v17936_v60 = vld [vmem:[#allocation141_spill] sm:$0xff] }
 0xc23   : > { %7031 = vmatpush1.bf16.msra.mxu0 %v17899_v31  ;;  %v17937_v31 = vld [vmem:[#allocation142_spill] sm:$0xff] }
 0xc24   : > { %7072 = vmatpush1.bf16.msra.mxu1 %v17900_v43  ;;  %7032 = vmatprep.subr.bf16.mxu0 %v17901_v0  ;;  %v17938_v43 = vld [vmem:[#allocation143_spill] sm:$0xff]  ;;  %v17939_v0 = vld [vmem:[#allocation144_spill] sm:$0xff] }
 0xc25   : > { %7073 = vmatprep.subr.bf16.mxu1 %v17902_v42  ;;  %v17940_v42 = vld [vmem:[#allocation145_spill] sm:$0xff] }
 0xc27   : > { %7033 = vmatpush1.bf16.msra.mxu0 %v17903_v29  ;;  %v17941_v29 = vld [vmem:[#allocation146_spill] sm:$0xff] }
 0xc28   : > { %7074 = vmatpush1.bf16.msra.mxu1 %v17904_v46  ;;  %7034 = vmatprep.subr.bf16.mxu0 %v17905_v35  ;;  %v17942_v46 = vld [vmem:[#allocation147_spill] sm:$0xff]  ;;  %v17943_v35 = vld [vmem:[#allocation148_spill] sm:$0xff] }
 0xc29   : > { %7075 = vmatprep.subr.bf16.mxu1 %v17906_v9  ;;  %v17944_v9 = vld [vmem:[#allocation149_spill] sm:$0xff] }
 0xc2b   : > { %7035 = vmatpush1.bf16.msra.mxu0 %v17907_v58  ;;  %v17945_v58 = vld [vmem:[#allocation150_spill] sm:$0xff] }
 0xc2c   : > { %7076 = vmatpush1.bf16.msra.mxu1 %v17908_v57  ;;  %7036 = vmatprep.subr.bf16.mxu0 %v17909_v36  ;;  %v17946_v57 = vld [vmem:[#allocation151_spill] sm:$0xff] }
 0xc2d   : > { %7077 = vmatprep.subr.bf16.mxu1 %v17910_v7  ;;  %v15672_v36 = vld [vmem:[%s11906_s6 + $0x180] ss:$24 sps:$4 sm:$0xff]  }
 0xc2e   : > { %v15676_v7 = vld [vmem:[%s11906_s6 + $0x480] ss:$24 sps:$4 sm:$0xff]  }
 0xc2f   : > { %7037 = vmatpush1.bf16.msra.mxu0 %v17911_v1  ;;  %v15680_v1 = vld [vmem:[%s11906_s6 + $0x1b4] ss:$24 sps:$4 sm:$0xff]  }
 0xc30   : > { %7078 = vmatpush1.bf16.msra.mxu1 %v17912_v23  ;;  %7190 = vmatprep.subr.bf16.mxu0 %v17913_v52  ;;  %v15684_v23 = vld [vmem:[%s11906_s6 + $0x4b4] ss:$24 sps:$4 sm:$0xff]   ;;  %v15688_v52 = vld [vmem:[%s11906_s6 + $0x1b0] ss:$24 sps:$4 sm:$0xff]  }
 0xc31   : > { %7231 = vmatprep.subr.bf16.mxu1 %v17914_v47  ;;  %v15692_v47 = vld [vmem:[%s11906_s6 + $0x4b0] ss:$24 sps:$4 sm:$0xff]  }
 0xc32   : > { %9172 = vmatmul.mubr.msk.bf16.vlgmr.msra.gmra.mrb[68].mxu0 %vm13227_vm6, %v15405_v24 }
 0xc33   : > { %9178 = vmatmul.mubr.msk.bf16.vlgmr.msra.gmra.mrb[68].mxu1 %vm13237_vm7, %v15405_v24  ;;  %7191 = vmatpush1.bf16.msra.mxu0 %v17915_v15  ;;  %v17925_v24 = vld [vmem:[#allocation130_spill] sm:$0xff]  ;;  %v15696_v15 = vld [vmem:[%s11906_s6 + $0x1e4] ss:$24 sps:$4 sm:$0xff]  }
 0xc34   : > { %7232 = vmatpush1.bf16.msra.mxu1 %v17916_v25  ;;  %7192 = vmatprep.subr.bf16.mxu0 %v17917_v44  ;;  %v15700_v25 = vld [vmem:[%s11906_s6 + $0x4e4] ss:$24 sps:$4 sm:$0xff]   ;;  %v15704_v44 = vld [vmem:[%s11906_s6 + $0x1e0] ss:$24 sps:$4 sm:$0xff]  }
 0xc35   : > { %7233 = vmatprep.subr.bf16.mxu1 %v17918_v17  ;;  %v15708_v17 = vld [vmem:[%s11906_s6 + $0x4e0] ss:$24 sps:$4 sm:$0xff]  }
 0xc37   : > { %7193 = vmatpush1.bf16.msra.mxu0 %v17919_v21  ;;  %v15712_v21 = vld [vmem:[%s11906_s6 + $0x214] ss:$24 sps:$4 sm:$0xff]  }
 0xc38   : > { %7234 = vmatpush1.bf16.msra.mxu1 %v17920_v11  ;;  %7194 = vmatprep.subr.bf16.mxu0 %v17921_v38  ;;  %v15716_v11 = vld [vmem:[%s11906_s6 + $0x514] ss:$24 sps:$4 sm:$0xff]   ;;  %v15720_v38 = vld [vmem:[%s11906_s6 + $0x210] ss:$24 sps:$4 sm:$0xff]  }
 0xc39   : > { %7235 = vmatprep.subr.bf16.mxu1 %v17922_v10  ;;  %v15724_v10 = vld [vmem:[%s11906_s6 + $0x510] ss:$24 sps:$4 sm:$0xff]  }
 0xc3b   : > { %7195 = vmatpush1.bf16.msra.mxu0 %v17923_v14  ;;  %v15728_v14 = vld [vmem:[%s11906_s6 + $0x244] ss:$24 sps:$4 sm:$0xff]  }
 0xc3c   : > { %7236 = vmatpush1.bf16.msra.mxu1 %v17924_v41  ;;  %7196 = vmatprep.subr.bf16.mxu0 %v17925_v24  ;;  %17947 = vst [vmem:[#allocation28_spill] sm:$0xff] %v15728_v14  ;;  %v15732_v41 = vld [vmem:[%s11906_s6 + $0x544] ss:$24 sps:$4 sm:$0xff]   ;;  %v15736_v24 = vld [vmem:[%s11906_s6 + $0x240] ss:$24 sps:$4 sm:$0xff]  }
 0xc3d   : > { %7237 = vmatprep.subr.bf16.mxu1 %v17926_v6  ;;  %17948 = vst [vmem:[#allocation29_spill] sm:$0xff] %v15732_v41  ;;  %17949 = vst [vmem:[#allocation30_spill] sm:$0xff] %v15736_v24  ;;  %v15740_v6 = vld [vmem:[%s11906_s6 + $0x540] ss:$24 sps:$4 sm:$0xff]  }
 0xc3e   : > { %17950 = vst [vmem:[#allocation31_spill] sm:$0xff] %v15740_v6 }
 0xc3f   : > { %7197 = vmatpush1.bf16.msra.mxu0 %v17927_v49  ;;  %v15744_v49 = vld [vmem:[%s11906_s6 + $0x274] ss:$24 sps:$4 sm:$0xff]  }
 0xc40   : > { %7238 = vmatpush1.bf16.msra.mxu1 %v17928_v12  ;;  %7198 = vmatprep.subr.bf16.mxu0 %v17929_v63  ;;  %17951 = vst [vmem:[#allocation32_spill] sm:$0xff] %v15744_v49  ;;  %v15748_v12 = vld [vmem:[%s11906_s6 + $0x574] ss:$24 sps:$4 sm:$0xff]   ;;  %v15752_v63 = vld [vmem:[%s11906_s6 + $0x270] ss:$24 sps:$4 sm:$0xff]  }
 0xc41   : > { %7239 = vmatprep.subr.bf16.mxu1 %v17930_v3  ;;  %17952 = vst [vmem:[#allocation33_spill] sm:$0xff] %v15748_v12  ;;  %17953 = vst [vmem:[#allocation34_spill] sm:$0xff] %v15752_v63  ;;  %v15756_v3 = vld [vmem:[%s11906_s6 + $0x570] ss:$24 sps:$4 sm:$0xff]  }
 0xc42   : > { %17954 = vst [vmem:[#allocation35_spill] sm:$0xff] %v15756_v3 }
 0xc43   : > { %7199 = vmatpush1.bf16.msra.mxu0 %v17931_v34  ;;  %v15760_v34 = vld [vmem:[%s11906_s6 + $0x2a4] ss:$24 sps:$4 sm:$0xff]  }
 0xc44   : > { %7240 = vmatpush1.bf16.msra.mxu1 %v17932_v32  ;;  %7200 = vmatprep.subr.bf16.mxu0 %v17933_v13  ;;  %17955 = vst [vmem:[#allocation36_spill] sm:$0xff] %v15760_v34  ;;  %v15764_v32 = vld [vmem:[%s11906_s6 + $0x5a4] ss:$24 sps:$4 sm:$0xff]   ;;  %v15768_v13 = vld [vmem:[%s11906_s6 + $0x2a0] ss:$24 sps:$4 sm:$0xff]  }
 0xc45   : > { %7241 = vmatprep.subr.bf16.mxu1 %v17934_v16  ;;  %17956 = vst [vmem:[#allocation37_spill] sm:$0xff] %v15764_v32  ;;  %17957 = vst [vmem:[#allocation38_spill] sm:$0xff] %v15768_v13  ;;  %v15772_v16 = vld [vmem:[%s11906_s6 + $0x5a0] ss:$24 sps:$4 sm:$0xff]  }
 0xc46   : > { %17958 = vst [vmem:[#allocation39_spill] sm:$0xff] %v15772_v16 }
 0xc47   : > { %7201 = vmatpush1.bf16.msra.mxu0 %v17935_v33  ;;  %v15776_v33 = vld [vmem:[%s11906_s6 + $0x2d4] ss:$24 sps:$4 sm:$0xff]  }
 0xc48   : > { %7242 = vmatpush1.bf16.msra.mxu1 %v17936_v60  ;;  %7202 = vmatprep.subr.bf16.mxu0 %v17937_v31  ;;  %17959 = vst [vmem:[#allocation40_spill] sm:$0xff] %v15776_v33  ;;  %v15780_v60 = vld [vmem:[%s11906_s6 + $0x5d4] ss:$24 sps:$4 sm:$0xff]   ;;  %v15784_v31 = vld [vmem:[%s11906_s6 + $0x2d0] ss:$24 sps:$4 sm:$0xff]  }
 0xc49   : > { %7243 = vmatprep.subr.bf16.mxu1 %v17938_v43  ;;  %17960 = vst [vmem:[#allocation41_spill] sm:$0xff] %v15780_v60  ;;  %17961 = vst [vmem:[#allocation42_spill] sm:$0xff] %v15784_v31  ;;  %v15788_v43 = vld [vmem:[%s11906_s6 + $0x5d0] ss:$24 sps:$4 sm:$0xff]  }
 0xc4a   : > { %17962 = vst [vmem:[#allocation43_spill] sm:$0xff] %v15788_v43 }
 0xc4b   : > { %7203 = vmatpush1.bf16.msra.mxu0 %v17939_v0  ;;  %v15792_v0 = vld [vmem:[%s11906_s6 + $0xc] ss:$24 sps:$4 sm:$0xff]  }
 0xc4c   : > { %7244 = vmatpush1.bf16.msra.mxu1 %v17940_v42  ;;  %7204 = vmatprep.subr.bf16.mxu0 %v17941_v29  ;;  %17963 = vst [vmem:[#allocation44_spill] sm:$0xff] %v15792_v0  ;;  %v15796_v42 = vld [vmem:[%s11906_s6 + $0x30c] ss:$24 sps:$4 sm:$0xff]  }
 0xc4d   : > { %7245 = vmatprep.subr.bf16.mxu1 %v17942_v46  ;;  %17964 = vst [vmem:[#allocation45_spill] sm:$0xff] %v15796_v42 }
 0xc4f   : > { %7205 = vmatpush1.bf16.msra.mxu0 %v17943_v35 }
 0xc50   : > { %7246 = vmatpush1.bf16.msra.mxu1 %v17944_v9  ;;  %7206 = vmatprep.subr.bf16.mxu0 %v17945_v58 }
 0xc51   : > { %7247 = vmatprep.subr.bf16.mxu1 %v17946_v57 }
 0xc53   : > { %7207 = vmatpush1.bf16.msra.mxu0 %v15672_v36 }
 0xc54   : > { %7248 = vmatpush1.bf16.msra.mxu1 %v15676_v7  ;;  %7208 = vmatprep.subr.bf16.mxu0 %v15680_v1 }
 0xc55   : > { %7249 = vmatprep.subr.bf16.mxu1 %v15684_v23 }
 0xc57   : > { %7209 = vmatpush1.bf16.msra.mxu0 %v15688_v52 }
 0xc58   : > { %7250 = vmatpush1.bf16.msra.mxu1 %v15692_v47  ;;  %7210 = vmatprep.subr.bf16.mxu0 %v15696_v15 }
 0xc59   : > { %7251 = vmatprep.subr.bf16.mxu1 %v15700_v25 }
 0xc5b   : > { %7211 = vmatpush1.bf16.msra.mxu0 %v15704_v44 }
 0xc5c   : > { %7252 = vmatpush1.bf16.msra.mxu1 %v15708_v17  ;;  %7212 = vmatprep.subr.bf16.mxu0 %v15712_v21 }
 0xc5d   : > { %7253 = vmatprep.subr.bf16.mxu1 %v15716_v11 }
 0xc5f   : > { %7213 = vmatpush1.bf16.msra.mxu0 %v15720_v38 }
 0xc60   : > { %7254 = vmatpush1.bf16.msra.mxu1 %v15724_v10  ;;  %7214 = vmatprep.subr.bf16.mxu0 %v15728_v14 }
 0xc61   : > { %7255 = vmatprep.subr.bf16.mxu1 %v15732_v41 }
 0xc63   : > { %7215 = vmatpush1.bf16.msra.mxu0 %v15736_v24  ;;  %v6786_v24 = vld [vmem:[#allocation3 + $0x30] sm:$0x30] }
 0xc64   : > { %7256 = vmatpush1.bf16.msra.mxu1 %v15740_v6  ;;  %7216 = vmatprep.subr.bf16.mxu0 %v15744_v49  ;;  %v6780_v6 = vld [vmem:[#allocation3 + $0x60] sm:$0xc] }
 0xc65   : > { %7257 = vmatprep.subr.bf16.mxu1 %v15748_v12  ;;  %v6798_v41 = vrot.slane %v6780_v6, 2 }
 0xc67   : > { %7217 = vmatpush1.bf16.msra.mxu0 %v15752_v63 }
 0xc68   : > { %7258 = vmatpush1.bf16.msra.mxu1 %v15756_v3  ;;  %7218 = vmatprep.subr.bf16.mxu0 %v15760_v34 }
 0xc69   : > { %7259 = vmatprep.subr.bf16.mxu1 %v15764_v32 }
 0xc6b   : > { %7219 = vmatpush1.bf16.msra.mxu0 %v15768_v13 }
 0xc6c   : > { %7260 = vmatpush1.bf16.msra.mxu1 %v15772_v16  ;;  %7220 = vmatprep.subr.bf16.mxu0 %v15776_v33 }
 0xc6d   : > { %7261 = vmatprep.subr.bf16.mxu1 %v15780_v60 }
 0xc6f   : > { %7221 = vmatpush1.bf16.msra.mxu0 %v15784_v31 }
 0xc70   : > { %7262 = vmatpush1.bf16.msra.mxu1 %v15788_v43  ;;  %7272 = vmatprep.subr.bf16.mxu0 %v15792_v0 }
 0xc71   : > { %7313 = vmatprep.subr.bf16.mxu1 %v15796_v42 }
 0xc85   : > { %v6876_v29 = vpop.f32.mrb[60].mxu0  ;;  %v6917_v46 = vpop.f32.mrb[60].mxu1 }
 0xc86   : > { %v6918_v35 = vadd.f32 %v6917_v46, %v6876_v29  ;;  %v6878_v9 = vpop.f32.mrb[61].mxu0  ;;  %v6919_v58 = vpop.f32.mrb[61].mxu1  ;;  %v6781_v29 = vld [vmem:[#allocation3 + $0x68] sm:$0xc]  ;;  %v6787_v46 = vld [vmem:[#allocation3 + $0x38] sm:$0x30] }
 0xc87   : > { %v6920_v57 = vadd.f32 %v6919_v58, %v6878_v9  ;;  %v6880_v60 = vpop.f32.mrb[62].mxu0  ;;  %v6921_v31 = vpop.f32.mrb[62].mxu1  ;;  %v6816_v9 = vrot.slane %v6786_v24, 2 }
 0xc88   : > { %v6881_v33 = vpop.f32.mrb[63].mxu0  ;;  %v6922_v16 = vpop.f32.mrb[63].mxu1  ;;  %v6799_v60 = vrot.slane %v6781_v29, 2  ;;  %v6817_v31 = vrot.slane %v6787_v46, 2 }
 0xc89   : > { %v6828_v16 = vsel %vm4036_vm1, %v6798_v41, %v6816_v9 }
 0xc8a   : > { %v6829_v33 = vsel %vm4036_vm1, %v6799_v60, %v6817_v31 }
 0xcc5   : > { %v6958_v13 = vpop.f32.mrb[64].mxu0  ;;  %v6999_v43 = vpop.f32.mrb[64].mxu1 }
 0xcc6   : > { %v7000_v32 = vadd.f32 %v6999_v43, %v6958_v13  ;;  %v6960_v34 = vpop.f32.mrb[65].mxu0  ;;  %v7001_v3 = vpop.f32.mrb[65].mxu1  ;;  %v7088_v13 = vadd.f32 %v6918_v35, %v6828_v16  ;;  %v7089_v43 = vadd.f32 %v6920_v57, %v6829_v33 }
 0xcc7   : > { %v7002_v0 = vadd.f32 %v7001_v3, %v6960_v34  ;;  %v6962_v63 = vpop.f32.mrb[66].mxu0  ;;  %v7003_v12 = vpop.f32.mrb[66].mxu1  ;;  %v6789_v34 = vld [vmem:[#allocation3 + $0x48] sm:$0x30] }
 0xcc8   : > { %v6963_v49 = vpop.f32.mrb[67].mxu0  ;;  %v7004_v42 = vpop.f32.mrb[67].mxu1  ;;  %v9179_v58 = vmul.f32 -1.442695, %v7088_v13  ;;  %v9180_v3 = vmul.f32 -1.442695, %v7089_v43 }
 0xcc9   : > { %v6782_v49 = vld [vmem:[#allocation3 + $0x70] sm:$0xc]  ;;  %v6788_v12 = vld [vmem:[#allocation3 + $0x40] sm:$0x30]  ;;  %v6783_v63 = vld [vmem:[#allocation3 + $0x78] sm:$0xc] }
 0xcca   : > { %10503 = vpow2.f32 %v9179_v58  ;;  %v6800_v42 = vrot.slane %v6782_v49, 2  ;;  %v6818_v14 = vrot.slane %v6788_v12, 2  ;;  %v6801_v6 = vrot.slane %v6783_v63, 2  ;;  %v6784_v13 = vld [vmem:[#allocation3 + $0x80] sm:$0xc] }
 0xccb   : > { %10505 = vpow2.f32 %v9180_v3  ;;  %v6819_v24 = vrot.slane %v6789_v34, 2  ;;  %v6790_v43 = vld [vmem:[#allocation3 + $0x50] sm:$0x30]  ;;  %v6785_v58 = vld [vmem:[#allocation3 + $0x88] sm:$0xc] }
 0xccc   : > { %v6830_v29 = vsel %vm4036_vm1, %v6800_v42, %v6818_v14  ;;  %v6791_v3 = vld [vmem:[#allocation3 + $0x58] sm:$0x30]  ;;  %v6802_v14 = vrot.slane %v6784_v13, 2  ;;  %v6820_v12 = vrot.slane %v6790_v43, 2 }
 0xccd   : > { %v6831_v41 = vsel %vm4036_vm1, %v6801_v6, %v6819_v24  ;;  %v7102_v35 = vadd.f32 %v7000_v32, %v6830_v29  ;;  %v6803_v32 = vrot.slane %v6785_v58, 2 }
 0xcce   : > { %v7103_v57 = vadd.f32 %v7002_v0, %v6831_v41  ;;  %v6821_v0 = vrot.slane %v6791_v3, 2 }
 0xccf   : > { %v9181_v16 = vmul.f32 -1.442695, %v7102_v35 }
 0xcd0   : > { %v9182_v33 = vmul.f32 -1.442695, %v7103_v57  ;;  %v6833_v58 = vsel %vm4036_vm1, %v6803_v32, %v6821_v0 }
 0xcd4   : > { %v10504_v46 = vpop.eup %10503 }
 0xcd5   : > { %v10506_v9 = vpop.eup %10505  ;;  %v7096_v60 = vadd.f32 1.0, %v10504_v46 }
 0xcd6   : > { %v7097_v31 = vadd.f32 1.0, %v10506_v9 }
 0xcd7   : > { %10507 = vrcp.f32 %v7096_v60 }
 0xcd8   : > { %10509 = vrcp.f32 %v7097_v31 }
 0xcd9   : > { %10511 = vpow2.f32 %v9181_v16  ;;  %v6832_v16 = vsel %vm4036_vm1, %v6802_v14, %v6820_v12 }
 0xcda   : > { %10513 = vpow2.f32 %v9182_v33 }
 0xce1   : > { %v10508_v29 = vpop.eup %10507 }
 0xce2   : > { %v10510_v35 = vpop.eup %10509 }
 0xce3   : > { %v10512_v31 = vpop.eup %10511 }
 0xce4   : > { %v10514_v13 = vpop.eup %10513 }
 0xd05   : > { %v7040_v49 = vpop.f32.mrb[68].mxu0 }
 0xd06   : > { %v7081_v63 = vpop.f32.mrb[68].mxu1  ;;  %v7042_v34 = vpop.f32.mrb[69].mxu0 }
 0xd07   : > { %v7082_v42 = vadd.f32 %v7081_v63, %v7040_v49  ;;  %v7083_v6 = vpop.f32.mrb[69].mxu1  ;;  %v7044_v24 = vpop.f32.mrb[70].mxu0  ;;  %v7110_v49 = vadd.f32 1.0, %v10512_v31 }
 0xd08   : > { %v7084_v41 = vadd.f32 %v7083_v6, %v7042_v34  ;;  %v7085_v46 = vpop.f32.mrb[70].mxu1  ;;  %v7045_v9 = vpop.f32.mrb[71].mxu0  ;;  %v7111_v24 = vadd.f32 1.0, %v10514_v13  ;;  %v15952_v13 = vld [vmem:[%s11906_s6 + $0x21c] ss:$24 sps:$4 sm:$0xff]  }
 0xd09   : > { %v7116_v57 = vadd.f32 %v7082_v42, %v13215_v39  ;;  %v7086_v60 = vpop.f32.mrb[71].mxu1 }
 0xd0a   : > { %v7117_v33 = vadd.f32 %v7084_v41, %v13218_v45 }
 0xd0b   : > { %v7118_v43 = vmul.f32 %v10508_v29, %v7116_v57 }
 0xd0c   : > { %v7119_v3 = vmul.f32 %v10510_v35, %v7117_v33  ;;  %v15948_v33 = vld [vmem:[%s11906_s6 + $0x4e8] ss:$24 sps:$4 sm:$0xff]  }
 0xd0d   : > { %v7120_v63 = vadd.f32 %v7118_v43, %v6832_v16  ;;  %v15944_v16 = vld [vmem:[%s11906_s6 + $0x1e8] ss:$24 sps:$4 sm:$0xff]   ;;  %v15956_v43 = vld [vmem:[%s11906_s6 + $0x51c] ss:$24 sps:$4 sm:$0xff]  }
 0xd0e   : > { %v7121_v34 = vadd.f32 %v7119_v3, %v6833_v58  ;;  %v15960_v58 = vld [vmem:[%s11906_s6 + $0x218] ss:$24 sps:$4 sm:$0xff]  }
 0xd0f   : > { %10515 = vtanh.f32 %v7120_v63  ;;  %v15964_v3 = vld [vmem:[%s11906_s6 + $0x518] ss:$24 sps:$4 sm:$0xff]   ;;  %v15972_v63 = vld [vmem:[%s11906_s6 + $0x54c] ss:$24 sps:$4 sm:$0xff]  }
 0xd10   : > { %10517 = vtanh.f32 %v7121_v34  ;;  %v15980_v34 = vld [vmem:[%s11906_s6 + $0x548] ss:$24 sps:$4 sm:$0xff]  }
 0xd11   : > { %10519 = vrcp.f32 %v7110_v49  ;;  %v15968_v49 = vld [vmem:[%s11906_s6 + $0x24c] ss:$24 sps:$4 sm:$0xff]  }
 0xd12   : > { %10521 = vrcp.f32 %v7111_v24  ;;  %v15976_v24 = vld [vmem:[%s11906_s6 + $0x248] ss:$24 sps:$4 sm:$0xff]  }
 0xd19   : > { %v10516_v42 = vpop.eup %10515 }
 0xd1a   : > { %v10518_v6 = vpop.eup %10517  ;;  %v7124_v46 = vsub.f32 %v15399_v61, %v10516_v42 }
 0xd1b   : > { %v10520_v14 = vpop.eup %10519  ;;  %v7125_v12 = vsub.f32 %v15401_v20, %v10518_v6 }
 0xd1c   : > { %v10522_v41 = vpop.eup %10521  ;;  %v7126_v29 = vmul.f32 %v10520_v14, %v7124_v46  ;;  %v15992_v46 = vld [vmem:[%s11906_s6 + $0x278] ss:$24 sps:$4 sm:$0xff]  }
 0xd1d   : > { %v7127_v9 = vmul.f32 %v10522_v41, %v7125_v12  ;;  %v15996_v14 = vld [vmem:[%s11906_s6 + $0x578] ss:$24 sps:$4 sm:$0xff]   ;;  %v16000_v12 = vld [vmem:[%s11906_s6 + $0x2ac] ss:$24 sps:$4 sm:$0xff]  }
 0xd1e   : > { %v15809_v32 = vadd.f32 %v10516_v42, %v7126_v29  ;;  %v15984_v42 = vld [vmem:[%s11906_s6 + $0x27c] ss:$24 sps:$4 sm:$0xff]   ;;  %17965 = vst [vmem:[#allocation46_spill] sm:$0xff] %v16000_v12  ;;  %v16004_v41 = vld [vmem:[%s11906_s6 + $0x5ac] ss:$24 sps:$4 sm:$0xff]  }
 0xd1f   : > { %v15811_v0 = vadd.f32 %v10518_v6, %v7127_v9  ;;  %v15988_v6 = vld [vmem:[%s11906_s6 + $0x57c] ss:$24 sps:$4 sm:$0xff]   ;;  %17966 = vst [vmem:[#allocation47_spill] sm:$0xff] %v16004_v41  ;;  %v16008_v29 = vld [vmem:[%s11906_s6 + $0x2a8] ss:$24 sps:$4 sm:$0xff]  }
 0xd20   : > { %v15815_v35 = vpack.c.bf16 %v15809_v32, %v15809_v32  ;;  %17967 = vst [vmem:[#allocation48_spill] sm:$0xff] %v16008_v29  ;;  %v16012_v9 = vld [vmem:[%s11906_s6 + $0x5a8] ss:$24 sps:$4 sm:$0xff]  }
 0xd21   : > { %v15819_v57 = vpack.c.bf16 %v15811_v0, %v15811_v0  ;;  %17968 = vst [vmem:[#allocation49_spill] sm:$0xff] %v16012_v9 }
 0xd22   : > { %v7134_v61 = vrot.slane %v15815_v35, 3  ;;  %v7140_v60 = vrot.slane %v15815_v35, 7 }
 0xd23   : > { %v7135_v20 = vrot.slane %v15819_v57, 3  ;;  %v7141_v31 = vrot.slane %v15819_v57, 7  ;;  %9185 = vmatprep.mubr.msk.bf16.mxu0 %vm13227_vm6, %v15819_v57  ;;  %9191 = vmatprep.mubr.msk.bf16.mxu1 %vm13237_vm7, %v15819_v57 }
 0xd24   : > { %7138 = vst [vmem:[#allocation2] sm:$0x20] %v7134_v61  ;;  %7144 = vst [vmem:[#allocation2 + $0x10] sm:$0x4] %v7140_v60  ;;  %9188 = vmatmul.mubr.msk.bf16.vlgmr.msra.gmra.mrb[72].mxu0 %vm13227_vm6, %v15815_v35  ;;  %9194 = vmatmul.mubr.msk.bf16.vlgmr.msra.gmra.mrb[72].mxu1 %vm13237_vm7, %v15815_v35  ;;  %v16016_v61 = vld [vmem:[%s11906_s6 + $0x2dc] ss:$24 sps:$4 sm:$0xff]  }
 0xd25   : > { %7139 = vst [vmem:[#allocation2 + $0x8] sm:$0x20] %v7135_v20  ;;  %7145 = vst [vmem:[#allocation2 + $0x18] sm:$0x4] %v7141_v31  ;;  %7273 = vmatpush1.bf16.msra.mxu0 %v15428_v4  ;;  %7314 = vmatpush1.bf16.msra.mxu1 %v15432_v5  ;;  %v15864_v4 = vld [vmem:[%s11906_s6 + $0xf8] ss:$24 sps:$4 sm:$0xff]  }
 0xd26   : > { %9197 = vmatprep.mubr.msk.bf16.mxu0 %vm13227_vm6, %v15819_v57  ;;  %9203 = vmatprep.mubr.msk.bf16.mxu1 %vm13237_vm7, %v15819_v57  ;;  %v15868_v5 = vld [vmem:[%s11906_s6 + $0x3f8] ss:$24 sps:$4 sm:$0xff]   ;;  %17969 = vst [vmem:[#allocation50_spill] sm:$0xff] %v16016_v61  ;;  %v16020_v60 = vld [vmem:[%s11906_s6 + $0x5dc] ss:$24 sps:$4 sm:$0xff]  }
 0xd27   : > { %7274 = vmatprep.subr.bf16.mxu0 %v15442_v37  ;;  %7315 = vmatprep.subr.bf16.mxu1 %v15446_v53  ;;  %v15872_v37 = vld [vmem:[%s11906_s6 + $0x12c] ss:$24 sps:$4 sm:$0xff]   ;;  %17970 = vst [vmem:[#allocation51_spill] sm:$0xff] %v16020_v60  ;;  %v16024_v20 = vld [vmem:[%s11906_s6 + $0x2d8] ss:$24 sps:$4 sm:$0xff]  }
 0xd28   : > { %v15876_v53 = vld [vmem:[%s11906_s6 + $0x42c] ss:$24 sps:$4 sm:$0xff]   ;;  %17971 = vst [vmem:[#allocation52_spill] sm:$0xff] %v16024_v20  ;;  %v16028_v31 = vld [vmem:[%s11906_s6 + $0x5d8] ss:$24 sps:$4 sm:$0xff]  }
 0xd29   : > { %7275 = vmatpush1.bf16.msra.mxu0 %v15450_v62  ;;  %7316 = vmatpush1.bf16.msra.mxu1 %v15454_v54  ;;  %v15880_v62 = vld [vmem:[%s11906_s6 + $0x128] ss:$24 sps:$4 sm:$0xff]   ;;  %17972 = vst [vmem:[#allocation53_spill] sm:$0xff] %v16028_v31 }
 0xd2a   : > { %7276 = vmatprep.subr.bf16.mxu0 %v15458_v56  ;;  %7317 = vmatprep.subr.bf16.mxu1 %v15462_v8  ;;  %v15884_v54 = vld [vmem:[%s11906_s6 + $0x428] ss:$24 sps:$4 sm:$0xff]   ;;  %v15888_v56 = vld [vmem:[%s11906_s6 + $0x15c] ss:$24 sps:$4 sm:$0xff]  }
 0xd2b   : > { %v15892_v8 = vld [vmem:[%s11906_s6 + $0x45c] ss:$24 sps:$4 sm:$0xff]  }
 0xd2d   : > { %7277 = vmatpush1.bf16.msra.mxu0 %v15466_v28  ;;  %7318 = vmatpush1.bf16.msra.mxu1 %v15470_v50  ;;  %v15896_v28 = vld [vmem:[%s11906_s6 + $0x158] ss:$24 sps:$4 sm:$0xff]  }
 0xd2e   : > { %7278 = vmatprep.subr.bf16.mxu0 %v15474_v18  ;;  %7319 = vmatprep.subr.bf16.mxu1 %v15478_v19  ;;  %v15900_v50 = vld [vmem:[%s11906_s6 + $0x458] ss:$24 sps:$4 sm:$0xff]   ;;  %v15904_v18 = vld [vmem:[%s11906_s6 + $0x18c] ss:$24 sps:$4 sm:$0xff]  }
 0xd2f   : > { %v15908_v19 = vld [vmem:[%s11906_s6 + $0x48c] ss:$24 sps:$4 sm:$0xff]  }
 0xd31   : > { %7279 = vmatpush1.bf16.msra.mxu0 %v15482_v55  ;;  %7320 = vmatpush1.bf16.msra.mxu1 %v15486_v27  ;;  %v15912_v55 = vld [vmem:[%s11906_s6 + $0x188] ss:$24 sps:$4 sm:$0xff]  }
 0xd32   : > { %7280 = vmatprep.subr.bf16.mxu0 %v15490_v30  ;;  %7321 = vmatprep.subr.bf16.mxu1 %v15494_v22  ;;  %v15916_v27 = vld [vmem:[%s11906_s6 + $0x488] ss:$24 sps:$4 sm:$0xff]   ;;  %v15920_v30 = vld [vmem:[%s11906_s6 + $0x1bc] ss:$24 sps:$4 sm:$0xff]  }
 0xd33   : > { %v15924_v22 = vld [vmem:[%s11906_s6 + $0x4bc] ss:$24 sps:$4 sm:$0xff]  }
 0xd35   : > { %7281 = vmatpush1.bf16.msra.mxu0 %v15498_v2  ;;  %7322 = vmatpush1.bf16.msra.mxu1 %v15502_v26  ;;  %v15928_v2 = vld [vmem:[%s11906_s6 + $0x1b8] ss:$24 sps:$4 sm:$0xff]  }
 0xd36   : > { %7282 = vmatprep.subr.bf16.mxu0 %v15506_v40  ;;  %7323 = vmatprep.subr.bf16.mxu1 %v15510_v59  ;;  %v15932_v26 = vld [vmem:[%s11906_s6 + $0x4b8] ss:$24 sps:$4 sm:$0xff]   ;;  %v15936_v40 = vld [vmem:[%s11906_s6 + $0x1ec] ss:$24 sps:$4 sm:$0xff]  }
 0xd37   : > { %v15940_v59 = vld [vmem:[%s11906_s6 + $0x4ec] ss:$24 sps:$4 sm:$0xff]  }
 0xd39   : > { %7283 = vmatpush1.bf16.msra.mxu0 %v15864_v4  ;;  %7324 = vmatpush1.bf16.msra.mxu1 %v15868_v5 }
 0xd3a   : > { %7284 = vmatprep.subr.bf16.mxu0 %v15872_v37  ;;  %7325 = vmatprep.subr.bf16.mxu1 %v15876_v53 }
 0xd3d   : > { %7285 = vmatpush1.bf16.msra.mxu0 %v15880_v62  ;;  %7326 = vmatpush1.bf16.msra.mxu1 %v15884_v54 }
 0xd3e   : > { %7286 = vmatprep.subr.bf16.mxu0 %v15888_v56  ;;  %7327 = vmatprep.subr.bf16.mxu1 %v15892_v8 }
 0xd41   : > { %7287 = vmatpush1.bf16.msra.mxu0 %v15896_v28  ;;  %7328 = vmatpush1.bf16.msra.mxu1 %v15900_v50 }
 0xd42   : > { %7288 = vmatprep.subr.bf16.mxu0 %v15904_v18  ;;  %7329 = vmatprep.subr.bf16.mxu1 %v15908_v19 }
 0xd45   : > { %7289 = vmatpush1.bf16.msra.mxu0 %v15912_v55  ;;  %7330 = vmatpush1.bf16.msra.mxu1 %v15916_v27 }
 0xd46   : > { %7290 = vmatprep.subr.bf16.mxu0 %v15920_v30  ;;  %7331 = vmatprep.subr.bf16.mxu1 %v15924_v22 }
 0xd49   : > { %7291 = vmatpush1.bf16.msra.mxu0 %v15928_v2  ;;  %7332 = vmatpush1.bf16.msra.mxu1 %v15932_v26 }
 0xd4a   : > { %7292 = vmatprep.subr.bf16.mxu0 %v15936_v40  ;;  %7333 = vmatprep.subr.bf16.mxu1 %v15940_v59 }
 0xd4d   : > { %7293 = vmatpush1.bf16.msra.mxu0 %v15944_v16  ;;  %7334 = vmatpush1.bf16.msra.mxu1 %v15948_v33 }
 0xd4e   : > { %7294 = vmatprep.subr.bf16.mxu0 %v15952_v13  ;;  %7335 = vmatprep.subr.bf16.mxu1 %v15956_v43 }
 0xd51   : > { %7295 = vmatpush1.bf16.msra.mxu0 %v15960_v58  ;;  %7336 = vmatpush1.bf16.msra.mxu1 %v15964_v3 }
 0xd52   : > { %7296 = vmatprep.subr.bf16.mxu0 %v15968_v49  ;;  %7337 = vmatprep.subr.bf16.mxu1 %v15972_v63 }
 0xd55   : > { %7297 = vmatpush1.bf16.msra.mxu0 %v15976_v24  ;;  %7338 = vmatpush1.bf16.msra.mxu1 %v15980_v34 }
 0xd56   : > { %7298 = vmatprep.subr.bf16.mxu0 %v15984_v42  ;;  %7339 = vmatprep.subr.bf16.mxu1 %v15988_v6 }
 0xd59   : > { %7299 = vmatpush1.bf16.msra.mxu0 %v15992_v46  ;;  %7340 = vmatpush1.bf16.msra.mxu1 %v15996_v14 }
 0xd5a   : > { %7300 = vmatprep.subr.bf16.mxu0 %v16000_v12  ;;  %7341 = vmatprep.subr.bf16.mxu1 %v16004_v41  ;;  %v11168_v41 = vld [vmem:[%s11906_s6 + $0x454] ss:$24 sps:$4 sm:$0xff]   ;;  %v11171_v12 = vld [vmem:[%s11906_s6 + $0x184] ss:$24 sps:$4 sm:$0xff]  }
 0xd5d   : > { %7301 = vmatpush1.bf16.msra.mxu0 %v16008_v29  ;;  %7342 = vmatpush1.bf16.msra.mxu1 %v16012_v9  ;;  %v16032_v9 = vld [vmem:[%s11906_s6 + $0x14] ss:$24 sps:$4 sm:$0xff]   ;;  %v11147_v29 = vld [vmem:[%s11906_s6 + $0x64] ss:$24 sps:$4 sm:$0xff]  }
 0xd5e   : > { %7302 = vmatprep.subr.bf16.mxu0 %v16016_v61  ;;  %7343 = vmatprep.subr.bf16.mxu1 %v16020_v60  ;;  %17973 = vst [vmem:[#allocation54_spill] sm:$0xff] %v16032_v9  ;;  %v16036_v61 = vld [vmem:[%s11906_s6 + $0x314] ss:$24 sps:$4 sm:$0xff]   ;;  %v11140_v60 = vld [vmem:[%s11906_s6 + $0x304] ss:$24 sps:$4 sm:$0xff]  }
 0xd5f   : > { %17974 = vst [vmem:[#allocation55_spill] sm:$0xff] %v16036_v61 }
 0xd61   : > { %7303 = vmatpush1.bf16.msra.mxu0 %v16024_v20  ;;  %7344 = vmatpush1.bf16.msra.mxu1 %v16028_v31  ;;  %v16046_v31 = vld [vmem:[%s11906_s6 + $0x10] ss:$24 sps:$4 sm:$0xff]   ;;  %v16068_v20 = vld [vmem:[%s11906_s6 + $0x40] ss:$24 sps:$4 sm:$0xff]  }
 0xd62   : > { %7354 = vmatprep.subr.bf16.mxu0 %v16032_v9  ;;  %7395 = vmatprep.subr.bf16.mxu1 %v16036_v61  ;;  %17975 = vst [vmem:[#allocation56_spill] sm:$0xff] %v16046_v31  ;;  %v16053_v61 = vld [vmem:[%s11906_s6 + $0x310] ss:$24 sps:$4 sm:$0xff]   ;;  %v16060_v9 = vld [vmem:[%s11906_s6 + $0x44] ss:$24 sps:$4 sm:$0xff]   ;;  %17979 = vst [vmem:[#allocation60_spill] sm:$0xff] %v16068_v20 }
 0xd63   : > { %17976 = vst [vmem:[#allocation57_spill] sm:$0xff] %v16053_v61  ;;  %17977 = vst [vmem:[#allocation58_spill] sm:$0xff] %v16060_v9 }
 0xd64   : > { %9200 = vmatmul.mubr.msk.bf16.vlgmr.msra.gmra.mrb[76].mxu0 %vm13227_vm6, %v15815_v35  ;;  %9206 = vmatmul.mubr.msk.bf16.vlgmr.msra.gmra.mrb[76].mxu1 %vm13237_vm7, %v15815_v35 }
 0xd65   : > { %7355 = vmatpush1.bf16.msra.mxu0 %v16046_v31  ;;  %9209 = vmatprep.mubr.msk.bf16.mxu0 %vm13227_vm6, %v15819_v57  ;;  %v16064_v31 = vld [vmem:[%s11906_s6 + $0x344] ss:$24 sps:$4 sm:$0xff]  }
 0xd66   : > { %7396 = vmatpush1.bf16.msra.mxu1 %v16053_v61  ;;  %9215 = vmatprep.mubr.msk.bf16.mxu1 %vm13237_vm7, %v15819_v57  ;;  %17978 = vst [vmem:[#allocation59_spill] sm:$0xff] %v16064_v31  ;;  %v16072_v61 = vld [vmem:[%s11906_s6 + $0x340] ss:$24 sps:$4 sm:$0xff]   ;;  %v16076_v57 = vld [vmem:[%s11906_s6 + $0x74] ss:$24 sps:$4 sm:$0xff]  }
 0xd67   : > { %7356 = vmatprep.subr.bf16.mxu0 %v16060_v9  ;;  %7397 = vmatprep.subr.bf16.mxu1 %v16064_v31  ;;  %17980 = vst [vmem:[#allocation61_spill] sm:$0xff] %v16072_v61  ;;  %17981 = vst [vmem:[#allocation62_spill] sm:$0xff] %v16076_v57  ;;  %v16080_v9 = vld [vmem:[%s11906_s6 + $0x374] ss:$24 sps:$4 sm:$0xff]   ;;  %v16084_v31 = vld [vmem:[%s11906_s6 + $0x70] ss:$24 sps:$4 sm:$0xff]  }
 0xd68   : > { %17982 = vst [vmem:[#allocation63_spill] sm:$0xff] %v16080_v9  ;;  %17983 = vst [vmem:[#allocation64_spill] sm:$0xff] %v16084_v31 }
 0xd69   : > { %7357 = vmatpush1.bf16.msra.mxu0 %v16068_v20  ;;  %v16088_v20 = vld [vmem:[%s11906_s6 + $0x370] ss:$24 sps:$4 sm:$0xff]  }
 0xd6a   : > { %7398 = vmatpush1.bf16.msra.mxu1 %v16072_v61  ;;  %7358 = vmatprep.subr.bf16.mxu0 %v16076_v57  ;;  %17984 = vst [vmem:[#allocation65_spill] sm:$0xff] %v16088_v20  ;;  %v16092_v61 = vld [vmem:[%s11906_s6 + $0xa4] ss:$24 sps:$4 sm:$0xff]  }
 0xd6b   : > { %7399 = vmatprep.subr.bf16.mxu1 %v16080_v9  ;;  %17985 = vst [vmem:[#allocation66_spill] sm:$0xff] %v16092_v61  ;;  %v16096_v57 = vld [vmem:[%s11906_s6 + $0x3a4] ss:$24 sps:$4 sm:$0xff]   ;;  %v16100_v9 = vld [vmem:[%s11906_s6 + $0xa0] ss:$24 sps:$4 sm:$0xff]  }
 0xd6c   : > { %17986 = vst [vmem:[#allocation67_spill] sm:$0xff] %v16096_v57  ;;  %17987 = vst [vmem:[#allocation68_spill] sm:$0xff] %v16100_v9 }
 0xd6d   : > { %7359 = vmatpush1.bf16.msra.mxu0 %v16084_v31  ;;  %v16104_v31 = vld [vmem:[%s11906_s6 + $0x3a0] ss:$24 sps:$4 sm:$0xff]  }
 0xd6e   : > { %7400 = vmatpush1.bf16.msra.mxu1 %v16088_v20  ;;  %7360 = vmatprep.subr.bf16.mxu0 %v16092_v61  ;;  %17988 = vst [vmem:[#allocation69_spill] sm:$0xff] %v16104_v31  ;;  %v16108_v20 = vld [vmem:[%s11906_s6 + $0xd4] ss:$24 sps:$4 sm:$0xff]  }
 0xd6f   : > { %7401 = vmatprep.subr.bf16.mxu1 %v16096_v57  ;;  %17989 = vst [vmem:[#allocation70_spill] sm:$0xff] %v16108_v20  ;;  %v16112_v61 = vld [vmem:[%s11906_s6 + $0x3d4] ss:$24 sps:$4 sm:$0xff]   ;;  %v16116_v57 = vld [vmem:[%s11906_s6 + $0xd0] ss:$24 sps:$4 sm:$0xff]  }
 0xd70   : > { %17990 = vst [vmem:[#allocation71_spill] sm:$0xff] %v16112_v61  ;;  %17991 = vst [vmem:[#allocation72_spill] sm:$0xff] %v16116_v57 }
 0xd71   : > { %7361 = vmatpush1.bf16.msra.mxu0 %v16100_v9  ;;  %v16120_v9 = vld [vmem:[%s11906_s6 + $0x3d0] ss:$24 sps:$4 sm:$0xff]  }
 0xd72   : > { %7402 = vmatpush1.bf16.msra.mxu1 %v16104_v31  ;;  %7362 = vmatprep.subr.bf16.mxu0 %v16108_v20  ;;  %17992 = vst [vmem:[#allocation73_spill] sm:$0xff] %v16120_v9  ;;  %v16124_v31 = vld [vmem:[%s11906_s6 + $0x104] ss:$24 sps:$4 sm:$0xff]  }
 0xd73   : > { %7403 = vmatprep.subr.bf16.mxu1 %v16112_v61  ;;  %17993 = vst [vmem:[#allocation74_spill] sm:$0xff] %v16124_v31  ;;  %v16128_v20 = vld [vmem:[%s11906_s6 + $0x404] ss:$24 sps:$4 sm:$0xff]   ;;  %v16132_v61 = vld [vmem:[%s11906_s6 + $0x100] ss:$24 sps:$4 sm:$0xff]  }
 0xd74   : > { %17994 = vst [vmem:[#allocation75_spill] sm:$0xff] %v16128_v20  ;;  %17995 = vst [vmem:[#allocation76_spill] sm:$0xff] %v16132_v61 }
 0xd75   : > { %7363 = vmatpush1.bf16.msra.mxu0 %v16116_v57  ;;  %v16136_v57 = vld [vmem:[%s11906_s6 + $0x400] ss:$24 sps:$4 sm:$0xff]  }
 0xd76   : > { %7404 = vmatpush1.bf16.msra.mxu1 %v16120_v9  ;;  %7364 = vmatprep.subr.bf16.mxu0 %v16124_v31  ;;  %17996 = vst [vmem:[#allocation77_spill] sm:$0xff] %v16136_v57  ;;  %v16140_v9 = vld [vmem:[%s11906_s6 + $0x134] ss:$24 sps:$4 sm:$0xff]  }
 0xd77   : > { %7405 = vmatprep.subr.bf16.mxu1 %v16128_v20  ;;  %17997 = vst [vmem:[#allocation78_spill] sm:$0xff] %v16140_v9  ;;  %v16144_v31 = vld [vmem:[%s11906_s6 + $0x434] ss:$24 sps:$4 sm:$0xff]   ;;  %v16148_v20 = vld [vmem:[%s11906_s6 + $0x130] ss:$24 sps:$4 sm:$0xff]  }
 0xd78   : > { %17998 = vst [vmem:[#allocation79_spill] sm:$0xff] %v16144_v31  ;;  %17999 = vst [vmem:[#allocation80_spill] sm:$0xff] %v16148_v20 }
 0xd79   : > { %7365 = vmatpush1.bf16.msra.mxu0 %v16132_v61  ;;  %v16152_v61 = vld [vmem:[%s11906_s6 + $0x430] ss:$24 sps:$4 sm:$0xff]  }
 0xd7a   : > { %7406 = vmatpush1.bf16.msra.mxu1 %v16136_v57  ;;  %7366 = vmatprep.subr.bf16.mxu0 %v16140_v9  ;;  %18000 = vst [vmem:[#allocation81_spill] sm:$0xff] %v16152_v61  ;;  %v16156_v57 = vld [vmem:[%s11906_s6 + $0x164] ss:$24 sps:$4 sm:$0xff]  }
 0xd7b   : > { %7407 = vmatprep.subr.bf16.mxu1 %v16144_v31  ;;  %18001 = vst [vmem:[#allocation82_spill] sm:$0xff] %v16156_v57  ;;  %v16160_v9 = vld [vmem:[%s11906_s6 + $0x464] ss:$24 sps:$4 sm:$0xff]   ;;  %v16164_v31 = vld [vmem:[%s11906_s6 + $0x160] ss:$24 sps:$4 sm:$0xff]  }
 0xd7c   : > { %18002 = vst [vmem:[#allocation83_spill] sm:$0xff] %v16160_v9  ;;  %18003 = vst [vmem:[#allocation84_spill] sm:$0xff] %v16164_v31 }
 0xd7d   : > { %7367 = vmatpush1.bf16.msra.mxu0 %v16148_v20  ;;  %v16168_v20 = vld [vmem:[%s11906_s6 + $0x460] ss:$24 sps:$4 sm:$0xff]  }
 0xd7e   : > { %7408 = vmatpush1.bf16.msra.mxu1 %v16152_v61  ;;  %7368 = vmatprep.subr.bf16.mxu0 %v16156_v57  ;;  %18004 = vst [vmem:[#allocation85_spill] sm:$0xff] %v16168_v20  ;;  %v16172_v61 = vld [vmem:[%s11906_s6 + $0x194] ss:$24 sps:$4 sm:$0xff]  }
 0xd7f   : > { %7409 = vmatprep.subr.bf16.mxu1 %v16160_v9  ;;  %18005 = vst [vmem:[#allocation86_spill] sm:$0xff] %v16172_v61  ;;  %v16176_v57 = vld [vmem:[%s11906_s6 + $0x494] ss:$24 sps:$4 sm:$0xff]   ;;  %v16180_v9 = vld [vmem:[%s11906_s6 + $0x190] ss:$24 sps:$4 sm:$0xff]  }
 0xd80   : > { %18006 = vst [vmem:[#allocation87_spill] sm:$0xff] %v16176_v57  ;;  %18007 = vst [vmem:[#allocation88_spill] sm:$0xff] %v16180_v9 }
 0xd81   : > { %7369 = vmatpush1.bf16.msra.mxu0 %v16164_v31  ;;  %v16184_v31 = vld [vmem:[%s11906_s6 + $0x490] ss:$24 sps:$4 sm:$0xff]  }
 0xd82   : > { %7410 = vmatpush1.bf16.msra.mxu1 %v16168_v20  ;;  %7370 = vmatprep.subr.bf16.mxu0 %v16172_v61  ;;  %18008 = vst [vmem:[#allocation89_spill] sm:$0xff] %v16184_v31  ;;  %v16188_v20 = vld [vmem:[%s11906_s6 + $0x1c4] ss:$24 sps:$4 sm:$0xff]  }
 0xd83   : > { %7411 = vmatprep.subr.bf16.mxu1 %v16176_v57  ;;  %18009 = vst [vmem:[#allocation90_spill] sm:$0xff] %v16188_v20  ;;  %v16192_v61 = vld [vmem:[%s11906_s6 + $0x4c4] ss:$24 sps:$4 sm:$0xff]   ;;  %v16196_v57 = vld [vmem:[%s11906_s6 + $0x1c0] ss:$24 sps:$4 sm:$0xff]  }
 0xd84   : > { %18010 = vst [vmem:[#allocation91_spill] sm:$0xff] %v16192_v61  ;;  %18011 = vst [vmem:[#allocation92_spill] sm:$0xff] %v16196_v57 }
 0xd85   : > { %7371 = vmatpush1.bf16.msra.mxu0 %v16180_v9  ;;  %v16200_v9 = vld [vmem:[%s11906_s6 + $0x4c0] ss:$24 sps:$4 sm:$0xff]  }
 0xd86   : > { %7412 = vmatpush1.bf16.msra.mxu1 %v16184_v31  ;;  %7372 = vmatprep.subr.bf16.mxu0 %v16188_v20  ;;  %18012 = vst [vmem:[#allocation93_spill] sm:$0xff] %v16200_v9  ;;  %v16204_v31 = vld [vmem:[%s11906_s6 + $0x1f4] ss:$24 sps:$4 sm:$0xff]  }
 0xd87   : > { %7413 = vmatprep.subr.bf16.mxu1 %v16192_v61  ;;  %18013 = vst [vmem:[#allocation94_spill] sm:$0xff] %v16204_v31  ;;  %v16208_v20 = vld [vmem:[%s11906_s6 + $0x4f4] ss:$24 sps:$4 sm:$0xff]   ;;  %v16212_v61 = vld [vmem:[%s11906_s6 + $0x1f0] ss:$24 sps:$4 sm:$0xff]  }
 0xd88   : > { %18014 = vst [vmem:[#allocation95_spill] sm:$0xff] %v16208_v20  ;;  %18015 = vst [vmem:[#allocation96_spill] sm:$0xff] %v16212_v61 }
 0xd89   : > { %7373 = vmatpush1.bf16.msra.mxu0 %v16196_v57  ;;  %v16216_v57 = vld [vmem:[%s11906_s6 + $0x4f0] ss:$24 sps:$4 sm:$0xff]  }
 0xd8a   : > { %7414 = vmatpush1.bf16.msra.mxu1 %v16200_v9  ;;  %7374 = vmatprep.subr.bf16.mxu0 %v16204_v31  ;;  %18016 = vst [vmem:[#allocation97_spill] sm:$0xff] %v16216_v57  ;;  %v16220_v9 = vld [vmem:[%s11906_s6 + $0x224] ss:$24 sps:$4 sm:$0xff]  }
 0xd8b   : > { %7415 = vmatprep.subr.bf16.mxu1 %v16208_v20  ;;  %18017 = vst [vmem:[#allocation98_spill] sm:$0xff] %v16220_v9  ;;  %v16224_v31 = vld [vmem:[%s11906_s6 + $0x524] ss:$24 sps:$4 sm:$0xff]   ;;  %v16228_v20 = vld [vmem:[%s11906_s6 + $0x220] ss:$24 sps:$4 sm:$0xff]  }
 0xd8c   : > { %18018 = vst [vmem:[#allocation99_spill] sm:$0xff] %v16224_v31  ;;  %18019 = vst [vmem:[#allocation100_spill] sm:$0xff] %v16228_v20 }
 0xd8d   : > { %7375 = vmatpush1.bf16.msra.mxu0 %v16212_v61  ;;  %v16232_v61 = vld [vmem:[%s11906_s6 + $0x520] ss:$24 sps:$4 sm:$0xff]  }
 0xd8e   : > { %7416 = vmatpush1.bf16.msra.mxu1 %v16216_v57  ;;  %7376 = vmatprep.subr.bf16.mxu0 %v16220_v9  ;;  %18020 = vst [vmem:[#allocation101_spill] sm:$0xff] %v16232_v61  ;;  %v16236_v57 = vld [vmem:[%s11906_s6 + $0x254] ss:$24 sps:$4 sm:$0xff]  }
 0xd8f   : > { %7417 = vmatprep.subr.bf16.mxu1 %v16224_v31  ;;  %18021 = vst [vmem:[#allocation102_spill] sm:$0xff] %v16236_v57  ;;  %v16240_v9 = vld [vmem:[%s11906_s6 + $0x554] ss:$24 sps:$4 sm:$0xff]   ;;  %v16244_v31 = vld [vmem:[%s11906_s6 + $0x250] ss:$24 sps:$4 sm:$0xff]  }
 0xd90   : > { %18022 = vst [vmem:[#allocation103_spill] sm:$0xff] %v16240_v9  ;;  %18023 = vst [vmem:[#allocation104_spill] sm:$0xff] %v16244_v31 }
 0xd91   : > { %7377 = vmatpush1.bf16.msra.mxu0 %v16228_v20  ;;  %v16248_v20 = vld [vmem:[%s11906_s6 + $0x550] ss:$24 sps:$4 sm:$0xff]  }
 0xd92   : > { %7418 = vmatpush1.bf16.msra.mxu1 %v16232_v61  ;;  %7378 = vmatprep.subr.bf16.mxu0 %v16236_v57  ;;  %18024 = vst [vmem:[#allocation105_spill] sm:$0xff] %v16248_v20  ;;  %v16252_v61 = vld [vmem:[%s11906_s6 + $0x284] ss:$24 sps:$4 sm:$0xff]  }
 0xd93   : > { %7419 = vmatprep.subr.bf16.mxu1 %v16240_v9  ;;  %18025 = vst [vmem:[#allocation106_spill] sm:$0xff] %v16252_v61  ;;  %v16256_v57 = vld [vmem:[%s11906_s6 + $0x584] ss:$24 sps:$4 sm:$0xff]   ;;  %v16260_v9 = vld [vmem:[%s11906_s6 + $0x280] ss:$24 sps:$4 sm:$0xff]  }
 0xd94   : > { %18026 = vst [vmem:[#allocation107_spill] sm:$0xff] %v16256_v57  ;;  %18027 = vst [vmem:[#allocation108_spill] sm:$0xff] %v16260_v9 }
 0xd95   : > { %7379 = vmatpush1.bf16.msra.mxu0 %v16244_v31  ;;  %v16264_v31 = vld [vmem:[%s11906_s6 + $0x580] ss:$24 sps:$4 sm:$0xff]  }
 0xd96   : > { %7420 = vmatpush1.bf16.msra.mxu1 %v16248_v20  ;;  %7380 = vmatprep.subr.bf16.mxu0 %v16252_v61  ;;  %18028 = vst [vmem:[#allocation109_spill] sm:$0xff] %v16264_v31  ;;  %v16268_v20 = vld [vmem:[%s11906_s6 + $0x2b4] ss:$24 sps:$4 sm:$0xff]  }
 0xd97   : > { %7421 = vmatprep.subr.bf16.mxu1 %v16256_v57  ;;  %18029 = vst [vmem:[#allocation110_spill] sm:$0xff] %v16268_v20  ;;  %v16272_v61 = vld [vmem:[%s11906_s6 + $0x5b4] ss:$24 sps:$4 sm:$0xff]   ;;  %v16276_v57 = vld [vmem:[%s11906_s6 + $0x2b0] ss:$24 sps:$4 sm:$0xff]  }
 0xd98   : > { %18030 = vst [vmem:[#allocation111_spill] sm:$0xff] %v16272_v61  ;;  %18031 = vst [vmem:[#allocation112_spill] sm:$0xff] %v16276_v57 }
 0xd99   : > { %7381 = vmatpush1.bf16.msra.mxu0 %v16260_v9  ;;  %v16280_v9 = vld [vmem:[%s11906_s6 + $0x5b0] ss:$24 sps:$4 sm:$0xff]  }
 0xd9a   : > { %7422 = vmatpush1.bf16.msra.mxu1 %v16264_v31  ;;  %7382 = vmatprep.subr.bf16.mxu0 %v16268_v20  ;;  %18032 = vst [vmem:[#allocation113_spill] sm:$0xff] %v16280_v9  ;;  %v16284_v31 = vld [vmem:[%s11906_s6 + $0x2e4] ss:$24 sps:$4 sm:$0xff]  }
 0xd9b   : > { %7423 = vmatprep.subr.bf16.mxu1 %v16272_v61  ;;  %18033 = vst [vmem:[#allocation114_spill] sm:$0xff] %v16284_v31  ;;  %v16288_v20 = vld [vmem:[%s11906_s6 + $0x5e4] ss:$24 sps:$4 sm:$0xff]   ;;  %v16292_v61 = vld [vmem:[%s11906_s6 + $0x2e0] ss:$24 sps:$4 sm:$0xff]  }
 0xd9c   : > { %18034 = vst [vmem:[#allocation115_spill] sm:$0xff] %v16288_v20  ;;  %18035 = vst [vmem:[#allocation116_spill] sm:$0xff] %v16292_v61 }
 0xd9d   : > { %7383 = vmatpush1.bf16.msra.mxu0 %v16276_v57  ;;  %v16296_v57 = vld [vmem:[%s11906_s6 + $0x5e0] ss:$24 sps:$4 sm:$0xff]  }
 0xd9e   : > { %7424 = vmatpush1.bf16.msra.mxu1 %v16280_v9  ;;  %7384 = vmatprep.subr.bf16.mxu0 %v16284_v31  ;;  %18036 = vst [vmem:[#allocation117_spill] sm:$0xff] %v16296_v57  ;;  %v11139_v9 = vld [vmem:[%s11906_s6 + $0x4] ss:$24 sps:$4 sm:$0xff]   ;;  %v11146_v31 = vld [vmem:[%s11906_s6 + $0x330] ss:$24 sps:$4 sm:$0xff]  }
 0xd9f   : > { %7425 = vmatprep.subr.bf16.mxu1 %v16288_v20  ;;  %v11142_v20 = vld [vmem:[%s11906_s6 + $0x300] ss:$24 sps:$4 sm:$0xff]  }
 0xda1   : > { %7385 = vmatpush1.bf16.msra.mxu0 %v16292_v61  ;;  %v11141_v61 = vld [vmem:[%s11906_s6] ss:$24 sps:$4 sm:$0xff]  }
 0xda2   : > { %7426 = vmatpush1.bf16.msra.mxu1 %v16296_v57  ;;  %7552 = vmatprep.subr.bf16.mxu0 %v11139_v9  ;;  %v11143_v57 = vld [vmem:[%s11906_s6 + $0x34] ss:$24 sps:$4 sm:$0xff]  }
 0xda3   : > { %7593 = vmatprep.subr.bf16.mxu1 %v11140_v60  ;;  %v11144_v9 = vld [vmem:[%s11906_s6 + $0x334] ss:$24 sps:$4 sm:$0xff]   ;;  %v11145_v60 = vld [vmem:[%s11906_s6 + $0x30] ss:$24 sps:$4 sm:$0xff]  }
 0xda4   : > { %9212 = vmatmul.mubr.msk.bf16.vlgmr.msra.gmra.mrb[80].mxu0 %vm13227_vm6, %v15815_v35 }
 0xda5   : > { %9218 = vmatmul.mubr.msk.bf16.vlgmr.msra.gmra.mrb[80].mxu1 %vm13237_vm7, %v15815_v35  ;;  %7553 = vmatpush1.bf16.msra.mxu0 %v11141_v61  ;;  %v11148_v35 = vld [vmem:[%s11906_s6 + $0x364] ss:$24 sps:$4 sm:$0xff]   ;;  %v11149_v61 = vld [vmem:[%s11906_s6 + $0x60] ss:$24 sps:$4 sm:$0xff]  }
 0xda6   : > { %7594 = vmatpush1.bf16.msra.mxu1 %v11142_v20  ;;  %7554 = vmatprep.subr.bf16.mxu0 %v11143_v57  ;;  %v11150_v20 = vld [vmem:[%s11906_s6 + $0x360] ss:$24 sps:$4 sm:$0xff]   ;;  %v11151_v57 = vld [vmem:[%s11906_s6 + $0x94] ss:$24 sps:$4 sm:$0xff]  }
 0xda7   : > { %7595 = vmatprep.subr.bf16.mxu1 %v11144_v9  ;;  %v11152_v9 = vld [vmem:[%s11906_s6 + $0x394] ss:$24 sps:$4 sm:$0xff]  }
 0xda9   : > { %7555 = vmatpush1.bf16.msra.mxu0 %v11145_v60  ;;  %v11153_v60 = vld [vmem:[%s11906_s6 + $0x90] ss:$24 sps:$4 sm:$0xff]  }
 0xdaa   : > { %7596 = vmatpush1.bf16.msra.mxu1 %v11146_v31  ;;  %7556 = vmatprep.subr.bf16.mxu0 %v11147_v29  ;;  %v11154_v31 = vld [vmem:[%s11906_s6 + $0x390] ss:$24 sps:$4 sm:$0xff]   ;;  %v11155_v29 = vld [vmem:[%s11906_s6 + $0xc4] ss:$24 sps:$4 sm:$0xff]  }
 0xdab   : > { %7597 = vmatprep.subr.bf16.mxu1 %v11148_v35  ;;  %v11156_v35 = vld [vmem:[%s11906_s6 + $0x3c4] ss:$24 sps:$4 sm:$0xff]  }
 0xdad   : > { %7557 = vmatpush1.bf16.msra.mxu0 %v11149_v61  ;;  %v11157_v61 = vld [vmem:[%s11906_s6 + $0xc0] ss:$24 sps:$4 sm:$0xff]  }
 0xdae   : > { %7598 = vmatpush1.bf16.msra.mxu1 %v11150_v20  ;;  %7558 = vmatprep.subr.bf16.mxu0 %v11151_v57  ;;  %v11158_v20 = vld [vmem:[%s11906_s6 + $0x3c0] ss:$24 sps:$4 sm:$0xff]   ;;  %v11159_v57 = vld [vmem:[%s11906_s6 + $0xf4] ss:$24 sps:$4 sm:$0xff]  }
 0xdaf   : > { %7599 = vmatprep.subr.bf16.mxu1 %v11152_v9  ;;  %v11160_v9 = vld [vmem:[%s11906_s6 + $0x3f4] ss:$24 sps:$4 sm:$0xff]  }
 0xdb1   : > { %7559 = vmatpush1.bf16.msra.mxu0 %v11153_v60  ;;  %v11161_v60 = vld [vmem:[%s11906_s6 + $0xf0] ss:$24 sps:$4 sm:$0xff]  }
 0xdb2   : > { %7600 = vmatpush1.bf16.msra.mxu1 %v11154_v31  ;;  %7560 = vmatprep.subr.bf16.mxu0 %v11155_v29  ;;  %v11162_v31 = vld [vmem:[%s11906_s6 + $0x3f0] ss:$24 sps:$4 sm:$0xff]   ;;  %v11163_v29 = vld [vmem:[%s11906_s6 + $0x124] ss:$24 sps:$4 sm:$0xff]  }
 0xdb3   : > { %7601 = vmatprep.subr.bf16.mxu1 %v11156_v35  ;;  %v11164_v35 = vld [vmem:[%s11906_s6 + $0x424] ss:$24 sps:$4 sm:$0xff]  }
 0xdb5   : > { %7561 = vmatpush1.bf16.msra.mxu0 %v11157_v61  ;;  %v11165_v61 = vld [vmem:[%s11906_s6 + $0x120] ss:$24 sps:$4 sm:$0xff]  }
 0xdb6   : > { %7602 = vmatpush1.bf16.msra.mxu1 %v11158_v20  ;;  %7562 = vmatprep.subr.bf16.mxu0 %v11159_v57  ;;  %v11166_v20 = vld [vmem:[%s11906_s6 + $0x420] ss:$24 sps:$4 sm:$0xff]   ;;  %v11167_v57 = vld [vmem:[%s11906_s6 + $0x154] ss:$24 sps:$4 sm:$0xff]  }
 0xdb7   : > { %7603 = vmatprep.subr.bf16.mxu1 %v11160_v9  ;;  %v11169_v9 = vld [vmem:[%s11906_s6 + $0x150] ss:$24 sps:$4 sm:$0xff]  }
 0xdb9   : > { %7563 = vmatpush1.bf16.msra.mxu0 %v11161_v60  ;;  %v11170_v60 = vld [vmem:[%s11906_s6 + $0x450] ss:$24 sps:$4 sm:$0xff]  }
 0xdba   : > { %7604 = vmatpush1.bf16.msra.mxu1 %v11162_v31  ;;  %7564 = vmatprep.subr.bf16.mxu0 %v11163_v29  ;;  %v11172_v31 = vld [vmem:[%s11906_s6 + $0x484] ss:$24 sps:$4 sm:$0xff]  }
 0xdbb   : > { %7605 = vmatprep.subr.bf16.mxu1 %v11164_v35  ;;  %v18053_v29 = vld [vmem:[#allocation44_spill] sm:$0xff]  ;;  %v18054_v35 = vld [vmem:[#allocation45_spill] sm:$0xff] }
 0xdbd   : > { %7565 = vmatpush1.bf16.msra.mxu0 %v11165_v61 }
 0xdbe   : > { %7606 = vmatpush1.bf16.msra.mxu1 %v11166_v20  ;;  %7566 = vmatprep.subr.bf16.mxu0 %v11167_v57 }
 0xdbf   : > { %7607 = vmatprep.subr.bf16.mxu1 %v11168_v41  ;;  %v18052_v41 = vld [vmem:[#allocation43_spill] sm:$0xff] }
 0xdc1   : > { %7567 = vmatpush1.bf16.msra.mxu0 %v11169_v9 }
 0xdc2   : > { %7608 = vmatpush1.bf16.msra.mxu1 %v11170_v60  ;;  %7568 = vmatprep.subr.bf16.mxu0 %v11171_v12  ;;  %v18051_v12 = vld [vmem:[#allocation42_spill] sm:$0xff] }
 0xdc3   : > { %7609 = vmatprep.subr.bf16.mxu1 %v11172_v31 }
 0xdc5   : > { %7569 = vmatpush1.bf16.msra.mxu0 %v15672_v36  ;;  %v18037_v36 = vld [vmem:[#allocation28_spill] sm:$0xff] }
 0xdc6   : > { %7610 = vmatpush1.bf16.msra.mxu1 %v15676_v7  ;;  %7570 = vmatprep.subr.bf16.mxu0 %v15680_v1  ;;  %v18038_v7 = vld [vmem:[#allocation29_spill] sm:$0xff]  ;;  %v18039_v1 = vld [vmem:[#allocation30_spill] sm:$0xff] }
 0xdc7   : > { %7611 = vmatprep.subr.bf16.mxu1 %v15684_v23  ;;  %v18040_v23 = vld [vmem:[#allocation31_spill] sm:$0xff] }
 0xdc9   : > { %7571 = vmatpush1.bf16.msra.mxu0 %v15688_v52  ;;  %v18041_v52 = vld [vmem:[#allocation32_spill] sm:$0xff] }
 0xdca   : > { %7612 = vmatpush1.bf16.msra.mxu1 %v15692_v47  ;;  %7572 = vmatprep.subr.bf16.mxu0 %v15696_v15  ;;  %v18042_v47 = vld [vmem:[#allocation33_spill] sm:$0xff]  ;;  %v18043_v15 = vld [vmem:[#allocation34_spill] sm:$0xff] }
 0xdcb   : > { %7613 = vmatprep.subr.bf16.mxu1 %v15700_v25  ;;  %v18044_v25 = vld [vmem:[#allocation35_spill] sm:$0xff] }
 0xdcd   : > { %7573 = vmatpush1.bf16.msra.mxu0 %v15704_v44  ;;  %v18045_v44 = vld [vmem:[#allocation36_spill] sm:$0xff] }
 0xdce   : > { %7614 = vmatpush1.bf16.msra.mxu1 %v15708_v17  ;;  %7574 = vmatprep.subr.bf16.mxu0 %v15712_v21  ;;  %v18046_v17 = vld [vmem:[#allocation37_spill] sm:$0xff]  ;;  %v18047_v21 = vld [vmem:[#allocation38_spill] sm:$0xff] }
 0xdcf   : > { %7615 = vmatprep.subr.bf16.mxu1 %v15716_v11  ;;  %v18048_v11 = vld [vmem:[#allocation39_spill] sm:$0xff] }
 0xdd1   : > { %7575 = vmatpush1.bf16.msra.mxu0 %v15720_v38  ;;  %v18049_v38 = vld [vmem:[#allocation40_spill] sm:$0xff] }
 0xdd2   : > { %7616 = vmatpush1.bf16.msra.mxu1 %v15724_v10  ;;  %7576 = vmatprep.subr.bf16.mxu0 %v18037_v36  ;;  %v18050_v10 = vld [vmem:[#allocation41_spill] sm:$0xff] }
 0xdd3   : > { %7617 = vmatprep.subr.bf16.mxu1 %v18038_v7 }
 0xdd5   : > { %7577 = vmatpush1.bf16.msra.mxu0 %v18039_v1 }
 0xdd6   : > { %7618 = vmatpush1.bf16.msra.mxu1 %v18040_v23  ;;  %7578 = vmatprep.subr.bf16.mxu0 %v18041_v52 }
 0xdd7   : > { %7619 = vmatprep.subr.bf16.mxu1 %v18042_v47 }
 0xdd9   : > { %7579 = vmatpush1.bf16.msra.mxu0 %v18043_v15 }
 0xdda   : > { %7620 = vmatpush1.bf16.msra.mxu1 %v18044_v25  ;;  %7580 = vmatprep.subr.bf16.mxu0 %v18045_v44 }
 0xddb   : > { %7621 = vmatprep.subr.bf16.mxu1 %v18046_v17 }
 0xddd   : > { %7581 = vmatpush1.bf16.msra.mxu0 %v18047_v21 }
 0xdde   : > { %7622 = vmatpush1.bf16.msra.mxu1 %v18048_v11  ;;  %7582 = vmatprep.subr.bf16.mxu0 %v18049_v38 }
 0xddf   : > { %7623 = vmatprep.subr.bf16.mxu1 %v18050_v10 }
 0xde1   : > { %7583 = vmatpush1.bf16.msra.mxu0 %v18051_v12  ;;  %v7146_v12 = vld [vmem:[#allocation3 + $0x60] sm:$0x30] }
 0xde2   : > { %7624 = vmatpush1.bf16.msra.mxu1 %v18052_v41  ;;  %7634 = vmatprep.subr.bf16.mxu0 %v18053_v29  ;;  %v7147_v41 = vld [vmem:[#allocation3 + $0x68] sm:$0x30]  ;;  %v7164_v29 = vrot.slane %v7146_v12, 4 }
 0xde3   : > { %7675 = vmatprep.subr.bf16.mxu1 %v18054_v35  ;;  %v7152_v35 = vld [vmem:[#allocation3 + $0x30] sm:$0xc] }
 0xdf7   : > { %v7224_v61 = vpop.f32.mrb[72].mxu0  ;;  %v7265_v20 = vpop.f32.mrb[72].mxu1 }
 0xdf8   : > { %v7266_v57 = vadd.f32 %v7265_v20, %v7224_v61  ;;  %v7226_v9 = vpop.f32.mrb[73].mxu0  ;;  %v7267_v60 = vpop.f32.mrb[73].mxu1  ;;  %v7165_v61 = vrot.slane %v7147_v41, 4  ;;  %v7153_v20 = vld [vmem:[#allocation3 + $0x38] sm:$0xc] }
 0xdf9   : > { %v7268_v31 = vadd.f32 %v7267_v60, %v7226_v9  ;;  %v7228_v36 = vpop.f32.mrb[74].mxu0  ;;  %v7269_v7 = vpop.f32.mrb[74].mxu1  ;;  %v7176_v9 = vsel %vm4036_vm1, %v7164_v29, %v7152_v35 }
 0xdfa   : > { %v7229_v1 = vpop.f32.mrb[75].mxu0  ;;  %v7270_v23 = vpop.f32.mrb[75].mxu1  ;;  %v7177_v60 = vsel %vm4036_vm1, %v7165_v61, %v7153_v20  ;;  %v7436_v36 = vadd.f32 %v7266_v57, %v7176_v9  ;;  %v7150_v9 = vld [vmem:[#allocation3 + $0x80] sm:$0x30] }
 0xdfb   : > { %v7437_v7 = vadd.f32 %v7268_v31, %v7177_v60  ;;  %v7151_v60 = vld [vmem:[#allocation3 + $0x88] sm:$0x30] }
 0xdfc   : > { %v9219_v1 = vmul.f32 -1.442695, %v7436_v36 }
 0xdfd   : > { %v9220_v23 = vmul.f32 -1.442695, %v7437_v7  ;;  %v7168_v7 = vrot.slane %v7150_v9, 4 }
 0xdfe   : > { %10523 = vpow2.f32 %v9219_v1 }
 0xdff   : > { %10525 = vpow2.f32 %v9220_v23 }
 0xe08   : > { %v10524_v12 = vpop.eup %10523 }
 0xe09   : > { %v10526_v41 = vpop.eup %10525  ;;  %v7444_v57 = vadd.f32 1.0, %v10524_v12 }
 0xe0a   : > { %v7445_v31 = vadd.f32 1.0, %v10526_v41 }
 0xe0b   : > { %10527 = vrcp.f32 %v7444_v57 }
 0xe0c   : > { %10529 = vrcp.f32 %v7445_v31 }
 0xe37   : > { %v7306_v52 = vpop.f32.mrb[76].mxu0  ;;  %v7347_v47 = vpop.f32.mrb[76].mxu1 }
 0xe38   : > { %v7348_v15 = vadd.f32 %v7347_v47, %v7306_v52  ;;  %v7308_v25 = vpop.f32.mrb[77].mxu0  ;;  %v7349_v44 = vpop.f32.mrb[77].mxu1  ;;  %v7148_v52 = vld [vmem:[#allocation3 + $0x70] sm:$0x30]  ;;  %v7149_v47 = vld [vmem:[#allocation3 + $0x78] sm:$0x30] }
 0xe39   : > { %v7350_v17 = vadd.f32 %v7349_v44, %v7308_v25  ;;  %v7310_v21 = vpop.f32.mrb[78].mxu0  ;;  %v7351_v11 = vpop.f32.mrb[78].mxu1  ;;  %v7166_v25 = vrot.slane %v7148_v52, 4  ;;  %v7154_v44 = vld [vmem:[#allocation3 + $0x40] sm:$0xc] }
 0xe3a   : > { %v7311_v38 = vpop.f32.mrb[79].mxu0  ;;  %v7352_v10 = vpop.f32.mrb[79].mxu1  ;;  %v7167_v21 = vrot.slane %v7149_v47, 4  ;;  %v7155_v11 = vld [vmem:[#allocation3 + $0x48] sm:$0xc] }
 0xe3b   : > { %v7178_v38 = vsel %vm4036_vm1, %v7166_v25, %v7154_v44  ;;  %v7156_v52 = vld [vmem:[#allocation3 + $0x50] sm:$0xc]  ;;  %v7169_v25 = vrot.slane %v7151_v60, 4 }
 0xe3c   : > { %v7179_v10 = vsel %vm4036_vm1, %v7167_v21, %v7155_v11  ;;  %v7450_v29 = vadd.f32 %v7348_v15, %v7178_v38  ;;  %v7157_v21 = vld [vmem:[#allocation3 + $0x58] sm:$0xc]  ;;  %v7180_v57 = vsel %vm4036_vm1, %v7168_v7, %v7156_v52 }
 0xe3d   : > { %v7451_v35 = vadd.f32 %v7350_v17, %v7179_v10  ;;  %v10528_v17 = vpop.eup %10527  ;;  %v7181_v9 = vsel %vm4036_vm1, %v7169_v25, %v7157_v21 }
 0xe3e   : > { %v9221_v61 = vmul.f32 -1.442695, %v7450_v29  ;;  %v10530_v12 = vpop.eup %10529 }
 0xe3f   : > { %v9222_v20 = vmul.f32 -1.442695, %v7451_v35 }
 0xe40   : > { %10531 = vpow2.f32 %v9221_v61 }
 0xe41   : > { %10533 = vpow2.f32 %v9222_v20 }
 0xe4a   : > { %v10532_v35 = vpop.eup %10531 }
 0xe4b   : > { %v10534_v61 = vpop.eup %10533 }
 0xe77   : > { %v7388_v36 = vpop.f32.mrb[80].mxu0 }
 0xe78   : > { %v7429_v1 = vpop.f32.mrb[80].mxu1  ;;  %v7390_v23 = vpop.f32.mrb[81].mxu0 }
 0xe79   : > { %v7430_v47 = vadd.f32 %v7429_v1, %v7388_v36  ;;  %v7431_v44 = vpop.f32.mrb[81].mxu1  ;;  %v7392_v15 = vpop.f32.mrb[82].mxu0  ;;  %v7458_v36 = vadd.f32 1.0, %v10532_v35  ;;  %v11174_v35 = vld [vmem:[%s11906_s6 + $0x308] ss:$24 sps:$4 sm:$0xff]  }
 0xe7a   : > { %v7432_v11 = vadd.f32 %v7431_v44, %v7390_v23  ;;  %v7433_v38 = vpop.f32.mrb[82].mxu1  ;;  %v7393_v10 = vpop.f32.mrb[83].mxu0  ;;  %v7459_v15 = vadd.f32 1.0, %v10534_v61  ;;  %v11177_v61 = vld [vmem:[%s11906_s6 + $0x38] ss:$24 sps:$4 sm:$0xff]  }
 0xe7b   : > { %v7464_v41 = vadd.f32 %v7430_v47, %v13215_v39  ;;  %v7434_v29 = vpop.f32.mrb[83].mxu1 }
 0xe7c   : > { %v7465_v31 = vadd.f32 %v7432_v11, %v13218_v45  ;;  %v11173_v29 = vld [vmem:[%s11906_s6 + $0x8] ss:$24 sps:$4 sm:$0xff]  }
 0xe7d   : > { %v7466_v20 = vmul.f32 %v10528_v17, %v7464_v41 }
 0xe7e   : > { %v7467_v60 = vmul.f32 %v10530_v12, %v7465_v31  ;;  %v11176_v31 = vld [vmem:[%s11906_s6 + $0x33c] ss:$24 sps:$4 sm:$0xff]  }
 0xe7f   : > { %v7468_v1 = vadd.f32 %v7466_v20, %v7180_v57  ;;  %v11175_v57 = vld [vmem:[%s11906_s6 + $0x3c] ss:$24 sps:$4 sm:$0xff]   ;;  %v11178_v20 = vld [vmem:[%s11906_s6 + $0x338] ss:$24 sps:$4 sm:$0xff]  }
 0xe80   : > { %v7469_v23 = vadd.f32 %v7467_v60, %v7181_v9  ;;  %v11179_v9 = vld [vmem:[%s11906_s6 + $0x6c] ss:$24 sps:$4 sm:$0xff]  }
 0xe81   : > { %10535 = vtanh.f32 %v7468_v1  ;;  %v11180_v60 = vld [vmem:[%s11906_s6 + $0x36c] ss:$24 sps:$4 sm:$0xff]   ;;  %v11182_v1 = vld [vmem:[%s11906_s6 + $0x368] ss:$24 sps:$4 sm:$0xff]  }
 0xe82   : > { %10537 = vtanh.f32 %v7469_v23  ;;  %v11184_v23 = vld [vmem:[%s11906_s6 + $0x39c] ss:$24 sps:$4 sm:$0xff]  }
 0xe83   : > { %10539 = vrcp.f32 %v7458_v36  ;;  %v11181_v36 = vld [vmem:[%s11906_s6 + $0x68] ss:$24 sps:$4 sm:$0xff]  }
 0xe84   : > { %10541 = vrcp.f32 %v7459_v15  ;;  %v11183_v15 = vld [vmem:[%s11906_s6 + $0x9c] ss:$24 sps:$4 sm:$0xff]  }
 0xe8b   : > { %v10536_v47 = vpop.eup %10535 }
 0xe8c   : > { %v10538_v44 = vpop.eup %10537  ;;  %v7472_v38 = vsub.f32 %v15809_v32, %v10536_v47 }
 0xe8d   : > { %v10540_v7 = vpop.eup %10539  ;;  %v7473_v52 = vsub.f32 %v15811_v0, %v10538_v44 }
 0xe8e   : > { %v10542_v11 = vpop.eup %10541  ;;  %v7474_v17 = vmul.f32 %v10540_v7, %v7472_v38  ;;  %v11187_v38 = vld [vmem:[%s11906_s6 + $0xcc] ss:$24 sps:$4 sm:$0xff]  }
 0xe8f   : > { %v7475_v25 = vmul.f32 %v10542_v11, %v7473_v52  ;;  %v11188_v7 = vld [vmem:[%s11906_s6 + $0x3cc] ss:$24 sps:$4 sm:$0xff]   ;;  %v11189_v52 = vld [vmem:[%s11906_s6 + $0xc8] ss:$24 sps:$4 sm:$0xff]  }
 0xe90   : > { %v16381_v21 = vadd.f32 %v10536_v47, %v7474_v17  ;;  %v11185_v47 = vld [vmem:[%s11906_s6 + $0x98] ss:$24 sps:$4 sm:$0xff]   ;;  %v11190_v11 = vld [vmem:[%s11906_s6 + $0x3c8] ss:$24 sps:$4 sm:$0xff]   ;;  %v11191_v17 = vld [vmem:[%s11906_s6 + $0xfc] ss:$24 sps:$4 sm:$0xff]  }
 0xe91   : > { %v16383_v10 = vadd.f32 %v10538_v44, %v7475_v25  ;;  %v11186_v44 = vld [vmem:[%s11906_s6 + $0x398] ss:$24 sps:$4 sm:$0xff]   ;;  %v11192_v25 = vld [vmem:[%s11906_s6 + $0x3fc] ss:$24 sps:$4 sm:$0xff]  }
 0xe92   : > { %v16387_v12 = vpack.c.bf16 %v16381_v21, %v16381_v21 }
 0xe93   : > { %v16391_v41 = vpack.c.bf16 %v16383_v10, %v16383_v10 }
 0xe94   : > { %v7482_v32 = vrot.slane %v16387_v12, 2  ;;  %7488 = vst [vmem:[#allocation2 + $0x10] sm:$0x2] %v16387_v12 }
 0xe95   : > { %v7483_v0 = vrot.slane %v16391_v41, 2  ;;  %7489 = vst [vmem:[#allocation2 + $0x18] sm:$0x2] %v16391_v41  ;;  %9225 = vmatprep.mubr.msk.bf16.mxu0 %vm13227_vm6, %v16391_v41  ;;  %9231 = vmatprep.mubr.msk.bf16.mxu1 %vm13237_vm7, %v16391_v41 }
 0xe96   : > { %7486 = vst [vmem:[#allocation2] sm:$0x40] %v7482_v32  ;;  %9228 = vmatmul.mubr.msk.bf16.vlgmr.msra.gmra.mrb[84].mxu0 %vm13227_vm6, %v16387_v12  ;;  %9234 = vmatmul.mubr.msk.bf16.vlgmr.msra.gmra.mrb[84].mxu1 %vm13237_vm7, %v16387_v12  ;;  %v18090_v32 = vld [vmem:[#allocation81_spill] sm:$0xff] }
 0xe97   : > { %7487 = vst [vmem:[#allocation2 + $0x8] sm:$0x40] %v7483_v0  ;;  %7635 = vmatpush1.bf16.msra.mxu0 %v11173_v29  ;;  %7676 = vmatpush1.bf16.msra.mxu1 %v11174_v35  ;;  %v18091_v0 = vld [vmem:[#allocation82_spill] sm:$0xff]  ;;  %v18092_v29 = vld [vmem:[#allocation83_spill] sm:$0xff]  ;;  %v18093_v35 = vld [vmem:[#allocation84_spill] sm:$0xff] }
 0xe98   : > { %9237 = vmatprep.mubr.msk.bf16.mxu0 %vm13227_vm6, %v16391_v41  ;;  %9243 = vmatprep.mubr.msk.bf16.mxu1 %vm13237_vm7, %v16391_v41 }
 0xe99   : > { %7636 = vmatprep.subr.bf16.mxu0 %v11175_v57  ;;  %7677 = vmatprep.subr.bf16.mxu1 %v11176_v31  ;;  %v18094_v57 = vld [vmem:[#allocation85_spill] sm:$0xff]  ;;  %v18095_v31 = vld [vmem:[#allocation86_spill] sm:$0xff] }
 0xe9b   : > { %7637 = vmatpush1.bf16.msra.mxu0 %v11177_v61  ;;  %7678 = vmatpush1.bf16.msra.mxu1 %v11178_v20  ;;  %v18096_v61 = vld [vmem:[#allocation87_spill] sm:$0xff]  ;;  %v18097_v20 = vld [vmem:[#allocation88_spill] sm:$0xff] }
 0xe9c   : > { %7638 = vmatprep.subr.bf16.mxu0 %v11179_v9  ;;  %7679 = vmatprep.subr.bf16.mxu1 %v11180_v60  ;;  %v18098_v9 = vld [vmem:[#allocation89_spill] sm:$0xff]  ;;  %v18099_v60 = vld [vmem:[#allocation90_spill] sm:$0xff] }
 0xe9f   : > { %7639 = vmatpush1.bf16.msra.mxu0 %v11181_v36  ;;  %7680 = vmatpush1.bf16.msra.mxu1 %v11182_v1  ;;  %v18100_v36 = vld [vmem:[#allocation91_spill] sm:$0xff]  ;;  %v18101_v1 = vld [vmem:[#allocation92_spill] sm:$0xff] }
 0xea0   : > { %7640 = vmatprep.subr.bf16.mxu0 %v11183_v15  ;;  %7681 = vmatprep.subr.bf16.mxu1 %v11184_v23  ;;  %v18102_v15 = vld [vmem:[#allocation93_spill] sm:$0xff]  ;;  %v18103_v23 = vld [vmem:[#allocation94_spill] sm:$0xff] }
 0xea3   : > { %7641 = vmatpush1.bf16.msra.mxu0 %v11185_v47  ;;  %7682 = vmatpush1.bf16.msra.mxu1 %v11186_v44  ;;  %v18104_v47 = vld [vmem:[#allocation95_spill] sm:$0xff]  ;;  %v18105_v44 = vld [vmem:[#allocation96_spill] sm:$0xff] }
 0xea4   : > { %7642 = vmatprep.subr.bf16.mxu0 %v11187_v38  ;;  %7683 = vmatprep.subr.bf16.mxu1 %v11188_v7  ;;  %v18106_v38 = vld [vmem:[#allocation97_spill] sm:$0xff]  ;;  %v18107_v7 = vld [vmem:[#allocation98_spill] sm:$0xff] }
 0xea7   : > { %7643 = vmatpush1.bf16.msra.mxu0 %v11189_v52  ;;  %7684 = vmatpush1.bf16.msra.mxu1 %v11190_v11  ;;  %v18108_v52 = vld [vmem:[#allocation99_spill] sm:$0xff]  ;;  %v18109_v11 = vld [vmem:[#allocation100_spill] sm:$0xff] }
 0xea8   : > { %7644 = vmatprep.subr.bf16.mxu0 %v11191_v17  ;;  %7685 = vmatprep.subr.bf16.mxu1 %v11192_v25  ;;  %v18110_v17 = vld [vmem:[#allocation101_spill] sm:$0xff]  ;;  %v18111_v25 = vld [vmem:[#allocation102_spill] sm:$0xff] }
 0xeab   : > { %7645 = vmatpush1.bf16.msra.mxu0 %v15864_v4  ;;  %7686 = vmatpush1.bf16.msra.mxu1 %v15868_v5  ;;  %v18055_v4 = vld [vmem:[#allocation46_spill] sm:$0xff]  ;;  %v18056_v5 = vld [vmem:[#allocation47_spill] sm:$0xff] }
 0xeac   : > { %7646 = vmatprep.subr.bf16.mxu0 %v15872_v37  ;;  %7687 = vmatprep.subr.bf16.mxu1 %v15876_v53  ;;  %v18057_v37 = vld [vmem:[#allocation48_spill] sm:$0xff]  ;;  %v18058_v53 = vld [vmem:[#allocation49_spill] sm:$0xff] }
 0xeaf   : > { %7647 = vmatpush1.bf16.msra.mxu0 %v15880_v62  ;;  %7688 = vmatpush1.bf16.msra.mxu1 %v15884_v54  ;;  %v18059_v62 = vld [vmem:[#allocation50_spill] sm:$0xff]  ;;  %v18060_v54 = vld [vmem:[#allocation51_spill] sm:$0xff] }
 0xeb0   : > { %7648 = vmatprep.subr.bf16.mxu0 %v15888_v56  ;;  %7689 = vmatprep.subr.bf16.mxu1 %v15892_v8  ;;  %v18061_v56 = vld [vmem:[#allocation52_spill] sm:$0xff]  ;;  %v18062_v8 = vld [vmem:[#allocation53_spill] sm:$0xff] }
 0xeb3   : > { %7649 = vmatpush1.bf16.msra.mxu0 %v15896_v28  ;;  %7690 = vmatpush1.bf16.msra.mxu1 %v15900_v50  ;;  %v18063_v28 = vld [vmem:[#allocation54_spill] sm:$0xff]  ;;  %v18064_v50 = vld [vmem:[#allocation55_spill] sm:$0xff] }
 0xeb4   : > { %7650 = vmatprep.subr.bf16.mxu0 %v15904_v18  ;;  %7691 = vmatprep.subr.bf16.mxu1 %v15908_v19  ;;  %v18065_v18 = vld [vmem:[#allocation56_spill] sm:$0xff]  ;;  %v18066_v19 = vld [vmem:[#allocation57_spill] sm:$0xff] }
 0xeb7   : > { %7651 = vmatpush1.bf16.msra.mxu0 %v15912_v55  ;;  %7692 = vmatpush1.bf16.msra.mxu1 %v15916_v27  ;;  %v18067_v55 = vld [vmem:[#allocation58_spill] sm:$0xff]  ;;  %v18068_v27 = vld [vmem:[#allocation59_spill] sm:$0xff] }
 0xeb8   : > { %7652 = vmatprep.subr.bf16.mxu0 %v15920_v30  ;;  %7693 = vmatprep.subr.bf16.mxu1 %v15924_v22  ;;  %v18069_v30 = vld [vmem:[#allocation60_spill] sm:$0xff]  ;;  %v18070_v22 = vld [vmem:[#allocation61_spill] sm:$0xff] }
 0xebb   : > { %7653 = vmatpush1.bf16.msra.mxu0 %v15928_v2  ;;  %7694 = vmatpush1.bf16.msra.mxu1 %v15932_v26  ;;  %v18071_v2 = vld [vmem:[#allocation62_spill] sm:$0xff]  ;;  %v18072_v26 = vld [vmem:[#allocation63_spill] sm:$0xff] }
 0xebc   : > { %7654 = vmatprep.subr.bf16.mxu0 %v15936_v40  ;;  %7695 = vmatprep.subr.bf16.mxu1 %v15940_v59  ;;  %v18073_v40 = vld [vmem:[#allocation64_spill] sm:$0xff]  ;;  %v18074_v59 = vld [vmem:[#allocation65_spill] sm:$0xff] }
 0xebf   : > { %7655 = vmatpush1.bf16.msra.mxu0 %v15944_v16  ;;  %7696 = vmatpush1.bf16.msra.mxu1 %v15948_v33  ;;  %v18075_v16 = vld [vmem:[#allocation66_spill] sm:$0xff]  ;;  %v18076_v33 = vld [vmem:[#allocation67_spill] sm:$0xff] }
 0xec0   : > { %7656 = vmatprep.subr.bf16.mxu0 %v15952_v13  ;;  %7697 = vmatprep.subr.bf16.mxu1 %v15956_v43  ;;  %v18077_v13 = vld [vmem:[#allocation68_spill] sm:$0xff]  ;;  %v18078_v43 = vld [vmem:[#allocation69_spill] sm:$0xff] }
 0xec3   : > { %7657 = vmatpush1.bf16.msra.mxu0 %v15960_v58  ;;  %7698 = vmatpush1.bf16.msra.mxu1 %v15964_v3  ;;  %v18079_v58 = vld [vmem:[#allocation70_spill] sm:$0xff]  ;;  %v18080_v3 = vld [vmem:[#allocation71_spill] sm:$0xff] }
 0xec4   : > { %7658 = vmatprep.subr.bf16.mxu0 %v15968_v49  ;;  %7699 = vmatprep.subr.bf16.mxu1 %v15972_v63  ;;  %v18081_v49 = vld [vmem:[#allocation72_spill] sm:$0xff]  ;;  %v18082_v63 = vld [vmem:[#allocation73_spill] sm:$0xff] }
 0xec7   : > { %7659 = vmatpush1.bf16.msra.mxu0 %v15976_v24  ;;  %7700 = vmatpush1.bf16.msra.mxu1 %v15980_v34  ;;  %v18083_v24 = vld [vmem:[#allocation74_spill] sm:$0xff]  ;;  %v18084_v34 = vld [vmem:[#allocation75_spill] sm:$0xff] }
 0xec8   : > { %7660 = vmatprep.subr.bf16.mxu0 %v15984_v42  ;;  %7701 = vmatprep.subr.bf16.mxu1 %v15988_v6  ;;  %v18085_v42 = vld [vmem:[#allocation76_spill] sm:$0xff]  ;;  %v18086_v6 = vld [vmem:[#allocation77_spill] sm:$0xff] }
 0xecb   : > { %7661 = vmatpush1.bf16.msra.mxu0 %v15992_v46  ;;  %7702 = vmatpush1.bf16.msra.mxu1 %v15996_v14  ;;  %v18087_v46 = vld [vmem:[#allocation78_spill] sm:$0xff]  ;;  %v18088_v14 = vld [vmem:[#allocation79_spill] sm:$0xff] }
 0xecc   : > { %7662 = vmatprep.subr.bf16.mxu0 %v18055_v4  ;;  %7703 = vmatprep.subr.bf16.mxu1 %v18056_v5  ;;  %v18112_v4 = vld [vmem:[#allocation103_spill] sm:$0xff]  ;;  %v18113_v5 = vld [vmem:[#allocation104_spill] sm:$0xff] }
 0xecf   : > { %7663 = vmatpush1.bf16.msra.mxu0 %v18057_v37  ;;  %7704 = vmatpush1.bf16.msra.mxu1 %v18058_v53  ;;  %v18114_v37 = vld [vmem:[#allocation105_spill] sm:$0xff]  ;;  %v18115_v53 = vld [vmem:[#allocation106_spill] sm:$0xff] }
 0xed0   : > { %7664 = vmatprep.subr.bf16.mxu0 %v18059_v62  ;;  %7705 = vmatprep.subr.bf16.mxu1 %v18060_v54  ;;  %v18116_v62 = vld [vmem:[#allocation107_spill] sm:$0xff]  ;;  %v18117_v54 = vld [vmem:[#allocation108_spill] sm:$0xff] }
 0xed3   : > { %7665 = vmatpush1.bf16.msra.mxu0 %v18061_v56  ;;  %7706 = vmatpush1.bf16.msra.mxu1 %v18062_v8  ;;  %v18118_v56 = vld [vmem:[#allocation109_spill] sm:$0xff]  ;;  %v18119_v8 = vld [vmem:[#allocation110_spill] sm:$0xff] }
 0xed4   : > { %7716 = vmatprep.subr.bf16.mxu0 %v18063_v28  ;;  %7757 = vmatprep.subr.bf16.mxu1 %v18064_v50  ;;  %v18120_v28 = vld [vmem:[#allocation111_spill] sm:$0xff]  ;;  %v18121_v50 = vld [vmem:[#allocation112_spill] sm:$0xff] }
 0xed6   : > { %9240 = vmatmul.mubr.msk.bf16.vlgmr.msra.gmra.mrb[88].mxu0 %vm13227_vm6, %v16387_v12  ;;  %9246 = vmatmul.mubr.msk.bf16.vlgmr.msra.gmra.mrb[88].mxu1 %vm13237_vm7, %v16387_v12 }
 0xed7   : > { %7717 = vmatpush1.bf16.msra.mxu0 %v18065_v18  ;;  %9249 = vmatprep.mubr.msk.bf16.mxu0 %vm13227_vm6, %v16391_v41  ;;  %v18122_v18 = vld [vmem:[#allocation113_spill] sm:$0xff] }
 0xed8   : > { %7758 = vmatpush1.bf16.msra.mxu1 %v18066_v19  ;;  %9255 = vmatprep.mubr.msk.bf16.mxu1 %vm13237_vm7, %v16391_v41  ;;  %v18089_v41 = vld [vmem:[#allocation80_spill] sm:$0xff]  ;;  %v18123_v19 = vld [vmem:[#allocation114_spill] sm:$0xff] }
 0xed9   : > { %7718 = vmatprep.subr.bf16.mxu0 %v18067_v55  ;;  %7759 = vmatprep.subr.bf16.mxu1 %v18068_v27  ;;  %v18124_v55 = vld [vmem:[#allocation115_spill] sm:$0xff]  ;;  %v18125_v27 = vld [vmem:[#allocation116_spill] sm:$0xff] }
 0xedb   : > { %7719 = vmatpush1.bf16.msra.mxu0 %v18069_v30  ;;  %v18126_v30 = vld [vmem:[#allocation117_spill] sm:$0xff] }
 0xedc   : > { %7760 = vmatpush1.bf16.msra.mxu1 %v18070_v22  ;;  %7720 = vmatprep.subr.bf16.mxu0 %v18071_v2 }
 0xedd   : > { %7761 = vmatprep.subr.bf16.mxu1 %v18072_v26 }
 0xedf   : > { %7721 = vmatpush1.bf16.msra.mxu0 %v18073_v40 }
 0xee0   : > { %7762 = vmatpush1.bf16.msra.mxu1 %v18074_v59  ;;  %7722 = vmatprep.subr.bf16.mxu0 %v18075_v16 }
 0xee1   : > { %7763 = vmatprep.subr.bf16.mxu1 %v18076_v33 }
 0xee3   : > { %7723 = vmatpush1.bf16.msra.mxu0 %v18077_v13 }
 0xee4   : > { %7764 = vmatpush1.bf16.msra.mxu1 %v18078_v43  ;;  %7724 = vmatprep.subr.bf16.mxu0 %v18079_v58 }
 0xee5   : > { %7765 = vmatprep.subr.bf16.mxu1 %v18080_v3 }
 0xee7   : > { %7725 = vmatpush1.bf16.msra.mxu0 %v18081_v49 }
 0xee8   : > { %7766 = vmatpush1.bf16.msra.mxu1 %v18082_v63  ;;  %7726 = vmatprep.subr.bf16.mxu0 %v18083_v24 }
 0xee9   : > { %7767 = vmatprep.subr.bf16.mxu1 %v18084_v34 }
 0xeeb   : > { %7727 = vmatpush1.bf16.msra.mxu0 %v18085_v42 }
 0xeec   : > { %7768 = vmatpush1.bf16.msra.mxu1 %v18086_v6  ;;  %7728 = vmatprep.subr.bf16.mxu0 %v18087_v46  ;;  %v7490_v46 = vld [vmem:[#allocation3 + $0x60] sm:$0xc0] }
 0xeed   : > { %7769 = vmatprep.subr.bf16.mxu1 %v18088_v14  ;;  %v7496_v14 = vld [vmem:[#allocation3 + $0x30] sm:$0x3] }
 0xeef   : > { %7729 = vmatpush1.bf16.msra.mxu0 %v18089_v41  ;;  %v7491_v41 = vld [vmem:[#allocation3 + $0x68] sm:$0xc0] }
 0xef0   : > { %7770 = vmatpush1.bf16.msra.mxu1 %v18090_v32  ;;  %7730 = vmatprep.subr.bf16.mxu0 %v18091_v0  ;;  %v7497_v32 = vld [vmem:[#allocation3 + $0x38] sm:$0x3]  ;;  %v7508_v0 = vrot.slane %v7490_v46, 6 }
 0xef1   : > { %7771 = vmatprep.subr.bf16.mxu1 %v18092_v29  ;;  %v7526_v29 = vrot.slane %v7496_v14, 6 }
 0xef3   : > { %7731 = vmatpush1.bf16.msra.mxu0 %v18093_v35  ;;  %v7509_v35 = vrot.slane %v7491_v41, 6 }
 0xef4   : > { %7772 = vmatpush1.bf16.msra.mxu1 %v18094_v57  ;;  %7732 = vmatprep.subr.bf16.mxu0 %v18095_v31  ;;  %v7527_v57 = vrot.slane %v7497_v32, 6  ;;  %v7538_v31 = vsel %vm4036_vm1, %v7508_v0, %v7526_v29 }
 0xef5   : > { %7773 = vmatprep.subr.bf16.mxu1 %v18096_v61 }
 0xef6   : > { %v7539_v61 = vsel %vm4036_vm1, %v7509_v35, %v7527_v57 }
 0xef7   : > { %7733 = vmatpush1.bf16.msra.mxu0 %v18097_v20 }
 0xef8   : > { %7774 = vmatpush1.bf16.msra.mxu1 %v18098_v9  ;;  %7734 = vmatprep.subr.bf16.mxu0 %v18099_v60 }
 0xef9   : > { %7775 = vmatprep.subr.bf16.mxu1 %v18100_v36 }
 0xefb   : > { %7735 = vmatpush1.bf16.msra.mxu0 %v18101_v1  ;;  %v7492_v1 = vld [vmem:[#allocation3 + $0x70] sm:$0xc0] }
 0xefc   : > { %7776 = vmatpush1.bf16.msra.mxu1 %v18102_v15  ;;  %7736 = vmatprep.subr.bf16.mxu0 %v18103_v23  ;;  %v7498_v15 = vld [vmem:[#allocation3 + $0x40] sm:$0x3]  ;;  %v7493_v23 = vld [vmem:[#allocation3 + $0x78] sm:$0xc0] }
 0xefd   : > { %7777 = vmatprep.subr.bf16.mxu1 %v18104_v47  ;;  %v7499_v47 = vld [vmem:[#allocation3 + $0x48] sm:$0x3] }
 0xeff   : > { %7737 = vmatpush1.bf16.msra.mxu0 %v18105_v44  ;;  %v7510_v44 = vrot.slane %v7492_v1, 6 }
 0xf00   : > { %7778 = vmatpush1.bf16.msra.mxu1 %v18106_v38  ;;  %7738 = vmatprep.subr.bf16.mxu0 %v18107_v7  ;;  %v7528_v38 = vrot.slane %v7498_v15, 6  ;;  %v7511_v7 = vrot.slane %v7493_v23, 6  ;;  %v11195_v23 = vld [vmem:[%s18127_s14] sm:$0xff] (!%p9263_p2)  }
 0xf01   : > { %7779 = vmatprep.subr.bf16.mxu1 %v18108_v52  ;;  %v7529_v52 = vrot.slane %v7499_v47, 6  ;;  %v11196_v47 = vld [vmem:[%s18127_s14 + $0x80] sm:$0xff] (!%p9263_p2)  }
 0xf03   : > { %7739 = vmatpush1.bf16.msra.mxu0 %v18109_v11  ;;  %v7540_v11 = vsel %vm4036_vm1, %v7510_v44, %v7528_v38  ;;  %v11197_v44 = vld [vmem:[%s18127_s14 + $0x48] sm:$0xff] (!%p9263_p2)  }
 0xf04   : > { %7780 = vmatpush1.bf16.msra.mxu1 %v18110_v17  ;;  %7740 = vmatprep.subr.bf16.mxu0 %v18111_v25  ;;  %v7541_v17 = vsel %vm4036_vm1, %v7511_v7, %v7529_v52  ;;  %v11198_v38 = vld [vmem:[%s18127_s14 + $0xc8] sm:$0xff] (!%p9263_p2)  }
 0xf05   : > { %7781 = vmatprep.subr.bf16.mxu1 %v18112_v4  ;;  %v11199_v7 = vld [vmem:[%s18127_s14 + $0x8] sm:$0xff] (!%p9263_p2)  }
 0xf06   : > { %v11200_v52 = vld [vmem:[%s18127_s14 + $0x88] sm:$0xff] (!%p9263_p2)  }
 0xf07   : > { %7741 = vmatpush1.bf16.msra.mxu0 %v18113_v5 }
 0xf08   : > { %7782 = vmatpush1.bf16.msra.mxu1 %v18114_v37  ;;  %7742 = vmatprep.subr.bf16.mxu0 %v18115_v53 }
 0xf09   : > { %7783 = vmatprep.subr.bf16.mxu1 %v18116_v62 }
 0xf0b   : > { %7743 = vmatpush1.bf16.msra.mxu0 %v18117_v54 }
 0xf0c   : > { %7784 = vmatpush1.bf16.msra.mxu1 %v18118_v56  ;;  %7744 = vmatprep.subr.bf16.mxu0 %v18119_v8  ;;  %v7494_v8 = vld [vmem:[#allocation3 + $0x80] sm:$0xc0] }
 0xf0d   : > { %7785 = vmatprep.subr.bf16.mxu1 %v18120_v28  ;;  %v7500_v28 = vld [vmem:[#allocation3 + $0x50] sm:$0x3] }
 0xf0f   : > { %7745 = vmatpush1.bf16.msra.mxu0 %v18121_v50  ;;  %v7495_v50 = vld [vmem:[#allocation3 + $0x88] sm:$0xc0] }
 0xf10   : > { %7786 = vmatpush1.bf16.msra.mxu1 %v18122_v18  ;;  %7746 = vmatprep.subr.bf16.mxu0 %v18123_v19  ;;  %v7501_v18 = vld [vmem:[#allocation3 + $0x58] sm:$0x3] }
 0xf11   : > { %7787 = vmatprep.subr.bf16.mxu1 %v18124_v55  ;;  %v7512_v55 = vrot.slane %v7494_v8, 6  ;;  %v11211_v8 = vld [vmem:[%s18127_s14 + $0x20] sm:$0xff] (!%p9263_p2)  }
 0xf13   : > { %7747 = vmatpush1.bf16.msra.mxu0 %v18125_v27  ;;  %v7530_v27 = vrot.slane %v7500_v28, 6  ;;  %v11212_v28 = vld [vmem:[%s18127_s14 + $0xa0] sm:$0xff] (!%p9263_p2)  }
 0xf14   : > { %7788 = vmatpush1.bf16.msra.mxu1 %v18126_v30 }
 0xf16   : > { %9252 = vmatmul.mubr.msk.bf16.vlgmr.msra.gmra.mrb[92].mxu0 %vm13227_vm6, %v16387_v12 }
 0xf17   : > { %9258 = vmatmul.mubr.msk.bf16.vlgmr.msra.gmra.mrb[92].mxu1 %vm13237_vm7, %v16387_v12 }
 0xf69   : > { %v7586_v22 = vpop.f32.mrb[84].mxu0  ;;  %v7627_v2 = vpop.f32.mrb[84].mxu1 }
 0xf6a   : > { %v7628_v26 = vadd.f32 %v7627_v2, %v7586_v22  ;;  %v7588_v40 = vpop.f32.mrb[85].mxu0  ;;  %v7629_v59 = vpop.f32.mrb[85].mxu1 }
 0xf6b   : > { %v7630_v16 = vadd.f32 %v7629_v59, %v7588_v40  ;;  %v7590_v33 = vpop.f32.mrb[86].mxu0  ;;  %v7631_v13 = vpop.f32.mrb[86].mxu1  ;;  %v7531_v40 = vrot.slane %v7501_v18, 6  ;;  %v11214_v18 = vld [vmem:[%s18127_s14 + $0xe8] sm:$0xff] (!%p9263_p2)  }
 0xf6c   : > { %v7591_v43 = vpop.f32.mrb[87].mxu0  ;;  %v7632_v58 = vpop.f32.mrb[87].mxu1  ;;  %v7798_v20 = vadd.f32 %v7628_v26, %v7538_v31  ;;  %v7513_v26 = vrot.slane %v7495_v50, 6  ;;  %v11213_v50 = vld [vmem:[%s18127_s14 + $0x68] sm:$0xff] (!%p9263_p2)  }
 0xf6d   : > { %v7799_v9 = vadd.f32 %v7630_v16, %v7539_v61 }
 0xf6e   : > { %v9259_v60 = vmul.f32 -1.442695, %v7798_v20 }
 0xf6f   : > { %v9260_v36 = vmul.f32 -1.442695, %v7799_v9 }
 0xf70   : > { %10543 = vpow2.f32 %v9259_v60 }
 0xf71   : > { %10545 = vpow2.f32 %v9260_v36 }
 0xf7a   : > { %v10544_v25 = vpop.eup %10543 }
 0xf7b   : > { %v10546_v4 = vpop.eup %10545  ;;  %v7806_v53 = vadd.f32 1.0, %v10544_v25  ;;  %v11203_v25 = vld [vmem:[%s18127_s14 + $0x10] sm:$0xff] (!%p9263_p2)  }
 0xf7c   : > { %v7807_v62 = vadd.f32 1.0, %v10546_v4  ;;  %v11204_v4 = vld [vmem:[%s18127_s14 + $0x90] sm:$0xff] (!%p9263_p2)  }
 0xf7d   : > { %10547 = vrcp.f32 %v7806_v53  ;;  %v11207_v53 = vld [vmem:[%s18127_s14 + $0x18] sm:$0xff] (!%p9263_p2)  }
 0xf7e   : > { %10549 = vrcp.f32 %v7807_v62  ;;  %v11208_v62 = vld [vmem:[%s18127_s14 + $0x98] sm:$0xff] (!%p9263_p2)  }
 0xf87   : > { %v10548_v33 = vpop.eup %10547 }
 0xfa9   : > { %v7668_v3 = vpop.f32.mrb[88].mxu0  ;;  %v7709_v49 = vpop.f32.mrb[88].mxu1 }
 0xfaa   : > { %v7710_v63 = vadd.f32 %v7709_v49, %v7668_v3  ;;  %v7670_v24 = vpop.f32.mrb[89].mxu0  ;;  %v7711_v48 = vpop.f32.mrb[89].mxu1 }
 0xfab   : > { %v7712_v34 = vadd.f32 %v7711_v48, %v7670_v24  ;;  %v7672_v42 = vpop.f32.mrb[90].mxu0  ;;  %v7713_v6 = vpop.f32.mrb[90].mxu1  ;;  %v7542_v48 = vsel %vm4036_vm1, %v7512_v55, %v7530_v27  ;;  %v11216_v55 = vld [vmem:[%s18127_s14 + $0xa8] sm:$0xff] (!%p9263_p2)   ;;  %v11217_v27 = vld [vmem:[%s18127_s14 + $0x70] sm:$0xff] (!%p9263_p2)  }
 0xfac   : > { %v7673_v51 = vpop.f32.mrb[91].mxu0  ;;  %v7714_v12 = vpop.f32.mrb[91].mxu1  ;;  %v7812_v5 = vadd.f32 %v7710_v63, %v7540_v11  ;;  %v11201_v11 = vld [vmem:[%s18127_s14 + $0x50] sm:$0xff] (!%p9263_p2)  }
 0xfad   : > { %v7813_v37 = vadd.f32 %v7712_v34, %v7541_v17  ;;  %v10550_v3 = vpop.eup %10549  ;;  %v7543_v51 = vsel %vm4036_vm1, %v7513_v26, %v7531_v40  ;;  %v11202_v17 = vld [vmem:[%s18127_s14 + $0xd0] sm:$0xff] (!%p9263_p2)   ;;  %v11221_v26 = vld [vmem:[%s18127_s14 + $0x78] sm:$0xff] (!%p9263_p2)  }
 0xfae   : > { %v9261_v54 = vmul.f32 -1.442695, %v7812_v5  ;;  %v11205_v5 = vld [vmem:[%s18127_s14 + $0x58] sm:$0xff] (!%p9263_p2)  }
 0xfaf   : > { %v9262_v56 = vmul.f32 -1.442695, %v7813_v37  ;;  %v11206_v37 = vld [vmem:[%s18127_s14 + $0xd8] sm:$0xff] (!%p9263_p2)  }
 0xfb0   : > { %10551 = vpow2.f32 %v9261_v54  ;;  %v11209_v54 = vld [vmem:[%s18127_s14 + $0x60] sm:$0xff] (!%p9263_p2)   ;;  %v11222_v40 = vld [vmem:[%s18127_s14 + $0xf8] sm:$0xff] (!%p9263_p2)  }
 0xfb1   : > { %10553 = vpow2.f32 %v9262_v56  ;;  %v11210_v56 = vld [vmem:[%s18127_s14 + $0xe0] sm:$0xff] (!%p9263_p2)  }
 0xfba   : > { %v10552_v24 = vpop.eup %10551 }
 0xfbb   : > { %v10554_v42 = vpop.eup %10553  ;;  %v7820_v46 = vadd.f32 1.0, %v10552_v24  ;;  %v7858_v24 = vld [vmem:[#allocation2 + $0x10] sm:$0x80] (!%p9263_p2) }
 0xfbc   : > { %v7821_v41 = vadd.f32 1.0, %v10554_v42 }
 0xfe9   : > { %v7750_v19 = vpop.f32.mrb[92].mxu0 }
 0xfea   : > { %v7791_v30 = vpop.f32.mrb[92].mxu1  ;;  %v7752_v22 = vpop.f32.mrb[93].mxu0 }
 0xfeb   : > { %v7792_v2 = vadd.f32 %v7791_v30, %v7750_v19  ;;  %v7793_v59 = vpop.f32.mrb[93].mxu1  ;;  %v7754_v16 = vpop.f32.mrb[94].mxu0  ;;  %v11215_v19 = vld [vmem:[%s18127_s14 + $0x28] sm:$0xff] (!%p9263_p2)   ;;  %v11218_v30 = vld [vmem:[%s18127_s14 + $0xf0] sm:$0xff] (!%p9263_p2)  }
 0xfec   : > { %v7794_v13 = vadd.f32 %v7793_v59, %v7752_v22  ;;  %v7795_v43 = vpop.f32.mrb[94].mxu1  ;;  %v7755_v58 = vpop.f32.mrb[95].mxu0  ;;  %v11219_v22 = vld [vmem:[%s18127_s14 + $0x30] sm:$0xff] (!%p9263_p2)   ;;  %v11223_v59 = vld [vmem:[%s18127_s14 + $0x38] sm:$0xff] (!%p9263_p2)  }
 0xfed   : > { %v7826_v49 = vadd.f32 %v7792_v2, %v13215_v39  ;;  %v7796_v63 = vpop.f32.mrb[95].mxu1  ;;  %v11220_v2 = vld [vmem:[%s18127_s14 + $0xb0] sm:$0xff] (!%p9263_p2)   ;;  %v11224_v16 = vld [vmem:[%s18127_s14 + $0xb8] sm:$0xff] (!%p9263_p2)   ;;  %v11520_v58 = vmov (!%p9263_p2), 0  }
 0xfee   : > { %v7827_v34 = vadd.f32 %v7794_v13, %v13218_v45  ;;  %v7859_v13 = vld [vmem:[#allocation2 + $0x18] sm:$0x80] (!%p9263_p2) }
 0xfef   : > { %v7828_v6 = vmul.f32 %v10548_v33, %v7826_v49  ;;  %v7863_v49 = vmax.bf16 (!%p9263_p2), %v11520_v58, %v7859_v13 }
 0xff0   : > { %v7829_v12 = vmul.f32 %v10550_v3, %v7827_v34 }
 0xff1   : > { %v7830_v14 = vadd.f32 %v7828_v6, %v7542_v48  ;;  %v7862_v48 = vmax.bf16 (!%p9263_p2), %v11520_v58, %v7858_v24  ;;  %v7942_v42 = vrot.slane (!%p9263_p2), %v7863_v49, 7 }
 0xff2   : > { %v7831_v32 = vadd.f32 %v7829_v12, %v7543_v51 }
 0xff3   : > { %10555 = vtanh.f32 %v7830_v14  ;;  %v7941_v51 = vrot.slane (!%p9263_p2), %v7862_v48, 7  ;;  %8211 = vmatprep.mubr.bf16.mxu1 (!%p9263_p2), %v7942_v42  ;;  %v9264_v14 = vld [vmem:[#allocation13] ss:$0 sm:$0xff] (!%p9263_p2) }
 0xff4   : > { %10557 = vtanh.f32 %v7831_v32 }
 0xff5   : > { %10559 = vrcp.f32 %v7820_v46 }
 0xff6   : > { %10561 = vrcp.f32 %v7821_v41 }
 0xffd   : > { %v10556_v39 = vpop.eup %10555 }
 0xffe   : > { %v10558_v0 = vpop.eup %10557  ;;  %v7834_v29 = vsub.f32 %v16381_v21, %v10556_v39  ;;  %v11193_v21 = vld [vmem:[%s18127_s14 + $0x40] sm:$0xff] (!%p9263_p2)  }
 0xfff   : > { %v10560_v35 = vpop.eup %10559  ;;  %v7835_v45 = vsub.f32 %v16383_v10, %v10558_v0  ;;  %v11194_v10 = vld [vmem:[%s18127_s14 + $0xc0] sm:$0xff] (!%p9263_p2)   ;;  %9302 = vmatprep.subr.bf16.mxu0 (!%p9263_p2), %v11193_v21 }
0x1000   : > { %v10562_v57 = vpop.eup %10561  ;;  %v7836_v31 = vmul.f32 %v10560_v35, %v7834_v29  ;;  %9324 = vmatprep.subr.bf16.mxu1 (!%p9263_p2), %v11194_v10  ;;  %9303 = vmatpush3.bf16.msra.mxu0 (!%p9263_p2), %v11195_v23 }
0x1001   : > { %v7837_v61 = vmul.f32 %v10562_v57, %v7835_v45  ;;  %9325 = vmatpush3.bf16.msra.mxu1 (!%p9263_p2), %v11196_v47  ;;  %9304 = vmatprep.subr.bf16.mxu0 (!%p9263_p2), %v11197_v44 }
0x1002   : > { %v7838_v20 = vadd.f32 %v10556_v39, %v7836_v31  ;;  %9326 = vmatprep.subr.bf16.mxu1 (!%p9263_p2), %v11198_v38 }
0x1003   : > { %v7839_v9 = vadd.f32 %v10558_v0, %v7837_v61  ;;  %7855 = sbr.rel (%p9263_p2) target bundleno = 4349 (0x10fd), region = 88  ;;  %v8219_v61 = vld [vmem:[%s18128_s11] sm:$0x3] (!%p9263_p2) }
0x1004   : > { %v7840_v60 = vpack.c.bf16 %v7838_v20, %v7838_v20  ;;  %9305 = vmatpush3.bf16.msra.mxu0 (!%p9263_p2), %v11199_v7 }
0x1005   : > { %v7841_v36 = vpack.c.bf16 %v7839_v9, %v7839_v9  ;;  %9327 = vmatpush3.bf16.msra.mxu1 (!%p9263_p2), %v11200_v52  ;;  %9306 = vmatprep.subr.bf16.mxu0 (!%p9263_p2), %v11201_v11 }
0x1006   : > { %v7844_v1 = vrot.slane %v7840_v60, 1  ;;  %9328 = vmatprep.subr.bf16.mxu1 (!%p9263_p2), %v11202_v17 }
0x1007   : > { %v7845_v15 = vrot.slane %v7841_v36, 1 }
0x1008   : > { %7848 = vst [vmem:[#allocation2 + $0x10] ss:$-12 sps:$4 sm:$0x81] %v7844_v1   ;;  %9307 = vmatpush3.bf16.msra.mxu0 (!%p9263_p2), %v11203_v25 }
0x1009   : > { %7849 = vst [vmem:[#allocation2 + $0x18] ss:$-12 sps:$4 sm:$0x81] %v7845_v15   ;;  %9329 = vmatpush3.bf16.msra.mxu1 (!%p9263_p2), %v11204_v4  ;;  %9308 = vmatprep.subr.bf16.mxu0 (!%p9263_p2), %v11205_v5 }
0x100a   : > { %9330 = vmatprep.subr.bf16.mxu1 %v11206_v37 }
0x100c   : > { %9309 = vmatpush3.bf16.msra.mxu0 %v11207_v53 }
0x100d   : > { %9331 = vmatpush3.bf16.msra.mxu1 %v11208_v62  ;;  %9310 = vmatprep.subr.bf16.mxu0 %v11209_v54 }
0x100e   : > { %9332 = vmatprep.subr.bf16.mxu1 %v11210_v56 }
0x100f   : > { %v7856_v43 = vld [vmem:[#allocation2] sm:$0x80] }
0x1010   : > { %9311 = vmatpush3.bf16.msra.mxu0 %v11211_v8  ;;  %v7857_v33 = vld [vmem:[#allocation2 + $0x8] sm:$0x80]  ;;  %v7860_v63 = vmax.bf16 %v11520_v58, %v7856_v43 }
0x1011   : > { %9333 = vmatpush3.bf16.msra.mxu1 %v11212_v28  ;;  %9312 = vmatprep.subr.bf16.mxu0 %v11213_v50  ;;  %v7861_v3 = vmax.bf16 %v11520_v58, %v7857_v33 }
0x1012   : > { %9334 = vmatprep.subr.bf16.mxu1 %v11214_v18  ;;  %v7939_v6 = vrot.slane %v7860_v63, 7 }
0x1013   : > { %v7940_v34 = vrot.slane %v7861_v3, 7 }
0x1014   : > { %9313 = vmatpush3.bf16.msra.mxu0 %v11215_v19 }
0x1015   : > { %9335 = vmatpush3.bf16.msra.mxu1 %v11216_v55  ;;  %9314 = vmatprep.subr.bf16.mxu0 %v11217_v27 }
0x1016   : > { %9336 = vmatprep.subr.bf16.mxu1 %v11218_v30  ;;  %8171 = vmatprep.mubr.bf16.mxu0 %v7940_v34 }
0x1018   : > { %9315 = vmatpush3.bf16.msra.mxu0 %v11219_v22 }
0x1019   : > { %9337 = vmatpush3.bf16.msra.mxu1 %v11220_v2  ;;  %9316 = vmatprep.subr.bf16.mxu0 %v11221_v26 }
0x101a   : > { %9338 = vmatprep.subr.bf16.mxu1 %v11222_v40 }
0x101c   : > { %9317 = vmatpush3.bf16.msra.mxu0 %v11223_v59 }
0x101d   : > { %9339 = vmatpush3.bf16.msra.mxu1 %v11224_v16 }
0x101f   : > { %8172 = vmatmul.mubr.bf16.vlgmr.msra.gmra.mrb[0].mxu0 %v7939_v6 }
0x1020   : > { %8212 = vmatmul.mubr.bf16.vlgmr.msra.gmra.mrb[0].mxu1 %v7941_v51 }
0x10f2   : > { %v9318_v12 = vpop.f32.mrb[0].mxu0 }
0x10f3   : > { %v9340_v46 = vpop.f32.mrb[0].mxu1  ;;  %v9319_v41 = vpop.f32.mrb[1].mxu0 }
0x10f4   : > { %v9341_v32 = vpop.f32.mrb[1].mxu1  ;;  %v9320_v39 = vadd.f32 %v9319_v41, %v9318_v12  ;;  %v9321_v29 = vpop.f32.mrb[2].mxu0 }
0x10f5   : > { %v9342_v0 = vadd.f32 %v9341_v32, %v9340_v46  ;;  %v9343_v35 = vpop.f32.mrb[2].mxu1  ;;  %v9322_v45 = vpop.f32.mrb[3].mxu0 }
0x10f6   : > { %v9344_v57 = vpop.f32.mrb[3].mxu1  ;;  %v8174_v31 = vadd.f32 %v9320_v39, %v9264_v14 }
0x10f8   : > { %v8214_v20 = vadd.f32 %v9342_v0, %v8174_v31 }
0x10fa   : > { %v8220_v9 = vadd.f32 %v8219_v61, %v8214_v20 }
0x10fc   : > { %8222 = vst.msk [vmem:[#allocation15] sm:$0x3] %vm8221_vm8, %v8220_v9 }
0x10fd PF: > { %p9448_p13 = scmp.eq.s32.totalorder %s11603_s12, 2  ;;  %s11521_s18 = smov [#allocation15]  }
0x10fe   : > { %s8230_s2 = sshll.u32 %s11521_s18, 4  ;;  %s8231_s2 = int_to_ptr.vmem [resolvable:$true] %s8230_s2 }
0x10ff   : > { %s11401_s10 = scalar_lea.vmem %s8231_s2, 32  ;;  %p11408_p9 = scmp.lt.s32.totalorder %s8231_s2, %s8231_s2 }
0x1100   : > { %p11402_p8 = scmp.ne.s32.totalorder %s8231_s2, %s11401_s10  ;;  %p11409_p5 = scmp.lt.s32.totalorder %s11401_s10, %s11401_s10 }
0x1102   : > { %p11403_p0 = pnand %p11402_p8, %p9448_p13  ;;  %p11410_p10 = por %p11409_p5, %p11408_p9 }
0x1104   : > { %p11404_p6 = pneg %p11403_p0 }
0x1106   : > { %p11411_p4 = pnand %p11410_p10, %p11404_p6 }
0x1108   : > { %11414 = shalt.err (!%p11411_p4)
}
0x1109   : > { %s18129_s29 = sld [smem:[#allocation156_spill]] }
0x110f   : > { %s18130_s26 = smov %s18129_s29  ;;  %s11415_s22 = scalar_lea.hbm %s18129_s29, 32 }
0x1110   : > { %p11416_p7 = scmp.ne.s32.totalorder %s18130_s26, %s11415_s22  ;;  %p11421_p11 = scmp.lt.u32.totalorder %s11415_s22, %s18130_s26 }
0x1112   : > { %p11417_p3 = pnand %p11416_p7, %p9448_p13 }
0x1114   : > { %p11418_p1 = pneg %p11417_p3 }
0x1116   : > { %p11423_p12 = pnand %p11421_p11, %p11418_p1 }
0x1118   : > { %11426 = shalt.err (!%p11423_p12)
}
0x1119   : > { %9420 = dma.vmem_to_hbm [thread:$0]  (%p9448_p13), %s8231_s2, 32, %s18130_s26, [#allocation6]  }
0x111a   : > { %11476 = dma.done.wait (%p9448_p13), [#allocation6], 32  }
0x111b   : > { %11478 = vsyncadd (%p9448_p13), [#allocation6], 4294967264 }
0x111c PF: > { %s18131_s11 = sld [smem:[#allocation24_spill]]  ;;  %s18132_s6 = sld [smem:[#allocation22_spill]] }
0x111d   : > { %s18133_s29 = sld [smem:[#allocation26_spill]]  ;;  %s18134_s8 = sld [smem:[#allocation23_spill]] }
0x111e   : > { %s18135_s10 = sld [smem:[#allocation25_spill]]  ;;  %s18136_s27 = smov %s11485_s28 }
0x111f   : > { %s18138_s30 = smov %s11497_s9 }
0x1122   : > { %p24_p2 = scmp.ge.s32.totalorder %s18131_s11, 5   ;;  %s18137_s28 = smov %s18132_s6 }
0x1123   : > { %s18139_s9 = smov %s18134_s8 }
0x1124   :  { %26 = sbr.rel (!%p24_p2) target bundleno = 16 (0x10), region = 145 }
0x112b   :  { %8243 = vsyncpa [#allocation5], 1 }
0x112c   :  { %8245 = vsyncpa [#allocation5 + $0x1], 1 }
0x112d   :  { %8246 = vsyncpa [#allocation8], 1 }
0x112e   :  { %8248 = vsyncpa [#allocation8 + $0x1], 1 }
0x112f   :  { %8249 = vsyncpa [#allocation11], 1 }
0x1130   :  { %8251 = vsyncpa [#allocation11 + $0x1], 1 }
0x1131   :  { %8252 = vsyncpa [#allocation14], 1 }
0x1132   :  { %8253 = vsyncpa [#allocation6], 1 }
0x1133   :  { %8255 = vsyncpa [#allocation6 + $0x1], 1 }

</bundles_post_ra>
